<compile_context>
chip_gen: v6e
topology: v6e:2x2x1
jax: 0.10.0
libtpu: 0.0.40
codegen_flags: <defaults>
</compile_context>

<pallas_src>
import functools

import jax
import jax.numpy as jnp
from jax.experimental import pallas as pl
from jax.experimental.pallas import tpu as pltpu


def _split_block5_kernel(h, w,
                         xee_ref, xoo_ref, xeo_ref, xoe_ref,
                         we_ref, be_ref, wo_ref, bo_ref,
                         wce_ref, bce_ref, gam_ref, bet_ref,
                         out_ref):
    """One invocation processes the whole batch.

    xee/xoo/xeo/xoe_ref : (C, N, P) f32 in VMEM, P = h*w (spatial on lanes)
    we/wo_ref           : (9*C*C,)  f32 in SMEM, flat over (ky, kx, ci, co)
    wce_ref             : (C*C,)    f32 in SMEM, flat over (ci, co)
    b*/gam/bet_ref      : (C,)      f32 in SMEM
    out_ref             : (C, N, 2*P) f32 in VMEM  ([even | odd] on lanes)
    """
    C, N, P = xee_ref.shape
    eps = 1e-5
    inv_p = 1.0 / P
    inv_cp = 1.0 / (C * P)

    # Column-validity masks for the horizontal +/-1 taps (flattened-spatial
    # shifts wrap across row boundaries; the mask zeroes the wrapped lanes).
    col = jax.lax.broadcasted_iota(jnp.int32, (1, 1, P), dimension=2) % w
    mask_l = jnp.where(col >= 1, 1.0, 0.0)        # tap dx = -1 valid iff j-1 >= 0
    mask_r = jnp.where(col <= w - 2, 1.0, 0.0)    # tap dx = +1 valid iff j+1 <  w

    zpad = jnp.zeros((C, N, w + 1), jnp.float32)

    def conv3x3(x, w_ref, b_ref):
        # Zero-padded 3x3 conv as 9 static lane shifts + scalar-weight FMAs.
        xpad = jnp.concatenate([zpad, x, zpad], axis=-1)      # (C, N, P + 2w + 2)
        taps = []
        for dy in (-1, 0, 1):
            for dx in (-1, 0, 1):
                off = (w + 1) + dy * w + dx
                t = xpad[:, :, off:off + P]                   # (C, N, P)
                if dx == -1:
                    t = t * mask_l
                elif dx == 1:
                    t = t * mask_r
                taps.append(t)
        outs = []
        for co in range(C):
            acc = jnp.zeros((N, P), jnp.float32)
            for t_idx in range(9):
                tap = taps[t_idx]
                for ci in range(C):
                    acc = acc + tap[ci] * w_ref[(t_idx * C + ci) * C + co]
            outs.append(acc + b_ref[co])
        return jnp.stack(outs, axis=0)                        # (C, N, P)

    def conv1x1(x):   # conv_e: pure channel mixing with SMEM-scalar weights
        outs = []
        for co in range(C):
            acc = jnp.zeros((N, P), jnp.float32)
            for ci in range(C):
                acc = acc + x[ci] * wce_ref[ci * C + co]
            outs.append(acc + bce_ref[co])
        return jnp.stack(outs, axis=0)

    def sum_leading(t):   # (C, N, 1) -> (N, 1): fold the untiled channel axis
        acc = t[0]
        for ci in range(1, C):
            acc = acc + t[ci]
        return acc

    def instance_norm(y):   # nn.InstanceNorm2d(affine=False), eps=1e-5
        s1 = jnp.sum(y, axis=-1, keepdims=True) * inv_p              # (C, N, 1)
        s2 = jnp.sum(y * y, axis=-1, keepdims=True) * inv_p
        var = s2 - s1 * s1
        return (y - s1) * jax.lax.rsqrt(var + eps)

    def group_norm1(y):     # nn.GroupNorm(1, C), per-channel affine, eps=1e-5
        s1 = sum_leading(jnp.sum(y, axis=-1, keepdims=True)) * inv_cp    # (N, 1)
        s2 = sum_leading(jnp.sum(y * y, axis=-1, keepdims=True)) * inv_cp
        var = s2 - s1 * s1
        yhat = (y - s1) * jax.lax.rsqrt(var + eps)                       # (C, N, P)
        rows = [yhat[ci] * gam_ref[ci] + bet_ref[ci] for ci in range(C)]
        return jnp.stack(rows, axis=0)

    x_ee = xee_ref[...]
    x_oo = xoo_ref[...]
    x_eo = xeo_ref[...]
    x_oe = xoe_ref[...]

    # block_split_e / block_split_o : conv3x3 -> InstanceNorm -> ReLU
    x_even = jnp.maximum(instance_norm(conv3x3(x_ee, we_ref, be_ref)), 0.0)
    x_odd = jnp.maximum(instance_norm(conv3x3(x_oo, wo_ref, bo_ref)), 0.0)

    # The PyTorch module reuses conv_e / norm_e / sig_e for BOTH gates.
    gate_e = jax.nn.sigmoid(group_norm1(conv1x1(x_odd)))
    x_even_l = x_even + x_eo * gate_e

    gate_o = jax.nn.sigmoid(group_norm1(conv1x1(x_even)))
    x_odd_l = x_odd + x_oe * gate_o

    # Lane-dense store: [even | odd] concatenated on the lane axis -> 2*P lanes.
    out_ref[...] = jnp.concatenate([x_even_l, x_odd_l], axis=-1)


def make_split_block5_params(key, in_ch, o_ch):
    # The residual/gating math requires in_ch == o_ch (as in the source model).
    assert in_ch == o_ch, "Split_block5 gating requires in_ch == o_ch"
    c = o_ch
    ks = jax.random.split(key, 8)
    return dict(
        # conv weights in HWIO layout: w[ky, kx, ci, co] == torch_weight[co, ci, ky, kx]
        w_e=0.1 * jax.random.normal(ks[0], (3, 3, c, c), jnp.float32),   # block_split_e.conv
        b_e=0.1 * jax.random.normal(ks[1], (c,), jnp.float32),
        w_o=0.1 * jax.random.normal(ks[2], (3, 3, c, c), jnp.float32),   # block_split_o.conv
        b_o=0.1 * jax.random.normal(ks[3], (c,), jnp.float32),
        w_ce=0.1 * jax.random.normal(ks[4], (c, c), jnp.float32),        # conv_e (1x1), (ci, co)
        b_ce=0.1 * jax.random.normal(ks[5], (c,), jnp.float32),
        gamma=1.0 + 0.1 * jax.random.normal(ks[6], (c,), jnp.float32),   # norm_e affine
        beta=0.1 * jax.random.normal(ks[7], (c,), jnp.float32),
    )


@jax.jit
def split_block5_forward(x_nchw, params):
    """x_nchw: (N, C, H, W) float32 -> (N, 2*C, H//2, W//2)."""
    n, c, hh, ww = x_nchw.shape
    assert hh % 2 == 0 and ww % 2 == 0, "even/odd split needs even H and W"
    h, w = hh // 2, ww // 2
    p = h * w

    # Splitting2 + layout plumbing (NCHW -> channel-major with flattened
    # spatial on the lane axis).  Plain JAX outside the kernel.
    def to_kernel_layout(t):                       # (N, C, h, w) -> (C, N, h*w)
        return jnp.transpose(t, (1, 0, 2, 3)).reshape(c, n, p)

    x_ee = to_kernel_layout(x_nchw[:, :, ::2, ::2])
    x_oo = to_kernel_layout(x_nchw[:, :, 1::2, 1::2])
    x_eo = to_kernel_layout(x_nchw[:, :, ::2, 1::2])
    x_oe = to_kernel_layout(x_nchw[:, :, 1::2, ::2])

    vmem = pl.BlockSpec(memory_space=pltpu.MemorySpace.VMEM)
    smem = pl.BlockSpec(memory_space=pltpu.MemorySpace.SMEM)

    # Single invocation processes the whole (tiny) batch: no grid -> no
    # per-step overhead and weights are DMA'd exactly once.  For large batches
    # one would add a leading batch grid axis with
    # dimension_semantics=("parallel",) so v7x can shard it across its two
    # TensorCores; VMEM footprint here is a few KiB, far below any generation's
    # limit (budget against v7x's 64 MiB if block sizes are ever enlarged).
    out = pl.pallas_call(
        functools.partial(_split_block5_kernel, h, w),
        out_shape=jax.ShapeDtypeStruct((c, n, 2 * p), jnp.float32),
        in_specs=[vmem] * 4 + [smem] * 8,
        out_specs=vmem,
    )(x_ee, x_oo, x_eo, x_oe,
      params["w_e"].reshape(-1), params["b_e"],
      params["w_o"].reshape(-1), params["b_o"],
      params["w_ce"].reshape(-1), params["b_ce"],
      params["gamma"], params["beta"])

    # Back to NCHW and channel concat (matches torch.cat((x_even_l, x_odd_l), 1)).
    out = out.reshape(c, n, 2, h, w)
    x_even_l = jnp.transpose(out[:, :, 0], (1, 0, 2, 3))
    x_odd_l = jnp.transpose(out[:, :, 1], (1, 0, 2, 3))
    return jnp.concatenate([x_even_l, x_odd_l], axis=1)


def _reference_forward(x, params):
    """Pure-JAX reference mirroring the PyTorch module."""
    n, c, hh, ww = x.shape
    h, w = hh // 2, ww // 2
    relu = lambda t: jnp.maximum(t, 0.0)

    def conv3x3(t, w_hwio, b):
        tp = jnp.pad(t, ((0, 0), (0, 0), (1, 1), (1, 1)))
        acc = jnp.zeros((n, c, h, w), jnp.float32)
        for ky in range(3):
            for kx in range(3):
                acc = acc + jnp.einsum("ncij,cd->ndij",
                                       tp[:, :, ky:ky + h, kx:kx + w], w_hwio[ky, kx])
        return acc + b[None, :, None, None]

    def conv1x1(t, w1, b):
        return jnp.einsum("ncij,cd->ndij", t, w1) + b[None, :, None, None]

    def inorm(t):
        mu = jnp.mean(t, axis=(2, 3), keepdims=True)
        var = jnp.mean((t - mu) ** 2, axis=(2, 3), keepdims=True)
        return (t - mu) / jnp.sqrt(var + 1e-5)

    def gnorm(t):
        mu = jnp.mean(t, axis=(1, 2, 3), keepdims=True)
        var = jnp.mean((t - mu) ** 2, axis=(1, 2, 3), keepdims=True)
        that = (t - mu) / jnp.sqrt(var + 1e-5)
        return (that * params["gamma"][None, :, None, None]
                + params["beta"][None, :, None, None])

    x_ee = x[:, :, ::2, ::2]
    x_oo = x[:, :, 1::2, 1::2]
    x_eo = x[:, :, ::2, 1::2]
    x_oe = x[:, :, 1::2, ::2]
    x_even = relu(inorm(conv3x3(x_ee, params["w_e"], params["b_e"])))
    x_odd = relu(inorm(conv3x3(x_oo, params["w_o"], params["b_o"])))
    g_e = jax.nn.sigmoid(gnorm(conv1x1(x_odd, params["w_ce"], params["b_ce"])))
    x_even_l = x_even + x_eo * g_e
    g_o = jax.nn.sigmoid(gnorm(conv1x1(x_even, params["w_ce"], params["b_ce"])))
    x_odd_l = x_odd + x_oe * g_o
    return jnp.concatenate([x_even_l, x_odd_l], axis=1)


if __name__ == "__main__":
    N, C, H, W = 2, 4, 16, 16
    key = jax.random.PRNGKey(0)
    kx, kp = jax.random.split(key)
    x = jax.random.normal(kx, (N, C, H, W), jnp.float32)
    params = make_split_block5_params(kp, in_ch=C, o_ch=C)

    out = split_block5_forward(x, params)
    out = jax.block_until_ready(out)

    assert out.shape == (N, 2 * C, H // 2, W // 2), out.shape
    assert bool(jnp.all(jnp.isfinite(out)))

    ref = _reference_forward(x, params)
    max_err = float(jnp.max(jnp.abs(out - ref)))
    assert max_err < 1e-3, f"kernel/reference mismatch: {max_err}"
    print("KERNEL_OK")
</pallas_src>

<mosaic_0001>
module attributes {stable_mosaic.version = 11 : i64} {
  func.func @_split_block5_kernel(%arg0: memref<4x2x64xf32, #tpu.memory_space<vmem>>, %arg1: memref<4x2x64xf32, #tpu.memory_space<vmem>>, %arg2: memref<4x2x64xf32, #tpu.memory_space<vmem>>, %arg3: memref<4x2x64xf32, #tpu.memory_space<vmem>>, %arg4: memref<144xf32, #tpu.memory_space<smem>>, %arg5: memref<4xf32, #tpu.memory_space<smem>>, %arg6: memref<144xf32, #tpu.memory_space<smem>>, %arg7: memref<4xf32, #tpu.memory_space<smem>>, %arg8: memref<16xf32, #tpu.memory_space<smem>>, %arg9: memref<4xf32, #tpu.memory_space<smem>>, %arg10: memref<4xf32, #tpu.memory_space<smem>>, %arg11: memref<4xf32, #tpu.memory_space<smem>>, %arg12: memref<4x2x128xf32, #tpu.memory_space<vmem>>) attributes {dimension_semantics = [], scalar_prefetch = 0 : i64, scratch_operands = 0 : i64, tpu.core_type = #tpu.core_type<tc>} {
    %0 = tpu.iota {dimensions = array<i32: 2>} : vector<1x1x64xi32>
    %c8_i32 = arith.constant 8 : i32
    %c0_i32 = arith.constant 0 : i32
    %1 = arith.cmpi eq, %c8_i32, %c0_i32 : i32
    %c1_i32 = arith.constant 1 : i32
    %2 = arith.select %1, %c1_i32, %c8_i32 : i32
    %3 = vector.broadcast %2 : i32 to vector<1x1x64xi32>
    %4 = arith.remsi %0, %3 : vector<1x1x64xi32>
    %c0_i32_0 = arith.constant 0 : i32
    %5 = vector.broadcast %c0_i32_0 : i32 to vector<1x1x64xi32>
    %6 = arith.cmpi ne, %4, %5 : vector<1x1x64xi32>
    %c0_i32_1 = arith.constant 0 : i32
    %7 = vector.broadcast %c0_i32_1 : i32 to vector<1x1x64xi32>
    %8 = arith.cmpi slt, %4, %7 : vector<1x1x64xi32>
    %c0_i32_2 = arith.constant 0 : i32
    %9 = arith.cmpi slt, %2, %c0_i32_2 : i32
    %10 = vector.broadcast %9 : i1 to vector<1x1x64xi1>
    %11 = vector.broadcast %10 : vector<1x1x64xi1> to vector<1x1x64xi1>
    %12 = arith.xori %8, %11 : vector<1x1x64xi1>
    %13 = arith.andi %12, %6 : vector<1x1x64xi1>
    %14 = vector.broadcast %2 : i32 to vector<1x1x64xi32>
    %15 = arith.addi %4, %14 : vector<1x1x64xi32>
    %16 = arith.select %13, %15, %4 : vector<1x1x64xi1>, vector<1x1x64xi32>
    %c1_i32_3 = arith.constant 1 : i32
    %17 = vector.broadcast %c1_i32_3 : i32 to vector<1x1x64xi32>
    %18 = arith.cmpi sge, %16, %17 : vector<1x1x64xi32>
    %cst = arith.constant 1.000000e+00 : f32
    %cst_4 = arith.constant 0.000000e+00 : f32
    %19 = vector.broadcast %cst : f32 to vector<1x1x64xf32>
    %20 = vector.broadcast %cst_4 : f32 to vector<1x1x64xf32>
    %21 = arith.select %18, %19, %20 : vector<1x1x64xi1>, vector<1x1x64xf32>
    %c6_i32 = arith.constant 6 : i32
    %22 = vector.broadcast %c6_i32 : i32 to vector<1x1x64xi32>
    %23 = arith.cmpi sle, %16, %22 : vector<1x1x64xi32>
    %cst_5 = arith.constant 1.000000e+00 : f32
    %cst_6 = arith.constant 0.000000e+00 : f32
    %24 = vector.broadcast %cst_5 : f32 to vector<1x1x64xf32>
    %25 = vector.broadcast %cst_6 : f32 to vector<1x1x64xf32>
    %26 = arith.select %23, %24, %25 : vector<1x1x64xi1>, vector<1x1x64xf32>
    %cst_7 = arith.constant 0.000000e+00 : f32
    %27 = vector.broadcast %cst_7 : f32 to vector<4x2x9xf32>
    %c0 = arith.constant 0 : index
    %c0_8 = arith.constant 0 : index
    %c0_9 = arith.constant 0 : index
    %28 = vector.load %arg0[%c0, %c0_8, %c0_9] : memref<4x2x64xf32, #tpu.memory_space<vmem>>, vector<4x2x64xf32>
    %c0_10 = arith.constant 0 : index
    %c0_11 = arith.constant 0 : index
    %c0_12 = arith.constant 0 : index
    %29 = vector.load %arg1[%c0_10, %c0_11, %c0_12] : memref<4x2x64xf32, #tpu.memory_space<vmem>>, vector<4x2x64xf32>
    %c0_13 = arith.constant 0 : index
    %c0_14 = arith.constant 0 : index
    %c0_15 = arith.constant 0 : index
    %30 = vector.load %arg2[%c0_13, %c0_14, %c0_15] : memref<4x2x64xf32, #tpu.memory_space<vmem>>, vector<4x2x64xf32>
    %c0_16 = arith.constant 0 : index
    %c0_17 = arith.constant 0 : index
    %c0_18 = arith.constant 0 : index
    %31 = vector.load %arg3[%c0_16, %c0_17, %c0_18] : memref<4x2x64xf32, #tpu.memory_space<vmem>>, vector<4x2x64xf32>
    %32 = tpu.concatenate %27, %28, %27 in 2 : vector<4x2x9xf32>, vector<4x2x64xf32>, vector<4x2x9xf32> -> vector<4x2x82xf32>
    %33 = vector.extract_strided_slice %32 {offsets = [0, 0, 0], sizes = [4, 2, 64], strides = [1, 1, 1]} : vector<4x2x82xf32> to vector<4x2x64xf32>
    %34 = vector.broadcast %21 : vector<1x1x64xf32> to vector<4x2x64xf32>
    %35 = arith.mulf %33, %34 : vector<4x2x64xf32>
    %36 = vector.extract_strided_slice %32 {offsets = [0, 0, 1], sizes = [4, 2, 64], strides = [1, 1, 1]} : vector<4x2x82xf32> to vector<4x2x64xf32>
    %37 = vector.extract_strided_slice %32 {offsets = [0, 0, 2], sizes = [4, 2, 64], strides = [1, 1, 1]} : vector<4x2x82xf32> to vector<4x2x64xf32>
    %38 = vector.broadcast %26 : vector<1x1x64xf32> to vector<4x2x64xf32>
    %39 = arith.mulf %37, %38 : vector<4x2x64xf32>
    %40 = vector.extract_strided_slice %32 {offsets = [0, 0, 8], sizes = [4, 2, 64], strides = [1, 1, 1]} : vector<4x2x82xf32> to vector<4x2x64xf32>
    %41 = vector.broadcast %21 : vector<1x1x64xf32> to vector<4x2x64xf32>
    %42 = arith.mulf %40, %41 : vector<4x2x64xf32>
    %43 = vector.extract_strided_slice %32 {offsets = [0, 0, 9], sizes = [4, 2, 64], strides = [1, 1, 1]} : vector<4x2x82xf32> to vector<4x2x64xf32>
    %44 = vector.extract_strided_slice %32 {offsets = [0, 0, 10], sizes = [4, 2, 64], strides = [1, 1, 1]} : vector<4x2x82xf32> to vector<4x2x64xf32>
    %45 = vector.broadcast %26 : vector<1x1x64xf32> to vector<4x2x64xf32>
    %46 = arith.mulf %44, %45 : vector<4x2x64xf32>
    %47 = vector.extract_strided_slice %32 {offsets = [0, 0, 16], sizes = [4, 2, 64], strides = [1, 1, 1]} : vector<4x2x82xf32> to vector<4x2x64xf32>
    %48 = vector.broadcast %21 : vector<1x1x64xf32> to vector<4x2x64xf32>
    %49 = arith.mulf %47, %48 : vector<4x2x64xf32>
    %50 = vector.extract_strided_slice %32 {offsets = [0, 0, 17], sizes = [4, 2, 64], strides = [1, 1, 1]} : vector<4x2x82xf32> to vector<4x2x64xf32>
    %51 = vector.extract_strided_slice %32 {offsets = [0, 0, 18], sizes = [4, 2, 64], strides = [1, 1, 1]} : vector<4x2x82xf32> to vector<4x2x64xf32>
    %52 = vector.broadcast %26 : vector<1x1x64xf32> to vector<4x2x64xf32>
    %53 = arith.mulf %51, %52 : vector<4x2x64xf32>
    %cst_19 = arith.constant 0.000000e+00 : f32
    %54 = vector.broadcast %cst_19 : f32 to vector<2x64xf32>
    %55 = vector.extract_strided_slice %35 {offsets = [0, 0, 0], sizes = [1, 2, 64], strides = [1, 1, 1]} : vector<4x2x64xf32> to vector<1x2x64xf32>
    %56 = vector.shape_cast %55 : vector<1x2x64xf32> to vector<2x64xf32>
    %c0_20 = arith.constant 0 : index
    %57 = memref.load %arg4[%c0_20] : memref<144xf32, #tpu.memory_space<smem>>
    %58 = vector.broadcast %57 : f32 to vector<2x64xf32>
    %59 = arith.mulf %56, %58 : vector<2x64xf32>
    %60 = arith.addf %54, %59 : vector<2x64xf32>
    %61 = vector.extract_strided_slice %35 {offsets = [1, 0, 0], sizes = [1, 2, 64], strides = [1, 1, 1]} : vector<4x2x64xf32> to vector<1x2x64xf32>
    %62 = vector.shape_cast %61 : vector<1x2x64xf32> to vector<2x64xf32>
    %c4 = arith.constant 4 : index
    %63 = memref.load %arg4[%c4] : memref<144xf32, #tpu.memory_space<smem>>
    %64 = vector.broadcast %63 : f32 to vector<2x64xf32>
    %65 = arith.mulf %62, %64 : vector<2x64xf32>
    %66 = arith.addf %60, %65 : vector<2x64xf32>
    %67 = vector.extract_strided_slice %35 {offsets = [2, 0, 0], sizes = [1, 2, 64], strides = [1, 1, 1]} : vector<4x2x64xf32> to vector<1x2x64xf32>
    %68 = vector.shape_cast %67 : vector<1x2x64xf32> to vector<2x64xf32>
    %c8 = arith.constant 8 : index
    %69 = memref.load %arg4[%c8] : memref<144xf32, #tpu.memory_space<smem>>
    %70 = vector.broadcast %69 : f32 to vector<2x64xf32>
    %71 = arith.mulf %68, %70 : vector<2x64xf32>
    %72 = arith.addf %66, %71 : vector<2x64xf32>
    %73 = vector.extract_strided_slice %35 {offsets = [3, 0, 0], sizes = [1, 2, 64], strides = [1, 1, 1]} : vector<4x2x64xf32> to vector<1x2x64xf32>
    %74 = vector.shape_cast %73 : vector<1x2x64xf32> to vector<2x64xf32>
    %c12 = arith.constant 12 : index
    %75 = memref.load %arg4[%c12] : memref<144xf32, #tpu.memory_space<smem>>
    %76 = vector.broadcast %75 : f32 to vector<2x64xf32>
    %77 = arith.mulf %74, %76 : vector<2x64xf32>
    %78 = arith.addf %72, %77 : vector<2x64xf32>
    %79 = vector.extract_strided_slice %36 {offsets = [0, 0, 0], sizes = [1, 2, 64], strides = [1, 1, 1]} : vector<4x2x64xf32> to vector<1x2x64xf32>
    %80 = vector.shape_cast %79 : vector<1x2x64xf32> to vector<2x64xf32>
    %c16 = arith.constant 16 : index
    %81 = memref.load %arg4[%c16] : memref<144xf32, #tpu.memory_space<smem>>
    %82 = vector.broadcast %81 : f32 to vector<2x64xf32>
    %83 = arith.mulf %80, %82 : vector<2x64xf32>
    %84 = arith.addf %78, %83 : vector<2x64xf32>
    %85 = vector.extract_strided_slice %36 {offsets = [1, 0, 0], sizes = [1, 2, 64], strides = [1, 1, 1]} : vector<4x2x64xf32> to vector<1x2x64xf32>
    %86 = vector.shape_cast %85 : vector<1x2x64xf32> to vector<2x64xf32>
    %c20 = arith.constant 20 : index
    %87 = memref.load %arg4[%c20] : memref<144xf32, #tpu.memory_space<smem>>
    %88 = vector.broadcast %87 : f32 to vector<2x64xf32>
    %89 = arith.mulf %86, %88 : vector<2x64xf32>
    %90 = arith.addf %84, %89 : vector<2x64xf32>
    %91 = vector.extract_strided_slice %36 {offsets = [2, 0, 0], sizes = [1, 2, 64], strides = [1, 1, 1]} : vector<4x2x64xf32> to vector<1x2x64xf32>
    %92 = vector.shape_cast %91 : vector<1x2x64xf32> to vector<2x64xf32>
    %c24 = arith.constant 24 : index
    %93 = memref.load %arg4[%c24] : memref<144xf32, #tpu.memory_space<smem>>
    %94 = vector.broadcast %93 : f32 to vector<2x64xf32>
    %95 = arith.mulf %92, %94 : vector<2x64xf32>
    %96 = arith.addf %90, %95 : vector<2x64xf32>
    %97 = vector.extract_strided_slice %36 {offsets = [3, 0, 0], sizes = [1, 2, 64], strides = [1, 1, 1]} : vector<4x2x64xf32> to vector<1x2x64xf32>
    %98 = vector.shape_cast %97 : vector<1x2x64xf32> to vector<2x64xf32>
    %c28 = arith.constant 28 : index
    %99 = memref.load %arg4[%c28] : memref<144xf32, #tpu.memory_space<smem>>
    %100 = vector.broadcast %99 : f32 to vector<2x64xf32>
    %101 = arith.mulf %98, %100 : vector<2x64xf32>
    %102 = arith.addf %96, %101 : vector<2x64xf32>
    %103 = vector.extract_strided_slice %39 {offsets = [0, 0, 0], sizes = [1, 2, 64], strides = [1, 1, 1]} : vector<4x2x64xf32> to vector<1x2x64xf32>
    %104 = vector.shape_cast %103 : vector<1x2x64xf32> to vector<2x64xf32>
    %c32 = arith.constant 32 : index
    %105 = memref.load %arg4[%c32] : memref<144xf32, #tpu.memory_space<smem>>
    %106 = vector.broadcast %105 : f32 to vector<2x64xf32>
    %107 = arith.mulf %104, %106 : vector<2x64xf32>
    %108 = arith.addf %102, %107 : vector<2x64xf32>
    %109 = vector.extract_strided_slice %39 {offsets = [1, 0, 0], sizes = [1, 2, 64], strides = [1, 1, 1]} : vector<4x2x64xf32> to vector<1x2x64xf32>
    %110 = vector.shape_cast %109 : vector<1x2x64xf32> to vector<2x64xf32>
    %c36 = arith.constant 36 : index
    %111 = memref.load %arg4[%c36] : memref<144xf32, #tpu.memory_space<smem>>
    %112 = vector.broadcast %111 : f32 to vector<2x64xf32>
    %113 = arith.mulf %110, %112 : vector<2x64xf32>
    %114 = arith.addf %108, %113 : vector<2x64xf32>
    %115 = vector.extract_strided_slice %39 {offsets = [2, 0, 0], sizes = [1, 2, 64], strides = [1, 1, 1]} : vector<4x2x64xf32> to vector<1x2x64xf32>
    %116 = vector.shape_cast %115 : vector<1x2x64xf32> to vector<2x64xf32>
    %c40 = arith.constant 40 : index
    %117 = memref.load %arg4[%c40] : memref<144xf32, #tpu.memory_space<smem>>
    %118 = vector.broadcast %117 : f32 to vector<2x64xf32>
    %119 = arith.mulf %116, %118 : vector<2x64xf32>
    %120 = arith.addf %114, %119 : vector<2x64xf32>
    %121 = vector.extract_strided_slice %39 {offsets = [3, 0, 0], sizes = [1, 2, 64], strides = [1, 1, 1]} : vector<4x2x64xf32> to vector<1x2x64xf32>
    %122 = vector.shape_cast %121 : vector<1x2x64xf32> to vector<2x64xf32>
    %c44 = arith.constant 44 : index
    %123 = memref.load %arg4[%c44] : memref<144xf32, #tpu.memory_space<smem>>
    %124 = vector.broadcast %123 : f32 to vector<2x64xf32>
    %125 = arith.mulf %122, %124 : vector<2x64xf32>
    %126 = arith.addf %120, %125 : vector<2x64xf32>
    %127 = vector.extract_strided_slice %42 {offsets = [0, 0, 0], sizes = [1, 2, 64], strides = [1, 1, 1]} : vector<4x2x64xf32> to vector<1x2x64xf32>
    %128 = vector.shape_cast %127 : vector<1x2x64xf32> to vector<2x64xf32>
    %c48 = arith.constant 48 : index
    %129 = memref.load %arg4[%c48] : memref<144xf32, #tpu.memory_space<smem>>
    %130 = vector.broadcast %129 : f32 to vector<2x64xf32>
    %131 = arith.mulf %128, %130 : vector<2x64xf32>
    %132 = arith.addf %126, %131 : vector<2x64xf32>
    %133 = vector.extract_strided_slice %42 {offsets = [1, 0, 0], sizes = [1, 2, 64], strides = [1, 1, 1]} : vector<4x2x64xf32> to vector<1x2x64xf32>
    %134 = vector.shape_cast %133 : vector<1x2x64xf32> to vector<2x64xf32>
    %c52 = arith.constant 52 : index
    %135 = memref.load %arg4[%c52] : memref<144xf32, #tpu.memory_space<smem>>
    %136 = vector.broadcast %135 : f32 to vector<2x64xf32>
    %137 = arith.mulf %134, %136 : vector<2x64xf32>
    %138 = arith.addf %132, %137 : vector<2x64xf32>
    %139 = vector.extract_strided_slice %42 {offsets = [2, 0, 0], sizes = [1, 2, 64], strides = [1, 1, 1]} : vector<4x2x64xf32> to vector<1x2x64xf32>
    %140 = vector.shape_cast %139 : vector<1x2x64xf32> to vector<2x64xf32>
    %c56 = arith.constant 56 : index
    %141 = memref.load %arg4[%c56] : memref<144xf32, #tpu.memory_space<smem>>
    %142 = vector.broadcast %141 : f32 to vector<2x64xf32>
    %143 = arith.mulf %140, %142 : vector<2x64xf32>
    %144 = arith.addf %138, %143 : vector<2x64xf32>
    %145 = vector.extract_strided_slice %42 {offsets = [3, 0, 0], sizes = [1, 2, 64], strides = [1, 1, 1]} : vector<4x2x64xf32> to vector<1x2x64xf32>
    %146 = vector.shape_cast %145 : vector<1x2x64xf32> to vector<2x64xf32>
    %c60 = arith.constant 60 : index
    %147 = memref.load %arg4[%c60] : memref<144xf32, #tpu.memory_space<smem>>
    %148 = vector.broadcast %147 : f32 to vector<2x64xf32>
    %149 = arith.mulf %146, %148 : vector<2x64xf32>
    %150 = arith.addf %144, %149 : vector<2x64xf32>
    %151 = vector.extract_strided_slice %43 {offsets = [0, 0, 0], sizes = [1, 2, 64], strides = [1, 1, 1]} : vector<4x2x64xf32> to vector<1x2x64xf32>
    %152 = vector.shape_cast %151 : vector<1x2x64xf32> to vector<2x64xf32>
    %c64 = arith.constant 64 : index
    %153 = memref.load %arg4[%c64] : memref<144xf32, #tpu.memory_space<smem>>
    %154 = vector.broadcast %153 : f32 to vector<2x64xf32>
    %155 = arith.mulf %152, %154 : vector<2x64xf32>
    %156 = arith.addf %150, %155 : vector<2x64xf32>
    %157 = vector.extract_strided_slice %43 {offsets = [1, 0, 0], sizes = [1, 2, 64], strides = [1, 1, 1]} : vector<4x2x64xf32> to vector<1x2x64xf32>
    %158 = vector.shape_cast %157 : vector<1x2x64xf32> to vector<2x64xf32>
    %c68 = arith.constant 68 : index
    %159 = memref.load %arg4[%c68] : memref<144xf32, #tpu.memory_space<smem>>
    %160 = vector.broadcast %159 : f32 to vector<2x64xf32>
    %161 = arith.mulf %158, %160 : vector<2x64xf32>
    %162 = arith.addf %156, %161 : vector<2x64xf32>
    %163 = vector.extract_strided_slice %43 {offsets = [2, 0, 0], sizes = [1, 2, 64], strides = [1, 1, 1]} : vector<4x2x64xf32> to vector<1x2x64xf32>
    %164 = vector.shape_cast %163 : vector<1x2x64xf32> to vector<2x64xf32>
    %c72 = arith.constant 72 : index
    %165 = memref.load %arg4[%c72] : memref<144xf32, #tpu.memory_space<smem>>
    %166 = vector.broadcast %165 : f32 to vector<2x64xf32>
    %167 = arith.mulf %164, %166 : vector<2x64xf32>
    %168 = arith.addf %162, %167 : vector<2x64xf32>
    %169 = vector.extract_strided_slice %43 {offsets = [3, 0, 0], sizes = [1, 2, 64], strides = [1, 1, 1]} : vector<4x2x64xf32> to vector<1x2x64xf32>
    %170 = vector.shape_cast %169 : vector<1x2x64xf32> to vector<2x64xf32>
    %c76 = arith.constant 76 : index
    %171 = memref.load %arg4[%c76] : memref<144xf32, #tpu.memory_space<smem>>
    %172 = vector.broadcast %171 : f32 to vector<2x64xf32>
    %173 = arith.mulf %170, %172 : vector<2x64xf32>
    %174 = arith.addf %168, %173 : vector<2x64xf32>
    %175 = vector.extract_strided_slice %46 {offsets = [0, 0, 0], sizes = [1, 2, 64], strides = [1, 1, 1]} : vector<4x2x64xf32> to vector<1x2x64xf32>
    %176 = vector.shape_cast %175 : vector<1x2x64xf32> to vector<2x64xf32>
    %c80 = arith.constant 80 : index
    %177 = memref.load %arg4[%c80] : memref<144xf32, #tpu.memory_space<smem>>
    %178 = vector.broadcast %177 : f32 to vector<2x64xf32>
    %179 = arith.mulf %176, %178 : vector<2x64xf32>
    %180 = arith.addf %174, %179 : vector<2x64xf32>
    %181 = vector.extract_strided_slice %46 {offsets = [1, 0, 0], sizes = [1, 2, 64], strides = [1, 1, 1]} : vector<4x2x64xf32> to vector<1x2x64xf32>
    %182 = vector.shape_cast %181 : vector<1x2x64xf32> to vector<2x64xf32>
    %c84 = arith.constant 84 : index
    %183 = memref.load %arg4[%c84] : memref<144xf32, #tpu.memory_space<smem>>
    %184 = vector.broadcast %183 : f32 to vector<2x64xf32>
    %185 = arith.mulf %182, %184 : vector<2x64xf32>
    %186 = arith.addf %180, %185 : vector<2x64xf32>
    %187 = vector.extract_strided_slice %46 {offsets = [2, 0, 0], sizes = [1, 2, 64], strides = [1, 1, 1]} : vector<4x2x64xf32> to vector<1x2x64xf32>
    %188 = vector.shape_cast %187 : vector<1x2x64xf32> to vector<2x64xf32>
    %c88 = arith.constant 88 : index
    %189 = memref.load %arg4[%c88] : memref<144xf32, #tpu.memory_space<smem>>
    %190 = vector.broadcast %189 : f32 to vector<2x64xf32>
    %191 = arith.mulf %188, %190 : vector<2x64xf32>
    %192 = arith.addf %186, %191 : vector<2x64xf32>
    %193 = vector.extract_strided_slice %46 {offsets = [3, 0, 0], sizes = [1, 2, 64], strides = [1, 1, 1]} : vector<4x2x64xf32> to vector<1x2x64xf32>
    %194 = vector.shape_cast %193 : vector<1x2x64xf32> to vector<2x64xf32>
    %c92 = arith.constant 92 : index
    %195 = memref.load %arg4[%c92] : memref<144xf32, #tpu.memory_space<smem>>
    %196 = vector.broadcast %195 : f32 to vector<2x64xf32>
    %197 = arith.mulf %194, %196 : vector<2x64xf32>
    %198 = arith.addf %192, %197 : vector<2x64xf32>
    %199 = vector.extract_strided_slice %49 {offsets = [0, 0, 0], sizes = [1, 2, 64], strides = [1, 1, 1]} : vector<4x2x64xf32> to vector<1x2x64xf32>
    %200 = vector.shape_cast %199 : vector<1x2x64xf32> to vector<2x64xf32>
    %c96 = arith.constant 96 : index
    %201 = memref.load %arg4[%c96] : memref<144xf32, #tpu.memory_space<smem>>
    %202 = vector.broadcast %201 : f32 to vector<2x64xf32>
    %203 = arith.mulf %200, %202 : vector<2x64xf32>
    %204 = arith.addf %198, %203 : vector<2x64xf32>
    %205 = vector.extract_strided_slice %49 {offsets = [1, 0, 0], sizes = [1, 2, 64], strides = [1, 1, 1]} : vector<4x2x64xf32> to vector<1x2x64xf32>
    %206 = vector.shape_cast %205 : vector<1x2x64xf32> to vector<2x64xf32>
    %c100 = arith.constant 100 : index
    %207 = memref.load %arg4[%c100] : memref<144xf32, #tpu.memory_space<smem>>
    %208 = vector.broadcast %207 : f32 to vector<2x64xf32>
    %209 = arith.mulf %206, %208 : vector<2x64xf32>
    %210 = arith.addf %204, %209 : vector<2x64xf32>
    %211 = vector.extract_strided_slice %49 {offsets = [2, 0, 0], sizes = [1, 2, 64], strides = [1, 1, 1]} : vector<4x2x64xf32> to vector<1x2x64xf32>
    %212 = vector.shape_cast %211 : vector<1x2x64xf32> to vector<2x64xf32>
    %c104 = arith.constant 104 : index
    %213 = memref.load %arg4[%c104] : memref<144xf32, #tpu.memory_space<smem>>
    %214 = vector.broadcast %213 : f32 to vector<2x64xf32>
    %215 = arith.mulf %212, %214 : vector<2x64xf32>
    %216 = arith.addf %210, %215 : vector<2x64xf32>
    %217 = vector.extract_strided_slice %49 {offsets = [3, 0, 0], sizes = [1, 2, 64], strides = [1, 1, 1]} : vector<4x2x64xf32> to vector<1x2x64xf32>
    %218 = vector.shape_cast %217 : vector<1x2x64xf32> to vector<2x64xf32>
    %c108 = arith.constant 108 : index
    %219 = memref.load %arg4[%c108] : memref<144xf32, #tpu.memory_space<smem>>
    %220 = vector.broadcast %219 : f32 to vector<2x64xf32>
    %221 = arith.mulf %218, %220 : vector<2x64xf32>
    %222 = arith.addf %216, %221 : vector<2x64xf32>
    %223 = vector.extract_strided_slice %50 {offsets = [0, 0, 0], sizes = [1, 2, 64], strides = [1, 1, 1]} : vector<4x2x64xf32> to vector<1x2x64xf32>
    %224 = vector.shape_cast %223 : vector<1x2x64xf32> to vector<2x64xf32>
    %c112 = arith.constant 112 : index
    %225 = memref.load %arg4[%c112] : memref<144xf32, #tpu.memory_space<smem>>
    %226 = vector.broadcast %225 : f32 to vector<2x64xf32>
    %227 = arith.mulf %224, %226 : vector<2x64xf32>
    %228 = arith.addf %222, %227 : vector<2x64xf32>
    %229 = vector.extract_strided_slice %50 {offsets = [1, 0, 0], sizes = [1, 2, 64], strides = [1, 1, 1]} : vector<4x2x64xf32> to vector<1x2x64xf32>
    %230 = vector.shape_cast %229 : vector<1x2x64xf32> to vector<2x64xf32>
    %c116 = arith.constant 116 : index
    %231 = memref.load %arg4[%c116] : memref<144xf32, #tpu.memory_space<smem>>
    %232 = vector.broadcast %231 : f32 to vector<2x64xf32>
    %233 = arith.mulf %230, %232 : vector<2x64xf32>
    %234 = arith.addf %228, %233 : vector<2x64xf32>
    %235 = vector.extract_strided_slice %50 {offsets = [2, 0, 0], sizes = [1, 2, 64], strides = [1, 1, 1]} : vector<4x2x64xf32> to vector<1x2x64xf32>
    %236 = vector.shape_cast %235 : vector<1x2x64xf32> to vector<2x64xf32>
    %c120 = arith.constant 120 : index
    %237 = memref.load %arg4[%c120] : memref<144xf32, #tpu.memory_space<smem>>
    %238 = vector.broadcast %237 : f32 to vector<2x64xf32>
    %239 = arith.mulf %236, %238 : vector<2x64xf32>
    %240 = arith.addf %234, %239 : vector<2x64xf32>
    %241 = vector.extract_strided_slice %50 {offsets = [3, 0, 0], sizes = [1, 2, 64], strides = [1, 1, 1]} : vector<4x2x64xf32> to vector<1x2x64xf32>
    %242 = vector.shape_cast %241 : vector<1x2x64xf32> to vector<2x64xf32>
    %c124 = arith.constant 124 : index
    %243 = memref.load %arg4[%c124] : memref<144xf32, #tpu.memory_space<smem>>
    %244 = vector.broadcast %243 : f32 to vector<2x64xf32>
    %245 = arith.mulf %242, %244 : vector<2x64xf32>
    %246 = arith.addf %240, %245 : vector<2x64xf32>
    %247 = vector.extract_strided_slice %53 {offsets = [0, 0, 0], sizes = [1, 2, 64], strides = [1, 1, 1]} : vector<4x2x64xf32> to vector<1x2x64xf32>
    %248 = vector.shape_cast %247 : vector<1x2x64xf32> to vector<2x64xf32>
    %c128 = arith.constant 128 : index
    %249 = memref.load %arg4[%c128] : memref<144xf32, #tpu.memory_space<smem>>
    %250 = vector.broadcast %249 : f32 to vector<2x64xf32>
    %251 = arith.mulf %248, %250 : vector<2x64xf32>
    %252 = arith.addf %246, %251 : vector<2x64xf32>
    %253 = vector.extract_strided_slice %53 {offsets = [1, 0, 0], sizes = [1, 2, 64], strides = [1, 1, 1]} : vector<4x2x64xf32> to vector<1x2x64xf32>
    %254 = vector.shape_cast %253 : vector<1x2x64xf32> to vector<2x64xf32>
    %c132 = arith.constant 132 : index
    %255 = memref.load %arg4[%c132] : memref<144xf32, #tpu.memory_space<smem>>
    %256 = vector.broadcast %255 : f32 to vector<2x64xf32>
    %257 = arith.mulf %254, %256 : vector<2x64xf32>
    %258 = arith.addf %252, %257 : vector<2x64xf32>
    %259 = vector.extract_strided_slice %53 {offsets = [2, 0, 0], sizes = [1, 2, 64], strides = [1, 1, 1]} : vector<4x2x64xf32> to vector<1x2x64xf32>
    %260 = vector.shape_cast %259 : vector<1x2x64xf32> to vector<2x64xf32>
    %c136 = arith.constant 136 : index
    %261 = memref.load %arg4[%c136] : memref<144xf32, #tpu.memory_space<smem>>
    %262 = vector.broadcast %261 : f32 to vector<2x64xf32>
    %263 = arith.mulf %260, %262 : vector<2x64xf32>
    %264 = arith.addf %258, %263 : vector<2x64xf32>
    %265 = vector.extract_strided_slice %53 {offsets = [3, 0, 0], sizes = [1, 2, 64], strides = [1, 1, 1]} : vector<4x2x64xf32> to vector<1x2x64xf32>
    %266 = vector.shape_cast %265 : vector<1x2x64xf32> to vector<2x64xf32>
    %c140 = arith.constant 140 : index
    %267 = memref.load %arg4[%c140] : memref<144xf32, #tpu.memory_space<smem>>
    %268 = vector.broadcast %267 : f32 to vector<2x64xf32>
    %269 = arith.mulf %266, %268 : vector<2x64xf32>
    %270 = arith.addf %264, %269 : vector<2x64xf32>
    %c0_21 = arith.constant 0 : index
    %271 = memref.load %arg5[%c0_21] : memref<4xf32, #tpu.memory_space<smem>>
    %272 = vector.broadcast %271 : f32 to vector<2x64xf32>
    %273 = arith.addf %270, %272 : vector<2x64xf32>
    %cst_22 = arith.constant 0.000000e+00 : f32
    %274 = vector.broadcast %cst_22 : f32 to vector<2x64xf32>
    %275 = vector.extract_strided_slice %35 {offsets = [0, 0, 0], sizes = [1, 2, 64], strides = [1, 1, 1]} : vector<4x2x64xf32> to vector<1x2x64xf32>
    %276 = vector.shape_cast %275 : vector<1x2x64xf32> to vector<2x64xf32>
    %c1 = arith.constant 1 : index
    %277 = memref.load %arg4[%c1] : memref<144xf32, #tpu.memory_space<smem>>
    %278 = vector.broadcast %277 : f32 to vector<2x64xf32>
    %279 = arith.mulf %276, %278 : vector<2x64xf32>
    %280 = arith.addf %274, %279 : vector<2x64xf32>
    %281 = vector.extract_strided_slice %35 {offsets = [1, 0, 0], sizes = [1, 2, 64], strides = [1, 1, 1]} : vector<4x2x64xf32> to vector<1x2x64xf32>
    %282 = vector.shape_cast %281 : vector<1x2x64xf32> to vector<2x64xf32>
    %c5 = arith.constant 5 : index
    %283 = memref.load %arg4[%c5] : memref<144xf32, #tpu.memory_space<smem>>
    %284 = vector.broadcast %283 : f32 to vector<2x64xf32>
    %285 = arith.mulf %282, %284 : vector<2x64xf32>
    %286 = arith.addf %280, %285 : vector<2x64xf32>
    %287 = vector.extract_strided_slice %35 {offsets = [2, 0, 0], sizes = [1, 2, 64], strides = [1, 1, 1]} : vector<4x2x64xf32> to vector<1x2x64xf32>
    %288 = vector.shape_cast %287 : vector<1x2x64xf32> to vector<2x64xf32>
    %c9 = arith.constant 9 : index
    %289 = memref.load %arg4[%c9] : memref<144xf32, #tpu.memory_space<smem>>
    %290 = vector.broadcast %289 : f32 to vector<2x64xf32>
    %291 = arith.mulf %288, %290 : vector<2x64xf32>
    %292 = arith.addf %286, %291 : vector<2x64xf32>
    %293 = vector.extract_strided_slice %35 {offsets = [3, 0, 0], sizes = [1, 2, 64], strides = [1, 1, 1]} : vector<4x2x64xf32> to vector<1x2x64xf32>
    %294 = vector.shape_cast %293 : vector<1x2x64xf32> to vector<2x64xf32>
    %c13 = arith.constant 13 : index
    %295 = memref.load %arg4[%c13] : memref<144xf32, #tpu.memory_space<smem>>
    %296 = vector.broadcast %295 : f32 to vector<2x64xf32>
    %297 = arith.mulf %294, %296 : vector<2x64xf32>
    %298 = arith.addf %292, %297 : vector<2x64xf32>
    %299 = vector.extract_strided_slice %36 {offsets = [0, 0, 0], sizes = [1, 2, 64], strides = [1, 1, 1]} : vector<4x2x64xf32> to vector<1x2x64xf32>
    %300 = vector.shape_cast %299 : vector<1x2x64xf32> to vector<2x64xf32>
    %c17 = arith.constant 17 : index
    %301 = memref.load %arg4[%c17] : memref<144xf32, #tpu.memory_space<smem>>
    %302 = vector.broadcast %301 : f32 to vector<2x64xf32>
    %303 = arith.mulf %300, %302 : vector<2x64xf32>
    %304 = arith.addf %298, %303 : vector<2x64xf32>
    %305 = vector.extract_strided_slice %36 {offsets = [1, 0, 0], sizes = [1, 2, 64], strides = [1, 1, 1]} : vector<4x2x64xf32> to vector<1x2x64xf32>
    %306 = vector.shape_cast %305 : vector<1x2x64xf32> to vector<2x64xf32>
    %c21 = arith.constant 21 : index
    %307 = memref.load %arg4[%c21] : memref<144xf32, #tpu.memory_space<smem>>
    %308 = vector.broadcast %307 : f32 to vector<2x64xf32>
    %309 = arith.mulf %306, %308 : vector<2x64xf32>
    %310 = arith.addf %304, %309 : vector<2x64xf32>
    %311 = vector.extract_strided_slice %36 {offsets = [2, 0, 0], sizes = [1, 2, 64], strides = [1, 1, 1]} : vector<4x2x64xf32> to vector<1x2x64xf32>
    %312 = vector.shape_cast %311 : vector<1x2x64xf32> to vector<2x64xf32>
    %c25 = arith.constant 25 : index
    %313 = memref.load %arg4[%c25] : memref<144xf32, #tpu.memory_space<smem>>
    %314 = vector.broadcast %313 : f32 to vector<2x64xf32>
    %315 = arith.mulf %312, %314 : vector<2x64xf32>
    %316 = arith.addf %310, %315 : vector<2x64xf32>
    %317 = vector.extract_strided_slice %36 {offsets = [3, 0, 0], sizes = [1, 2, 64], strides = [1, 1, 1]} : vector<4x2x64xf32> to vector<1x2x64xf32>
    %318 = vector.shape_cast %317 : vector<1x2x64xf32> to vector<2x64xf32>
    %c29 = arith.constant 29 : index
    %319 = memref.load %arg4[%c29] : memref<144xf32, #tpu.memory_space<smem>>
    %320 = vector.broadcast %319 : f32 to vector<2x64xf32>
    %321 = arith.mulf %318, %320 : vector<2x64xf32>
    %322 = arith.addf %316, %321 : vector<2x64xf32>
    %323 = vector.extract_strided_slice %39 {offsets = [0, 0, 0], sizes = [1, 2, 64], strides = [1, 1, 1]} : vector<4x2x64xf32> to vector<1x2x64xf32>
    %324 = vector.shape_cast %323 : vector<1x2x64xf32> to vector<2x64xf32>
    %c33 = arith.constant 33 : index
    %325 = memref.load %arg4[%c33] : memref<144xf32, #tpu.memory_space<smem>>
    %326 = vector.broadcast %325 : f32 to vector<2x64xf32>
    %327 = arith.mulf %324, %326 : vector<2x64xf32>
    %328 = arith.addf %322, %327 : vector<2x64xf32>
    %329 = vector.extract_strided_slice %39 {offsets = [1, 0, 0], sizes = [1, 2, 64], strides = [1, 1, 1]} : vector<4x2x64xf32> to vector<1x2x64xf32>
    %330 = vector.shape_cast %329 : vector<1x2x64xf32> to vector<2x64xf32>
    %c37 = arith.constant 37 : index
    %331 = memref.load %arg4[%c37] : memref<144xf32, #tpu.memory_space<smem>>
    %332 = vector.broadcast %331 : f32 to vector<2x64xf32>
    %333 = arith.mulf %330, %332 : vector<2x64xf32>
    %334 = arith.addf %328, %333 : vector<2x64xf32>
    %335 = vector.extract_strided_slice %39 {offsets = [2, 0, 0], sizes = [1, 2, 64], strides = [1, 1, 1]} : vector<4x2x64xf32> to vector<1x2x64xf32>
    %336 = vector.shape_cast %335 : vector<1x2x64xf32> to vector<2x64xf32>
    %c41 = arith.constant 41 : index
    %337 = memref.load %arg4[%c41] : memref<144xf32, #tpu.memory_space<smem>>
    %338 = vector.broadcast %337 : f32 to vector<2x64xf32>
    %339 = arith.mulf %336, %338 : vector<2x64xf32>
    %340 = arith.addf %334, %339 : vector<2x64xf32>
    %341 = vector.extract_strided_slice %39 {offsets = [3, 0, 0], sizes = [1, 2, 64], strides = [1, 1, 1]} : vector<4x2x64xf32> to vector<1x2x64xf32>
    %342 = vector.shape_cast %341 : vector<1x2x64xf32> to vector<2x64xf32>
    %c45 = arith.constant 45 : index
    %343 = memref.load %arg4[%c45] : memref<144xf32, #tpu.memory_space<smem>>
    %344 = vector.broadcast %343 : f32 to vector<2x64xf32>
    %345 = arith.mulf %342, %344 : vector<2x64xf32>
    %346 = arith.addf %340, %345 : vector<2x64xf32>
    %347 = vector.extract_strided_slice %42 {offsets = [0, 0, 0], sizes = [1, 2, 64], strides = [1, 1, 1]} : vector<4x2x64xf32> to vector<1x2x64xf32>
    %348 = vector.shape_cast %347 : vector<1x2x64xf32> to vector<2x64xf32>
    %c49 = arith.constant 49 : index
    %349 = memref.load %arg4[%c49] : memref<144xf32, #tpu.memory_space<smem>>
    %350 = vector.broadcast %349 : f32 to vector<2x64xf32>
    %351 = arith.mulf %348, %350 : vector<2x64xf32>
    %352 = arith.addf %346, %351 : vector<2x64xf32>
    %353 = vector.extract_strided_slice %42 {offsets = [1, 0, 0], sizes = [1, 2, 64], strides = [1, 1, 1]} : vector<4x2x64xf32> to vector<1x2x64xf32>
    %354 = vector.shape_cast %353 : vector<1x2x64xf32> to vector<2x64xf32>
    %c53 = arith.constant 53 : index
    %355 = memref.load %arg4[%c53] : memref<144xf32, #tpu.memory_space<smem>>
    %356 = vector.broadcast %355 : f32 to vector<2x64xf32>
    %357 = arith.mulf %354, %356 : vector<2x64xf32>
    %358 = arith.addf %352, %357 : vector<2x64xf32>
    %359 = vector.extract_strided_slice %42 {offsets = [2, 0, 0], sizes = [1, 2, 64], strides = [1, 1, 1]} : vector<4x2x64xf32> to vector<1x2x64xf32>
    %360 = vector.shape_cast %359 : vector<1x2x64xf32> to vector<2x64xf32>
    %c57 = arith.constant 57 : index
    %361 = memref.load %arg4[%c57] : memref<144xf32, #tpu.memory_space<smem>>
    %362 = vector.broadcast %361 : f32 to vector<2x64xf32>
    %363 = arith.mulf %360, %362 : vector<2x64xf32>
    %364 = arith.addf %358, %363 : vector<2x64xf32>
    %365 = vector.extract_strided_slice %42 {offsets = [3, 0, 0], sizes = [1, 2, 64], strides = [1, 1, 1]} : vector<4x2x64xf32> to vector<1x2x64xf32>
    %366 = vector.shape_cast %365 : vector<1x2x64xf32> to vector<2x64xf32>
    %c61 = arith.constant 61 : index
    %367 = memref.load %arg4[%c61] : memref<144xf32, #tpu.memory_space<smem>>
    %368 = vector.broadcast %367 : f32 to vector<2x64xf32>
    %369 = arith.mulf %366, %368 : vector<2x64xf32>
    %370 = arith.addf %364, %369 : vector<2x64xf32>
    %371 = vector.extract_strided_slice %43 {offsets = [0, 0, 0], sizes = [1, 2, 64], strides = [1, 1, 1]} : vector<4x2x64xf32> to vector<1x2x64xf32>
    %372 = vector.shape_cast %371 : vector<1x2x64xf32> to vector<2x64xf32>
    %c65 = arith.constant 65 : index
    %373 = memref.load %arg4[%c65] : memref<144xf32, #tpu.memory_space<smem>>
    %374 = vector.broadcast %373 : f32 to vector<2x64xf32>
    %375 = arith.mulf %372, %374 : vector<2x64xf32>
    %376 = arith.addf %370, %375 : vector<2x64xf32>
    %377 = vector.extract_strided_slice %43 {offsets = [1, 0, 0], sizes = [1, 2, 64], strides = [1, 1, 1]} : vector<4x2x64xf32> to vector<1x2x64xf32>
    %378 = vector.shape_cast %377 : vector<1x2x64xf32> to vector<2x64xf32>
    %c69 = arith.constant 69 : index
    %379 = memref.load %arg4[%c69] : memref<144xf32, #tpu.memory_space<smem>>
    %380 = vector.broadcast %379 : f32 to vector<2x64xf32>
    %381 = arith.mulf %378, %380 : vector<2x64xf32>
    %382 = arith.addf %376, %381 : vector<2x64xf32>
    %383 = vector.extract_strided_slice %43 {offsets = [2, 0, 0], sizes = [1, 2, 64], strides = [1, 1, 1]} : vector<4x2x64xf32> to vector<1x2x64xf32>
    %384 = vector.shape_cast %383 : vector<1x2x64xf32> to vector<2x64xf32>
    %c73 = arith.constant 73 : index
    %385 = memref.load %arg4[%c73] : memref<144xf32, #tpu.memory_space<smem>>
    %386 = vector.broadcast %385 : f32 to vector<2x64xf32>
    %387 = arith.mulf %384, %386 : vector<2x64xf32>
    %388 = arith.addf %382, %387 : vector<2x64xf32>
    %389 = vector.extract_strided_slice %43 {offsets = [3, 0, 0], sizes = [1, 2, 64], strides = [1, 1, 1]} : vector<4x2x64xf32> to vector<1x2x64xf32>
    %390 = vector.shape_cast %389 : vector<1x2x64xf32> to vector<2x64xf32>
    %c77 = arith.constant 77 : index
    %391 = memref.load %arg4[%c77] : memref<144xf32, #tpu.memory_space<smem>>
    %392 = vector.broadcast %391 : f32 to vector<2x64xf32>
    %393 = arith.mulf %390, %392 : vector<2x64xf32>
    %394 = arith.addf %388, %393 : vector<2x64xf32>
    %395 = vector.extract_strided_slice %46 {offsets = [0, 0, 0], sizes = [1, 2, 64], strides = [1, 1, 1]} : vector<4x2x64xf32> to vector<1x2x64xf32>
    %396 = vector.shape_cast %395 : vector<1x2x64xf32> to vector<2x64xf32>
    %c81 = arith.constant 81 : index
    %397 = memref.load %arg4[%c81] : memref<144xf32, #tpu.memory_space<smem>>
    %398 = vector.broadcast %397 : f32 to vector<2x64xf32>
    %399 = arith.mulf %396, %398 : vector<2x64xf32>
    %400 = arith.addf %394, %399 : vector<2x64xf32>
    %401 = vector.extract_strided_slice %46 {offsets = [1, 0, 0], sizes = [1, 2, 64], strides = [1, 1, 1]} : vector<4x2x64xf32> to vector<1x2x64xf32>
    %402 = vector.shape_cast %401 : vector<1x2x64xf32> to vector<2x64xf32>
    %c85 = arith.constant 85 : index
    %403 = memref.load %arg4[%c85] : memref<144xf32, #tpu.memory_space<smem>>
    %404 = vector.broadcast %403 : f32 to vector<2x64xf32>
    %405 = arith.mulf %402, %404 : vector<2x64xf32>
    %406 = arith.addf %400, %405 : vector<2x64xf32>
    %407 = vector.extract_strided_slice %46 {offsets = [2, 0, 0], sizes = [1, 2, 64], strides = [1, 1, 1]} : vector<4x2x64xf32> to vector<1x2x64xf32>
    %408 = vector.shape_cast %407 : vector<1x2x64xf32> to vector<2x64xf32>
    %c89 = arith.constant 89 : index
    %409 = memref.load %arg4[%c89] : memref<144xf32, #tpu.memory_space<smem>>
    %410 = vector.broadcast %409 : f32 to vector<2x64xf32>
    %411 = arith.mulf %408, %410 : vector<2x64xf32>
    %412 = arith.addf %406, %411 : vector<2x64xf32>
    %413 = vector.extract_strided_slice %46 {offsets = [3, 0, 0], sizes = [1, 2, 64], strides = [1, 1, 1]} : vector<4x2x64xf32> to vector<1x2x64xf32>
    %414 = vector.shape_cast %413 : vector<1x2x64xf32> to vector<2x64xf32>
    %c93 = arith.constant 93 : index
    %415 = memref.load %arg4[%c93] : memref<144xf32, #tpu.memory_space<smem>>
    %416 = vector.broadcast %415 : f32 to vector<2x64xf32>
    %417 = arith.mulf %414, %416 : vector<2x64xf32>
    %418 = arith.addf %412, %417 : vector<2x64xf32>
    %419 = vector.extract_strided_slice %49 {offsets = [0, 0, 0], sizes = [1, 2, 64], strides = [1, 1, 1]} : vector<4x2x64xf32> to vector<1x2x64xf32>
    %420 = vector.shape_cast %419 : vector<1x2x64xf32> to vector<2x64xf32>
    %c97 = arith.constant 97 : index
    %421 = memref.load %arg4[%c97] : memref<144xf32, #tpu.memory_space<smem>>
    %422 = vector.broadcast %421 : f32 to vector<2x64xf32>
    %423 = arith.mulf %420, %422 : vector<2x64xf32>
    %424 = arith.addf %418, %423 : vector<2x64xf32>
    %425 = vector.extract_strided_slice %49 {offsets = [1, 0, 0], sizes = [1, 2, 64], strides = [1, 1, 1]} : vector<4x2x64xf32> to vector<1x2x64xf32>
    %426 = vector.shape_cast %425 : vector<1x2x64xf32> to vector<2x64xf32>
    %c101 = arith.constant 101 : index
    %427 = memref.load %arg4[%c101] : memref<144xf32, #tpu.memory_space<smem>>
    %428 = vector.broadcast %427 : f32 to vector<2x64xf32>
    %429 = arith.mulf %426, %428 : vector<2x64xf32>
    %430 = arith.addf %424, %429 : vector<2x64xf32>
    %431 = vector.extract_strided_slice %49 {offsets = [2, 0, 0], sizes = [1, 2, 64], strides = [1, 1, 1]} : vector<4x2x64xf32> to vector<1x2x64xf32>
    %432 = vector.shape_cast %431 : vector<1x2x64xf32> to vector<2x64xf32>
    %c105 = arith.constant 105 : index
    %433 = memref.load %arg4[%c105] : memref<144xf32, #tpu.memory_space<smem>>
    %434 = vector.broadcast %433 : f32 to vector<2x64xf32>
    %435 = arith.mulf %432, %434 : vector<2x64xf32>
    %436 = arith.addf %430, %435 : vector<2x64xf32>
    %437 = vector.extract_strided_slice %49 {offsets = [3, 0, 0], sizes = [1, 2, 64], strides = [1, 1, 1]} : vector<4x2x64xf32> to vector<1x2x64xf32>
    %438 = vector.shape_cast %437 : vector<1x2x64xf32> to vector<2x64xf32>
    %c109 = arith.constant 109 : index
    %439 = memref.load %arg4[%c109] : memref<144xf32, #tpu.memory_space<smem>>
    %440 = vector.broadcast %439 : f32 to vector<2x64xf32>
    %441 = arith.mulf %438, %440 : vector<2x64xf32>
    %442 = arith.addf %436, %441 : vector<2x64xf32>
    %443 = vector.extract_strided_slice %50 {offsets = [0, 0, 0], sizes = [1, 2, 64], strides = [1, 1, 1]} : vector<4x2x64xf32> to vector<1x2x64xf32>
    %444 = vector.shape_cast %443 : vector<1x2x64xf32> to vector<2x64xf32>
    %c113 = arith.constant 113 : index
    %445 = memref.load %arg4[%c113] : memref<144xf32, #tpu.memory_space<smem>>
    %446 = vector.broadcast %445 : f32 to vector<2x64xf32>
    %447 = arith.mulf %444, %446 : vector<2x64xf32>
    %448 = arith.addf %442, %447 : vector<2x64xf32>
    %449 = vector.extract_strided_slice %50 {offsets = [1, 0, 0], sizes = [1, 2, 64], strides = [1, 1, 1]} : vector<4x2x64xf32> to vector<1x2x64xf32>
    %450 = vector.shape_cast %449 : vector<1x2x64xf32> to vector<2x64xf32>
    %c117 = arith.constant 117 : index
    %451 = memref.load %arg4[%c117] : memref<144xf32, #tpu.memory_space<smem>>
    %452 = vector.broadcast %451 : f32 to vector<2x64xf32>
    %453 = arith.mulf %450, %452 : vector<2x64xf32>
    %454 = arith.addf %448, %453 : vector<2x64xf32>
    %455 = vector.extract_strided_slice %50 {offsets = [2, 0, 0], sizes = [1, 2, 64], strides = [1, 1, 1]} : vector<4x2x64xf32> to vector<1x2x64xf32>
    %456 = vector.shape_cast %455 : vector<1x2x64xf32> to vector<2x64xf32>
    %c121 = arith.constant 121 : index
    %457 = memref.load %arg4[%c121] : memref<144xf32, #tpu.memory_space<smem>>
    %458 = vector.broadcast %457 : f32 to vector<2x64xf32>
    %459 = arith.mulf %456, %458 : vector<2x64xf32>
    %460 = arith.addf %454, %459 : vector<2x64xf32>
    %461 = vector.extract_strided_slice %50 {offsets = [3, 0, 0], sizes = [1, 2, 64], strides = [1, 1, 1]} : vector<4x2x64xf32> to vector<1x2x64xf32>
    %462 = vector.shape_cast %461 : vector<1x2x64xf32> to vector<2x64xf32>
    %c125 = arith.constant 125 : index
    %463 = memref.load %arg4[%c125] : memref<144xf32, #tpu.memory_space<smem>>
    %464 = vector.broadcast %463 : f32 to vector<2x64xf32>
    %465 = arith.mulf %462, %464 : vector<2x64xf32>
    %466 = arith.addf %460, %465 : vector<2x64xf32>
    %467 = vector.extract_strided_slice %53 {offsets = [0, 0, 0], sizes = [1, 2, 64], strides = [1, 1, 1]} : vector<4x2x64xf32> to vector<1x2x64xf32>
    %468 = vector.shape_cast %467 : vector<1x2x64xf32> to vector<2x64xf32>
    %c129 = arith.constant 129 : index
    %469 = memref.load %arg4[%c129] : memref<144xf32, #tpu.memory_space<smem>>
    %470 = vector.broadcast %469 : f32 to vector<2x64xf32>
    %471 = arith.mulf %468, %470 : vector<2x64xf32>
    %472 = arith.addf %466, %471 : vector<2x64xf32>
    %473 = vector.extract_strided_slice %53 {offsets = [1, 0, 0], sizes = [1, 2, 64], strides = [1, 1, 1]} : vector<4x2x64xf32> to vector<1x2x64xf32>
    %474 = vector.shape_cast %473 : vector<1x2x64xf32> to vector<2x64xf32>
    %c133 = arith.constant 133 : index
    %475 = memref.load %arg4[%c133] : memref<144xf32, #tpu.memory_space<smem>>
    %476 = vector.broadcast %475 : f32 to vector<2x64xf32>
    %477 = arith.mulf %474, %476 : vector<2x64xf32>
    %478 = arith.addf %472, %477 : vector<2x64xf32>
    %479 = vector.extract_strided_slice %53 {offsets = [2, 0, 0], sizes = [1, 2, 64], strides = [1, 1, 1]} : vector<4x2x64xf32> to vector<1x2x64xf32>
    %480 = vector.shape_cast %479 : vector<1x2x64xf32> to vector<2x64xf32>
    %c137 = arith.constant 137 : index
    %481 = memref.load %arg4[%c137] : memref<144xf32, #tpu.memory_space<smem>>
    %482 = vector.broadcast %481 : f32 to vector<2x64xf32>
    %483 = arith.mulf %480, %482 : vector<2x64xf32>
    %484 = arith.addf %478, %483 : vector<2x64xf32>
    %485 = vector.extract_strided_slice %53 {offsets = [3, 0, 0], sizes = [1, 2, 64], strides = [1, 1, 1]} : vector<4x2x64xf32> to vector<1x2x64xf32>
    %486 = vector.shape_cast %485 : vector<1x2x64xf32> to vector<2x64xf32>
    %c141 = arith.constant 141 : index
    %487 = memref.load %arg4[%c141] : memref<144xf32, #tpu.memory_space<smem>>
    %488 = vector.broadcast %487 : f32 to vector<2x64xf32>
    %489 = arith.mulf %486, %488 : vector<2x64xf32>
    %490 = arith.addf %484, %489 : vector<2x64xf32>
    %c1_23 = arith.constant 1 : index
    %491 = memref.load %arg5[%c1_23] : memref<4xf32, #tpu.memory_space<smem>>
    %492 = vector.broadcast %491 : f32 to vector<2x64xf32>
    %493 = arith.addf %490, %492 : vector<2x64xf32>
    %cst_24 = arith.constant 0.000000e+00 : f32
    %494 = vector.broadcast %cst_24 : f32 to vector<2x64xf32>
    %495 = vector.extract_strided_slice %35 {offsets = [0, 0, 0], sizes = [1, 2, 64], strides = [1, 1, 1]} : vector<4x2x64xf32> to vector<1x2x64xf32>
    %496 = vector.shape_cast %495 : vector<1x2x64xf32> to vector<2x64xf32>
    %c2 = arith.constant 2 : index
    %497 = memref.load %arg4[%c2] : memref<144xf32, #tpu.memory_space<smem>>
    %498 = vector.broadcast %497 : f32 to vector<2x64xf32>
    %499 = arith.mulf %496, %498 : vector<2x64xf32>
    %500 = arith.addf %494, %499 : vector<2x64xf32>
    %501 = vector.extract_strided_slice %35 {offsets = [1, 0, 0], sizes = [1, 2, 64], strides = [1, 1, 1]} : vector<4x2x64xf32> to vector<1x2x64xf32>
    %502 = vector.shape_cast %501 : vector<1x2x64xf32> to vector<2x64xf32>
    %c6 = arith.constant 6 : index
    %503 = memref.load %arg4[%c6] : memref<144xf32, #tpu.memory_space<smem>>
    %504 = vector.broadcast %503 : f32 to vector<2x64xf32>
    %505 = arith.mulf %502, %504 : vector<2x64xf32>
    %506 = arith.addf %500, %505 : vector<2x64xf32>
    %507 = vector.extract_strided_slice %35 {offsets = [2, 0, 0], sizes = [1, 2, 64], strides = [1, 1, 1]} : vector<4x2x64xf32> to vector<1x2x64xf32>
    %508 = vector.shape_cast %507 : vector<1x2x64xf32> to vector<2x64xf32>
    %c10 = arith.constant 10 : index
    %509 = memref.load %arg4[%c10] : memref<144xf32, #tpu.memory_space<smem>>
    %510 = vector.broadcast %509 : f32 to vector<2x64xf32>
    %511 = arith.mulf %508, %510 : vector<2x64xf32>
    %512 = arith.addf %506, %511 : vector<2x64xf32>
    %513 = vector.extract_strided_slice %35 {offsets = [3, 0, 0], sizes = [1, 2, 64], strides = [1, 1, 1]} : vector<4x2x64xf32> to vector<1x2x64xf32>
    %514 = vector.shape_cast %513 : vector<1x2x64xf32> to vector<2x64xf32>
    %c14 = arith.constant 14 : index
    %515 = memref.load %arg4[%c14] : memref<144xf32, #tpu.memory_space<smem>>
    %516 = vector.broadcast %515 : f32 to vector<2x64xf32>
    %517 = arith.mulf %514, %516 : vector<2x64xf32>
    %518 = arith.addf %512, %517 : vector<2x64xf32>
    %519 = vector.extract_strided_slice %36 {offsets = [0, 0, 0], sizes = [1, 2, 64], strides = [1, 1, 1]} : vector<4x2x64xf32> to vector<1x2x64xf32>
    %520 = vector.shape_cast %519 : vector<1x2x64xf32> to vector<2x64xf32>
    %c18 = arith.constant 18 : index
    %521 = memref.load %arg4[%c18] : memref<144xf32, #tpu.memory_space<smem>>
    %522 = vector.broadcast %521 : f32 to vector<2x64xf32>
    %523 = arith.mulf %520, %522 : vector<2x64xf32>
    %524 = arith.addf %518, %523 : vector<2x64xf32>
    %525 = vector.extract_strided_slice %36 {offsets = [1, 0, 0], sizes = [1, 2, 64], strides = [1, 1, 1]} : vector<4x2x64xf32> to vector<1x2x64xf32>
    %526 = vector.shape_cast %525 : vector<1x2x64xf32> to vector<2x64xf32>
    %c22 = arith.constant 22 : index
    %527 = memref.load %arg4[%c22] : memref<144xf32, #tpu.memory_space<smem>>
    %528 = vector.broadcast %527 : f32 to vector<2x64xf32>
    %529 = arith.mulf %526, %528 : vector<2x64xf32>
    %530 = arith.addf %524, %529 : vector<2x64xf32>
    %531 = vector.extract_strided_slice %36 {offsets = [2, 0, 0], sizes = [1, 2, 64], strides = [1, 1, 1]} : vector<4x2x64xf32> to vector<1x2x64xf32>
    %532 = vector.shape_cast %531 : vector<1x2x64xf32> to vector<2x64xf32>
    %c26 = arith.constant 26 : index
    %533 = memref.load %arg4[%c26] : memref<144xf32, #tpu.memory_space<smem>>
    %534 = vector.broadcast %533 : f32 to vector<2x64xf32>
    %535 = arith.mulf %532, %534 : vector<2x64xf32>
    %536 = arith.addf %530, %535 : vector<2x64xf32>
    %537 = vector.extract_strided_slice %36 {offsets = [3, 0, 0], sizes = [1, 2, 64], strides = [1, 1, 1]} : vector<4x2x64xf32> to vector<1x2x64xf32>
    %538 = vector.shape_cast %537 : vector<1x2x64xf32> to vector<2x64xf32>
    %c30 = arith.constant 30 : index
    %539 = memref.load %arg4[%c30] : memref<144xf32, #tpu.memory_space<smem>>
    %540 = vector.broadcast %539 : f32 to vector<2x64xf32>
    %541 = arith.mulf %538, %540 : vector<2x64xf32>
    %542 = arith.addf %536, %541 : vector<2x64xf32>
    %543 = vector.extract_strided_slice %39 {offsets = [0, 0, 0], sizes = [1, 2, 64], strides = [1, 1, 1]} : vector<4x2x64xf32> to vector<1x2x64xf32>
    %544 = vector.shape_cast %543 : vector<1x2x64xf32> to vector<2x64xf32>
    %c34 = arith.constant 34 : index
    %545 = memref.load %arg4[%c34] : memref<144xf32, #tpu.memory_space<smem>>
    %546 = vector.broadcast %545 : f32 to vector<2x64xf32>
    %547 = arith.mulf %544, %546 : vector<2x64xf32>
    %548 = arith.addf %542, %547 : vector<2x64xf32>
    %549 = vector.extract_strided_slice %39 {offsets = [1, 0, 0], sizes = [1, 2, 64], strides = [1, 1, 1]} : vector<4x2x64xf32> to vector<1x2x64xf32>
    %550 = vector.shape_cast %549 : vector<1x2x64xf32> to vector<2x64xf32>
    %c38 = arith.constant 38 : index
    %551 = memref.load %arg4[%c38] : memref<144xf32, #tpu.memory_space<smem>>
    %552 = vector.broadcast %551 : f32 to vector<2x64xf32>
    %553 = arith.mulf %550, %552 : vector<2x64xf32>
    %554 = arith.addf %548, %553 : vector<2x64xf32>
    %555 = vector.extract_strided_slice %39 {offsets = [2, 0, 0], sizes = [1, 2, 64], strides = [1, 1, 1]} : vector<4x2x64xf32> to vector<1x2x64xf32>
    %556 = vector.shape_cast %555 : vector<1x2x64xf32> to vector<2x64xf32>
    %c42 = arith.constant 42 : index
    %557 = memref.load %arg4[%c42] : memref<144xf32, #tpu.memory_space<smem>>
    %558 = vector.broadcast %557 : f32 to vector<2x64xf32>
    %559 = arith.mulf %556, %558 : vector<2x64xf32>
    %560 = arith.addf %554, %559 : vector<2x64xf32>
    %561 = vector.extract_strided_slice %39 {offsets = [3, 0, 0], sizes = [1, 2, 64], strides = [1, 1, 1]} : vector<4x2x64xf32> to vector<1x2x64xf32>
    %562 = vector.shape_cast %561 : vector<1x2x64xf32> to vector<2x64xf32>
    %c46 = arith.constant 46 : index
    %563 = memref.load %arg4[%c46] : memref<144xf32, #tpu.memory_space<smem>>
    %564 = vector.broadcast %563 : f32 to vector<2x64xf32>
    %565 = arith.mulf %562, %564 : vector<2x64xf32>
    %566 = arith.addf %560, %565 : vector<2x64xf32>
    %567 = vector.extract_strided_slice %42 {offsets = [0, 0, 0], sizes = [1, 2, 64], strides = [1, 1, 1]} : vector<4x2x64xf32> to vector<1x2x64xf32>
    %568 = vector.shape_cast %567 : vector<1x2x64xf32> to vector<2x64xf32>
    %c50 = arith.constant 50 : index
    %569 = memref.load %arg4[%c50] : memref<144xf32, #tpu.memory_space<smem>>
    %570 = vector.broadcast %569 : f32 to vector<2x64xf32>
    %571 = arith.mulf %568, %570 : vector<2x64xf32>
    %572 = arith.addf %566, %571 : vector<2x64xf32>
    %573 = vector.extract_strided_slice %42 {offsets = [1, 0, 0], sizes = [1, 2, 64], strides = [1, 1, 1]} : vector<4x2x64xf32> to vector<1x2x64xf32>
    %574 = vector.shape_cast %573 : vector<1x2x64xf32> to vector<2x64xf32>
    %c54 = arith.constant 54 : index
    %575 = memref.load %arg4[%c54] : memref<144xf32, #tpu.memory_space<smem>>
    %576 = vector.broadcast %575 : f32 to vector<2x64xf32>
    %577 = arith.mulf %574, %576 : vector<2x64xf32>
    %578 = arith.addf %572, %577 : vector<2x64xf32>
    %579 = vector.extract_strided_slice %42 {offsets = [2, 0, 0], sizes = [1, 2, 64], strides = [1, 1, 1]} : vector<4x2x64xf32> to vector<1x2x64xf32>
    %580 = vector.shape_cast %579 : vector<1x2x64xf32> to vector<2x64xf32>
    %c58 = arith.constant 58 : index
    %581 = memref.load %arg4[%c58] : memref<144xf32, #tpu.memory_space<smem>>
    %582 = vector.broadcast %581 : f32 to vector<2x64xf32>
    %583 = arith.mulf %580, %582 : vector<2x64xf32>
    %584 = arith.addf %578, %583 : vector<2x64xf32>
    %585 = vector.extract_strided_slice %42 {offsets = [3, 0, 0], sizes = [1, 2, 64], strides = [1, 1, 1]} : vector<4x2x64xf32> to vector<1x2x64xf32>
    %586 = vector.shape_cast %585 : vector<1x2x64xf32> to vector<2x64xf32>
    %c62 = arith.constant 62 : index
    %587 = memref.load %arg4[%c62] : memref<144xf32, #tpu.memory_space<smem>>
    %588 = vector.broadcast %587 : f32 to vector<2x64xf32>
    %589 = arith.mulf %586, %588 : vector<2x64xf32>
    %590 = arith.addf %584, %589 : vector<2x64xf32>
    %591 = vector.extract_strided_slice %43 {offsets = [0, 0, 0], sizes = [1, 2, 64], strides = [1, 1, 1]} : vector<4x2x64xf32> to vector<1x2x64xf32>
    %592 = vector.shape_cast %591 : vector<1x2x64xf32> to vector<2x64xf32>
    %c66 = arith.constant 66 : index
    %593 = memref.load %arg4[%c66] : memref<144xf32, #tpu.memory_space<smem>>
    %594 = vector.broadcast %593 : f32 to vector<2x64xf32>
    %595 = arith.mulf %592, %594 : vector<2x64xf32>
    %596 = arith.addf %590, %595 : vector<2x64xf32>
    %597 = vector.extract_strided_slice %43 {offsets = [1, 0, 0], sizes = [1, 2, 64], strides = [1, 1, 1]} : vector<4x2x64xf32> to vector<1x2x64xf32>
    %598 = vector.shape_cast %597 : vector<1x2x64xf32> to vector<2x64xf32>
    %c70 = arith.constant 70 : index
    %599 = memref.load %arg4[%c70] : memref<144xf32, #tpu.memory_space<smem>>
    %600 = vector.broadcast %599 : f32 to vector<2x64xf32>
    %601 = arith.mulf %598, %600 : vector<2x64xf32>
    %602 = arith.addf %596, %601 : vector<2x64xf32>
    %603 = vector.extract_strided_slice %43 {offsets = [2, 0, 0], sizes = [1, 2, 64], strides = [1, 1, 1]} : vector<4x2x64xf32> to vector<1x2x64xf32>
    %604 = vector.shape_cast %603 : vector<1x2x64xf32> to vector<2x64xf32>
    %c74 = arith.constant 74 : index
    %605 = memref.load %arg4[%c74] : memref<144xf32, #tpu.memory_space<smem>>
    %606 = vector.broadcast %605 : f32 to vector<2x64xf32>
    %607 = arith.mulf %604, %606 : vector<2x64xf32>
    %608 = arith.addf %602, %607 : vector<2x64xf32>
    %609 = vector.extract_strided_slice %43 {offsets = [3, 0, 0], sizes = [1, 2, 64], strides = [1, 1, 1]} : vector<4x2x64xf32> to vector<1x2x64xf32>
    %610 = vector.shape_cast %609 : vector<1x2x64xf32> to vector<2x64xf32>
    %c78 = arith.constant 78 : index
    %611 = memref.load %arg4[%c78] : memref<144xf32, #tpu.memory_space<smem>>
    %612 = vector.broadcast %611 : f32 to vector<2x64xf32>
    %613 = arith.mulf %610, %612 : vector<2x64xf32>
    %614 = arith.addf %608, %613 : vector<2x64xf32>
    %615 = vector.extract_strided_slice %46 {offsets = [0, 0, 0], sizes = [1, 2, 64], strides = [1, 1, 1]} : vector<4x2x64xf32> to vector<1x2x64xf32>
    %616 = vector.shape_cast %615 : vector<1x2x64xf32> to vector<2x64xf32>
    %c82 = arith.constant 82 : index
    %617 = memref.load %arg4[%c82] : memref<144xf32, #tpu.memory_space<smem>>
    %618 = vector.broadcast %617 : f32 to vector<2x64xf32>
    %619 = arith.mulf %616, %618 : vector<2x64xf32>
    %620 = arith.addf %614, %619 : vector<2x64xf32>
    %621 = vector.extract_strided_slice %46 {offsets = [1, 0, 0], sizes = [1, 2, 64], strides = [1, 1, 1]} : vector<4x2x64xf32> to vector<1x2x64xf32>
    %622 = vector.shape_cast %621 : vector<1x2x64xf32> to vector<2x64xf32>
    %c86 = arith.constant 86 : index
    %623 = memref.load %arg4[%c86] : memref<144xf32, #tpu.memory_space<smem>>
    %624 = vector.broadcast %623 : f32 to vector<2x64xf32>
    %625 = arith.mulf %622, %624 : vector<2x64xf32>
    %626 = arith.addf %620, %625 : vector<2x64xf32>
    %627 = vector.extract_strided_slice %46 {offsets = [2, 0, 0], sizes = [1, 2, 64], strides = [1, 1, 1]} : vector<4x2x64xf32> to vector<1x2x64xf32>
    %628 = vector.shape_cast %627 : vector<1x2x64xf32> to vector<2x64xf32>
    %c90 = arith.constant 90 : index
    %629 = memref.load %arg4[%c90] : memref<144xf32, #tpu.memory_space<smem>>
    %630 = vector.broadcast %629 : f32 to vector<2x64xf32>
    %631 = arith.mulf %628, %630 : vector<2x64xf32>
    %632 = arith.addf %626, %631 : vector<2x64xf32>
    %633 = vector.extract_strided_slice %46 {offsets = [3, 0, 0], sizes = [1, 2, 64], strides = [1, 1, 1]} : vector<4x2x64xf32> to vector<1x2x64xf32>
    %634 = vector.shape_cast %633 : vector<1x2x64xf32> to vector<2x64xf32>
    %c94 = arith.constant 94 : index
    %635 = memref.load %arg4[%c94] : memref<144xf32, #tpu.memory_space<smem>>
    %636 = vector.broadcast %635 : f32 to vector<2x64xf32>
    %637 = arith.mulf %634, %636 : vector<2x64xf32>
    %638 = arith.addf %632, %637 : vector<2x64xf32>
    %639 = vector.extract_strided_slice %49 {offsets = [0, 0, 0], sizes = [1, 2, 64], strides = [1, 1, 1]} : vector<4x2x64xf32> to vector<1x2x64xf32>
    %640 = vector.shape_cast %639 : vector<1x2x64xf32> to vector<2x64xf32>
    %c98 = arith.constant 98 : index
    %641 = memref.load %arg4[%c98] : memref<144xf32, #tpu.memory_space<smem>>
    %642 = vector.broadcast %641 : f32 to vector<2x64xf32>
    %643 = arith.mulf %640, %642 : vector<2x64xf32>
    %644 = arith.addf %638, %643 : vector<2x64xf32>
    %645 = vector.extract_strided_slice %49 {offsets = [1, 0, 0], sizes = [1, 2, 64], strides = [1, 1, 1]} : vector<4x2x64xf32> to vector<1x2x64xf32>
    %646 = vector.shape_cast %645 : vector<1x2x64xf32> to vector<2x64xf32>
    %c102 = arith.constant 102 : index
    %647 = memref.load %arg4[%c102] : memref<144xf32, #tpu.memory_space<smem>>
    %648 = vector.broadcast %647 : f32 to vector<2x64xf32>
    %649 = arith.mulf %646, %648 : vector<2x64xf32>
    %650 = arith.addf %644, %649 : vector<2x64xf32>
    %651 = vector.extract_strided_slice %49 {offsets = [2, 0, 0], sizes = [1, 2, 64], strides = [1, 1, 1]} : vector<4x2x64xf32> to vector<1x2x64xf32>
    %652 = vector.shape_cast %651 : vector<1x2x64xf32> to vector<2x64xf32>
    %c106 = arith.constant 106 : index
    %653 = memref.load %arg4[%c106] : memref<144xf32, #tpu.memory_space<smem>>
    %654 = vector.broadcast %653 : f32 to vector<2x64xf32>
    %655 = arith.mulf %652, %654 : vector<2x64xf32>
    %656 = arith.addf %650, %655 : vector<2x64xf32>
    %657 = vector.extract_strided_slice %49 {offsets = [3, 0, 0], sizes = [1, 2, 64], strides = [1, 1, 1]} : vector<4x2x64xf32> to vector<1x2x64xf32>
    %658 = vector.shape_cast %657 : vector<1x2x64xf32> to vector<2x64xf32>
    %c110 = arith.constant 110 : index
    %659 = memref.load %arg4[%c110] : memref<144xf32, #tpu.memory_space<smem>>
    %660 = vector.broadcast %659 : f32 to vector<2x64xf32>
    %661 = arith.mulf %658, %660 : vector<2x64xf32>
    %662 = arith.addf %656, %661 : vector<2x64xf32>
    %663 = vector.extract_strided_slice %50 {offsets = [0, 0, 0], sizes = [1, 2, 64], strides = [1, 1, 1]} : vector<4x2x64xf32> to vector<1x2x64xf32>
    %664 = vector.shape_cast %663 : vector<1x2x64xf32> to vector<2x64xf32>
    %c114 = arith.constant 114 : index
    %665 = memref.load %arg4[%c114] : memref<144xf32, #tpu.memory_space<smem>>
    %666 = vector.broadcast %665 : f32 to vector<2x64xf32>
    %667 = arith.mulf %664, %666 : vector<2x64xf32>
    %668 = arith.addf %662, %667 : vector<2x64xf32>
    %669 = vector.extract_strided_slice %50 {offsets = [1, 0, 0], sizes = [1, 2, 64], strides = [1, 1, 1]} : vector<4x2x64xf32> to vector<1x2x64xf32>
    %670 = vector.shape_cast %669 : vector<1x2x64xf32> to vector<2x64xf32>
    %c118 = arith.constant 118 : index
    %671 = memref.load %arg4[%c118] : memref<144xf32, #tpu.memory_space<smem>>
    %672 = vector.broadcast %671 : f32 to vector<2x64xf32>
    %673 = arith.mulf %670, %672 : vector<2x64xf32>
    %674 = arith.addf %668, %673 : vector<2x64xf32>
    %675 = vector.extract_strided_slice %50 {offsets = [2, 0, 0], sizes = [1, 2, 64], strides = [1, 1, 1]} : vector<4x2x64xf32> to vector<1x2x64xf32>
    %676 = vector.shape_cast %675 : vector<1x2x64xf32> to vector<2x64xf32>
    %c122 = arith.constant 122 : index
    %677 = memref.load %arg4[%c122] : memref<144xf32, #tpu.memory_space<smem>>
    %678 = vector.broadcast %677 : f32 to vector<2x64xf32>
    %679 = arith.mulf %676, %678 : vector<2x64xf32>
    %680 = arith.addf %674, %679 : vector<2x64xf32>
    %681 = vector.extract_strided_slice %50 {offsets = [3, 0, 0], sizes = [1, 2, 64], strides = [1, 1, 1]} : vector<4x2x64xf32> to vector<1x2x64xf32>
    %682 = vector.shape_cast %681 : vector<1x2x64xf32> to vector<2x64xf32>
    %c126 = arith.constant 126 : index
    %683 = memref.load %arg4[%c126] : memref<144xf32, #tpu.memory_space<smem>>
    %684 = vector.broadcast %683 : f32 to vector<2x64xf32>
    %685 = arith.mulf %682, %684 : vector<2x64xf32>
    %686 = arith.addf %680, %685 : vector<2x64xf32>
    %687 = vector.extract_strided_slice %53 {offsets = [0, 0, 0], sizes = [1, 2, 64], strides = [1, 1, 1]} : vector<4x2x64xf32> to vector<1x2x64xf32>
    %688 = vector.shape_cast %687 : vector<1x2x64xf32> to vector<2x64xf32>
    %c130 = arith.constant 130 : index
    %689 = memref.load %arg4[%c130] : memref<144xf32, #tpu.memory_space<smem>>
    %690 = vector.broadcast %689 : f32 to vector<2x64xf32>
    %691 = arith.mulf %688, %690 : vector<2x64xf32>
    %692 = arith.addf %686, %691 : vector<2x64xf32>
    %693 = vector.extract_strided_slice %53 {offsets = [1, 0, 0], sizes = [1, 2, 64], strides = [1, 1, 1]} : vector<4x2x64xf32> to vector<1x2x64xf32>
    %694 = vector.shape_cast %693 : vector<1x2x64xf32> to vector<2x64xf32>
    %c134 = arith.constant 134 : index
    %695 = memref.load %arg4[%c134] : memref<144xf32, #tpu.memory_space<smem>>
    %696 = vector.broadcast %695 : f32 to vector<2x64xf32>
    %697 = arith.mulf %694, %696 : vector<2x64xf32>
    %698 = arith.addf %692, %697 : vector<2x64xf32>
    %699 = vector.extract_strided_slice %53 {offsets = [2, 0, 0], sizes = [1, 2, 64], strides = [1, 1, 1]} : vector<4x2x64xf32> to vector<1x2x64xf32>
    %700 = vector.shape_cast %699 : vector<1x2x64xf32> to vector<2x64xf32>
    %c138 = arith.constant 138 : index
    %701 = memref.load %arg4[%c138] : memref<144xf32, #tpu.memory_space<smem>>
    %702 = vector.broadcast %701 : f32 to vector<2x64xf32>
    %703 = arith.mulf %700, %702 : vector<2x64xf32>
    %704 = arith.addf %698, %703 : vector<2x64xf32>
    %705 = vector.extract_strided_slice %53 {offsets = [3, 0, 0], sizes = [1, 2, 64], strides = [1, 1, 1]} : vector<4x2x64xf32> to vector<1x2x64xf32>
    %706 = vector.shape_cast %705 : vector<1x2x64xf32> to vector<2x64xf32>
    %c142 = arith.constant 142 : index
    %707 = memref.load %arg4[%c142] : memref<144xf32, #tpu.memory_space<smem>>
    %708 = vector.broadcast %707 : f32 to vector<2x64xf32>
    %709 = arith.mulf %706, %708 : vector<2x64xf32>
    %710 = arith.addf %704, %709 : vector<2x64xf32>
    %c2_25 = arith.constant 2 : index
    %711 = memref.load %arg5[%c2_25] : memref<4xf32, #tpu.memory_space<smem>>
    %712 = vector.broadcast %711 : f32 to vector<2x64xf32>
    %713 = arith.addf %710, %712 : vector<2x64xf32>
    %cst_26 = arith.constant 0.000000e+00 : f32
    %714 = vector.broadcast %cst_26 : f32 to vector<2x64xf32>
    %715 = vector.extract_strided_slice %35 {offsets = [0, 0, 0], sizes = [1, 2, 64], strides = [1, 1, 1]} : vector<4x2x64xf32> to vector<1x2x64xf32>
    %716 = vector.shape_cast %715 : vector<1x2x64xf32> to vector<2x64xf32>
    %c3 = arith.constant 3 : index
    %717 = memref.load %arg4[%c3] : memref<144xf32, #tpu.memory_space<smem>>
    %718 = vector.broadcast %717 : f32 to vector<2x64xf32>
    %719 = arith.mulf %716, %718 : vector<2x64xf32>
    %720 = arith.addf %714, %719 : vector<2x64xf32>
    %721 = vector.extract_strided_slice %35 {offsets = [1, 0, 0], sizes = [1, 2, 64], strides = [1, 1, 1]} : vector<4x2x64xf32> to vector<1x2x64xf32>
    %722 = vector.shape_cast %721 : vector<1x2x64xf32> to vector<2x64xf32>
    %c7 = arith.constant 7 : index
    %723 = memref.load %arg4[%c7] : memref<144xf32, #tpu.memory_space<smem>>
    %724 = vector.broadcast %723 : f32 to vector<2x64xf32>
    %725 = arith.mulf %722, %724 : vector<2x64xf32>
    %726 = arith.addf %720, %725 : vector<2x64xf32>
    %727 = vector.extract_strided_slice %35 {offsets = [2, 0, 0], sizes = [1, 2, 64], strides = [1, 1, 1]} : vector<4x2x64xf32> to vector<1x2x64xf32>
    %728 = vector.shape_cast %727 : vector<1x2x64xf32> to vector<2x64xf32>
    %c11 = arith.constant 11 : index
    %729 = memref.load %arg4[%c11] : memref<144xf32, #tpu.memory_space<smem>>
    %730 = vector.broadcast %729 : f32 to vector<2x64xf32>
    %731 = arith.mulf %728, %730 : vector<2x64xf32>
    %732 = arith.addf %726, %731 : vector<2x64xf32>
    %733 = vector.extract_strided_slice %35 {offsets = [3, 0, 0], sizes = [1, 2, 64], strides = [1, 1, 1]} : vector<4x2x64xf32> to vector<1x2x64xf32>
    %734 = vector.shape_cast %733 : vector<1x2x64xf32> to vector<2x64xf32>
    %c15 = arith.constant 15 : index
    %735 = memref.load %arg4[%c15] : memref<144xf32, #tpu.memory_space<smem>>
    %736 = vector.broadcast %735 : f32 to vector<2x64xf32>
    %737 = arith.mulf %734, %736 : vector<2x64xf32>
    %738 = arith.addf %732, %737 : vector<2x64xf32>
    %739 = vector.extract_strided_slice %36 {offsets = [0, 0, 0], sizes = [1, 2, 64], strides = [1, 1, 1]} : vector<4x2x64xf32> to vector<1x2x64xf32>
    %740 = vector.shape_cast %739 : vector<1x2x64xf32> to vector<2x64xf32>
    %c19 = arith.constant 19 : index
    %741 = memref.load %arg4[%c19] : memref<144xf32, #tpu.memory_space<smem>>
    %742 = vector.broadcast %741 : f32 to vector<2x64xf32>
    %743 = arith.mulf %740, %742 : vector<2x64xf32>
    %744 = arith.addf %738, %743 : vector<2x64xf32>
    %745 = vector.extract_strided_slice %36 {offsets = [1, 0, 0], sizes = [1, 2, 64], strides = [1, 1, 1]} : vector<4x2x64xf32> to vector<1x2x64xf32>
    %746 = vector.shape_cast %745 : vector<1x2x64xf32> to vector<2x64xf32>
    %c23 = arith.constant 23 : index
    %747 = memref.load %arg4[%c23] : memref<144xf32, #tpu.memory_space<smem>>
    %748 = vector.broadcast %747 : f32 to vector<2x64xf32>
    %749 = arith.mulf %746, %748 : vector<2x64xf32>
    %750 = arith.addf %744, %749 : vector<2x64xf32>
    %751 = vector.extract_strided_slice %36 {offsets = [2, 0, 0], sizes = [1, 2, 64], strides = [1, 1, 1]} : vector<4x2x64xf32> to vector<1x2x64xf32>
    %752 = vector.shape_cast %751 : vector<1x2x64xf32> to vector<2x64xf32>
    %c27 = arith.constant 27 : index
    %753 = memref.load %arg4[%c27] : memref<144xf32, #tpu.memory_space<smem>>
    %754 = vector.broadcast %753 : f32 to vector<2x64xf32>
    %755 = arith.mulf %752, %754 : vector<2x64xf32>
    %756 = arith.addf %750, %755 : vector<2x64xf32>
    %757 = vector.extract_strided_slice %36 {offsets = [3, 0, 0], sizes = [1, 2, 64], strides = [1, 1, 1]} : vector<4x2x64xf32> to vector<1x2x64xf32>
    %758 = vector.shape_cast %757 : vector<1x2x64xf32> to vector<2x64xf32>
    %c31 = arith.constant 31 : index
    %759 = memref.load %arg4[%c31] : memref<144xf32, #tpu.memory_space<smem>>
    %760 = vector.broadcast %759 : f32 to vector<2x64xf32>
    %761 = arith.mulf %758, %760 : vector<2x64xf32>
    %762 = arith.addf %756, %761 : vector<2x64xf32>
    %763 = vector.extract_strided_slice %39 {offsets = [0, 0, 0], sizes = [1, 2, 64], strides = [1, 1, 1]} : vector<4x2x64xf32> to vector<1x2x64xf32>
    %764 = vector.shape_cast %763 : vector<1x2x64xf32> to vector<2x64xf32>
    %c35 = arith.constant 35 : index
    %765 = memref.load %arg4[%c35] : memref<144xf32, #tpu.memory_space<smem>>
    %766 = vector.broadcast %765 : f32 to vector<2x64xf32>
    %767 = arith.mulf %764, %766 : vector<2x64xf32>
    %768 = arith.addf %762, %767 : vector<2x64xf32>
    %769 = vector.extract_strided_slice %39 {offsets = [1, 0, 0], sizes = [1, 2, 64], strides = [1, 1, 1]} : vector<4x2x64xf32> to vector<1x2x64xf32>
    %770 = vector.shape_cast %769 : vector<1x2x64xf32> to vector<2x64xf32>
    %c39 = arith.constant 39 : index
    %771 = memref.load %arg4[%c39] : memref<144xf32, #tpu.memory_space<smem>>
    %772 = vector.broadcast %771 : f32 to vector<2x64xf32>
    %773 = arith.mulf %770, %772 : vector<2x64xf32>
    %774 = arith.addf %768, %773 : vector<2x64xf32>
    %775 = vector.extract_strided_slice %39 {offsets = [2, 0, 0], sizes = [1, 2, 64], strides = [1, 1, 1]} : vector<4x2x64xf32> to vector<1x2x64xf32>
    %776 = vector.shape_cast %775 : vector<1x2x64xf32> to vector<2x64xf32>
    %c43 = arith.constant 43 : index
    %777 = memref.load %arg4[%c43] : memref<144xf32, #tpu.memory_space<smem>>
    %778 = vector.broadcast %777 : f32 to vector<2x64xf32>
    %779 = arith.mulf %776, %778 : vector<2x64xf32>
    %780 = arith.addf %774, %779 : vector<2x64xf32>
    %781 = vector.extract_strided_slice %39 {offsets = [3, 0, 0], sizes = [1, 2, 64], strides = [1, 1, 1]} : vector<4x2x64xf32> to vector<1x2x64xf32>
    %782 = vector.shape_cast %781 : vector<1x2x64xf32> to vector<2x64xf32>
    %c47 = arith.constant 47 : index
    %783 = memref.load %arg4[%c47] : memref<144xf32, #tpu.memory_space<smem>>
    %784 = vector.broadcast %783 : f32 to vector<2x64xf32>
    %785 = arith.mulf %782, %784 : vector<2x64xf32>
    %786 = arith.addf %780, %785 : vector<2x64xf32>
    %787 = vector.extract_strided_slice %42 {offsets = [0, 0, 0], sizes = [1, 2, 64], strides = [1, 1, 1]} : vector<4x2x64xf32> to vector<1x2x64xf32>
    %788 = vector.shape_cast %787 : vector<1x2x64xf32> to vector<2x64xf32>
    %c51 = arith.constant 51 : index
    %789 = memref.load %arg4[%c51] : memref<144xf32, #tpu.memory_space<smem>>
    %790 = vector.broadcast %789 : f32 to vector<2x64xf32>
    %791 = arith.mulf %788, %790 : vector<2x64xf32>
    %792 = arith.addf %786, %791 : vector<2x64xf32>
    %793 = vector.extract_strided_slice %42 {offsets = [1, 0, 0], sizes = [1, 2, 64], strides = [1, 1, 1]} : vector<4x2x64xf32> to vector<1x2x64xf32>
    %794 = vector.shape_cast %793 : vector<1x2x64xf32> to vector<2x64xf32>
    %c55 = arith.constant 55 : index
    %795 = memref.load %arg4[%c55] : memref<144xf32, #tpu.memory_space<smem>>
    %796 = vector.broadcast %795 : f32 to vector<2x64xf32>
    %797 = arith.mulf %794, %796 : vector<2x64xf32>
    %798 = arith.addf %792, %797 : vector<2x64xf32>
    %799 = vector.extract_strided_slice %42 {offsets = [2, 0, 0], sizes = [1, 2, 64], strides = [1, 1, 1]} : vector<4x2x64xf32> to vector<1x2x64xf32>
    %800 = vector.shape_cast %799 : vector<1x2x64xf32> to vector<2x64xf32>
    %c59 = arith.constant 59 : index
    %801 = memref.load %arg4[%c59] : memref<144xf32, #tpu.memory_space<smem>>
    %802 = vector.broadcast %801 : f32 to vector<2x64xf32>
    %803 = arith.mulf %800, %802 : vector<2x64xf32>
    %804 = arith.addf %798, %803 : vector<2x64xf32>
    %805 = vector.extract_strided_slice %42 {offsets = [3, 0, 0], sizes = [1, 2, 64], strides = [1, 1, 1]} : vector<4x2x64xf32> to vector<1x2x64xf32>
    %806 = vector.shape_cast %805 : vector<1x2x64xf32> to vector<2x64xf32>
    %c63 = arith.constant 63 : index
    %807 = memref.load %arg4[%c63] : memref<144xf32, #tpu.memory_space<smem>>
    %808 = vector.broadcast %807 : f32 to vector<2x64xf32>
    %809 = arith.mulf %806, %808 : vector<2x64xf32>
    %810 = arith.addf %804, %809 : vector<2x64xf32>
    %811 = vector.extract_strided_slice %43 {offsets = [0, 0, 0], sizes = [1, 2, 64], strides = [1, 1, 1]} : vector<4x2x64xf32> to vector<1x2x64xf32>
    %812 = vector.shape_cast %811 : vector<1x2x64xf32> to vector<2x64xf32>
    %c67 = arith.constant 67 : index
    %813 = memref.load %arg4[%c67] : memref<144xf32, #tpu.memory_space<smem>>
    %814 = vector.broadcast %813 : f32 to vector<2x64xf32>
    %815 = arith.mulf %812, %814 : vector<2x64xf32>
    %816 = arith.addf %810, %815 : vector<2x64xf32>
    %817 = vector.extract_strided_slice %43 {offsets = [1, 0, 0], sizes = [1, 2, 64], strides = [1, 1, 1]} : vector<4x2x64xf32> to vector<1x2x64xf32>
    %818 = vector.shape_cast %817 : vector<1x2x64xf32> to vector<2x64xf32>
    %c71 = arith.constant 71 : index
    %819 = memref.load %arg4[%c71] : memref<144xf32, #tpu.memory_space<smem>>
    %820 = vector.broadcast %819 : f32 to vector<2x64xf32>
    %821 = arith.mulf %818, %820 : vector<2x64xf32>
    %822 = arith.addf %816, %821 : vector<2x64xf32>
    %823 = vector.extract_strided_slice %43 {offsets = [2, 0, 0], sizes = [1, 2, 64], strides = [1, 1, 1]} : vector<4x2x64xf32> to vector<1x2x64xf32>
    %824 = vector.shape_cast %823 : vector<1x2x64xf32> to vector<2x64xf32>
    %c75 = arith.constant 75 : index
    %825 = memref.load %arg4[%c75] : memref<144xf32, #tpu.memory_space<smem>>
    %826 = vector.broadcast %825 : f32 to vector<2x64xf32>
    %827 = arith.mulf %824, %826 : vector<2x64xf32>
    %828 = arith.addf %822, %827 : vector<2x64xf32>
    %829 = vector.extract_strided_slice %43 {offsets = [3, 0, 0], sizes = [1, 2, 64], strides = [1, 1, 1]} : vector<4x2x64xf32> to vector<1x2x64xf32>
    %830 = vector.shape_cast %829 : vector<1x2x64xf32> to vector<2x64xf32>
    %c79 = arith.constant 79 : index
    %831 = memref.load %arg4[%c79] : memref<144xf32, #tpu.memory_space<smem>>
    %832 = vector.broadcast %831 : f32 to vector<2x64xf32>
    %833 = arith.mulf %830, %832 : vector<2x64xf32>
    %834 = arith.addf %828, %833 : vector<2x64xf32>
    %835 = vector.extract_strided_slice %46 {offsets = [0, 0, 0], sizes = [1, 2, 64], strides = [1, 1, 1]} : vector<4x2x64xf32> to vector<1x2x64xf32>
    %836 = vector.shape_cast %835 : vector<1x2x64xf32> to vector<2x64xf32>
    %c83 = arith.constant 83 : index
    %837 = memref.load %arg4[%c83] : memref<144xf32, #tpu.memory_space<smem>>
    %838 = vector.broadcast %837 : f32 to vector<2x64xf32>
    %839 = arith.mulf %836, %838 : vector<2x64xf32>
    %840 = arith.addf %834, %839 : vector<2x64xf32>
    %841 = vector.extract_strided_slice %46 {offsets = [1, 0, 0], sizes = [1, 2, 64], strides = [1, 1, 1]} : vector<4x2x64xf32> to vector<1x2x64xf32>
    %842 = vector.shape_cast %841 : vector<1x2x64xf32> to vector<2x64xf32>
    %c87 = arith.constant 87 : index
    %843 = memref.load %arg4[%c87] : memref<144xf32, #tpu.memory_space<smem>>
    %844 = vector.broadcast %843 : f32 to vector<2x64xf32>
    %845 = arith.mulf %842, %844 : vector<2x64xf32>
    %846 = arith.addf %840, %845 : vector<2x64xf32>
    %847 = vector.extract_strided_slice %46 {offsets = [2, 0, 0], sizes = [1, 2, 64], strides = [1, 1, 1]} : vector<4x2x64xf32> to vector<1x2x64xf32>
    %848 = vector.shape_cast %847 : vector<1x2x64xf32> to vector<2x64xf32>
    %c91 = arith.constant 91 : index
    %849 = memref.load %arg4[%c91] : memref<144xf32, #tpu.memory_space<smem>>
    %850 = vector.broadcast %849 : f32 to vector<2x64xf32>
    %851 = arith.mulf %848, %850 : vector<2x64xf32>
    %852 = arith.addf %846, %851 : vector<2x64xf32>
    %853 = vector.extract_strided_slice %46 {offsets = [3, 0, 0], sizes = [1, 2, 64], strides = [1, 1, 1]} : vector<4x2x64xf32> to vector<1x2x64xf32>
    %854 = vector.shape_cast %853 : vector<1x2x64xf32> to vector<2x64xf32>
    %c95 = arith.constant 95 : index
    %855 = memref.load %arg4[%c95] : memref<144xf32, #tpu.memory_space<smem>>
    %856 = vector.broadcast %855 : f32 to vector<2x64xf32>
    %857 = arith.mulf %854, %856 : vector<2x64xf32>
    %858 = arith.addf %852, %857 : vector<2x64xf32>
    %859 = vector.extract_strided_slice %49 {offsets = [0, 0, 0], sizes = [1, 2, 64], strides = [1, 1, 1]} : vector<4x2x64xf32> to vector<1x2x64xf32>
    %860 = vector.shape_cast %859 : vector<1x2x64xf32> to vector<2x64xf32>
    %c99 = arith.constant 99 : index
    %861 = memref.load %arg4[%c99] : memref<144xf32, #tpu.memory_space<smem>>
    %862 = vector.broadcast %861 : f32 to vector<2x64xf32>
    %863 = arith.mulf %860, %862 : vector<2x64xf32>
    %864 = arith.addf %858, %863 : vector<2x64xf32>
    %865 = vector.extract_strided_slice %49 {offsets = [1, 0, 0], sizes = [1, 2, 64], strides = [1, 1, 1]} : vector<4x2x64xf32> to vector<1x2x64xf32>
    %866 = vector.shape_cast %865 : vector<1x2x64xf32> to vector<2x64xf32>
    %c103 = arith.constant 103 : index
    %867 = memref.load %arg4[%c103] : memref<144xf32, #tpu.memory_space<smem>>
    %868 = vector.broadcast %867 : f32 to vector<2x64xf32>
    %869 = arith.mulf %866, %868 : vector<2x64xf32>
    %870 = arith.addf %864, %869 : vector<2x64xf32>
    %871 = vector.extract_strided_slice %49 {offsets = [2, 0, 0], sizes = [1, 2, 64], strides = [1, 1, 1]} : vector<4x2x64xf32> to vector<1x2x64xf32>
    %872 = vector.shape_cast %871 : vector<1x2x64xf32> to vector<2x64xf32>
    %c107 = arith.constant 107 : index
    %873 = memref.load %arg4[%c107] : memref<144xf32, #tpu.memory_space<smem>>
    %874 = vector.broadcast %873 : f32 to vector<2x64xf32>
    %875 = arith.mulf %872, %874 : vector<2x64xf32>
    %876 = arith.addf %870, %875 : vector<2x64xf32>
    %877 = vector.extract_strided_slice %49 {offsets = [3, 0, 0], sizes = [1, 2, 64], strides = [1, 1, 1]} : vector<4x2x64xf32> to vector<1x2x64xf32>
    %878 = vector.shape_cast %877 : vector<1x2x64xf32> to vector<2x64xf32>
    %c111 = arith.constant 111 : index
    %879 = memref.load %arg4[%c111] : memref<144xf32, #tpu.memory_space<smem>>
    %880 = vector.broadcast %879 : f32 to vector<2x64xf32>
    %881 = arith.mulf %878, %880 : vector<2x64xf32>
    %882 = arith.addf %876, %881 : vector<2x64xf32>
    %883 = vector.extract_strided_slice %50 {offsets = [0, 0, 0], sizes = [1, 2, 64], strides = [1, 1, 1]} : vector<4x2x64xf32> to vector<1x2x64xf32>
    %884 = vector.shape_cast %883 : vector<1x2x64xf32> to vector<2x64xf32>
    %c115 = arith.constant 115 : index
    %885 = memref.load %arg4[%c115] : memref<144xf32, #tpu.memory_space<smem>>
    %886 = vector.broadcast %885 : f32 to vector<2x64xf32>
    %887 = arith.mulf %884, %886 : vector<2x64xf32>
    %888 = arith.addf %882, %887 : vector<2x64xf32>
    %889 = vector.extract_strided_slice %50 {offsets = [1, 0, 0], sizes = [1, 2, 64], strides = [1, 1, 1]} : vector<4x2x64xf32> to vector<1x2x64xf32>
    %890 = vector.shape_cast %889 : vector<1x2x64xf32> to vector<2x64xf32>
    %c119 = arith.constant 119 : index
    %891 = memref.load %arg4[%c119] : memref<144xf32, #tpu.memory_space<smem>>
    %892 = vector.broadcast %891 : f32 to vector<2x64xf32>
    %893 = arith.mulf %890, %892 : vector<2x64xf32>
    %894 = arith.addf %888, %893 : vector<2x64xf32>
    %895 = vector.extract_strided_slice %50 {offsets = [2, 0, 0], sizes = [1, 2, 64], strides = [1, 1, 1]} : vector<4x2x64xf32> to vector<1x2x64xf32>
    %896 = vector.shape_cast %895 : vector<1x2x64xf32> to vector<2x64xf32>
    %c123 = arith.constant 123 : index
    %897 = memref.load %arg4[%c123] : memref<144xf32, #tpu.memory_space<smem>>
    %898 = vector.broadcast %897 : f32 to vector<2x64xf32>
    %899 = arith.mulf %896, %898 : vector<2x64xf32>
    %900 = arith.addf %894, %899 : vector<2x64xf32>
    %901 = vector.extract_strided_slice %50 {offsets = [3, 0, 0], sizes = [1, 2, 64], strides = [1, 1, 1]} : vector<4x2x64xf32> to vector<1x2x64xf32>
    %902 = vector.shape_cast %901 : vector<1x2x64xf32> to vector<2x64xf32>
    %c127 = arith.constant 127 : index
    %903 = memref.load %arg4[%c127] : memref<144xf32, #tpu.memory_space<smem>>
    %904 = vector.broadcast %903 : f32 to vector<2x64xf32>
    %905 = arith.mulf %902, %904 : vector<2x64xf32>
    %906 = arith.addf %900, %905 : vector<2x64xf32>
    %907 = vector.extract_strided_slice %53 {offsets = [0, 0, 0], sizes = [1, 2, 64], strides = [1, 1, 1]} : vector<4x2x64xf32> to vector<1x2x64xf32>
    %908 = vector.shape_cast %907 : vector<1x2x64xf32> to vector<2x64xf32>
    %c131 = arith.constant 131 : index
    %909 = memref.load %arg4[%c131] : memref<144xf32, #tpu.memory_space<smem>>
    %910 = vector.broadcast %909 : f32 to vector<2x64xf32>
    %911 = arith.mulf %908, %910 : vector<2x64xf32>
    %912 = arith.addf %906, %911 : vector<2x64xf32>
    %913 = vector.extract_strided_slice %53 {offsets = [1, 0, 0], sizes = [1, 2, 64], strides = [1, 1, 1]} : vector<4x2x64xf32> to vector<1x2x64xf32>
    %914 = vector.shape_cast %913 : vector<1x2x64xf32> to vector<2x64xf32>
    %c135 = arith.constant 135 : index
    %915 = memref.load %arg4[%c135] : memref<144xf32, #tpu.memory_space<smem>>
    %916 = vector.broadcast %915 : f32 to vector<2x64xf32>
    %917 = arith.mulf %914, %916 : vector<2x64xf32>
    %918 = arith.addf %912, %917 : vector<2x64xf32>
    %919 = vector.extract_strided_slice %53 {offsets = [2, 0, 0], sizes = [1, 2, 64], strides = [1, 1, 1]} : vector<4x2x64xf32> to vector<1x2x64xf32>
    %920 = vector.shape_cast %919 : vector<1x2x64xf32> to vector<2x64xf32>
    %c139 = arith.constant 139 : index
    %921 = memref.load %arg4[%c139] : memref<144xf32, #tpu.memory_space<smem>>
    %922 = vector.broadcast %921 : f32 to vector<2x64xf32>
    %923 = arith.mulf %920, %922 : vector<2x64xf32>
    %924 = arith.addf %918, %923 : vector<2x64xf32>
    %925 = vector.extract_strided_slice %53 {offsets = [3, 0, 0], sizes = [1, 2, 64], strides = [1, 1, 1]} : vector<4x2x64xf32> to vector<1x2x64xf32>
    %926 = vector.shape_cast %925 : vector<1x2x64xf32> to vector<2x64xf32>
    %c143 = arith.constant 143 : index
    %927 = memref.load %arg4[%c143] : memref<144xf32, #tpu.memory_space<smem>>
    %928 = vector.broadcast %927 : f32 to vector<2x64xf32>
    %929 = arith.mulf %926, %928 : vector<2x64xf32>
    %930 = arith.addf %924, %929 : vector<2x64xf32>
    %c3_27 = arith.constant 3 : index
    %931 = memref.load %arg5[%c3_27] : memref<4xf32, #tpu.memory_space<smem>>
    %932 = vector.broadcast %931 : f32 to vector<2x64xf32>
    %933 = arith.addf %930, %932 : vector<2x64xf32>
    %934 = vector.shape_cast %273 : vector<2x64xf32> to vector<1x2x64xf32>
    %935 = vector.shape_cast %493 : vector<2x64xf32> to vector<1x2x64xf32>
    %936 = vector.shape_cast %713 : vector<2x64xf32> to vector<1x2x64xf32>
    %937 = vector.shape_cast %933 : vector<2x64xf32> to vector<1x2x64xf32>
    %938 = tpu.concatenate %934, %935, %936, %937 in 0 : vector<1x2x64xf32>, vector<1x2x64xf32>, vector<1x2x64xf32>, vector<1x2x64xf32> -> vector<4x2x64xf32>
    %cst_28 = arith.constant dense<0.000000e+00> : vector<4x2xf32>
    %939 = vector.multi_reduction <add>, %938, %cst_28 [2] : vector<4x2x64xf32> to vector<4x2xf32>
    %940 = vector.shape_cast %939 : vector<4x2xf32> to vector<4x2x1xf32>
    %cst_29 = arith.constant 1.562500e-02 : f32
    %941 = vector.broadcast %cst_29 : f32 to vector<4x2x1xf32>
    %942 = arith.mulf %940, %941 : vector<4x2x1xf32>
    %943 = arith.mulf %938, %938 : vector<4x2x64xf32>
    %cst_30 = arith.constant dense<0.000000e+00> : vector<4x2xf32>
    %944 = vector.multi_reduction <add>, %943, %cst_30 [2] : vector<4x2x64xf32> to vector<4x2xf32>
    %945 = vector.shape_cast %944 : vector<4x2xf32> to vector<4x2x1xf32>
    %cst_31 = arith.constant 1.562500e-02 : f32
    %946 = vector.broadcast %cst_31 : f32 to vector<4x2x1xf32>
    %947 = arith.mulf %945, %946 : vector<4x2x1xf32>
    %948 = arith.mulf %942, %942 : vector<4x2x1xf32>
    %949 = arith.subf %947, %948 : vector<4x2x1xf32>
    %950 = vector.broadcast %942 : vector<4x2x1xf32> to vector<4x2x64xf32>
    %951 = arith.subf %938, %950 : vector<4x2x64xf32>
    %cst_32 = arith.constant 9.99999974E-6 : f32
    %952 = vector.broadcast %cst_32 : f32 to vector<4x2x1xf32>
    %953 = arith.addf %949, %952 : vector<4x2x1xf32>
    %954 = math.rsqrt %953 : vector<4x2x1xf32>
    %955 = vector.broadcast %954 : vector<4x2x1xf32> to vector<4x2x64xf32>
    %956 = arith.mulf %951, %955 : vector<4x2x64xf32>
    %cst_33 = arith.constant 0.000000e+00 : f32
    %957 = vector.broadcast %cst_33 : f32 to vector<4x2x64xf32>
    %958 = arith.maximumf %956, %957 : vector<4x2x64xf32>
    %959 = tpu.concatenate %27, %29, %27 in 2 : vector<4x2x9xf32>, vector<4x2x64xf32>, vector<4x2x9xf32> -> vector<4x2x82xf32>
    %960 = vector.extract_strided_slice %959 {offsets = [0, 0, 0], sizes = [4, 2, 64], strides = [1, 1, 1]} : vector<4x2x82xf32> to vector<4x2x64xf32>
    %961 = vector.broadcast %21 : vector<1x1x64xf32> to vector<4x2x64xf32>
    %962 = arith.mulf %960, %961 : vector<4x2x64xf32>
    %963 = vector.extract_strided_slice %959 {offsets = [0, 0, 1], sizes = [4, 2, 64], strides = [1, 1, 1]} : vector<4x2x82xf32> to vector<4x2x64xf32>
    %964 = vector.extract_strided_slice %959 {offsets = [0, 0, 2], sizes = [4, 2, 64], strides = [1, 1, 1]} : vector<4x2x82xf32> to vector<4x2x64xf32>
    %965 = vector.broadcast %26 : vector<1x1x64xf32> to vector<4x2x64xf32>
    %966 = arith.mulf %964, %965 : vector<4x2x64xf32>
    %967 = vector.extract_strided_slice %959 {offsets = [0, 0, 8], sizes = [4, 2, 64], strides = [1, 1, 1]} : vector<4x2x82xf32> to vector<4x2x64xf32>
    %968 = vector.broadcast %21 : vector<1x1x64xf32> to vector<4x2x64xf32>
    %969 = arith.mulf %967, %968 : vector<4x2x64xf32>
    %970 = vector.extract_strided_slice %959 {offsets = [0, 0, 9], sizes = [4, 2, 64], strides = [1, 1, 1]} : vector<4x2x82xf32> to vector<4x2x64xf32>
    %971 = vector.extract_strided_slice %959 {offsets = [0, 0, 10], sizes = [4, 2, 64], strides = [1, 1, 1]} : vector<4x2x82xf32> to vector<4x2x64xf32>
    %972 = vector.broadcast %26 : vector<1x1x64xf32> to vector<4x2x64xf32>
    %973 = arith.mulf %971, %972 : vector<4x2x64xf32>
    %974 = vector.extract_strided_slice %959 {offsets = [0, 0, 16], sizes = [4, 2, 64], strides = [1, 1, 1]} : vector<4x2x82xf32> to vector<4x2x64xf32>
    %975 = vector.broadcast %21 : vector<1x1x64xf32> to vector<4x2x64xf32>
    %976 = arith.mulf %974, %975 : vector<4x2x64xf32>
    %977 = vector.extract_strided_slice %959 {offsets = [0, 0, 17], sizes = [4, 2, 64], strides = [1, 1, 1]} : vector<4x2x82xf32> to vector<4x2x64xf32>
    %978 = vector.extract_strided_slice %959 {offsets = [0, 0, 18], sizes = [4, 2, 64], strides = [1, 1, 1]} : vector<4x2x82xf32> to vector<4x2x64xf32>
    %979 = vector.broadcast %26 : vector<1x1x64xf32> to vector<4x2x64xf32>
    %980 = arith.mulf %978, %979 : vector<4x2x64xf32>
    %cst_34 = arith.constant 0.000000e+00 : f32
    %981 = vector.broadcast %cst_34 : f32 to vector<2x64xf32>
    %982 = vector.extract_strided_slice %962 {offsets = [0, 0, 0], sizes = [1, 2, 64], strides = [1, 1, 1]} : vector<4x2x64xf32> to vector<1x2x64xf32>
    %983 = vector.shape_cast %982 : vector<1x2x64xf32> to vector<2x64xf32>
    %c0_35 = arith.constant 0 : index
    %984 = memref.load %arg6[%c0_35] : memref<144xf32, #tpu.memory_space<smem>>
    %985 = vector.broadcast %984 : f32 to vector<2x64xf32>
    %986 = arith.mulf %983, %985 : vector<2x64xf32>
    %987 = arith.addf %981, %986 : vector<2x64xf32>
    %988 = vector.extract_strided_slice %962 {offsets = [1, 0, 0], sizes = [1, 2, 64], strides = [1, 1, 1]} : vector<4x2x64xf32> to vector<1x2x64xf32>
    %989 = vector.shape_cast %988 : vector<1x2x64xf32> to vector<2x64xf32>
    %c4_36 = arith.constant 4 : index
    %990 = memref.load %arg6[%c4_36] : memref<144xf32, #tpu.memory_space<smem>>
    %991 = vector.broadcast %990 : f32 to vector<2x64xf32>
    %992 = arith.mulf %989, %991 : vector<2x64xf32>
    %993 = arith.addf %987, %992 : vector<2x64xf32>
    %994 = vector.extract_strided_slice %962 {offsets = [2, 0, 0], sizes = [1, 2, 64], strides = [1, 1, 1]} : vector<4x2x64xf32> to vector<1x2x64xf32>
    %995 = vector.shape_cast %994 : vector<1x2x64xf32> to vector<2x64xf32>
    %c8_37 = arith.constant 8 : index
    %996 = memref.load %arg6[%c8_37] : memref<144xf32, #tpu.memory_space<smem>>
    %997 = vector.broadcast %996 : f32 to vector<2x64xf32>
    %998 = arith.mulf %995, %997 : vector<2x64xf32>
    %999 = arith.addf %993, %998 : vector<2x64xf32>
    %1000 = vector.extract_strided_slice %962 {offsets = [3, 0, 0], sizes = [1, 2, 64], strides = [1, 1, 1]} : vector<4x2x64xf32> to vector<1x2x64xf32>
    %1001 = vector.shape_cast %1000 : vector<1x2x64xf32> to vector<2x64xf32>
    %c12_38 = arith.constant 12 : index
    %1002 = memref.load %arg6[%c12_38] : memref<144xf32, #tpu.memory_space<smem>>
    %1003 = vector.broadcast %1002 : f32 to vector<2x64xf32>
    %1004 = arith.mulf %1001, %1003 : vector<2x64xf32>
    %1005 = arith.addf %999, %1004 : vector<2x64xf32>
    %1006 = vector.extract_strided_slice %963 {offsets = [0, 0, 0], sizes = [1, 2, 64], strides = [1, 1, 1]} : vector<4x2x64xf32> to vector<1x2x64xf32>
    %1007 = vector.shape_cast %1006 : vector<1x2x64xf32> to vector<2x64xf32>
    %c16_39 = arith.constant 16 : index
    %1008 = memref.load %arg6[%c16_39] : memref<144xf32, #tpu.memory_space<smem>>
    %1009 = vector.broadcast %1008 : f32 to vector<2x64xf32>
    %1010 = arith.mulf %1007, %1009 : vector<2x64xf32>
    %1011 = arith.addf %1005, %1010 : vector<2x64xf32>
    %1012 = vector.extract_strided_slice %963 {offsets = [1, 0, 0], sizes = [1, 2, 64], strides = [1, 1, 1]} : vector<4x2x64xf32> to vector<1x2x64xf32>
    %1013 = vector.shape_cast %1012 : vector<1x2x64xf32> to vector<2x64xf32>
    %c20_40 = arith.constant 20 : index
    %1014 = memref.load %arg6[%c20_40] : memref<144xf32, #tpu.memory_space<smem>>
    %1015 = vector.broadcast %1014 : f32 to vector<2x64xf32>
    %1016 = arith.mulf %1013, %1015 : vector<2x64xf32>
    %1017 = arith.addf %1011, %1016 : vector<2x64xf32>
    %1018 = vector.extract_strided_slice %963 {offsets = [2, 0, 0], sizes = [1, 2, 64], strides = [1, 1, 1]} : vector<4x2x64xf32> to vector<1x2x64xf32>
    %1019 = vector.shape_cast %1018 : vector<1x2x64xf32> to vector<2x64xf32>
    %c24_41 = arith.constant 24 : index
    %1020 = memref.load %arg6[%c24_41] : memref<144xf32, #tpu.memory_space<smem>>
    %1021 = vector.broadcast %1020 : f32 to vector<2x64xf32>
    %1022 = arith.mulf %1019, %1021 : vector<2x64xf32>
    %1023 = arith.addf %1017, %1022 : vector<2x64xf32>
    %1024 = vector.extract_strided_slice %963 {offsets = [3, 0, 0], sizes = [1, 2, 64], strides = [1, 1, 1]} : vector<4x2x64xf32> to vector<1x2x64xf32>
    %1025 = vector.shape_cast %1024 : vector<1x2x64xf32> to vector<2x64xf32>
    %c28_42 = arith.constant 28 : index
    %1026 = memref.load %arg6[%c28_42] : memref<144xf32, #tpu.memory_space<smem>>
    %1027 = vector.broadcast %1026 : f32 to vector<2x64xf32>
    %1028 = arith.mulf %1025, %1027 : vector<2x64xf32>
    %1029 = arith.addf %1023, %1028 : vector<2x64xf32>
    %1030 = vector.extract_strided_slice %966 {offsets = [0, 0, 0], sizes = [1, 2, 64], strides = [1, 1, 1]} : vector<4x2x64xf32> to vector<1x2x64xf32>
    %1031 = vector.shape_cast %1030 : vector<1x2x64xf32> to vector<2x64xf32>
    %c32_43 = arith.constant 32 : index
    %1032 = memref.load %arg6[%c32_43] : memref<144xf32, #tpu.memory_space<smem>>
    %1033 = vector.broadcast %1032 : f32 to vector<2x64xf32>
    %1034 = arith.mulf %1031, %1033 : vector<2x64xf32>
    %1035 = arith.addf %1029, %1034 : vector<2x64xf32>
    %1036 = vector.extract_strided_slice %966 {offsets = [1, 0, 0], sizes = [1, 2, 64], strides = [1, 1, 1]} : vector<4x2x64xf32> to vector<1x2x64xf32>
    %1037 = vector.shape_cast %1036 : vector<1x2x64xf32> to vector<2x64xf32>
    %c36_44 = arith.constant 36 : index
    %1038 = memref.load %arg6[%c36_44] : memref<144xf32, #tpu.memory_space<smem>>
    %1039 = vector.broadcast %1038 : f32 to vector<2x64xf32>
    %1040 = arith.mulf %1037, %1039 : vector<2x64xf32>
    %1041 = arith.addf %1035, %1040 : vector<2x64xf32>
    %1042 = vector.extract_strided_slice %966 {offsets = [2, 0, 0], sizes = [1, 2, 64], strides = [1, 1, 1]} : vector<4x2x64xf32> to vector<1x2x64xf32>
    %1043 = vector.shape_cast %1042 : vector<1x2x64xf32> to vector<2x64xf32>
    %c40_45 = arith.constant 40 : index
    %1044 = memref.load %arg6[%c40_45] : memref<144xf32, #tpu.memory_space<smem>>
    %1045 = vector.broadcast %1044 : f32 to vector<2x64xf32>
    %1046 = arith.mulf %1043, %1045 : vector<2x64xf32>
    %1047 = arith.addf %1041, %1046 : vector<2x64xf32>
    %1048 = vector.extract_strided_slice %966 {offsets = [3, 0, 0], sizes = [1, 2, 64], strides = [1, 1, 1]} : vector<4x2x64xf32> to vector<1x2x64xf32>
    %1049 = vector.shape_cast %1048 : vector<1x2x64xf32> to vector<2x64xf32>
    %c44_46 = arith.constant 44 : index
    %1050 = memref.load %arg6[%c44_46] : memref<144xf32, #tpu.memory_space<smem>>
    %1051 = vector.broadcast %1050 : f32 to vector<2x64xf32>
    %1052 = arith.mulf %1049, %1051 : vector<2x64xf32>
    %1053 = arith.addf %1047, %1052 : vector<2x64xf32>
    %1054 = vector.extract_strided_slice %969 {offsets = [0, 0, 0], sizes = [1, 2, 64], strides = [1, 1, 1]} : vector<4x2x64xf32> to vector<1x2x64xf32>
    %1055 = vector.shape_cast %1054 : vector<1x2x64xf32> to vector<2x64xf32>
    %c48_47 = arith.constant 48 : index
    %1056 = memref.load %arg6[%c48_47] : memref<144xf32, #tpu.memory_space<smem>>
    %1057 = vector.broadcast %1056 : f32 to vector<2x64xf32>
    %1058 = arith.mulf %1055, %1057 : vector<2x64xf32>
    %1059 = arith.addf %1053, %1058 : vector<2x64xf32>
    %1060 = vector.extract_strided_slice %969 {offsets = [1, 0, 0], sizes = [1, 2, 64], strides = [1, 1, 1]} : vector<4x2x64xf32> to vector<1x2x64xf32>
    %1061 = vector.shape_cast %1060 : vector<1x2x64xf32> to vector<2x64xf32>
    %c52_48 = arith.constant 52 : index
    %1062 = memref.load %arg6[%c52_48] : memref<144xf32, #tpu.memory_space<smem>>
    %1063 = vector.broadcast %1062 : f32 to vector<2x64xf32>
    %1064 = arith.mulf %1061, %1063 : vector<2x64xf32>
    %1065 = arith.addf %1059, %1064 : vector<2x64xf32>
    %1066 = vector.extract_strided_slice %969 {offsets = [2, 0, 0], sizes = [1, 2, 64], strides = [1, 1, 1]} : vector<4x2x64xf32> to vector<1x2x64xf32>
    %1067 = vector.shape_cast %1066 : vector<1x2x64xf32> to vector<2x64xf32>
    %c56_49 = arith.constant 56 : index
    %1068 = memref.load %arg6[%c56_49] : memref<144xf32, #tpu.memory_space<smem>>
    %1069 = vector.broadcast %1068 : f32 to vector<2x64xf32>
    %1070 = arith.mulf %1067, %1069 : vector<2x64xf32>
    %1071 = arith.addf %1065, %1070 : vector<2x64xf32>
    %1072 = vector.extract_strided_slice %969 {offsets = [3, 0, 0], sizes = [1, 2, 64], strides = [1, 1, 1]} : vector<4x2x64xf32> to vector<1x2x64xf32>
    %1073 = vector.shape_cast %1072 : vector<1x2x64xf32> to vector<2x64xf32>
    %c60_50 = arith.constant 60 : index
    %1074 = memref.load %arg6[%c60_50] : memref<144xf32, #tpu.memory_space<smem>>
    %1075 = vector.broadcast %1074 : f32 to vector<2x64xf32>
    %1076 = arith.mulf %1073, %1075 : vector<2x64xf32>
    %1077 = arith.addf %1071, %1076 : vector<2x64xf32>
    %1078 = vector.extract_strided_slice %970 {offsets = [0, 0, 0], sizes = [1, 2, 64], strides = [1, 1, 1]} : vector<4x2x64xf32> to vector<1x2x64xf32>
    %1079 = vector.shape_cast %1078 : vector<1x2x64xf32> to vector<2x64xf32>
    %c64_51 = arith.constant 64 : index
    %1080 = memref.load %arg6[%c64_51] : memref<144xf32, #tpu.memory_space<smem>>
    %1081 = vector.broadcast %1080 : f32 to vector<2x64xf32>
    %1082 = arith.mulf %1079, %1081 : vector<2x64xf32>
    %1083 = arith.addf %1077, %1082 : vector<2x64xf32>
    %1084 = vector.extract_strided_slice %970 {offsets = [1, 0, 0], sizes = [1, 2, 64], strides = [1, 1, 1]} : vector<4x2x64xf32> to vector<1x2x64xf32>
    %1085 = vector.shape_cast %1084 : vector<1x2x64xf32> to vector<2x64xf32>
    %c68_52 = arith.constant 68 : index
    %1086 = memref.load %arg6[%c68_52] : memref<144xf32, #tpu.memory_space<smem>>
    %1087 = vector.broadcast %1086 : f32 to vector<2x64xf32>
    %1088 = arith.mulf %1085, %1087 : vector<2x64xf32>
    %1089 = arith.addf %1083, %1088 : vector<2x64xf32>
    %1090 = vector.extract_strided_slice %970 {offsets = [2, 0, 0], sizes = [1, 2, 64], strides = [1, 1, 1]} : vector<4x2x64xf32> to vector<1x2x64xf32>
    %1091 = vector.shape_cast %1090 : vector<1x2x64xf32> to vector<2x64xf32>
    %c72_53 = arith.constant 72 : index
    %1092 = memref.load %arg6[%c72_53] : memref<144xf32, #tpu.memory_space<smem>>
    %1093 = vector.broadcast %1092 : f32 to vector<2x64xf32>
    %1094 = arith.mulf %1091, %1093 : vector<2x64xf32>
    %1095 = arith.addf %1089, %1094 : vector<2x64xf32>
    %1096 = vector.extract_strided_slice %970 {offsets = [3, 0, 0], sizes = [1, 2, 64], strides = [1, 1, 1]} : vector<4x2x64xf32> to vector<1x2x64xf32>
    %1097 = vector.shape_cast %1096 : vector<1x2x64xf32> to vector<2x64xf32>
    %c76_54 = arith.constant 76 : index
    %1098 = memref.load %arg6[%c76_54] : memref<144xf32, #tpu.memory_space<smem>>
    %1099 = vector.broadcast %1098 : f32 to vector<2x64xf32>
    %1100 = arith.mulf %1097, %1099 : vector<2x64xf32>
    %1101 = arith.addf %1095, %1100 : vector<2x64xf32>
    %1102 = vector.extract_strided_slice %973 {offsets = [0, 0, 0], sizes = [1, 2, 64], strides = [1, 1, 1]} : vector<4x2x64xf32> to vector<1x2x64xf32>
    %1103 = vector.shape_cast %1102 : vector<1x2x64xf32> to vector<2x64xf32>
    %c80_55 = arith.constant 80 : index
    %1104 = memref.load %arg6[%c80_55] : memref<144xf32, #tpu.memory_space<smem>>
    %1105 = vector.broadcast %1104 : f32 to vector<2x64xf32>
    %1106 = arith.mulf %1103, %1105 : vector<2x64xf32>
    %1107 = arith.addf %1101, %1106 : vector<2x64xf32>
    %1108 = vector.extract_strided_slice %973 {offsets = [1, 0, 0], sizes = [1, 2, 64], strides = [1, 1, 1]} : vector<4x2x64xf32> to vector<1x2x64xf32>
    %1109 = vector.shape_cast %1108 : vector<1x2x64xf32> to vector<2x64xf32>
    %c84_56 = arith.constant 84 : index
    %1110 = memref.load %arg6[%c84_56] : memref<144xf32, #tpu.memory_space<smem>>
    %1111 = vector.broadcast %1110 : f32 to vector<2x64xf32>
    %1112 = arith.mulf %1109, %1111 : vector<2x64xf32>
    %1113 = arith.addf %1107, %1112 : vector<2x64xf32>
    %1114 = vector.extract_strided_slice %973 {offsets = [2, 0, 0], sizes = [1, 2, 64], strides = [1, 1, 1]} : vector<4x2x64xf32> to vector<1x2x64xf32>
    %1115 = vector.shape_cast %1114 : vector<1x2x64xf32> to vector<2x64xf32>
    %c88_57 = arith.constant 88 : index
    %1116 = memref.load %arg6[%c88_57] : memref<144xf32, #tpu.memory_space<smem>>
    %1117 = vector.broadcast %1116 : f32 to vector<2x64xf32>
    %1118 = arith.mulf %1115, %1117 : vector<2x64xf32>
    %1119 = arith.addf %1113, %1118 : vector<2x64xf32>
    %1120 = vector.extract_strided_slice %973 {offsets = [3, 0, 0], sizes = [1, 2, 64], strides = [1, 1, 1]} : vector<4x2x64xf32> to vector<1x2x64xf32>
    %1121 = vector.shape_cast %1120 : vector<1x2x64xf32> to vector<2x64xf32>
    %c92_58 = arith.constant 92 : index
    %1122 = memref.load %arg6[%c92_58] : memref<144xf32, #tpu.memory_space<smem>>
    %1123 = vector.broadcast %1122 : f32 to vector<2x64xf32>
    %1124 = arith.mulf %1121, %1123 : vector<2x64xf32>
    %1125 = arith.addf %1119, %1124 : vector<2x64xf32>
    %1126 = vector.extract_strided_slice %976 {offsets = [0, 0, 0], sizes = [1, 2, 64], strides = [1, 1, 1]} : vector<4x2x64xf32> to vector<1x2x64xf32>
    %1127 = vector.shape_cast %1126 : vector<1x2x64xf32> to vector<2x64xf32>
    %c96_59 = arith.constant 96 : index
    %1128 = memref.load %arg6[%c96_59] : memref<144xf32, #tpu.memory_space<smem>>
    %1129 = vector.broadcast %1128 : f32 to vector<2x64xf32>
    %1130 = arith.mulf %1127, %1129 : vector<2x64xf32>
    %1131 = arith.addf %1125, %1130 : vector<2x64xf32>
    %1132 = vector.extract_strided_slice %976 {offsets = [1, 0, 0], sizes = [1, 2, 64], strides = [1, 1, 1]} : vector<4x2x64xf32> to vector<1x2x64xf32>
    %1133 = vector.shape_cast %1132 : vector<1x2x64xf32> to vector<2x64xf32>
    %c100_60 = arith.constant 100 : index
    %1134 = memref.load %arg6[%c100_60] : memref<144xf32, #tpu.memory_space<smem>>
    %1135 = vector.broadcast %1134 : f32 to vector<2x64xf32>
    %1136 = arith.mulf %1133, %1135 : vector<2x64xf32>
    %1137 = arith.addf %1131, %1136 : vector<2x64xf32>
    %1138 = vector.extract_strided_slice %976 {offsets = [2, 0, 0], sizes = [1, 2, 64], strides = [1, 1, 1]} : vector<4x2x64xf32> to vector<1x2x64xf32>
    %1139 = vector.shape_cast %1138 : vector<1x2x64xf32> to vector<2x64xf32>
    %c104_61 = arith.constant 104 : index
    %1140 = memref.load %arg6[%c104_61] : memref<144xf32, #tpu.memory_space<smem>>
    %1141 = vector.broadcast %1140 : f32 to vector<2x64xf32>
    %1142 = arith.mulf %1139, %1141 : vector<2x64xf32>
    %1143 = arith.addf %1137, %1142 : vector<2x64xf32>
    %1144 = vector.extract_strided_slice %976 {offsets = [3, 0, 0], sizes = [1, 2, 64], strides = [1, 1, 1]} : vector<4x2x64xf32> to vector<1x2x64xf32>
    %1145 = vector.shape_cast %1144 : vector<1x2x64xf32> to vector<2x64xf32>
    %c108_62 = arith.constant 108 : index
    %1146 = memref.load %arg6[%c108_62] : memref<144xf32, #tpu.memory_space<smem>>
    %1147 = vector.broadcast %1146 : f32 to vector<2x64xf32>
    %1148 = arith.mulf %1145, %1147 : vector<2x64xf32>
    %1149 = arith.addf %1143, %1148 : vector<2x64xf32>
    %1150 = vector.extract_strided_slice %977 {offsets = [0, 0, 0], sizes = [1, 2, 64], strides = [1, 1, 1]} : vector<4x2x64xf32> to vector<1x2x64xf32>
    %1151 = vector.shape_cast %1150 : vector<1x2x64xf32> to vector<2x64xf32>
    %c112_63 = arith.constant 112 : index
    %1152 = memref.load %arg6[%c112_63] : memref<144xf32, #tpu.memory_space<smem>>
    %1153 = vector.broadcast %1152 : f32 to vector<2x64xf32>
    %1154 = arith.mulf %1151, %1153 : vector<2x64xf32>
    %1155 = arith.addf %1149, %1154 : vector<2x64xf32>
    %1156 = vector.extract_strided_slice %977 {offsets = [1, 0, 0], sizes = [1, 2, 64], strides = [1, 1, 1]} : vector<4x2x64xf32> to vector<1x2x64xf32>
    %1157 = vector.shape_cast %1156 : vector<1x2x64xf32> to vector<2x64xf32>
    %c116_64 = arith.constant 116 : index
    %1158 = memref.load %arg6[%c116_64] : memref<144xf32, #tpu.memory_space<smem>>
    %1159 = vector.broadcast %1158 : f32 to vector<2x64xf32>
    %1160 = arith.mulf %1157, %1159 : vector<2x64xf32>
    %1161 = arith.addf %1155, %1160 : vector<2x64xf32>
    %1162 = vector.extract_strided_slice %977 {offsets = [2, 0, 0], sizes = [1, 2, 64], strides = [1, 1, 1]} : vector<4x2x64xf32> to vector<1x2x64xf32>
    %1163 = vector.shape_cast %1162 : vector<1x2x64xf32> to vector<2x64xf32>
    %c120_65 = arith.constant 120 : index
    %1164 = memref.load %arg6[%c120_65] : memref<144xf32, #tpu.memory_space<smem>>
    %1165 = vector.broadcast %1164 : f32 to vector<2x64xf32>
    %1166 = arith.mulf %1163, %1165 : vector<2x64xf32>
    %1167 = arith.addf %1161, %1166 : vector<2x64xf32>
    %1168 = vector.extract_strided_slice %977 {offsets = [3, 0, 0], sizes = [1, 2, 64], strides = [1, 1, 1]} : vector<4x2x64xf32> to vector<1x2x64xf32>
    %1169 = vector.shape_cast %1168 : vector<1x2x64xf32> to vector<2x64xf32>
    %c124_66 = arith.constant 124 : index
    %1170 = memref.load %arg6[%c124_66] : memref<144xf32, #tpu.memory_space<smem>>
    %1171 = vector.broadcast %1170 : f32 to vector<2x64xf32>
    %1172 = arith.mulf %1169, %1171 : vector<2x64xf32>
    %1173 = arith.addf %1167, %1172 : vector<2x64xf32>
    %1174 = vector.extract_strided_slice %980 {offsets = [0, 0, 0], sizes = [1, 2, 64], strides = [1, 1, 1]} : vector<4x2x64xf32> to vector<1x2x64xf32>
    %1175 = vector.shape_cast %1174 : vector<1x2x64xf32> to vector<2x64xf32>
    %c128_67 = arith.constant 128 : index
    %1176 = memref.load %arg6[%c128_67] : memref<144xf32, #tpu.memory_space<smem>>
    %1177 = vector.broadcast %1176 : f32 to vector<2x64xf32>
    %1178 = arith.mulf %1175, %1177 : vector<2x64xf32>
    %1179 = arith.addf %1173, %1178 : vector<2x64xf32>
    %1180 = vector.extract_strided_slice %980 {offsets = [1, 0, 0], sizes = [1, 2, 64], strides = [1, 1, 1]} : vector<4x2x64xf32> to vector<1x2x64xf32>
    %1181 = vector.shape_cast %1180 : vector<1x2x64xf32> to vector<2x64xf32>
    %c132_68 = arith.constant 132 : index
    %1182 = memref.load %arg6[%c132_68] : memref<144xf32, #tpu.memory_space<smem>>
    %1183 = vector.broadcast %1182 : f32 to vector<2x64xf32>
    %1184 = arith.mulf %1181, %1183 : vector<2x64xf32>
    %1185 = arith.addf %1179, %1184 : vector<2x64xf32>
    %1186 = vector.extract_strided_slice %980 {offsets = [2, 0, 0], sizes = [1, 2, 64], strides = [1, 1, 1]} : vector<4x2x64xf32> to vector<1x2x64xf32>
    %1187 = vector.shape_cast %1186 : vector<1x2x64xf32> to vector<2x64xf32>
    %c136_69 = arith.constant 136 : index
    %1188 = memref.load %arg6[%c136_69] : memref<144xf32, #tpu.memory_space<smem>>
    %1189 = vector.broadcast %1188 : f32 to vector<2x64xf32>
    %1190 = arith.mulf %1187, %1189 : vector<2x64xf32>
    %1191 = arith.addf %1185, %1190 : vector<2x64xf32>
    %1192 = vector.extract_strided_slice %980 {offsets = [3, 0, 0], sizes = [1, 2, 64], strides = [1, 1, 1]} : vector<4x2x64xf32> to vector<1x2x64xf32>
    %1193 = vector.shape_cast %1192 : vector<1x2x64xf32> to vector<2x64xf32>
    %c140_70 = arith.constant 140 : index
    %1194 = memref.load %arg6[%c140_70] : memref<144xf32, #tpu.memory_space<smem>>
    %1195 = vector.broadcast %1194 : f32 to vector<2x64xf32>
    %1196 = arith.mulf %1193, %1195 : vector<2x64xf32>
    %1197 = arith.addf %1191, %1196 : vector<2x64xf32>
    %c0_71 = arith.constant 0 : index
    %1198 = memref.load %arg7[%c0_71] : memref<4xf32, #tpu.memory_space<smem>>
    %1199 = vector.broadcast %1198 : f32 to vector<2x64xf32>
    %1200 = arith.addf %1197, %1199 : vector<2x64xf32>
    %cst_72 = arith.constant 0.000000e+00 : f32
    %1201 = vector.broadcast %cst_72 : f32 to vector<2x64xf32>
    %1202 = vector.extract_strided_slice %962 {offsets = [0, 0, 0], sizes = [1, 2, 64], strides = [1, 1, 1]} : vector<4x2x64xf32> to vector<1x2x64xf32>
    %1203 = vector.shape_cast %1202 : vector<1x2x64xf32> to vector<2x64xf32>
    %c1_73 = arith.constant 1 : index
    %1204 = memref.load %arg6[%c1_73] : memref<144xf32, #tpu.memory_space<smem>>
    %1205 = vector.broadcast %1204 : f32 to vector<2x64xf32>
    %1206 = arith.mulf %1203, %1205 : vector<2x64xf32>
    %1207 = arith.addf %1201, %1206 : vector<2x64xf32>
    %1208 = vector.extract_strided_slice %962 {offsets = [1, 0, 0], sizes = [1, 2, 64], strides = [1, 1, 1]} : vector<4x2x64xf32> to vector<1x2x64xf32>
    %1209 = vector.shape_cast %1208 : vector<1x2x64xf32> to vector<2x64xf32>
    %c5_74 = arith.constant 5 : index
    %1210 = memref.load %arg6[%c5_74] : memref<144xf32, #tpu.memory_space<smem>>
    %1211 = vector.broadcast %1210 : f32 to vector<2x64xf32>
    %1212 = arith.mulf %1209, %1211 : vector<2x64xf32>
    %1213 = arith.addf %1207, %1212 : vector<2x64xf32>
    %1214 = vector.extract_strided_slice %962 {offsets = [2, 0, 0], sizes = [1, 2, 64], strides = [1, 1, 1]} : vector<4x2x64xf32> to vector<1x2x64xf32>
    %1215 = vector.shape_cast %1214 : vector<1x2x64xf32> to vector<2x64xf32>
    %c9_75 = arith.constant 9 : index
    %1216 = memref.load %arg6[%c9_75] : memref<144xf32, #tpu.memory_space<smem>>
    %1217 = vector.broadcast %1216 : f32 to vector<2x64xf32>
    %1218 = arith.mulf %1215, %1217 : vector<2x64xf32>
    %1219 = arith.addf %1213, %1218 : vector<2x64xf32>
    %1220 = vector.extract_strided_slice %962 {offsets = [3, 0, 0], sizes = [1, 2, 64], strides = [1, 1, 1]} : vector<4x2x64xf32> to vector<1x2x64xf32>
    %1221 = vector.shape_cast %1220 : vector<1x2x64xf32> to vector<2x64xf32>
    %c13_76 = arith.constant 13 : index
    %1222 = memref.load %arg6[%c13_76] : memref<144xf32, #tpu.memory_space<smem>>
    %1223 = vector.broadcast %1222 : f32 to vector<2x64xf32>
    %1224 = arith.mulf %1221, %1223 : vector<2x64xf32>
    %1225 = arith.addf %1219, %1224 : vector<2x64xf32>
    %1226 = vector.extract_strided_slice %963 {offsets = [0, 0, 0], sizes = [1, 2, 64], strides = [1, 1, 1]} : vector<4x2x64xf32> to vector<1x2x64xf32>
    %1227 = vector.shape_cast %1226 : vector<1x2x64xf32> to vector<2x64xf32>
    %c17_77 = arith.constant 17 : index
    %1228 = memref.load %arg6[%c17_77] : memref<144xf32, #tpu.memory_space<smem>>
    %1229 = vector.broadcast %1228 : f32 to vector<2x64xf32>
    %1230 = arith.mulf %1227, %1229 : vector<2x64xf32>
    %1231 = arith.addf %1225, %1230 : vector<2x64xf32>
    %1232 = vector.extract_strided_slice %963 {offsets = [1, 0, 0], sizes = [1, 2, 64], strides = [1, 1, 1]} : vector<4x2x64xf32> to vector<1x2x64xf32>
    %1233 = vector.shape_cast %1232 : vector<1x2x64xf32> to vector<2x64xf32>
    %c21_78 = arith.constant 21 : index
    %1234 = memref.load %arg6[%c21_78] : memref<144xf32, #tpu.memory_space<smem>>
    %1235 = vector.broadcast %1234 : f32 to vector<2x64xf32>
    %1236 = arith.mulf %1233, %1235 : vector<2x64xf32>
    %1237 = arith.addf %1231, %1236 : vector<2x64xf32>
    %1238 = vector.extract_strided_slice %963 {offsets = [2, 0, 0], sizes = [1, 2, 64], strides = [1, 1, 1]} : vector<4x2x64xf32> to vector<1x2x64xf32>
    %1239 = vector.shape_cast %1238 : vector<1x2x64xf32> to vector<2x64xf32>
    %c25_79 = arith.constant 25 : index
    %1240 = memref.load %arg6[%c25_79] : memref<144xf32, #tpu.memory_space<smem>>
    %1241 = vector.broadcast %1240 : f32 to vector<2x64xf32>
    %1242 = arith.mulf %1239, %1241 : vector<2x64xf32>
    %1243 = arith.addf %1237, %1242 : vector<2x64xf32>
    %1244 = vector.extract_strided_slice %963 {offsets = [3, 0, 0], sizes = [1, 2, 64], strides = [1, 1, 1]} : vector<4x2x64xf32> to vector<1x2x64xf32>
    %1245 = vector.shape_cast %1244 : vector<1x2x64xf32> to vector<2x64xf32>
    %c29_80 = arith.constant 29 : index
    %1246 = memref.load %arg6[%c29_80] : memref<144xf32, #tpu.memory_space<smem>>
    %1247 = vector.broadcast %1246 : f32 to vector<2x64xf32>
    %1248 = arith.mulf %1245, %1247 : vector<2x64xf32>
    %1249 = arith.addf %1243, %1248 : vector<2x64xf32>
    %1250 = vector.extract_strided_slice %966 {offsets = [0, 0, 0], sizes = [1, 2, 64], strides = [1, 1, 1]} : vector<4x2x64xf32> to vector<1x2x64xf32>
    %1251 = vector.shape_cast %1250 : vector<1x2x64xf32> to vector<2x64xf32>
    %c33_81 = arith.constant 33 : index
    %1252 = memref.load %arg6[%c33_81] : memref<144xf32, #tpu.memory_space<smem>>
    %1253 = vector.broadcast %1252 : f32 to vector<2x64xf32>
    %1254 = arith.mulf %1251, %1253 : vector<2x64xf32>
    %1255 = arith.addf %1249, %1254 : vector<2x64xf32>
    %1256 = vector.extract_strided_slice %966 {offsets = [1, 0, 0], sizes = [1, 2, 64], strides = [1, 1, 1]} : vector<4x2x64xf32> to vector<1x2x64xf32>
    %1257 = vector.shape_cast %1256 : vector<1x2x64xf32> to vector<2x64xf32>
    %c37_82 = arith.constant 37 : index
    %1258 = memref.load %arg6[%c37_82] : memref<144xf32, #tpu.memory_space<smem>>
    %1259 = vector.broadcast %1258 : f32 to vector<2x64xf32>
    %1260 = arith.mulf %1257, %1259 : vector<2x64xf32>
    %1261 = arith.addf %1255, %1260 : vector<2x64xf32>
    %1262 = vector.extract_strided_slice %966 {offsets = [2, 0, 0], sizes = [1, 2, 64], strides = [1, 1, 1]} : vector<4x2x64xf32> to vector<1x2x64xf32>
    %1263 = vector.shape_cast %1262 : vector<1x2x64xf32> to vector<2x64xf32>
    %c41_83 = arith.constant 41 : index
    %1264 = memref.load %arg6[%c41_83] : memref<144xf32, #tpu.memory_space<smem>>
    %1265 = vector.broadcast %1264 : f32 to vector<2x64xf32>
    %1266 = arith.mulf %1263, %1265 : vector<2x64xf32>
    %1267 = arith.addf %1261, %1266 : vector<2x64xf32>
    %1268 = vector.extract_strided_slice %966 {offsets = [3, 0, 0], sizes = [1, 2, 64], strides = [1, 1, 1]} : vector<4x2x64xf32> to vector<1x2x64xf32>
    %1269 = vector.shape_cast %1268 : vector<1x2x64xf32> to vector<2x64xf32>
    %c45_84 = arith.constant 45 : index
    %1270 = memref.load %arg6[%c45_84] : memref<144xf32, #tpu.memory_space<smem>>
    %1271 = vector.broadcast %1270 : f32 to vector<2x64xf32>
    %1272 = arith.mulf %1269, %1271 : vector<2x64xf32>
    %1273 = arith.addf %1267, %1272 : vector<2x64xf32>
    %1274 = vector.extract_strided_slice %969 {offsets = [0, 0, 0], sizes = [1, 2, 64], strides = [1, 1, 1]} : vector<4x2x64xf32> to vector<1x2x64xf32>
    %1275 = vector.shape_cast %1274 : vector<1x2x64xf32> to vector<2x64xf32>
    %c49_85 = arith.constant 49 : index
    %1276 = memref.load %arg6[%c49_85] : memref<144xf32, #tpu.memory_space<smem>>
    %1277 = vector.broadcast %1276 : f32 to vector<2x64xf32>
    %1278 = arith.mulf %1275, %1277 : vector<2x64xf32>
    %1279 = arith.addf %1273, %1278 : vector<2x64xf32>
    %1280 = vector.extract_strided_slice %969 {offsets = [1, 0, 0], sizes = [1, 2, 64], strides = [1, 1, 1]} : vector<4x2x64xf32> to vector<1x2x64xf32>
    %1281 = vector.shape_cast %1280 : vector<1x2x64xf32> to vector<2x64xf32>
    %c53_86 = arith.constant 53 : index
    %1282 = memref.load %arg6[%c53_86] : memref<144xf32, #tpu.memory_space<smem>>
    %1283 = vector.broadcast %1282 : f32 to vector<2x64xf32>
    %1284 = arith.mulf %1281, %1283 : vector<2x64xf32>
    %1285 = arith.addf %1279, %1284 : vector<2x64xf32>
    %1286 = vector.extract_strided_slice %969 {offsets = [2, 0, 0], sizes = [1, 2, 64], strides = [1, 1, 1]} : vector<4x2x64xf32> to vector<1x2x64xf32>
    %1287 = vector.shape_cast %1286 : vector<1x2x64xf32> to vector<2x64xf32>
    %c57_87 = arith.constant 57 : index
    %1288 = memref.load %arg6[%c57_87] : memref<144xf32, #tpu.memory_space<smem>>
    %1289 = vector.broadcast %1288 : f32 to vector<2x64xf32>
    %1290 = arith.mulf %1287, %1289 : vector<2x64xf32>
    %1291 = arith.addf %1285, %1290 : vector<2x64xf32>
    %1292 = vector.extract_strided_slice %969 {offsets = [3, 0, 0], sizes = [1, 2, 64], strides = [1, 1, 1]} : vector<4x2x64xf32> to vector<1x2x64xf32>
    %1293 = vector.shape_cast %1292 : vector<1x2x64xf32> to vector<2x64xf32>
    %c61_88 = arith.constant 61 : index
    %1294 = memref.load %arg6[%c61_88] : memref<144xf32, #tpu.memory_space<smem>>
    %1295 = vector.broadcast %1294 : f32 to vector<2x64xf32>
    %1296 = arith.mulf %1293, %1295 : vector<2x64xf32>
    %1297 = arith.addf %1291, %1296 : vector<2x64xf32>
    %1298 = vector.extract_strided_slice %970 {offsets = [0, 0, 0], sizes = [1, 2, 64], strides = [1, 1, 1]} : vector<4x2x64xf32> to vector<1x2x64xf32>
    %1299 = vector.shape_cast %1298 : vector<1x2x64xf32> to vector<2x64xf32>
    %c65_89 = arith.constant 65 : index
    %1300 = memref.load %arg6[%c65_89] : memref<144xf32, #tpu.memory_space<smem>>
    %1301 = vector.broadcast %1300 : f32 to vector<2x64xf32>
    %1302 = arith.mulf %1299, %1301 : vector<2x64xf32>
    %1303 = arith.addf %1297, %1302 : vector<2x64xf32>
    %1304 = vector.extract_strided_slice %970 {offsets = [1, 0, 0], sizes = [1, 2, 64], strides = [1, 1, 1]} : vector<4x2x64xf32> to vector<1x2x64xf32>
    %1305 = vector.shape_cast %1304 : vector<1x2x64xf32> to vector<2x64xf32>
    %c69_90 = arith.constant 69 : index
    %1306 = memref.load %arg6[%c69_90] : memref<144xf32, #tpu.memory_space<smem>>
    %1307 = vector.broadcast %1306 : f32 to vector<2x64xf32>
    %1308 = arith.mulf %1305, %1307 : vector<2x64xf32>
    %1309 = arith.addf %1303, %1308 : vector<2x64xf32>
    %1310 = vector.extract_strided_slice %970 {offsets = [2, 0, 0], sizes = [1, 2, 64], strides = [1, 1, 1]} : vector<4x2x64xf32> to vector<1x2x64xf32>
    %1311 = vector.shape_cast %1310 : vector<1x2x64xf32> to vector<2x64xf32>
    %c73_91 = arith.constant 73 : index
    %1312 = memref.load %arg6[%c73_91] : memref<144xf32, #tpu.memory_space<smem>>
    %1313 = vector.broadcast %1312 : f32 to vector<2x64xf32>
    %1314 = arith.mulf %1311, %1313 : vector<2x64xf32>
    %1315 = arith.addf %1309, %1314 : vector<2x64xf32>
    %1316 = vector.extract_strided_slice %970 {offsets = [3, 0, 0], sizes = [1, 2, 64], strides = [1, 1, 1]} : vector<4x2x64xf32> to vector<1x2x64xf32>
    %1317 = vector.shape_cast %1316 : vector<1x2x64xf32> to vector<2x64xf32>
    %c77_92 = arith.constant 77 : index
    %1318 = memref.load %arg6[%c77_92] : memref<144xf32, #tpu.memory_space<smem>>
    %1319 = vector.broadcast %1318 : f32 to vector<2x64xf32>
    %1320 = arith.mulf %1317, %1319 : vector<2x64xf32>
    %1321 = arith.addf %1315, %1320 : vector<2x64xf32>
    %1322 = vector.extract_strided_slice %973 {offsets = [0, 0, 0], sizes = [1, 2, 64], strides = [1, 1, 1]} : vector<4x2x64xf32> to vector<1x2x64xf32>
    %1323 = vector.shape_cast %1322 : vector<1x2x64xf32> to vector<2x64xf32>
    %c81_93 = arith.constant 81 : index
    %1324 = memref.load %arg6[%c81_93] : memref<144xf32, #tpu.memory_space<smem>>
    %1325 = vector.broadcast %1324 : f32 to vector<2x64xf32>
    %1326 = arith.mulf %1323, %1325 : vector<2x64xf32>
    %1327 = arith.addf %1321, %1326 : vector<2x64xf32>
    %1328 = vector.extract_strided_slice %973 {offsets = [1, 0, 0], sizes = [1, 2, 64], strides = [1, 1, 1]} : vector<4x2x64xf32> to vector<1x2x64xf32>
    %1329 = vector.shape_cast %1328 : vector<1x2x64xf32> to vector<2x64xf32>
    %c85_94 = arith.constant 85 : index
    %1330 = memref.load %arg6[%c85_94] : memref<144xf32, #tpu.memory_space<smem>>
    %1331 = vector.broadcast %1330 : f32 to vector<2x64xf32>
    %1332 = arith.mulf %1329, %1331 : vector<2x64xf32>
    %1333 = arith.addf %1327, %1332 : vector<2x64xf32>
    %1334 = vector.extract_strided_slice %973 {offsets = [2, 0, 0], sizes = [1, 2, 64], strides = [1, 1, 1]} : vector<4x2x64xf32> to vector<1x2x64xf32>
    %1335 = vector.shape_cast %1334 : vector<1x2x64xf32> to vector<2x64xf32>
    %c89_95 = arith.constant 89 : index
    %1336 = memref.load %arg6[%c89_95] : memref<144xf32, #tpu.memory_space<smem>>
    %1337 = vector.broadcast %1336 : f32 to vector<2x64xf32>
    %1338 = arith.mulf %1335, %1337 : vector<2x64xf32>
    %1339 = arith.addf %1333, %1338 : vector<2x64xf32>
    %1340 = vector.extract_strided_slice %973 {offsets = [3, 0, 0], sizes = [1, 2, 64], strides = [1, 1, 1]} : vector<4x2x64xf32> to vector<1x2x64xf32>
    %1341 = vector.shape_cast %1340 : vector<1x2x64xf32> to vector<2x64xf32>
    %c93_96 = arith.constant 93 : index
    %1342 = memref.load %arg6[%c93_96] : memref<144xf32, #tpu.memory_space<smem>>
    %1343 = vector.broadcast %1342 : f32 to vector<2x64xf32>
    %1344 = arith.mulf %1341, %1343 : vector<2x64xf32>
    %1345 = arith.addf %1339, %1344 : vector<2x64xf32>
    %1346 = vector.extract_strided_slice %976 {offsets = [0, 0, 0], sizes = [1, 2, 64], strides = [1, 1, 1]} : vector<4x2x64xf32> to vector<1x2x64xf32>
    %1347 = vector.shape_cast %1346 : vector<1x2x64xf32> to vector<2x64xf32>
    %c97_97 = arith.constant 97 : index
    %1348 = memref.load %arg6[%c97_97] : memref<144xf32, #tpu.memory_space<smem>>
    %1349 = vector.broadcast %1348 : f32 to vector<2x64xf32>
    %1350 = arith.mulf %1347, %1349 : vector<2x64xf32>
    %1351 = arith.addf %1345, %1350 : vector<2x64xf32>
    %1352 = vector.extract_strided_slice %976 {offsets = [1, 0, 0], sizes = [1, 2, 64], strides = [1, 1, 1]} : vector<4x2x64xf32> to vector<1x2x64xf32>
    %1353 = vector.shape_cast %1352 : vector<1x2x64xf32> to vector<2x64xf32>
    %c101_98 = arith.constant 101 : index
    %1354 = memref.load %arg6[%c101_98] : memref<144xf32, #tpu.memory_space<smem>>
    %1355 = vector.broadcast %1354 : f32 to vector<2x64xf32>
    %1356 = arith.mulf %1353, %1355 : vector<2x64xf32>
    %1357 = arith.addf %1351, %1356 : vector<2x64xf32>
    %1358 = vector.extract_strided_slice %976 {offsets = [2, 0, 0], sizes = [1, 2, 64], strides = [1, 1, 1]} : vector<4x2x64xf32> to vector<1x2x64xf32>
    %1359 = vector.shape_cast %1358 : vector<1x2x64xf32> to vector<2x64xf32>
    %c105_99 = arith.constant 105 : index
    %1360 = memref.load %arg6[%c105_99] : memref<144xf32, #tpu.memory_space<smem>>
    %1361 = vector.broadcast %1360 : f32 to vector<2x64xf32>
    %1362 = arith.mulf %1359, %1361 : vector<2x64xf32>
    %1363 = arith.addf %1357, %1362 : vector<2x64xf32>
    %1364 = vector.extract_strided_slice %976 {offsets = [3, 0, 0], sizes = [1, 2, 64], strides = [1, 1, 1]} : vector<4x2x64xf32> to vector<1x2x64xf32>
    %1365 = vector.shape_cast %1364 : vector<1x2x64xf32> to vector<2x64xf32>
    %c109_100 = arith.constant 109 : index
    %1366 = memref.load %arg6[%c109_100] : memref<144xf32, #tpu.memory_space<smem>>
    %1367 = vector.broadcast %1366 : f32 to vector<2x64xf32>
    %1368 = arith.mulf %1365, %1367 : vector<2x64xf32>
    %1369 = arith.addf %1363, %1368 : vector<2x64xf32>
    %1370 = vector.extract_strided_slice %977 {offsets = [0, 0, 0], sizes = [1, 2, 64], strides = [1, 1, 1]} : vector<4x2x64xf32> to vector<1x2x64xf32>
    %1371 = vector.shape_cast %1370 : vector<1x2x64xf32> to vector<2x64xf32>
    %c113_101 = arith.constant 113 : index
    %1372 = memref.load %arg6[%c113_101] : memref<144xf32, #tpu.memory_space<smem>>
    %1373 = vector.broadcast %1372 : f32 to vector<2x64xf32>
    %1374 = arith.mulf %1371, %1373 : vector<2x64xf32>
    %1375 = arith.addf %1369, %1374 : vector<2x64xf32>
    %1376 = vector.extract_strided_slice %977 {offsets = [1, 0, 0], sizes = [1, 2, 64], strides = [1, 1, 1]} : vector<4x2x64xf32> to vector<1x2x64xf32>
    %1377 = vector.shape_cast %1376 : vector<1x2x64xf32> to vector<2x64xf32>
    %c117_102 = arith.constant 117 : index
    %1378 = memref.load %arg6[%c117_102] : memref<144xf32, #tpu.memory_space<smem>>
    %1379 = vector.broadcast %1378 : f32 to vector<2x64xf32>
    %1380 = arith.mulf %1377, %1379 : vector<2x64xf32>
    %1381 = arith.addf %1375, %1380 : vector<2x64xf32>
    %1382 = vector.extract_strided_slice %977 {offsets = [2, 0, 0], sizes = [1, 2, 64], strides = [1, 1, 1]} : vector<4x2x64xf32> to vector<1x2x64xf32>
    %1383 = vector.shape_cast %1382 : vector<1x2x64xf32> to vector<2x64xf32>
    %c121_103 = arith.constant 121 : index
    %1384 = memref.load %arg6[%c121_103] : memref<144xf32, #tpu.memory_space<smem>>
    %1385 = vector.broadcast %1384 : f32 to vector<2x64xf32>
    %1386 = arith.mulf %1383, %1385 : vector<2x64xf32>
    %1387 = arith.addf %1381, %1386 : vector<2x64xf32>
    %1388 = vector.extract_strided_slice %977 {offsets = [3, 0, 0], sizes = [1, 2, 64], strides = [1, 1, 1]} : vector<4x2x64xf32> to vector<1x2x64xf32>
    %1389 = vector.shape_cast %1388 : vector<1x2x64xf32> to vector<2x64xf32>
    %c125_104 = arith.constant 125 : index
    %1390 = memref.load %arg6[%c125_104] : memref<144xf32, #tpu.memory_space<smem>>
    %1391 = vector.broadcast %1390 : f32 to vector<2x64xf32>
    %1392 = arith.mulf %1389, %1391 : vector<2x64xf32>
    %1393 = arith.addf %1387, %1392 : vector<2x64xf32>
    %1394 = vector.extract_strided_slice %980 {offsets = [0, 0, 0], sizes = [1, 2, 64], strides = [1, 1, 1]} : vector<4x2x64xf32> to vector<1x2x64xf32>
    %1395 = vector.shape_cast %1394 : vector<1x2x64xf32> to vector<2x64xf32>
    %c129_105 = arith.constant 129 : index
    %1396 = memref.load %arg6[%c129_105] : memref<144xf32, #tpu.memory_space<smem>>
    %1397 = vector.broadcast %1396 : f32 to vector<2x64xf32>
    %1398 = arith.mulf %1395, %1397 : vector<2x64xf32>
    %1399 = arith.addf %1393, %1398 : vector<2x64xf32>
    %1400 = vector.extract_strided_slice %980 {offsets = [1, 0, 0], sizes = [1, 2, 64], strides = [1, 1, 1]} : vector<4x2x64xf32> to vector<1x2x64xf32>
    %1401 = vector.shape_cast %1400 : vector<1x2x64xf32> to vector<2x64xf32>
    %c133_106 = arith.constant 133 : index
    %1402 = memref.load %arg6[%c133_106] : memref<144xf32, #tpu.memory_space<smem>>
    %1403 = vector.broadcast %1402 : f32 to vector<2x64xf32>
    %1404 = arith.mulf %1401, %1403 : vector<2x64xf32>
    %1405 = arith.addf %1399, %1404 : vector<2x64xf32>
    %1406 = vector.extract_strided_slice %980 {offsets = [2, 0, 0], sizes = [1, 2, 64], strides = [1, 1, 1]} : vector<4x2x64xf32> to vector<1x2x64xf32>
    %1407 = vector.shape_cast %1406 : vector<1x2x64xf32> to vector<2x64xf32>
    %c137_107 = arith.constant 137 : index
    %1408 = memref.load %arg6[%c137_107] : memref<144xf32, #tpu.memory_space<smem>>
    %1409 = vector.broadcast %1408 : f32 to vector<2x64xf32>
    %1410 = arith.mulf %1407, %1409 : vector<2x64xf32>
    %1411 = arith.addf %1405, %1410 : vector<2x64xf32>
    %1412 = vector.extract_strided_slice %980 {offsets = [3, 0, 0], sizes = [1, 2, 64], strides = [1, 1, 1]} : vector<4x2x64xf32> to vector<1x2x64xf32>
    %1413 = vector.shape_cast %1412 : vector<1x2x64xf32> to vector<2x64xf32>
    %c141_108 = arith.constant 141 : index
    %1414 = memref.load %arg6[%c141_108] : memref<144xf32, #tpu.memory_space<smem>>
    %1415 = vector.broadcast %1414 : f32 to vector<2x64xf32>
    %1416 = arith.mulf %1413, %1415 : vector<2x64xf32>
    %1417 = arith.addf %1411, %1416 : vector<2x64xf32>
    %c1_109 = arith.constant 1 : index
    %1418 = memref.load %arg7[%c1_109] : memref<4xf32, #tpu.memory_space<smem>>
    %1419 = vector.broadcast %1418 : f32 to vector<2x64xf32>
    %1420 = arith.addf %1417, %1419 : vector<2x64xf32>
    %cst_110 = arith.constant 0.000000e+00 : f32
    %1421 = vector.broadcast %cst_110 : f32 to vector<2x64xf32>
    %1422 = vector.extract_strided_slice %962 {offsets = [0, 0, 0], sizes = [1, 2, 64], strides = [1, 1, 1]} : vector<4x2x64xf32> to vector<1x2x64xf32>
    %1423 = vector.shape_cast %1422 : vector<1x2x64xf32> to vector<2x64xf32>
    %c2_111 = arith.constant 2 : index
    %1424 = memref.load %arg6[%c2_111] : memref<144xf32, #tpu.memory_space<smem>>
    %1425 = vector.broadcast %1424 : f32 to vector<2x64xf32>
    %1426 = arith.mulf %1423, %1425 : vector<2x64xf32>
    %1427 = arith.addf %1421, %1426 : vector<2x64xf32>
    %1428 = vector.extract_strided_slice %962 {offsets = [1, 0, 0], sizes = [1, 2, 64], strides = [1, 1, 1]} : vector<4x2x64xf32> to vector<1x2x64xf32>
    %1429 = vector.shape_cast %1428 : vector<1x2x64xf32> to vector<2x64xf32>
    %c6_112 = arith.constant 6 : index
    %1430 = memref.load %arg6[%c6_112] : memref<144xf32, #tpu.memory_space<smem>>
    %1431 = vector.broadcast %1430 : f32 to vector<2x64xf32>
    %1432 = arith.mulf %1429, %1431 : vector<2x64xf32>
    %1433 = arith.addf %1427, %1432 : vector<2x64xf32>
    %1434 = vector.extract_strided_slice %962 {offsets = [2, 0, 0], sizes = [1, 2, 64], strides = [1, 1, 1]} : vector<4x2x64xf32> to vector<1x2x64xf32>
    %1435 = vector.shape_cast %1434 : vector<1x2x64xf32> to vector<2x64xf32>
    %c10_113 = arith.constant 10 : index
    %1436 = memref.load %arg6[%c10_113] : memref<144xf32, #tpu.memory_space<smem>>
    %1437 = vector.broadcast %1436 : f32 to vector<2x64xf32>
    %1438 = arith.mulf %1435, %1437 : vector<2x64xf32>
    %1439 = arith.addf %1433, %1438 : vector<2x64xf32>
    %1440 = vector.extract_strided_slice %962 {offsets = [3, 0, 0], sizes = [1, 2, 64], strides = [1, 1, 1]} : vector<4x2x64xf32> to vector<1x2x64xf32>
    %1441 = vector.shape_cast %1440 : vector<1x2x64xf32> to vector<2x64xf32>
    %c14_114 = arith.constant 14 : index
    %1442 = memref.load %arg6[%c14_114] : memref<144xf32, #tpu.memory_space<smem>>
    %1443 = vector.broadcast %1442 : f32 to vector<2x64xf32>
    %1444 = arith.mulf %1441, %1443 : vector<2x64xf32>
    %1445 = arith.addf %1439, %1444 : vector<2x64xf32>
    %1446 = vector.extract_strided_slice %963 {offsets = [0, 0, 0], sizes = [1, 2, 64], strides = [1, 1, 1]} : vector<4x2x64xf32> to vector<1x2x64xf32>
    %1447 = vector.shape_cast %1446 : vector<1x2x64xf32> to vector<2x64xf32>
    %c18_115 = arith.constant 18 : index
    %1448 = memref.load %arg6[%c18_115] : memref<144xf32, #tpu.memory_space<smem>>
    %1449 = vector.broadcast %1448 : f32 to vector<2x64xf32>
    %1450 = arith.mulf %1447, %1449 : vector<2x64xf32>
    %1451 = arith.addf %1445, %1450 : vector<2x64xf32>
    %1452 = vector.extract_strided_slice %963 {offsets = [1, 0, 0], sizes = [1, 2, 64], strides = [1, 1, 1]} : vector<4x2x64xf32> to vector<1x2x64xf32>
    %1453 = vector.shape_cast %1452 : vector<1x2x64xf32> to vector<2x64xf32>
    %c22_116 = arith.constant 22 : index
    %1454 = memref.load %arg6[%c22_116] : memref<144xf32, #tpu.memory_space<smem>>
    %1455 = vector.broadcast %1454 : f32 to vector<2x64xf32>
    %1456 = arith.mulf %1453, %1455 : vector<2x64xf32>
    %1457 = arith.addf %1451, %1456 : vector<2x64xf32>
    %1458 = vector.extract_strided_slice %963 {offsets = [2, 0, 0], sizes = [1, 2, 64], strides = [1, 1, 1]} : vector<4x2x64xf32> to vector<1x2x64xf32>
    %1459 = vector.shape_cast %1458 : vector<1x2x64xf32> to vector<2x64xf32>
    %c26_117 = arith.constant 26 : index
    %1460 = memref.load %arg6[%c26_117] : memref<144xf32, #tpu.memory_space<smem>>
    %1461 = vector.broadcast %1460 : f32 to vector<2x64xf32>
    %1462 = arith.mulf %1459, %1461 : vector<2x64xf32>
    %1463 = arith.addf %1457, %1462 : vector<2x64xf32>
    %1464 = vector.extract_strided_slice %963 {offsets = [3, 0, 0], sizes = [1, 2, 64], strides = [1, 1, 1]} : vector<4x2x64xf32> to vector<1x2x64xf32>
    %1465 = vector.shape_cast %1464 : vector<1x2x64xf32> to vector<2x64xf32>
    %c30_118 = arith.constant 30 : index
    %1466 = memref.load %arg6[%c30_118] : memref<144xf32, #tpu.memory_space<smem>>
    %1467 = vector.broadcast %1466 : f32 to vector<2x64xf32>
    %1468 = arith.mulf %1465, %1467 : vector<2x64xf32>
    %1469 = arith.addf %1463, %1468 : vector<2x64xf32>
    %1470 = vector.extract_strided_slice %966 {offsets = [0, 0, 0], sizes = [1, 2, 64], strides = [1, 1, 1]} : vector<4x2x64xf32> to vector<1x2x64xf32>
    %1471 = vector.shape_cast %1470 : vector<1x2x64xf32> to vector<2x64xf32>
    %c34_119 = arith.constant 34 : index
    %1472 = memref.load %arg6[%c34_119] : memref<144xf32, #tpu.memory_space<smem>>
    %1473 = vector.broadcast %1472 : f32 to vector<2x64xf32>
    %1474 = arith.mulf %1471, %1473 : vector<2x64xf32>
    %1475 = arith.addf %1469, %1474 : vector<2x64xf32>
    %1476 = vector.extract_strided_slice %966 {offsets = [1, 0, 0], sizes = [1, 2, 64], strides = [1, 1, 1]} : vector<4x2x64xf32> to vector<1x2x64xf32>
    %1477 = vector.shape_cast %1476 : vector<1x2x64xf32> to vector<2x64xf32>
    %c38_120 = arith.constant 38 : index
    %1478 = memref.load %arg6[%c38_120] : memref<144xf32, #tpu.memory_space<smem>>
    %1479 = vector.broadcast %1478 : f32 to vector<2x64xf32>
    %1480 = arith.mulf %1477, %1479 : vector<2x64xf32>
    %1481 = arith.addf %1475, %1480 : vector<2x64xf32>
    %1482 = vector.extract_strided_slice %966 {offsets = [2, 0, 0], sizes = [1, 2, 64], strides = [1, 1, 1]} : vector<4x2x64xf32> to vector<1x2x64xf32>
    %1483 = vector.shape_cast %1482 : vector<1x2x64xf32> to vector<2x64xf32>
    %c42_121 = arith.constant 42 : index
    %1484 = memref.load %arg6[%c42_121] : memref<144xf32, #tpu.memory_space<smem>>
    %1485 = vector.broadcast %1484 : f32 to vector<2x64xf32>
    %1486 = arith.mulf %1483, %1485 : vector<2x64xf32>
    %1487 = arith.addf %1481, %1486 : vector<2x64xf32>
    %1488 = vector.extract_strided_slice %966 {offsets = [3, 0, 0], sizes = [1, 2, 64], strides = [1, 1, 1]} : vector<4x2x64xf32> to vector<1x2x64xf32>
    %1489 = vector.shape_cast %1488 : vector<1x2x64xf32> to vector<2x64xf32>
    %c46_122 = arith.constant 46 : index
    %1490 = memref.load %arg6[%c46_122] : memref<144xf32, #tpu.memory_space<smem>>
    %1491 = vector.broadcast %1490 : f32 to vector<2x64xf32>
    %1492 = arith.mulf %1489, %1491 : vector<2x64xf32>
    %1493 = arith.addf %1487, %1492 : vector<2x64xf32>
    %1494 = vector.extract_strided_slice %969 {offsets = [0, 0, 0], sizes = [1, 2, 64], strides = [1, 1, 1]} : vector<4x2x64xf32> to vector<1x2x64xf32>
    %1495 = vector.shape_cast %1494 : vector<1x2x64xf32> to vector<2x64xf32>
    %c50_123 = arith.constant 50 : index
    %1496 = memref.load %arg6[%c50_123] : memref<144xf32, #tpu.memory_space<smem>>
    %1497 = vector.broadcast %1496 : f32 to vector<2x64xf32>
    %1498 = arith.mulf %1495, %1497 : vector<2x64xf32>
    %1499 = arith.addf %1493, %1498 : vector<2x64xf32>
    %1500 = vector.extract_strided_slice %969 {offsets = [1, 0, 0], sizes = [1, 2, 64], strides = [1, 1, 1]} : vector<4x2x64xf32> to vector<1x2x64xf32>
    %1501 = vector.shape_cast %1500 : vector<1x2x64xf32> to vector<2x64xf32>
    %c54_124 = arith.constant 54 : index
    %1502 = memref.load %arg6[%c54_124] : memref<144xf32, #tpu.memory_space<smem>>
    %1503 = vector.broadcast %1502 : f32 to vector<2x64xf32>
    %1504 = arith.mulf %1501, %1503 : vector<2x64xf32>
    %1505 = arith.addf %1499, %1504 : vector<2x64xf32>
    %1506 = vector.extract_strided_slice %969 {offsets = [2, 0, 0], sizes = [1, 2, 64], strides = [1, 1, 1]} : vector<4x2x64xf32> to vector<1x2x64xf32>
    %1507 = vector.shape_cast %1506 : vector<1x2x64xf32> to vector<2x64xf32>
    %c58_125 = arith.constant 58 : index
    %1508 = memref.load %arg6[%c58_125] : memref<144xf32, #tpu.memory_space<smem>>
    %1509 = vector.broadcast %1508 : f32 to vector<2x64xf32>
    %1510 = arith.mulf %1507, %1509 : vector<2x64xf32>
    %1511 = arith.addf %1505, %1510 : vector<2x64xf32>
    %1512 = vector.extract_strided_slice %969 {offsets = [3, 0, 0], sizes = [1, 2, 64], strides = [1, 1, 1]} : vector<4x2x64xf32> to vector<1x2x64xf32>
    %1513 = vector.shape_cast %1512 : vector<1x2x64xf32> to vector<2x64xf32>
    %c62_126 = arith.constant 62 : index
    %1514 = memref.load %arg6[%c62_126] : memref<144xf32, #tpu.memory_space<smem>>
    %1515 = vector.broadcast %1514 : f32 to vector<2x64xf32>
    %1516 = arith.mulf %1513, %1515 : vector<2x64xf32>
    %1517 = arith.addf %1511, %1516 : vector<2x64xf32>
    %1518 = vector.extract_strided_slice %970 {offsets = [0, 0, 0], sizes = [1, 2, 64], strides = [1, 1, 1]} : vector<4x2x64xf32> to vector<1x2x64xf32>
    %1519 = vector.shape_cast %1518 : vector<1x2x64xf32> to vector<2x64xf32>
    %c66_127 = arith.constant 66 : index
    %1520 = memref.load %arg6[%c66_127] : memref<144xf32, #tpu.memory_space<smem>>
    %1521 = vector.broadcast %1520 : f32 to vector<2x64xf32>
    %1522 = arith.mulf %1519, %1521 : vector<2x64xf32>
    %1523 = arith.addf %1517, %1522 : vector<2x64xf32>
    %1524 = vector.extract_strided_slice %970 {offsets = [1, 0, 0], sizes = [1, 2, 64], strides = [1, 1, 1]} : vector<4x2x64xf32> to vector<1x2x64xf32>
    %1525 = vector.shape_cast %1524 : vector<1x2x64xf32> to vector<2x64xf32>
    %c70_128 = arith.constant 70 : index
    %1526 = memref.load %arg6[%c70_128] : memref<144xf32, #tpu.memory_space<smem>>
    %1527 = vector.broadcast %1526 : f32 to vector<2x64xf32>
    %1528 = arith.mulf %1525, %1527 : vector<2x64xf32>
    %1529 = arith.addf %1523, %1528 : vector<2x64xf32>
    %1530 = vector.extract_strided_slice %970 {offsets = [2, 0, 0], sizes = [1, 2, 64], strides = [1, 1, 1]} : vector<4x2x64xf32> to vector<1x2x64xf32>
    %1531 = vector.shape_cast %1530 : vector<1x2x64xf32> to vector<2x64xf32>
    %c74_129 = arith.constant 74 : index
    %1532 = memref.load %arg6[%c74_129] : memref<144xf32, #tpu.memory_space<smem>>
    %1533 = vector.broadcast %1532 : f32 to vector<2x64xf32>
    %1534 = arith.mulf %1531, %1533 : vector<2x64xf32>
    %1535 = arith.addf %1529, %1534 : vector<2x64xf32>
    %1536 = vector.extract_strided_slice %970 {offsets = [3, 0, 0], sizes = [1, 2, 64], strides = [1, 1, 1]} : vector<4x2x64xf32> to vector<1x2x64xf32>
    %1537 = vector.shape_cast %1536 : vector<1x2x64xf32> to vector<2x64xf32>
    %c78_130 = arith.constant 78 : index
    %1538 = memref.load %arg6[%c78_130] : memref<144xf32, #tpu.memory_space<smem>>
    %1539 = vector.broadcast %1538 : f32 to vector<2x64xf32>
    %1540 = arith.mulf %1537, %1539 : vector<2x64xf32>
    %1541 = arith.addf %1535, %1540 : vector<2x64xf32>
    %1542 = vector.extract_strided_slice %973 {offsets = [0, 0, 0], sizes = [1, 2, 64], strides = [1, 1, 1]} : vector<4x2x64xf32> to vector<1x2x64xf32>
    %1543 = vector.shape_cast %1542 : vector<1x2x64xf32> to vector<2x64xf32>
    %c82_131 = arith.constant 82 : index
    %1544 = memref.load %arg6[%c82_131] : memref<144xf32, #tpu.memory_space<smem>>
    %1545 = vector.broadcast %1544 : f32 to vector<2x64xf32>
    %1546 = arith.mulf %1543, %1545 : vector<2x64xf32>
    %1547 = arith.addf %1541, %1546 : vector<2x64xf32>
    %1548 = vector.extract_strided_slice %973 {offsets = [1, 0, 0], sizes = [1, 2, 64], strides = [1, 1, 1]} : vector<4x2x64xf32> to vector<1x2x64xf32>
    %1549 = vector.shape_cast %1548 : vector<1x2x64xf32> to vector<2x64xf32>
    %c86_132 = arith.constant 86 : index
    %1550 = memref.load %arg6[%c86_132] : memref<144xf32, #tpu.memory_space<smem>>
    %1551 = vector.broadcast %1550 : f32 to vector<2x64xf32>
    %1552 = arith.mulf %1549, %1551 : vector<2x64xf32>
    %1553 = arith.addf %1547, %1552 : vector<2x64xf32>
    %1554 = vector.extract_strided_slice %973 {offsets = [2, 0, 0], sizes = [1, 2, 64], strides = [1, 1, 1]} : vector<4x2x64xf32> to vector<1x2x64xf32>
    %1555 = vector.shape_cast %1554 : vector<1x2x64xf32> to vector<2x64xf32>
    %c90_133 = arith.constant 90 : index
    %1556 = memref.load %arg6[%c90_133] : memref<144xf32, #tpu.memory_space<smem>>
    %1557 = vector.broadcast %1556 : f32 to vector<2x64xf32>
    %1558 = arith.mulf %1555, %1557 : vector<2x64xf32>
    %1559 = arith.addf %1553, %1558 : vector<2x64xf32>
    %1560 = vector.extract_strided_slice %973 {offsets = [3, 0, 0], sizes = [1, 2, 64], strides = [1, 1, 1]} : vector<4x2x64xf32> to vector<1x2x64xf32>
    %1561 = vector.shape_cast %1560 : vector<1x2x64xf32> to vector<2x64xf32>
    %c94_134 = arith.constant 94 : index
    %1562 = memref.load %arg6[%c94_134] : memref<144xf32, #tpu.memory_space<smem>>
    %1563 = vector.broadcast %1562 : f32 to vector<2x64xf32>
    %1564 = arith.mulf %1561, %1563 : vector<2x64xf32>
    %1565 = arith.addf %1559, %1564 : vector<2x64xf32>
    %1566 = vector.extract_strided_slice %976 {offsets = [0, 0, 0], sizes = [1, 2, 64], strides = [1, 1, 1]} : vector<4x2x64xf32> to vector<1x2x64xf32>
    %1567 = vector.shape_cast %1566 : vector<1x2x64xf32> to vector<2x64xf32>
    %c98_135 = arith.constant 98 : index
    %1568 = memref.load %arg6[%c98_135] : memref<144xf32, #tpu.memory_space<smem>>
    %1569 = vector.broadcast %1568 : f32 to vector<2x64xf32>
    %1570 = arith.mulf %1567, %1569 : vector<2x64xf32>
    %1571 = arith.addf %1565, %1570 : vector<2x64xf32>
    %1572 = vector.extract_strided_slice %976 {offsets = [1, 0, 0], sizes = [1, 2, 64], strides = [1, 1, 1]} : vector<4x2x64xf32> to vector<1x2x64xf32>
    %1573 = vector.shape_cast %1572 : vector<1x2x64xf32> to vector<2x64xf32>
    %c102_136 = arith.constant 102 : index
    %1574 = memref.load %arg6[%c102_136] : memref<144xf32, #tpu.memory_space<smem>>
    %1575 = vector.broadcast %1574 : f32 to vector<2x64xf32>
    %1576 = arith.mulf %1573, %1575 : vector<2x64xf32>
    %1577 = arith.addf %1571, %1576 : vector<2x64xf32>
    %1578 = vector.extract_strided_slice %976 {offsets = [2, 0, 0], sizes = [1, 2, 64], strides = [1, 1, 1]} : vector<4x2x64xf32> to vector<1x2x64xf32>
    %1579 = vector.shape_cast %1578 : vector<1x2x64xf32> to vector<2x64xf32>
    %c106_137 = arith.constant 106 : index
    %1580 = memref.load %arg6[%c106_137] : memref<144xf32, #tpu.memory_space<smem>>
    %1581 = vector.broadcast %1580 : f32 to vector<2x64xf32>
    %1582 = arith.mulf %1579, %1581 : vector<2x64xf32>
    %1583 = arith.addf %1577, %1582 : vector<2x64xf32>
    %1584 = vector.extract_strided_slice %976 {offsets = [3, 0, 0], sizes = [1, 2, 64], strides = [1, 1, 1]} : vector<4x2x64xf32> to vector<1x2x64xf32>
    %1585 = vector.shape_cast %1584 : vector<1x2x64xf32> to vector<2x64xf32>
    %c110_138 = arith.constant 110 : index
    %1586 = memref.load %arg6[%c110_138] : memref<144xf32, #tpu.memory_space<smem>>
    %1587 = vector.broadcast %1586 : f32 to vector<2x64xf32>
    %1588 = arith.mulf %1585, %1587 : vector<2x64xf32>
    %1589 = arith.addf %1583, %1588 : vector<2x64xf32>
    %1590 = vector.extract_strided_slice %977 {offsets = [0, 0, 0], sizes = [1, 2, 64], strides = [1, 1, 1]} : vector<4x2x64xf32> to vector<1x2x64xf32>
    %1591 = vector.shape_cast %1590 : vector<1x2x64xf32> to vector<2x64xf32>
    %c114_139 = arith.constant 114 : index
    %1592 = memref.load %arg6[%c114_139] : memref<144xf32, #tpu.memory_space<smem>>
    %1593 = vector.broadcast %1592 : f32 to vector<2x64xf32>
    %1594 = arith.mulf %1591, %1593 : vector<2x64xf32>
    %1595 = arith.addf %1589, %1594 : vector<2x64xf32>
    %1596 = vector.extract_strided_slice %977 {offsets = [1, 0, 0], sizes = [1, 2, 64], strides = [1, 1, 1]} : vector<4x2x64xf32> to vector<1x2x64xf32>
    %1597 = vector.shape_cast %1596 : vector<1x2x64xf32> to vector<2x64xf32>
    %c118_140 = arith.constant 118 : index
    %1598 = memref.load %arg6[%c118_140] : memref<144xf32, #tpu.memory_space<smem>>
    %1599 = vector.broadcast %1598 : f32 to vector<2x64xf32>
    %1600 = arith.mulf %1597, %1599 : vector<2x64xf32>
    %1601 = arith.addf %1595, %1600 : vector<2x64xf32>
    %1602 = vector.extract_strided_slice %977 {offsets = [2, 0, 0], sizes = [1, 2, 64], strides = [1, 1, 1]} : vector<4x2x64xf32> to vector<1x2x64xf32>
    %1603 = vector.shape_cast %1602 : vector<1x2x64xf32> to vector<2x64xf32>
    %c122_141 = arith.constant 122 : index
    %1604 = memref.load %arg6[%c122_141] : memref<144xf32, #tpu.memory_space<smem>>
    %1605 = vector.broadcast %1604 : f32 to vector<2x64xf32>
    %1606 = arith.mulf %1603, %1605 : vector<2x64xf32>
    %1607 = arith.addf %1601, %1606 : vector<2x64xf32>
    %1608 = vector.extract_strided_slice %977 {offsets = [3, 0, 0], sizes = [1, 2, 64], strides = [1, 1, 1]} : vector<4x2x64xf32> to vector<1x2x64xf32>
    %1609 = vector.shape_cast %1608 : vector<1x2x64xf32> to vector<2x64xf32>
    %c126_142 = arith.constant 126 : index
    %1610 = memref.load %arg6[%c126_142] : memref<144xf32, #tpu.memory_space<smem>>
    %1611 = vector.broadcast %1610 : f32 to vector<2x64xf32>
    %1612 = arith.mulf %1609, %1611 : vector<2x64xf32>
    %1613 = arith.addf %1607, %1612 : vector<2x64xf32>
    %1614 = vector.extract_strided_slice %980 {offsets = [0, 0, 0], sizes = [1, 2, 64], strides = [1, 1, 1]} : vector<4x2x64xf32> to vector<1x2x64xf32>
    %1615 = vector.shape_cast %1614 : vector<1x2x64xf32> to vector<2x64xf32>
    %c130_143 = arith.constant 130 : index
    %1616 = memref.load %arg6[%c130_143] : memref<144xf32, #tpu.memory_space<smem>>
    %1617 = vector.broadcast %1616 : f32 to vector<2x64xf32>
    %1618 = arith.mulf %1615, %1617 : vector<2x64xf32>
    %1619 = arith.addf %1613, %1618 : vector<2x64xf32>
    %1620 = vector.extract_strided_slice %980 {offsets = [1, 0, 0], sizes = [1, 2, 64], strides = [1, 1, 1]} : vector<4x2x64xf32> to vector<1x2x64xf32>
    %1621 = vector.shape_cast %1620 : vector<1x2x64xf32> to vector<2x64xf32>
    %c134_144 = arith.constant 134 : index
    %1622 = memref.load %arg6[%c134_144] : memref<144xf32, #tpu.memory_space<smem>>
    %1623 = vector.broadcast %1622 : f32 to vector<2x64xf32>
    %1624 = arith.mulf %1621, %1623 : vector<2x64xf32>
    %1625 = arith.addf %1619, %1624 : vector<2x64xf32>
    %1626 = vector.extract_strided_slice %980 {offsets = [2, 0, 0], sizes = [1, 2, 64], strides = [1, 1, 1]} : vector<4x2x64xf32> to vector<1x2x64xf32>
    %1627 = vector.shape_cast %1626 : vector<1x2x64xf32> to vector<2x64xf32>
    %c138_145 = arith.constant 138 : index
    %1628 = memref.load %arg6[%c138_145] : memref<144xf32, #tpu.memory_space<smem>>
    %1629 = vector.broadcast %1628 : f32 to vector<2x64xf32>
    %1630 = arith.mulf %1627, %1629 : vector<2x64xf32>
    %1631 = arith.addf %1625, %1630 : vector<2x64xf32>
    %1632 = vector.extract_strided_slice %980 {offsets = [3, 0, 0], sizes = [1, 2, 64], strides = [1, 1, 1]} : vector<4x2x64xf32> to vector<1x2x64xf32>
    %1633 = vector.shape_cast %1632 : vector<1x2x64xf32> to vector<2x64xf32>
    %c142_146 = arith.constant 142 : index
    %1634 = memref.load %arg6[%c142_146] : memref<144xf32, #tpu.memory_space<smem>>
    %1635 = vector.broadcast %1634 : f32 to vector<2x64xf32>
    %1636 = arith.mulf %1633, %1635 : vector<2x64xf32>
    %1637 = arith.addf %1631, %1636 : vector<2x64xf32>
    %c2_147 = arith.constant 2 : index
    %1638 = memref.load %arg7[%c2_147] : memref<4xf32, #tpu.memory_space<smem>>
    %1639 = vector.broadcast %1638 : f32 to vector<2x64xf32>
    %1640 = arith.addf %1637, %1639 : vector<2x64xf32>
    %cst_148 = arith.constant 0.000000e+00 : f32
    %1641 = vector.broadcast %cst_148 : f32 to vector<2x64xf32>
    %1642 = vector.extract_strided_slice %962 {offsets = [0, 0, 0], sizes = [1, 2, 64], strides = [1, 1, 1]} : vector<4x2x64xf32> to vector<1x2x64xf32>
    %1643 = vector.shape_cast %1642 : vector<1x2x64xf32> to vector<2x64xf32>
    %c3_149 = arith.constant 3 : index
    %1644 = memref.load %arg6[%c3_149] : memref<144xf32, #tpu.memory_space<smem>>
    %1645 = vector.broadcast %1644 : f32 to vector<2x64xf32>
    %1646 = arith.mulf %1643, %1645 : vector<2x64xf32>
    %1647 = arith.addf %1641, %1646 : vector<2x64xf32>
    %1648 = vector.extract_strided_slice %962 {offsets = [1, 0, 0], sizes = [1, 2, 64], strides = [1, 1, 1]} : vector<4x2x64xf32> to vector<1x2x64xf32>
    %1649 = vector.shape_cast %1648 : vector<1x2x64xf32> to vector<2x64xf32>
    %c7_150 = arith.constant 7 : index
    %1650 = memref.load %arg6[%c7_150] : memref<144xf32, #tpu.memory_space<smem>>
    %1651 = vector.broadcast %1650 : f32 to vector<2x64xf32>
    %1652 = arith.mulf %1649, %1651 : vector<2x64xf32>
    %1653 = arith.addf %1647, %1652 : vector<2x64xf32>
    %1654 = vector.extract_strided_slice %962 {offsets = [2, 0, 0], sizes = [1, 2, 64], strides = [1, 1, 1]} : vector<4x2x64xf32> to vector<1x2x64xf32>
    %1655 = vector.shape_cast %1654 : vector<1x2x64xf32> to vector<2x64xf32>
    %c11_151 = arith.constant 11 : index
    %1656 = memref.load %arg6[%c11_151] : memref<144xf32, #tpu.memory_space<smem>>
    %1657 = vector.broadcast %1656 : f32 to vector<2x64xf32>
    %1658 = arith.mulf %1655, %1657 : vector<2x64xf32>
    %1659 = arith.addf %1653, %1658 : vector<2x64xf32>
    %1660 = vector.extract_strided_slice %962 {offsets = [3, 0, 0], sizes = [1, 2, 64], strides = [1, 1, 1]} : vector<4x2x64xf32> to vector<1x2x64xf32>
    %1661 = vector.shape_cast %1660 : vector<1x2x64xf32> to vector<2x64xf32>
    %c15_152 = arith.constant 15 : index
    %1662 = memref.load %arg6[%c15_152] : memref<144xf32, #tpu.memory_space<smem>>
    %1663 = vector.broadcast %1662 : f32 to vector<2x64xf32>
    %1664 = arith.mulf %1661, %1663 : vector<2x64xf32>
    %1665 = arith.addf %1659, %1664 : vector<2x64xf32>
    %1666 = vector.extract_strided_slice %963 {offsets = [0, 0, 0], sizes = [1, 2, 64], strides = [1, 1, 1]} : vector<4x2x64xf32> to vector<1x2x64xf32>
    %1667 = vector.shape_cast %1666 : vector<1x2x64xf32> to vector<2x64xf32>
    %c19_153 = arith.constant 19 : index
    %1668 = memref.load %arg6[%c19_153] : memref<144xf32, #tpu.memory_space<smem>>
    %1669 = vector.broadcast %1668 : f32 to vector<2x64xf32>
    %1670 = arith.mulf %1667, %1669 : vector<2x64xf32>
    %1671 = arith.addf %1665, %1670 : vector<2x64xf32>
    %1672 = vector.extract_strided_slice %963 {offsets = [1, 0, 0], sizes = [1, 2, 64], strides = [1, 1, 1]} : vector<4x2x64xf32> to vector<1x2x64xf32>
    %1673 = vector.shape_cast %1672 : vector<1x2x64xf32> to vector<2x64xf32>
    %c23_154 = arith.constant 23 : index
    %1674 = memref.load %arg6[%c23_154] : memref<144xf32, #tpu.memory_space<smem>>
    %1675 = vector.broadcast %1674 : f32 to vector<2x64xf32>
    %1676 = arith.mulf %1673, %1675 : vector<2x64xf32>
    %1677 = arith.addf %1671, %1676 : vector<2x64xf32>
    %1678 = vector.extract_strided_slice %963 {offsets = [2, 0, 0], sizes = [1, 2, 64], strides = [1, 1, 1]} : vector<4x2x64xf32> to vector<1x2x64xf32>
    %1679 = vector.shape_cast %1678 : vector<1x2x64xf32> to vector<2x64xf32>
    %c27_155 = arith.constant 27 : index
    %1680 = memref.load %arg6[%c27_155] : memref<144xf32, #tpu.memory_space<smem>>
    %1681 = vector.broadcast %1680 : f32 to vector<2x64xf32>
    %1682 = arith.mulf %1679, %1681 : vector<2x64xf32>
    %1683 = arith.addf %1677, %1682 : vector<2x64xf32>
    %1684 = vector.extract_strided_slice %963 {offsets = [3, 0, 0], sizes = [1, 2, 64], strides = [1, 1, 1]} : vector<4x2x64xf32> to vector<1x2x64xf32>
    %1685 = vector.shape_cast %1684 : vector<1x2x64xf32> to vector<2x64xf32>
    %c31_156 = arith.constant 31 : index
    %1686 = memref.load %arg6[%c31_156] : memref<144xf32, #tpu.memory_space<smem>>
    %1687 = vector.broadcast %1686 : f32 to vector<2x64xf32>
    %1688 = arith.mulf %1685, %1687 : vector<2x64xf32>
    %1689 = arith.addf %1683, %1688 : vector<2x64xf32>
    %1690 = vector.extract_strided_slice %966 {offsets = [0, 0, 0], sizes = [1, 2, 64], strides = [1, 1, 1]} : vector<4x2x64xf32> to vector<1x2x64xf32>
    %1691 = vector.shape_cast %1690 : vector<1x2x64xf32> to vector<2x64xf32>
    %c35_157 = arith.constant 35 : index
    %1692 = memref.load %arg6[%c35_157] : memref<144xf32, #tpu.memory_space<smem>>
    %1693 = vector.broadcast %1692 : f32 to vector<2x64xf32>
    %1694 = arith.mulf %1691, %1693 : vector<2x64xf32>
    %1695 = arith.addf %1689, %1694 : vector<2x64xf32>
    %1696 = vector.extract_strided_slice %966 {offsets = [1, 0, 0], sizes = [1, 2, 64], strides = [1, 1, 1]} : vector<4x2x64xf32> to vector<1x2x64xf32>
    %1697 = vector.shape_cast %1696 : vector<1x2x64xf32> to vector<2x64xf32>
    %c39_158 = arith.constant 39 : index
    %1698 = memref.load %arg6[%c39_158] : memref<144xf32, #tpu.memory_space<smem>>
    %1699 = vector.broadcast %1698 : f32 to vector<2x64xf32>
    %1700 = arith.mulf %1697, %1699 : vector<2x64xf32>
    %1701 = arith.addf %1695, %1700 : vector<2x64xf32>
    %1702 = vector.extract_strided_slice %966 {offsets = [2, 0, 0], sizes = [1, 2, 64], strides = [1, 1, 1]} : vector<4x2x64xf32> to vector<1x2x64xf32>
    %1703 = vector.shape_cast %1702 : vector<1x2x64xf32> to vector<2x64xf32>
    %c43_159 = arith.constant 43 : index
    %1704 = memref.load %arg6[%c43_159] : memref<144xf32, #tpu.memory_space<smem>>
    %1705 = vector.broadcast %1704 : f32 to vector<2x64xf32>
    %1706 = arith.mulf %1703, %1705 : vector<2x64xf32>
    %1707 = arith.addf %1701, %1706 : vector<2x64xf32>
    %1708 = vector.extract_strided_slice %966 {offsets = [3, 0, 0], sizes = [1, 2, 64], strides = [1, 1, 1]} : vector<4x2x64xf32> to vector<1x2x64xf32>
    %1709 = vector.shape_cast %1708 : vector<1x2x64xf32> to vector<2x64xf32>
    %c47_160 = arith.constant 47 : index
    %1710 = memref.load %arg6[%c47_160] : memref<144xf32, #tpu.memory_space<smem>>
    %1711 = vector.broadcast %1710 : f32 to vector<2x64xf32>
    %1712 = arith.mulf %1709, %1711 : vector<2x64xf32>
    %1713 = arith.addf %1707, %1712 : vector<2x64xf32>
    %1714 = vector.extract_strided_slice %969 {offsets = [0, 0, 0], sizes = [1, 2, 64], strides = [1, 1, 1]} : vector<4x2x64xf32> to vector<1x2x64xf32>
    %1715 = vector.shape_cast %1714 : vector<1x2x64xf32> to vector<2x64xf32>
    %c51_161 = arith.constant 51 : index
    %1716 = memref.load %arg6[%c51_161] : memref<144xf32, #tpu.memory_space<smem>>
    %1717 = vector.broadcast %1716 : f32 to vector<2x64xf32>
    %1718 = arith.mulf %1715, %1717 : vector<2x64xf32>
    %1719 = arith.addf %1713, %1718 : vector<2x64xf32>
    %1720 = vector.extract_strided_slice %969 {offsets = [1, 0, 0], sizes = [1, 2, 64], strides = [1, 1, 1]} : vector<4x2x64xf32> to vector<1x2x64xf32>
    %1721 = vector.shape_cast %1720 : vector<1x2x64xf32> to vector<2x64xf32>
    %c55_162 = arith.constant 55 : index
    %1722 = memref.load %arg6[%c55_162] : memref<144xf32, #tpu.memory_space<smem>>
    %1723 = vector.broadcast %1722 : f32 to vector<2x64xf32>
    %1724 = arith.mulf %1721, %1723 : vector<2x64xf32>
    %1725 = arith.addf %1719, %1724 : vector<2x64xf32>
    %1726 = vector.extract_strided_slice %969 {offsets = [2, 0, 0], sizes = [1, 2, 64], strides = [1, 1, 1]} : vector<4x2x64xf32> to vector<1x2x64xf32>
    %1727 = vector.shape_cast %1726 : vector<1x2x64xf32> to vector<2x64xf32>
    %c59_163 = arith.constant 59 : index
    %1728 = memref.load %arg6[%c59_163] : memref<144xf32, #tpu.memory_space<smem>>
    %1729 = vector.broadcast %1728 : f32 to vector<2x64xf32>
    %1730 = arith.mulf %1727, %1729 : vector<2x64xf32>
    %1731 = arith.addf %1725, %1730 : vector<2x64xf32>
    %1732 = vector.extract_strided_slice %969 {offsets = [3, 0, 0], sizes = [1, 2, 64], strides = [1, 1, 1]} : vector<4x2x64xf32> to vector<1x2x64xf32>
    %1733 = vector.shape_cast %1732 : vector<1x2x64xf32> to vector<2x64xf32>
    %c63_164 = arith.constant 63 : index
    %1734 = memref.load %arg6[%c63_164] : memref<144xf32, #tpu.memory_space<smem>>
    %1735 = vector.broadcast %1734 : f32 to vector<2x64xf32>
    %1736 = arith.mulf %1733, %1735 : vector<2x64xf32>
    %1737 = arith.addf %1731, %1736 : vector<2x64xf32>
    %1738 = vector.extract_strided_slice %970 {offsets = [0, 0, 0], sizes = [1, 2, 64], strides = [1, 1, 1]} : vector<4x2x64xf32> to vector<1x2x64xf32>
    %1739 = vector.shape_cast %1738 : vector<1x2x64xf32> to vector<2x64xf32>
    %c67_165 = arith.constant 67 : index
    %1740 = memref.load %arg6[%c67_165] : memref<144xf32, #tpu.memory_space<smem>>
    %1741 = vector.broadcast %1740 : f32 to vector<2x64xf32>
    %1742 = arith.mulf %1739, %1741 : vector<2x64xf32>
    %1743 = arith.addf %1737, %1742 : vector<2x64xf32>
    %1744 = vector.extract_strided_slice %970 {offsets = [1, 0, 0], sizes = [1, 2, 64], strides = [1, 1, 1]} : vector<4x2x64xf32> to vector<1x2x64xf32>
    %1745 = vector.shape_cast %1744 : vector<1x2x64xf32> to vector<2x64xf32>
    %c71_166 = arith.constant 71 : index
    %1746 = memref.load %arg6[%c71_166] : memref<144xf32, #tpu.memory_space<smem>>
    %1747 = vector.broadcast %1746 : f32 to vector<2x64xf32>
    %1748 = arith.mulf %1745, %1747 : vector<2x64xf32>
    %1749 = arith.addf %1743, %1748 : vector<2x64xf32>
    %1750 = vector.extract_strided_slice %970 {offsets = [2, 0, 0], sizes = [1, 2, 64], strides = [1, 1, 1]} : vector<4x2x64xf32> to vector<1x2x64xf32>
    %1751 = vector.shape_cast %1750 : vector<1x2x64xf32> to vector<2x64xf32>
    %c75_167 = arith.constant 75 : index
    %1752 = memref.load %arg6[%c75_167] : memref<144xf32, #tpu.memory_space<smem>>
    %1753 = vector.broadcast %1752 : f32 to vector<2x64xf32>
    %1754 = arith.mulf %1751, %1753 : vector<2x64xf32>
    %1755 = arith.addf %1749, %1754 : vector<2x64xf32>
    %1756 = vector.extract_strided_slice %970 {offsets = [3, 0, 0], sizes = [1, 2, 64], strides = [1, 1, 1]} : vector<4x2x64xf32> to vector<1x2x64xf32>
    %1757 = vector.shape_cast %1756 : vector<1x2x64xf32> to vector<2x64xf32>
    %c79_168 = arith.constant 79 : index
    %1758 = memref.load %arg6[%c79_168] : memref<144xf32, #tpu.memory_space<smem>>
    %1759 = vector.broadcast %1758 : f32 to vector<2x64xf32>
    %1760 = arith.mulf %1757, %1759 : vector<2x64xf32>
    %1761 = arith.addf %1755, %1760 : vector<2x64xf32>
    %1762 = vector.extract_strided_slice %973 {offsets = [0, 0, 0], sizes = [1, 2, 64], strides = [1, 1, 1]} : vector<4x2x64xf32> to vector<1x2x64xf32>
    %1763 = vector.shape_cast %1762 : vector<1x2x64xf32> to vector<2x64xf32>
    %c83_169 = arith.constant 83 : index
    %1764 = memref.load %arg6[%c83_169] : memref<144xf32, #tpu.memory_space<smem>>
    %1765 = vector.broadcast %1764 : f32 to vector<2x64xf32>
    %1766 = arith.mulf %1763, %1765 : vector<2x64xf32>
    %1767 = arith.addf %1761, %1766 : vector<2x64xf32>
    %1768 = vector.extract_strided_slice %973 {offsets = [1, 0, 0], sizes = [1, 2, 64], strides = [1, 1, 1]} : vector<4x2x64xf32> to vector<1x2x64xf32>
    %1769 = vector.shape_cast %1768 : vector<1x2x64xf32> to vector<2x64xf32>
    %c87_170 = arith.constant 87 : index
    %1770 = memref.load %arg6[%c87_170] : memref<144xf32, #tpu.memory_space<smem>>
    %1771 = vector.broadcast %1770 : f32 to vector<2x64xf32>
    %1772 = arith.mulf %1769, %1771 : vector<2x64xf32>
    %1773 = arith.addf %1767, %1772 : vector<2x64xf32>
    %1774 = vector.extract_strided_slice %973 {offsets = [2, 0, 0], sizes = [1, 2, 64], strides = [1, 1, 1]} : vector<4x2x64xf32> to vector<1x2x64xf32>
    %1775 = vector.shape_cast %1774 : vector<1x2x64xf32> to vector<2x64xf32>
    %c91_171 = arith.constant 91 : index
    %1776 = memref.load %arg6[%c91_171] : memref<144xf32, #tpu.memory_space<smem>>
    %1777 = vector.broadcast %1776 : f32 to vector<2x64xf32>
    %1778 = arith.mulf %1775, %1777 : vector<2x64xf32>
    %1779 = arith.addf %1773, %1778 : vector<2x64xf32>
    %1780 = vector.extract_strided_slice %973 {offsets = [3, 0, 0], sizes = [1, 2, 64], strides = [1, 1, 1]} : vector<4x2x64xf32> to vector<1x2x64xf32>
    %1781 = vector.shape_cast %1780 : vector<1x2x64xf32> to vector<2x64xf32>
    %c95_172 = arith.constant 95 : index
    %1782 = memref.load %arg6[%c95_172] : memref<144xf32, #tpu.memory_space<smem>>
    %1783 = vector.broadcast %1782 : f32 to vector<2x64xf32>
    %1784 = arith.mulf %1781, %1783 : vector<2x64xf32>
    %1785 = arith.addf %1779, %1784 : vector<2x64xf32>
    %1786 = vector.extract_strided_slice %976 {offsets = [0, 0, 0], sizes = [1, 2, 64], strides = [1, 1, 1]} : vector<4x2x64xf32> to vector<1x2x64xf32>
    %1787 = vector.shape_cast %1786 : vector<1x2x64xf32> to vector<2x64xf32>
    %c99_173 = arith.constant 99 : index
    %1788 = memref.load %arg6[%c99_173] : memref<144xf32, #tpu.memory_space<smem>>
    %1789 = vector.broadcast %1788 : f32 to vector<2x64xf32>
    %1790 = arith.mulf %1787, %1789 : vector<2x64xf32>
    %1791 = arith.addf %1785, %1790 : vector<2x64xf32>
    %1792 = vector.extract_strided_slice %976 {offsets = [1, 0, 0], sizes = [1, 2, 64], strides = [1, 1, 1]} : vector<4x2x64xf32> to vector<1x2x64xf32>
    %1793 = vector.shape_cast %1792 : vector<1x2x64xf32> to vector<2x64xf32>
    %c103_174 = arith.constant 103 : index
    %1794 = memref.load %arg6[%c103_174] : memref<144xf32, #tpu.memory_space<smem>>
    %1795 = vector.broadcast %1794 : f32 to vector<2x64xf32>
    %1796 = arith.mulf %1793, %1795 : vector<2x64xf32>
    %1797 = arith.addf %1791, %1796 : vector<2x64xf32>
    %1798 = vector.extract_strided_slice %976 {offsets = [2, 0, 0], sizes = [1, 2, 64], strides = [1, 1, 1]} : vector<4x2x64xf32> to vector<1x2x64xf32>
    %1799 = vector.shape_cast %1798 : vector<1x2x64xf32> to vector<2x64xf32>
    %c107_175 = arith.constant 107 : index
    %1800 = memref.load %arg6[%c107_175] : memref<144xf32, #tpu.memory_space<smem>>
    %1801 = vector.broadcast %1800 : f32 to vector<2x64xf32>
    %1802 = arith.mulf %1799, %1801 : vector<2x64xf32>
    %1803 = arith.addf %1797, %1802 : vector<2x64xf32>
    %1804 = vector.extract_strided_slice %976 {offsets = [3, 0, 0], sizes = [1, 2, 64], strides = [1, 1, 1]} : vector<4x2x64xf32> to vector<1x2x64xf32>
    %1805 = vector.shape_cast %1804 : vector<1x2x64xf32> to vector<2x64xf32>
    %c111_176 = arith.constant 111 : index
    %1806 = memref.load %arg6[%c111_176] : memref<144xf32, #tpu.memory_space<smem>>
    %1807 = vector.broadcast %1806 : f32 to vector<2x64xf32>
    %1808 = arith.mulf %1805, %1807 : vector<2x64xf32>
    %1809 = arith.addf %1803, %1808 : vector<2x64xf32>
    %1810 = vector.extract_strided_slice %977 {offsets = [0, 0, 0], sizes = [1, 2, 64], strides = [1, 1, 1]} : vector<4x2x64xf32> to vector<1x2x64xf32>
    %1811 = vector.shape_cast %1810 : vector<1x2x64xf32> to vector<2x64xf32>
    %c115_177 = arith.constant 115 : index
    %1812 = memref.load %arg6[%c115_177] : memref<144xf32, #tpu.memory_space<smem>>
    %1813 = vector.broadcast %1812 : f32 to vector<2x64xf32>
    %1814 = arith.mulf %1811, %1813 : vector<2x64xf32>
    %1815 = arith.addf %1809, %1814 : vector<2x64xf32>
    %1816 = vector.extract_strided_slice %977 {offsets = [1, 0, 0], sizes = [1, 2, 64], strides = [1, 1, 1]} : vector<4x2x64xf32> to vector<1x2x64xf32>
    %1817 = vector.shape_cast %1816 : vector<1x2x64xf32> to vector<2x64xf32>
    %c119_178 = arith.constant 119 : index
    %1818 = memref.load %arg6[%c119_178] : memref<144xf32, #tpu.memory_space<smem>>
    %1819 = vector.broadcast %1818 : f32 to vector<2x64xf32>
    %1820 = arith.mulf %1817, %1819 : vector<2x64xf32>
    %1821 = arith.addf %1815, %1820 : vector<2x64xf32>
    %1822 = vector.extract_strided_slice %977 {offsets = [2, 0, 0], sizes = [1, 2, 64], strides = [1, 1, 1]} : vector<4x2x64xf32> to vector<1x2x64xf32>
    %1823 = vector.shape_cast %1822 : vector<1x2x64xf32> to vector<2x64xf32>
    %c123_179 = arith.constant 123 : index
    %1824 = memref.load %arg6[%c123_179] : memref<144xf32, #tpu.memory_space<smem>>
    %1825 = vector.broadcast %1824 : f32 to vector<2x64xf32>
    %1826 = arith.mulf %1823, %1825 : vector<2x64xf32>
    %1827 = arith.addf %1821, %1826 : vector<2x64xf32>
    %1828 = vector.extract_strided_slice %977 {offsets = [3, 0, 0], sizes = [1, 2, 64], strides = [1, 1, 1]} : vector<4x2x64xf32> to vector<1x2x64xf32>
    %1829 = vector.shape_cast %1828 : vector<1x2x64xf32> to vector<2x64xf32>
    %c127_180 = arith.constant 127 : index
    %1830 = memref.load %arg6[%c127_180] : memref<144xf32, #tpu.memory_space<smem>>
    %1831 = vector.broadcast %1830 : f32 to vector<2x64xf32>
    %1832 = arith.mulf %1829, %1831 : vector<2x64xf32>
    %1833 = arith.addf %1827, %1832 : vector<2x64xf32>
    %1834 = vector.extract_strided_slice %980 {offsets = [0, 0, 0], sizes = [1, 2, 64], strides = [1, 1, 1]} : vector<4x2x64xf32> to vector<1x2x64xf32>
    %1835 = vector.shape_cast %1834 : vector<1x2x64xf32> to vector<2x64xf32>
    %c131_181 = arith.constant 131 : index
    %1836 = memref.load %arg6[%c131_181] : memref<144xf32, #tpu.memory_space<smem>>
    %1837 = vector.broadcast %1836 : f32 to vector<2x64xf32>
    %1838 = arith.mulf %1835, %1837 : vector<2x64xf32>
    %1839 = arith.addf %1833, %1838 : vector<2x64xf32>
    %1840 = vector.extract_strided_slice %980 {offsets = [1, 0, 0], sizes = [1, 2, 64], strides = [1, 1, 1]} : vector<4x2x64xf32> to vector<1x2x64xf32>
    %1841 = vector.shape_cast %1840 : vector<1x2x64xf32> to vector<2x64xf32>
    %c135_182 = arith.constant 135 : index
    %1842 = memref.load %arg6[%c135_182] : memref<144xf32, #tpu.memory_space<smem>>
    %1843 = vector.broadcast %1842 : f32 to vector<2x64xf32>
    %1844 = arith.mulf %1841, %1843 : vector<2x64xf32>
    %1845 = arith.addf %1839, %1844 : vector<2x64xf32>
    %1846 = vector.extract_strided_slice %980 {offsets = [2, 0, 0], sizes = [1, 2, 64], strides = [1, 1, 1]} : vector<4x2x64xf32> to vector<1x2x64xf32>
    %1847 = vector.shape_cast %1846 : vector<1x2x64xf32> to vector<2x64xf32>
    %c139_183 = arith.constant 139 : index
    %1848 = memref.load %arg6[%c139_183] : memref<144xf32, #tpu.memory_space<smem>>
    %1849 = vector.broadcast %1848 : f32 to vector<2x64xf32>
    %1850 = arith.mulf %1847, %1849 : vector<2x64xf32>
    %1851 = arith.addf %1845, %1850 : vector<2x64xf32>
    %1852 = vector.extract_strided_slice %980 {offsets = [3, 0, 0], sizes = [1, 2, 64], strides = [1, 1, 1]} : vector<4x2x64xf32> to vector<1x2x64xf32>
    %1853 = vector.shape_cast %1852 : vector<1x2x64xf32> to vector<2x64xf32>
    %c143_184 = arith.constant 143 : index
    %1854 = memref.load %arg6[%c143_184] : memref<144xf32, #tpu.memory_space<smem>>
    %1855 = vector.broadcast %1854 : f32 to vector<2x64xf32>
    %1856 = arith.mulf %1853, %1855 : vector<2x64xf32>
    %1857 = arith.addf %1851, %1856 : vector<2x64xf32>
    %c3_185 = arith.constant 3 : index
    %1858 = memref.load %arg7[%c3_185] : memref<4xf32, #tpu.memory_space<smem>>
    %1859 = vector.broadcast %1858 : f32 to vector<2x64xf32>
    %1860 = arith.addf %1857, %1859 : vector<2x64xf32>
    %1861 = vector.shape_cast %1200 : vector<2x64xf32> to vector<1x2x64xf32>
    %1862 = vector.shape_cast %1420 : vector<2x64xf32> to vector<1x2x64xf32>
    %1863 = vector.shape_cast %1640 : vector<2x64xf32> to vector<1x2x64xf32>
    %1864 = vector.shape_cast %1860 : vector<2x64xf32> to vector<1x2x64xf32>
    %1865 = tpu.concatenate %1861, %1862, %1863, %1864 in 0 : vector<1x2x64xf32>, vector<1x2x64xf32>, vector<1x2x64xf32>, vector<1x2x64xf32> -> vector<4x2x64xf32>
    %cst_186 = arith.constant dense<0.000000e+00> : vector<4x2xf32>
    %1866 = vector.multi_reduction <add>, %1865, %cst_186 [2] : vector<4x2x64xf32> to vector<4x2xf32>
    %1867 = vector.shape_cast %1866 : vector<4x2xf32> to vector<4x2x1xf32>
    %cst_187 = arith.constant 1.562500e-02 : f32
    %1868 = vector.broadcast %cst_187 : f32 to vector<4x2x1xf32>
    %1869 = arith.mulf %1867, %1868 : vector<4x2x1xf32>
    %1870 = arith.mulf %1865, %1865 : vector<4x2x64xf32>
    %cst_188 = arith.constant dense<0.000000e+00> : vector<4x2xf32>
    %1871 = vector.multi_reduction <add>, %1870, %cst_188 [2] : vector<4x2x64xf32> to vector<4x2xf32>
    %1872 = vector.shape_cast %1871 : vector<4x2xf32> to vector<4x2x1xf32>
    %cst_189 = arith.constant 1.562500e-02 : f32
    %1873 = vector.broadcast %cst_189 : f32 to vector<4x2x1xf32>
    %1874 = arith.mulf %1872, %1873 : vector<4x2x1xf32>
    %1875 = arith.mulf %1869, %1869 : vector<4x2x1xf32>
    %1876 = arith.subf %1874, %1875 : vector<4x2x1xf32>
    %1877 = vector.broadcast %1869 : vector<4x2x1xf32> to vector<4x2x64xf32>
    %1878 = arith.subf %1865, %1877 : vector<4x2x64xf32>
    %cst_190 = arith.constant 9.99999974E-6 : f32
    %1879 = vector.broadcast %cst_190 : f32 to vector<4x2x1xf32>
    %1880 = arith.addf %1876, %1879 : vector<4x2x1xf32>
    %1881 = math.rsqrt %1880 : vector<4x2x1xf32>
    %1882 = vector.broadcast %1881 : vector<4x2x1xf32> to vector<4x2x64xf32>
    %1883 = arith.mulf %1878, %1882 : vector<4x2x64xf32>
    %cst_191 = arith.constant 0.000000e+00 : f32
    %1884 = vector.broadcast %cst_191 : f32 to vector<4x2x64xf32>
    %1885 = arith.maximumf %1883, %1884 : vector<4x2x64xf32>
    %cst_192 = arith.constant 0.000000e+00 : f32
    %1886 = vector.broadcast %cst_192 : f32 to vector<2x64xf32>
    %1887 = vector.extract_strided_slice %1885 {offsets = [0, 0, 0], sizes = [1, 2, 64], strides = [1, 1, 1]} : vector<4x2x64xf32> to vector<1x2x64xf32>
    %1888 = vector.shape_cast %1887 : vector<1x2x64xf32> to vector<2x64xf32>
    %c0_193 = arith.constant 0 : index
    %1889 = memref.load %arg8[%c0_193] : memref<16xf32, #tpu.memory_space<smem>>
    %1890 = vector.broadcast %1889 : f32 to vector<2x64xf32>
    %1891 = arith.mulf %1888, %1890 : vector<2x64xf32>
    %1892 = arith.addf %1886, %1891 : vector<2x64xf32>
    %1893 = vector.extract_strided_slice %1885 {offsets = [1, 0, 0], sizes = [1, 2, 64], strides = [1, 1, 1]} : vector<4x2x64xf32> to vector<1x2x64xf32>
    %1894 = vector.shape_cast %1893 : vector<1x2x64xf32> to vector<2x64xf32>
    %c4_194 = arith.constant 4 : index
    %1895 = memref.load %arg8[%c4_194] : memref<16xf32, #tpu.memory_space<smem>>
    %1896 = vector.broadcast %1895 : f32 to vector<2x64xf32>
    %1897 = arith.mulf %1894, %1896 : vector<2x64xf32>
    %1898 = arith.addf %1892, %1897 : vector<2x64xf32>
    %1899 = vector.extract_strided_slice %1885 {offsets = [2, 0, 0], sizes = [1, 2, 64], strides = [1, 1, 1]} : vector<4x2x64xf32> to vector<1x2x64xf32>
    %1900 = vector.shape_cast %1899 : vector<1x2x64xf32> to vector<2x64xf32>
    %c8_195 = arith.constant 8 : index
    %1901 = memref.load %arg8[%c8_195] : memref<16xf32, #tpu.memory_space<smem>>
    %1902 = vector.broadcast %1901 : f32 to vector<2x64xf32>
    %1903 = arith.mulf %1900, %1902 : vector<2x64xf32>
    %1904 = arith.addf %1898, %1903 : vector<2x64xf32>
    %1905 = vector.extract_strided_slice %1885 {offsets = [3, 0, 0], sizes = [1, 2, 64], strides = [1, 1, 1]} : vector<4x2x64xf32> to vector<1x2x64xf32>
    %1906 = vector.shape_cast %1905 : vector<1x2x64xf32> to vector<2x64xf32>
    %c12_196 = arith.constant 12 : index
    %1907 = memref.load %arg8[%c12_196] : memref<16xf32, #tpu.memory_space<smem>>
    %1908 = vector.broadcast %1907 : f32 to vector<2x64xf32>
    %1909 = arith.mulf %1906, %1908 : vector<2x64xf32>
    %1910 = arith.addf %1904, %1909 : vector<2x64xf32>
    %c0_197 = arith.constant 0 : index
    %1911 = memref.load %arg9[%c0_197] : memref<4xf32, #tpu.memory_space<smem>>
    %1912 = vector.broadcast %1911 : f32 to vector<2x64xf32>
    %1913 = arith.addf %1910, %1912 : vector<2x64xf32>
    %cst_198 = arith.constant 0.000000e+00 : f32
    %1914 = vector.broadcast %cst_198 : f32 to vector<2x64xf32>
    %1915 = vector.extract_strided_slice %1885 {offsets = [0, 0, 0], sizes = [1, 2, 64], strides = [1, 1, 1]} : vector<4x2x64xf32> to vector<1x2x64xf32>
    %1916 = vector.shape_cast %1915 : vector<1x2x64xf32> to vector<2x64xf32>
    %c1_199 = arith.constant 1 : index
    %1917 = memref.load %arg8[%c1_199] : memref<16xf32, #tpu.memory_space<smem>>
    %1918 = vector.broadcast %1917 : f32 to vector<2x64xf32>
    %1919 = arith.mulf %1916, %1918 : vector<2x64xf32>
    %1920 = arith.addf %1914, %1919 : vector<2x64xf32>
    %1921 = vector.extract_strided_slice %1885 {offsets = [1, 0, 0], sizes = [1, 2, 64], strides = [1, 1, 1]} : vector<4x2x64xf32> to vector<1x2x64xf32>
    %1922 = vector.shape_cast %1921 : vector<1x2x64xf32> to vector<2x64xf32>
    %c5_200 = arith.constant 5 : index
    %1923 = memref.load %arg8[%c5_200] : memref<16xf32, #tpu.memory_space<smem>>
    %1924 = vector.broadcast %1923 : f32 to vector<2x64xf32>
    %1925 = arith.mulf %1922, %1924 : vector<2x64xf32>
    %1926 = arith.addf %1920, %1925 : vector<2x64xf32>
    %1927 = vector.extract_strided_slice %1885 {offsets = [2, 0, 0], sizes = [1, 2, 64], strides = [1, 1, 1]} : vector<4x2x64xf32> to vector<1x2x64xf32>
    %1928 = vector.shape_cast %1927 : vector<1x2x64xf32> to vector<2x64xf32>
    %c9_201 = arith.constant 9 : index
    %1929 = memref.load %arg8[%c9_201] : memref<16xf32, #tpu.memory_space<smem>>
    %1930 = vector.broadcast %1929 : f32 to vector<2x64xf32>
    %1931 = arith.mulf %1928, %1930 : vector<2x64xf32>
    %1932 = arith.addf %1926, %1931 : vector<2x64xf32>
    %1933 = vector.extract_strided_slice %1885 {offsets = [3, 0, 0], sizes = [1, 2, 64], strides = [1, 1, 1]} : vector<4x2x64xf32> to vector<1x2x64xf32>
    %1934 = vector.shape_cast %1933 : vector<1x2x64xf32> to vector<2x64xf32>
    %c13_202 = arith.constant 13 : index
    %1935 = memref.load %arg8[%c13_202] : memref<16xf32, #tpu.memory_space<smem>>
    %1936 = vector.broadcast %1935 : f32 to vector<2x64xf32>
    %1937 = arith.mulf %1934, %1936 : vector<2x64xf32>
    %1938 = arith.addf %1932, %1937 : vector<2x64xf32>
    %c1_203 = arith.constant 1 : index
    %1939 = memref.load %arg9[%c1_203] : memref<4xf32, #tpu.memory_space<smem>>
    %1940 = vector.broadcast %1939 : f32 to vector<2x64xf32>
    %1941 = arith.addf %1938, %1940 : vector<2x64xf32>
    %cst_204 = arith.constant 0.000000e+00 : f32
    %1942 = vector.broadcast %cst_204 : f32 to vector<2x64xf32>
    %1943 = vector.extract_strided_slice %1885 {offsets = [0, 0, 0], sizes = [1, 2, 64], strides = [1, 1, 1]} : vector<4x2x64xf32> to vector<1x2x64xf32>
    %1944 = vector.shape_cast %1943 : vector<1x2x64xf32> to vector<2x64xf32>
    %c2_205 = arith.constant 2 : index
    %1945 = memref.load %arg8[%c2_205] : memref<16xf32, #tpu.memory_space<smem>>
    %1946 = vector.broadcast %1945 : f32 to vector<2x64xf32>
    %1947 = arith.mulf %1944, %1946 : vector<2x64xf32>
    %1948 = arith.addf %1942, %1947 : vector<2x64xf32>
    %1949 = vector.extract_strided_slice %1885 {offsets = [1, 0, 0], sizes = [1, 2, 64], strides = [1, 1, 1]} : vector<4x2x64xf32> to vector<1x2x64xf32>
    %1950 = vector.shape_cast %1949 : vector<1x2x64xf32> to vector<2x64xf32>
    %c6_206 = arith.constant 6 : index
    %1951 = memref.load %arg8[%c6_206] : memref<16xf32, #tpu.memory_space<smem>>
    %1952 = vector.broadcast %1951 : f32 to vector<2x64xf32>
    %1953 = arith.mulf %1950, %1952 : vector<2x64xf32>
    %1954 = arith.addf %1948, %1953 : vector<2x64xf32>
    %1955 = vector.extract_strided_slice %1885 {offsets = [2, 0, 0], sizes = [1, 2, 64], strides = [1, 1, 1]} : vector<4x2x64xf32> to vector<1x2x64xf32>
    %1956 = vector.shape_cast %1955 : vector<1x2x64xf32> to vector<2x64xf32>
    %c10_207 = arith.constant 10 : index
    %1957 = memref.load %arg8[%c10_207] : memref<16xf32, #tpu.memory_space<smem>>
    %1958 = vector.broadcast %1957 : f32 to vector<2x64xf32>
    %1959 = arith.mulf %1956, %1958 : vector<2x64xf32>
    %1960 = arith.addf %1954, %1959 : vector<2x64xf32>
    %1961 = vector.extract_strided_slice %1885 {offsets = [3, 0, 0], sizes = [1, 2, 64], strides = [1, 1, 1]} : vector<4x2x64xf32> to vector<1x2x64xf32>
    %1962 = vector.shape_cast %1961 : vector<1x2x64xf32> to vector<2x64xf32>
    %c14_208 = arith.constant 14 : index
    %1963 = memref.load %arg8[%c14_208] : memref<16xf32, #tpu.memory_space<smem>>
    %1964 = vector.broadcast %1963 : f32 to vector<2x64xf32>
    %1965 = arith.mulf %1962, %1964 : vector<2x64xf32>
    %1966 = arith.addf %1960, %1965 : vector<2x64xf32>
    %c2_209 = arith.constant 2 : index
    %1967 = memref.load %arg9[%c2_209] : memref<4xf32, #tpu.memory_space<smem>>
    %1968 = vector.broadcast %1967 : f32 to vector<2x64xf32>
    %1969 = arith.addf %1966, %1968 : vector<2x64xf32>
    %cst_210 = arith.constant 0.000000e+00 : f32
    %1970 = vector.broadcast %cst_210 : f32 to vector<2x64xf32>
    %1971 = vector.extract_strided_slice %1885 {offsets = [0, 0, 0], sizes = [1, 2, 64], strides = [1, 1, 1]} : vector<4x2x64xf32> to vector<1x2x64xf32>
    %1972 = vector.shape_cast %1971 : vector<1x2x64xf32> to vector<2x64xf32>
    %c3_211 = arith.constant 3 : index
    %1973 = memref.load %arg8[%c3_211] : memref<16xf32, #tpu.memory_space<smem>>
    %1974 = vector.broadcast %1973 : f32 to vector<2x64xf32>
    %1975 = arith.mulf %1972, %1974 : vector<2x64xf32>
    %1976 = arith.addf %1970, %1975 : vector<2x64xf32>
    %1977 = vector.extract_strided_slice %1885 {offsets = [1, 0, 0], sizes = [1, 2, 64], strides = [1, 1, 1]} : vector<4x2x64xf32> to vector<1x2x64xf32>
    %1978 = vector.shape_cast %1977 : vector<1x2x64xf32> to vector<2x64xf32>
    %c7_212 = arith.constant 7 : index
    %1979 = memref.load %arg8[%c7_212] : memref<16xf32, #tpu.memory_space<smem>>
    %1980 = vector.broadcast %1979 : f32 to vector<2x64xf32>
    %1981 = arith.mulf %1978, %1980 : vector<2x64xf32>
    %1982 = arith.addf %1976, %1981 : vector<2x64xf32>
    %1983 = vector.extract_strided_slice %1885 {offsets = [2, 0, 0], sizes = [1, 2, 64], strides = [1, 1, 1]} : vector<4x2x64xf32> to vector<1x2x64xf32>
    %1984 = vector.shape_cast %1983 : vector<1x2x64xf32> to vector<2x64xf32>
    %c11_213 = arith.constant 11 : index
    %1985 = memref.load %arg8[%c11_213] : memref<16xf32, #tpu.memory_space<smem>>
    %1986 = vector.broadcast %1985 : f32 to vector<2x64xf32>
    %1987 = arith.mulf %1984, %1986 : vector<2x64xf32>
    %1988 = arith.addf %1982, %1987 : vector<2x64xf32>
    %1989 = vector.extract_strided_slice %1885 {offsets = [3, 0, 0], sizes = [1, 2, 64], strides = [1, 1, 1]} : vector<4x2x64xf32> to vector<1x2x64xf32>
    %1990 = vector.shape_cast %1989 : vector<1x2x64xf32> to vector<2x64xf32>
    %c15_214 = arith.constant 15 : index
    %1991 = memref.load %arg8[%c15_214] : memref<16xf32, #tpu.memory_space<smem>>
    %1992 = vector.broadcast %1991 : f32 to vector<2x64xf32>
    %1993 = arith.mulf %1990, %1992 : vector<2x64xf32>
    %1994 = arith.addf %1988, %1993 : vector<2x64xf32>
    %c3_215 = arith.constant 3 : index
    %1995 = memref.load %arg9[%c3_215] : memref<4xf32, #tpu.memory_space<smem>>
    %1996 = vector.broadcast %1995 : f32 to vector<2x64xf32>
    %1997 = arith.addf %1994, %1996 : vector<2x64xf32>
    %1998 = vector.shape_cast %1913 : vector<2x64xf32> to vector<1x2x64xf32>
    %1999 = vector.shape_cast %1941 : vector<2x64xf32> to vector<1x2x64xf32>
    %2000 = vector.shape_cast %1969 : vector<2x64xf32> to vector<1x2x64xf32>
    %2001 = vector.shape_cast %1997 : vector<2x64xf32> to vector<1x2x64xf32>
    %2002 = tpu.concatenate %1998, %1999, %2000, %2001 in 0 : vector<1x2x64xf32>, vector<1x2x64xf32>, vector<1x2x64xf32>, vector<1x2x64xf32> -> vector<4x2x64xf32>
    %cst_216 = arith.constant dense<0.000000e+00> : vector<4x2xf32>
    %2003 = vector.multi_reduction <add>, %2002, %cst_216 [2] : vector<4x2x64xf32> to vector<4x2xf32>
    %2004 = vector.shape_cast %2003 : vector<4x2xf32> to vector<4x2x1xf32>
    %2005 = vector.extract_strided_slice %2004 {offsets = [0, 0, 0], sizes = [1, 2, 1], strides = [1, 1, 1]} : vector<4x2x1xf32> to vector<1x2x1xf32>
    %2006 = vector.shape_cast %2005 : vector<1x2x1xf32> to vector<2x1xf32>
    %2007 = vector.extract_strided_slice %2004 {offsets = [1, 0, 0], sizes = [1, 2, 1], strides = [1, 1, 1]} : vector<4x2x1xf32> to vector<1x2x1xf32>
    %2008 = vector.shape_cast %2007 : vector<1x2x1xf32> to vector<2x1xf32>
    %2009 = arith.addf %2006, %2008 : vector<2x1xf32>
    %2010 = vector.extract_strided_slice %2004 {offsets = [2, 0, 0], sizes = [1, 2, 1], strides = [1, 1, 1]} : vector<4x2x1xf32> to vector<1x2x1xf32>
    %2011 = vector.shape_cast %2010 : vector<1x2x1xf32> to vector<2x1xf32>
    %2012 = arith.addf %2009, %2011 : vector<2x1xf32>
    %2013 = vector.extract_strided_slice %2004 {offsets = [3, 0, 0], sizes = [1, 2, 1], strides = [1, 1, 1]} : vector<4x2x1xf32> to vector<1x2x1xf32>
    %2014 = vector.shape_cast %2013 : vector<1x2x1xf32> to vector<2x1xf32>
    %2015 = arith.addf %2012, %2014 : vector<2x1xf32>
    %cst_217 = arith.constant 3.906250e-03 : f32
    %2016 = vector.broadcast %cst_217 : f32 to vector<2x1xf32>
    %2017 = arith.mulf %2015, %2016 : vector<2x1xf32>
    %2018 = arith.mulf %2002, %2002 : vector<4x2x64xf32>
    %cst_218 = arith.constant dense<0.000000e+00> : vector<4x2xf32>
    %2019 = vector.multi_reduction <add>, %2018, %cst_218 [2] : vector<4x2x64xf32> to vector<4x2xf32>
    %2020 = vector.shape_cast %2019 : vector<4x2xf32> to vector<4x2x1xf32>
    %2021 = vector.extract_strided_slice %2020 {offsets = [0, 0, 0], sizes = [1, 2, 1], strides = [1, 1, 1]} : vector<4x2x1xf32> to vector<1x2x1xf32>
    %2022 = vector.shape_cast %2021 : vector<1x2x1xf32> to vector<2x1xf32>
    %2023 = vector.extract_strided_slice %2020 {offsets = [1, 0, 0], sizes = [1, 2, 1], strides = [1, 1, 1]} : vector<4x2x1xf32> to vector<1x2x1xf32>
    %2024 = vector.shape_cast %2023 : vector<1x2x1xf32> to vector<2x1xf32>
    %2025 = arith.addf %2022, %2024 : vector<2x1xf32>
    %2026 = vector.extract_strided_slice %2020 {offsets = [2, 0, 0], sizes = [1, 2, 1], strides = [1, 1, 1]} : vector<4x2x1xf32> to vector<1x2x1xf32>
    %2027 = vector.shape_cast %2026 : vector<1x2x1xf32> to vector<2x1xf32>
    %2028 = arith.addf %2025, %2027 : vector<2x1xf32>
    %2029 = vector.extract_strided_slice %2020 {offsets = [3, 0, 0], sizes = [1, 2, 1], strides = [1, 1, 1]} : vector<4x2x1xf32> to vector<1x2x1xf32>
    %2030 = vector.shape_cast %2029 : vector<1x2x1xf32> to vector<2x1xf32>
    %2031 = arith.addf %2028, %2030 : vector<2x1xf32>
    %cst_219 = arith.constant 3.906250e-03 : f32
    %2032 = vector.broadcast %cst_219 : f32 to vector<2x1xf32>
    %2033 = arith.mulf %2031, %2032 : vector<2x1xf32>
    %2034 = arith.mulf %2017, %2017 : vector<2x1xf32>
    %2035 = arith.subf %2033, %2034 : vector<2x1xf32>
    %2036 = vector.shape_cast %2017 : vector<2x1xf32> to vector<1x2x1xf32>
    %2037 = vector.broadcast %2036 : vector<1x2x1xf32> to vector<4x2x64xf32>
    %2038 = arith.subf %2002, %2037 : vector<4x2x64xf32>
    %cst_220 = arith.constant 9.99999974E-6 : f32
    %2039 = vector.broadcast %cst_220 : f32 to vector<2x1xf32>
    %2040 = arith.addf %2035, %2039 : vector<2x1xf32>
    %2041 = math.rsqrt %2040 : vector<2x1xf32>
    %2042 = vector.shape_cast %2041 : vector<2x1xf32> to vector<1x2x1xf32>
    %2043 = vector.broadcast %2042 : vector<1x2x1xf32> to vector<4x2x64xf32>
    %2044 = arith.mulf %2038, %2043 : vector<4x2x64xf32>
    %2045 = vector.extract_strided_slice %2044 {offsets = [0, 0, 0], sizes = [1, 2, 64], strides = [1, 1, 1]} : vector<4x2x64xf32> to vector<1x2x64xf32>
    %2046 = vector.shape_cast %2045 : vector<1x2x64xf32> to vector<2x64xf32>
    %c0_221 = arith.constant 0 : index
    %2047 = memref.load %arg10[%c0_221] : memref<4xf32, #tpu.memory_space<smem>>
    %2048 = vector.broadcast %2047 : f32 to vector<2x64xf32>
    %2049 = arith.mulf %2046, %2048 : vector<2x64xf32>
    %c0_222 = arith.constant 0 : index
    %2050 = memref.load %arg11[%c0_222] : memref<4xf32, #tpu.memory_space<smem>>
    %2051 = vector.broadcast %2050 : f32 to vector<2x64xf32>
    %2052 = arith.addf %2049, %2051 : vector<2x64xf32>
    %2053 = vector.extract_strided_slice %2044 {offsets = [1, 0, 0], sizes = [1, 2, 64], strides = [1, 1, 1]} : vector<4x2x64xf32> to vector<1x2x64xf32>
    %2054 = vector.shape_cast %2053 : vector<1x2x64xf32> to vector<2x64xf32>
    %c1_223 = arith.constant 1 : index
    %2055 = memref.load %arg10[%c1_223] : memref<4xf32, #tpu.memory_space<smem>>
    %2056 = vector.broadcast %2055 : f32 to vector<2x64xf32>
    %2057 = arith.mulf %2054, %2056 : vector<2x64xf32>
    %c1_224 = arith.constant 1 : index
    %2058 = memref.load %arg11[%c1_224] : memref<4xf32, #tpu.memory_space<smem>>
    %2059 = vector.broadcast %2058 : f32 to vector<2x64xf32>
    %2060 = arith.addf %2057, %2059 : vector<2x64xf32>
    %2061 = vector.extract_strided_slice %2044 {offsets = [2, 0, 0], sizes = [1, 2, 64], strides = [1, 1, 1]} : vector<4x2x64xf32> to vector<1x2x64xf32>
    %2062 = vector.shape_cast %2061 : vector<1x2x64xf32> to vector<2x64xf32>
    %c2_225 = arith.constant 2 : index
    %2063 = memref.load %arg10[%c2_225] : memref<4xf32, #tpu.memory_space<smem>>
    %2064 = vector.broadcast %2063 : f32 to vector<2x64xf32>
    %2065 = arith.mulf %2062, %2064 : vector<2x64xf32>
    %c2_226 = arith.constant 2 : index
    %2066 = memref.load %arg11[%c2_226] : memref<4xf32, #tpu.memory_space<smem>>
    %2067 = vector.broadcast %2066 : f32 to vector<2x64xf32>
    %2068 = arith.addf %2065, %2067 : vector<2x64xf32>
    %2069 = vector.extract_strided_slice %2044 {offsets = [3, 0, 0], sizes = [1, 2, 64], strides = [1, 1, 1]} : vector<4x2x64xf32> to vector<1x2x64xf32>
    %2070 = vector.shape_cast %2069 : vector<1x2x64xf32> to vector<2x64xf32>
    %c3_227 = arith.constant 3 : index
    %2071 = memref.load %arg10[%c3_227] : memref<4xf32, #tpu.memory_space<smem>>
    %2072 = vector.broadcast %2071 : f32 to vector<2x64xf32>
    %2073 = arith.mulf %2070, %2072 : vector<2x64xf32>
    %c3_228 = arith.constant 3 : index
    %2074 = memref.load %arg11[%c3_228] : memref<4xf32, #tpu.memory_space<smem>>
    %2075 = vector.broadcast %2074 : f32 to vector<2x64xf32>
    %2076 = arith.addf %2073, %2075 : vector<2x64xf32>
    %2077 = vector.shape_cast %2052 : vector<2x64xf32> to vector<1x2x64xf32>
    %2078 = vector.shape_cast %2060 : vector<2x64xf32> to vector<1x2x64xf32>
    %2079 = vector.shape_cast %2068 : vector<2x64xf32> to vector<1x2x64xf32>
    %2080 = vector.shape_cast %2076 : vector<2x64xf32> to vector<1x2x64xf32>
    %2081 = tpu.concatenate %2077, %2078, %2079, %2080 in 0 : vector<1x2x64xf32>, vector<1x2x64xf32>, vector<1x2x64xf32>, vector<1x2x64xf32> -> vector<4x2x64xf32>
    %2082 = arith.negf %2081 : vector<4x2x64xf32>
    %2083 = math.exp %2082 : vector<4x2x64xf32>
    %cst_229 = arith.constant 1.000000e+00 : f32
    %2084 = vector.broadcast %cst_229 : f32 to vector<4x2x64xf32>
    %2085 = arith.addf %2084, %2083 : vector<4x2x64xf32>
    %2086 = arith.divf %2084, %2085 : vector<4x2x64xf32>
    %2087 = arith.mulf %30, %2086 : vector<4x2x64xf32>
    %2088 = arith.addf %958, %2087 : vector<4x2x64xf32>
    %cst_230 = arith.constant 0.000000e+00 : f32
    %2089 = vector.broadcast %cst_230 : f32 to vector<2x64xf32>
    %2090 = vector.extract_strided_slice %958 {offsets = [0, 0, 0], sizes = [1, 2, 64], strides = [1, 1, 1]} : vector<4x2x64xf32> to vector<1x2x64xf32>
    %2091 = vector.shape_cast %2090 : vector<1x2x64xf32> to vector<2x64xf32>
    %c0_231 = arith.constant 0 : index
    %2092 = memref.load %arg8[%c0_231] : memref<16xf32, #tpu.memory_space<smem>>
    %2093 = vector.broadcast %2092 : f32 to vector<2x64xf32>
    %2094 = arith.mulf %2091, %2093 : vector<2x64xf32>
    %2095 = arith.addf %2089, %2094 : vector<2x64xf32>
    %2096 = vector.extract_strided_slice %958 {offsets = [1, 0, 0], sizes = [1, 2, 64], strides = [1, 1, 1]} : vector<4x2x64xf32> to vector<1x2x64xf32>
    %2097 = vector.shape_cast %2096 : vector<1x2x64xf32> to vector<2x64xf32>
    %c4_232 = arith.constant 4 : index
    %2098 = memref.load %arg8[%c4_232] : memref<16xf32, #tpu.memory_space<smem>>
    %2099 = vector.broadcast %2098 : f32 to vector<2x64xf32>
    %2100 = arith.mulf %2097, %2099 : vector<2x64xf32>
    %2101 = arith.addf %2095, %2100 : vector<2x64xf32>
    %2102 = vector.extract_strided_slice %958 {offsets = [2, 0, 0], sizes = [1, 2, 64], strides = [1, 1, 1]} : vector<4x2x64xf32> to vector<1x2x64xf32>
    %2103 = vector.shape_cast %2102 : vector<1x2x64xf32> to vector<2x64xf32>
    %c8_233 = arith.constant 8 : index
    %2104 = memref.load %arg8[%c8_233] : memref<16xf32, #tpu.memory_space<smem>>
    %2105 = vector.broadcast %2104 : f32 to vector<2x64xf32>
    %2106 = arith.mulf %2103, %2105 : vector<2x64xf32>
    %2107 = arith.addf %2101, %2106 : vector<2x64xf32>
    %2108 = vector.extract_strided_slice %958 {offsets = [3, 0, 0], sizes = [1, 2, 64], strides = [1, 1, 1]} : vector<4x2x64xf32> to vector<1x2x64xf32>
    %2109 = vector.shape_cast %2108 : vector<1x2x64xf32> to vector<2x64xf32>
    %c12_234 = arith.constant 12 : index
    %2110 = memref.load %arg8[%c12_234] : memref<16xf32, #tpu.memory_space<smem>>
    %2111 = vector.broadcast %2110 : f32 to vector<2x64xf32>
    %2112 = arith.mulf %2109, %2111 : vector<2x64xf32>
    %2113 = arith.addf %2107, %2112 : vector<2x64xf32>
    %c0_235 = arith.constant 0 : index
    %2114 = memref.load %arg9[%c0_235] : memref<4xf32, #tpu.memory_space<smem>>
    %2115 = vector.broadcast %2114 : f32 to vector<2x64xf32>
    %2116 = arith.addf %2113, %2115 : vector<2x64xf32>
    %cst_236 = arith.constant 0.000000e+00 : f32
    %2117 = vector.broadcast %cst_236 : f32 to vector<2x64xf32>
    %2118 = vector.extract_strided_slice %958 {offsets = [0, 0, 0], sizes = [1, 2, 64], strides = [1, 1, 1]} : vector<4x2x64xf32> to vector<1x2x64xf32>
    %2119 = vector.shape_cast %2118 : vector<1x2x64xf32> to vector<2x64xf32>
    %c1_237 = arith.constant 1 : index
    %2120 = memref.load %arg8[%c1_237] : memref<16xf32, #tpu.memory_space<smem>>
    %2121 = vector.broadcast %2120 : f32 to vector<2x64xf32>
    %2122 = arith.mulf %2119, %2121 : vector<2x64xf32>
    %2123 = arith.addf %2117, %2122 : vector<2x64xf32>
    %2124 = vector.extract_strided_slice %958 {offsets = [1, 0, 0], sizes = [1, 2, 64], strides = [1, 1, 1]} : vector<4x2x64xf32> to vector<1x2x64xf32>
    %2125 = vector.shape_cast %2124 : vector<1x2x64xf32> to vector<2x64xf32>
    %c5_238 = arith.constant 5 : index
    %2126 = memref.load %arg8[%c5_238] : memref<16xf32, #tpu.memory_space<smem>>
    %2127 = vector.broadcast %2126 : f32 to vector<2x64xf32>
    %2128 = arith.mulf %2125, %2127 : vector<2x64xf32>
    %2129 = arith.addf %2123, %2128 : vector<2x64xf32>
    %2130 = vector.extract_strided_slice %958 {offsets = [2, 0, 0], sizes = [1, 2, 64], strides = [1, 1, 1]} : vector<4x2x64xf32> to vector<1x2x64xf32>
    %2131 = vector.shape_cast %2130 : vector<1x2x64xf32> to vector<2x64xf32>
    %c9_239 = arith.constant 9 : index
    %2132 = memref.load %arg8[%c9_239] : memref<16xf32, #tpu.memory_space<smem>>
    %2133 = vector.broadcast %2132 : f32 to vector<2x64xf32>
    %2134 = arith.mulf %2131, %2133 : vector<2x64xf32>
    %2135 = arith.addf %2129, %2134 : vector<2x64xf32>
    %2136 = vector.extract_strided_slice %958 {offsets = [3, 0, 0], sizes = [1, 2, 64], strides = [1, 1, 1]} : vector<4x2x64xf32> to vector<1x2x64xf32>
    %2137 = vector.shape_cast %2136 : vector<1x2x64xf32> to vector<2x64xf32>
    %c13_240 = arith.constant 13 : index
    %2138 = memref.load %arg8[%c13_240] : memref<16xf32, #tpu.memory_space<smem>>
    %2139 = vector.broadcast %2138 : f32 to vector<2x64xf32>
    %2140 = arith.mulf %2137, %2139 : vector<2x64xf32>
    %2141 = arith.addf %2135, %2140 : vector<2x64xf32>
    %c1_241 = arith.constant 1 : index
    %2142 = memref.load %arg9[%c1_241] : memref<4xf32, #tpu.memory_space<smem>>
    %2143 = vector.broadcast %2142 : f32 to vector<2x64xf32>
    %2144 = arith.addf %2141, %2143 : vector<2x64xf32>
    %cst_242 = arith.constant 0.000000e+00 : f32
    %2145 = vector.broadcast %cst_242 : f32 to vector<2x64xf32>
    %2146 = vector.extract_strided_slice %958 {offsets = [0, 0, 0], sizes = [1, 2, 64], strides = [1, 1, 1]} : vector<4x2x64xf32> to vector<1x2x64xf32>
    %2147 = vector.shape_cast %2146 : vector<1x2x64xf32> to vector<2x64xf32>
    %c2_243 = arith.constant 2 : index
    %2148 = memref.load %arg8[%c2_243] : memref<16xf32, #tpu.memory_space<smem>>
    %2149 = vector.broadcast %2148 : f32 to vector<2x64xf32>
    %2150 = arith.mulf %2147, %2149 : vector<2x64xf32>
    %2151 = arith.addf %2145, %2150 : vector<2x64xf32>
    %2152 = vector.extract_strided_slice %958 {offsets = [1, 0, 0], sizes = [1, 2, 64], strides = [1, 1, 1]} : vector<4x2x64xf32> to vector<1x2x64xf32>
    %2153 = vector.shape_cast %2152 : vector<1x2x64xf32> to vector<2x64xf32>
    %c6_244 = arith.constant 6 : index
    %2154 = memref.load %arg8[%c6_244] : memref<16xf32, #tpu.memory_space<smem>>
    %2155 = vector.broadcast %2154 : f32 to vector<2x64xf32>
    %2156 = arith.mulf %2153, %2155 : vector<2x64xf32>
    %2157 = arith.addf %2151, %2156 : vector<2x64xf32>
    %2158 = vector.extract_strided_slice %958 {offsets = [2, 0, 0], sizes = [1, 2, 64], strides = [1, 1, 1]} : vector<4x2x64xf32> to vector<1x2x64xf32>
    %2159 = vector.shape_cast %2158 : vector<1x2x64xf32> to vector<2x64xf32>
    %c10_245 = arith.constant 10 : index
    %2160 = memref.load %arg8[%c10_245] : memref<16xf32, #tpu.memory_space<smem>>
    %2161 = vector.broadcast %2160 : f32 to vector<2x64xf32>
    %2162 = arith.mulf %2159, %2161 : vector<2x64xf32>
    %2163 = arith.addf %2157, %2162 : vector<2x64xf32>
    %2164 = vector.extract_strided_slice %958 {offsets = [3, 0, 0], sizes = [1, 2, 64], strides = [1, 1, 1]} : vector<4x2x64xf32> to vector<1x2x64xf32>
    %2165 = vector.shape_cast %2164 : vector<1x2x64xf32> to vector<2x64xf32>
    %c14_246 = arith.constant 14 : index
    %2166 = memref.load %arg8[%c14_246] : memref<16xf32, #tpu.memory_space<smem>>
    %2167 = vector.broadcast %2166 : f32 to vector<2x64xf32>
    %2168 = arith.mulf %2165, %2167 : vector<2x64xf32>
    %2169 = arith.addf %2163, %2168 : vector<2x64xf32>
    %c2_247 = arith.constant 2 : index
    %2170 = memref.load %arg9[%c2_247] : memref<4xf32, #tpu.memory_space<smem>>
    %2171 = vector.broadcast %2170 : f32 to vector<2x64xf32>
    %2172 = arith.addf %2169, %2171 : vector<2x64xf32>
    %cst_248 = arith.constant 0.000000e+00 : f32
    %2173 = vector.broadcast %cst_248 : f32 to vector<2x64xf32>
    %2174 = vector.extract_strided_slice %958 {offsets = [0, 0, 0], sizes = [1, 2, 64], strides = [1, 1, 1]} : vector<4x2x64xf32> to vector<1x2x64xf32>
    %2175 = vector.shape_cast %2174 : vector<1x2x64xf32> to vector<2x64xf32>
    %c3_249 = arith.constant 3 : index
    %2176 = memref.load %arg8[%c3_249] : memref<16xf32, #tpu.memory_space<smem>>
    %2177 = vector.broadcast %2176 : f32 to vector<2x64xf32>
    %2178 = arith.mulf %2175, %2177 : vector<2x64xf32>
    %2179 = arith.addf %2173, %2178 : vector<2x64xf32>
    %2180 = vector.extract_strided_slice %958 {offsets = [1, 0, 0], sizes = [1, 2, 64], strides = [1, 1, 1]} : vector<4x2x64xf32> to vector<1x2x64xf32>
    %2181 = vector.shape_cast %2180 : vector<1x2x64xf32> to vector<2x64xf32>
    %c7_250 = arith.constant 7 : index
    %2182 = memref.load %arg8[%c7_250] : memref<16xf32, #tpu.memory_space<smem>>
    %2183 = vector.broadcast %2182 : f32 to vector<2x64xf32>
    %2184 = arith.mulf %2181, %2183 : vector<2x64xf32>
    %2185 = arith.addf %2179, %2184 : vector<2x64xf32>
    %2186 = vector.extract_strided_slice %958 {offsets = [2, 0, 0], sizes = [1, 2, 64], strides = [1, 1, 1]} : vector<4x2x64xf32> to vector<1x2x64xf32>
    %2187 = vector.shape_cast %2186 : vector<1x2x64xf32> to vector<2x64xf32>
    %c11_251 = arith.constant 11 : index
    %2188 = memref.load %arg8[%c11_251] : memref<16xf32, #tpu.memory_space<smem>>
    %2189 = vector.broadcast %2188 : f32 to vector<2x64xf32>
    %2190 = arith.mulf %2187, %2189 : vector<2x64xf32>
    %2191 = arith.addf %2185, %2190 : vector<2x64xf32>
    %2192 = vector.extract_strided_slice %958 {offsets = [3, 0, 0], sizes = [1, 2, 64], strides = [1, 1, 1]} : vector<4x2x64xf32> to vector<1x2x64xf32>
    %2193 = vector.shape_cast %2192 : vector<1x2x64xf32> to vector<2x64xf32>
    %c15_252 = arith.constant 15 : index
    %2194 = memref.load %arg8[%c15_252] : memref<16xf32, #tpu.memory_space<smem>>
    %2195 = vector.broadcast %2194 : f32 to vector<2x64xf32>
    %2196 = arith.mulf %2193, %2195 : vector<2x64xf32>
    %2197 = arith.addf %2191, %2196 : vector<2x64xf32>
    %c3_253 = arith.constant 3 : index
    %2198 = memref.load %arg9[%c3_253] : memref<4xf32, #tpu.memory_space<smem>>
    %2199 = vector.broadcast %2198 : f32 to vector<2x64xf32>
    %2200 = arith.addf %2197, %2199 : vector<2x64xf32>
    %2201 = vector.shape_cast %2116 : vector<2x64xf32> to vector<1x2x64xf32>
    %2202 = vector.shape_cast %2144 : vector<2x64xf32> to vector<1x2x64xf32>
    %2203 = vector.shape_cast %2172 : vector<2x64xf32> to vector<1x2x64xf32>
    %2204 = vector.shape_cast %2200 : vector<2x64xf32> to vector<1x2x64xf32>
    %2205 = tpu.concatenate %2201, %2202, %2203, %2204 in 0 : vector<1x2x64xf32>, vector<1x2x64xf32>, vector<1x2x64xf32>, vector<1x2x64xf32> -> vector<4x2x64xf32>
    %cst_254 = arith.constant dense<0.000000e+00> : vector<4x2xf32>
    %2206 = vector.multi_reduction <add>, %2205, %cst_254 [2] : vector<4x2x64xf32> to vector<4x2xf32>
    %2207 = vector.shape_cast %2206 : vector<4x2xf32> to vector<4x2x1xf32>
    %2208 = vector.extract_strided_slice %2207 {offsets = [0, 0, 0], sizes = [1, 2, 1], strides = [1, 1, 1]} : vector<4x2x1xf32> to vector<1x2x1xf32>
    %2209 = vector.shape_cast %2208 : vector<1x2x1xf32> to vector<2x1xf32>
    %2210 = vector.extract_strided_slice %2207 {offsets = [1, 0, 0], sizes = [1, 2, 1], strides = [1, 1, 1]} : vector<4x2x1xf32> to vector<1x2x1xf32>
    %2211 = vector.shape_cast %2210 : vector<1x2x1xf32> to vector<2x1xf32>
    %2212 = arith.addf %2209, %2211 : vector<2x1xf32>
    %2213 = vector.extract_strided_slice %2207 {offsets = [2, 0, 0], sizes = [1, 2, 1], strides = [1, 1, 1]} : vector<4x2x1xf32> to vector<1x2x1xf32>
    %2214 = vector.shape_cast %2213 : vector<1x2x1xf32> to vector<2x1xf32>
    %2215 = arith.addf %2212, %2214 : vector<2x1xf32>
    %2216 = vector.extract_strided_slice %2207 {offsets = [3, 0, 0], sizes = [1, 2, 1], strides = [1, 1, 1]} : vector<4x2x1xf32> to vector<1x2x1xf32>
    %2217 = vector.shape_cast %2216 : vector<1x2x1xf32> to vector<2x1xf32>
    %2218 = arith.addf %2215, %2217 : vector<2x1xf32>
    %cst_255 = arith.constant 3.906250e-03 : f32
    %2219 = vector.broadcast %cst_255 : f32 to vector<2x1xf32>
    %2220 = arith.mulf %2218, %2219 : vector<2x1xf32>
    %2221 = arith.mulf %2205, %2205 : vector<4x2x64xf32>
    %cst_256 = arith.constant dense<0.000000e+00> : vector<4x2xf32>
    %2222 = vector.multi_reduction <add>, %2221, %cst_256 [2] : vector<4x2x64xf32> to vector<4x2xf32>
    %2223 = vector.shape_cast %2222 : vector<4x2xf32> to vector<4x2x1xf32>
    %2224 = vector.extract_strided_slice %2223 {offsets = [0, 0, 0], sizes = [1, 2, 1], strides = [1, 1, 1]} : vector<4x2x1xf32> to vector<1x2x1xf32>
    %2225 = vector.shape_cast %2224 : vector<1x2x1xf32> to vector<2x1xf32>
    %2226 = vector.extract_strided_slice %2223 {offsets = [1, 0, 0], sizes = [1, 2, 1], strides = [1, 1, 1]} : vector<4x2x1xf32> to vector<1x2x1xf32>
    %2227 = vector.shape_cast %2226 : vector<1x2x1xf32> to vector<2x1xf32>
    %2228 = arith.addf %2225, %2227 : vector<2x1xf32>
    %2229 = vector.extract_strided_slice %2223 {offsets = [2, 0, 0], sizes = [1, 2, 1], strides = [1, 1, 1]} : vector<4x2x1xf32> to vector<1x2x1xf32>
    %2230 = vector.shape_cast %2229 : vector<1x2x1xf32> to vector<2x1xf32>
    %2231 = arith.addf %2228, %2230 : vector<2x1xf32>
    %2232 = vector.extract_strided_slice %2223 {offsets = [3, 0, 0], sizes = [1, 2, 1], strides = [1, 1, 1]} : vector<4x2x1xf32> to vector<1x2x1xf32>
    %2233 = vector.shape_cast %2232 : vector<1x2x1xf32> to vector<2x1xf32>
    %2234 = arith.addf %2231, %2233 : vector<2x1xf32>
    %cst_257 = arith.constant 3.906250e-03 : f32
    %2235 = vector.broadcast %cst_257 : f32 to vector<2x1xf32>
    %2236 = arith.mulf %2234, %2235 : vector<2x1xf32>
    %2237 = arith.mulf %2220, %2220 : vector<2x1xf32>
    %2238 = arith.subf %2236, %2237 : vector<2x1xf32>
    %2239 = vector.shape_cast %2220 : vector<2x1xf32> to vector<1x2x1xf32>
    %2240 = vector.broadcast %2239 : vector<1x2x1xf32> to vector<4x2x64xf32>
    %2241 = arith.subf %2205, %2240 : vector<4x2x64xf32>
    %cst_258 = arith.constant 9.99999974E-6 : f32
    %2242 = vector.broadcast %cst_258 : f32 to vector<2x1xf32>
    %2243 = arith.addf %2238, %2242 : vector<2x1xf32>
    %2244 = math.rsqrt %2243 : vector<2x1xf32>
    %2245 = vector.shape_cast %2244 : vector<2x1xf32> to vector<1x2x1xf32>
    %2246 = vector.broadcast %2245 : vector<1x2x1xf32> to vector<4x2x64xf32>
    %2247 = arith.mulf %2241, %2246 : vector<4x2x64xf32>
    %2248 = vector.extract_strided_slice %2247 {offsets = [0, 0, 0], sizes = [1, 2, 64], strides = [1, 1, 1]} : vector<4x2x64xf32> to vector<1x2x64xf32>
    %2249 = vector.shape_cast %2248 : vector<1x2x64xf32> to vector<2x64xf32>
    %c0_259 = arith.constant 0 : index
    %2250 = memref.load %arg10[%c0_259] : memref<4xf32, #tpu.memory_space<smem>>
    %2251 = vector.broadcast %2250 : f32 to vector<2x64xf32>
    %2252 = arith.mulf %2249, %2251 : vector<2x64xf32>
    %c0_260 = arith.constant 0 : index
    %2253 = memref.load %arg11[%c0_260] : memref<4xf32, #tpu.memory_space<smem>>
    %2254 = vector.broadcast %2253 : f32 to vector<2x64xf32>
    %2255 = arith.addf %2252, %2254 : vector<2x64xf32>
    %2256 = vector.extract_strided_slice %2247 {offsets = [1, 0, 0], sizes = [1, 2, 64], strides = [1, 1, 1]} : vector<4x2x64xf32> to vector<1x2x64xf32>
    %2257 = vector.shape_cast %2256 : vector<1x2x64xf32> to vector<2x64xf32>
    %c1_261 = arith.constant 1 : index
    %2258 = memref.load %arg10[%c1_261] : memref<4xf32, #tpu.memory_space<smem>>
    %2259 = vector.broadcast %2258 : f32 to vector<2x64xf32>
    %2260 = arith.mulf %2257, %2259 : vector<2x64xf32>
    %c1_262 = arith.constant 1 : index
    %2261 = memref.load %arg11[%c1_262] : memref<4xf32, #tpu.memory_space<smem>>
    %2262 = vector.broadcast %2261 : f32 to vector<2x64xf32>
    %2263 = arith.addf %2260, %2262 : vector<2x64xf32>
    %2264 = vector.extract_strided_slice %2247 {offsets = [2, 0, 0], sizes = [1, 2, 64], strides = [1, 1, 1]} : vector<4x2x64xf32> to vector<1x2x64xf32>
    %2265 = vector.shape_cast %2264 : vector<1x2x64xf32> to vector<2x64xf32>
    %c2_263 = arith.constant 2 : index
    %2266 = memref.load %arg10[%c2_263] : memref<4xf32, #tpu.memory_space<smem>>
    %2267 = vector.broadcast %2266 : f32 to vector<2x64xf32>
    %2268 = arith.mulf %2265, %2267 : vector<2x64xf32>
    %c2_264 = arith.constant 2 : index
    %2269 = memref.load %arg11[%c2_264] : memref<4xf32, #tpu.memory_space<smem>>
    %2270 = vector.broadcast %2269 : f32 to vector<2x64xf32>
    %2271 = arith.addf %2268, %2270 : vector<2x64xf32>
    %2272 = vector.extract_strided_slice %2247 {offsets = [3, 0, 0], sizes = [1, 2, 64], strides = [1, 1, 1]} : vector<4x2x64xf32> to vector<1x2x64xf32>
    %2273 = vector.shape_cast %2272 : vector<1x2x64xf32> to vector<2x64xf32>
    %c3_265 = arith.constant 3 : index
    %2274 = memref.load %arg10[%c3_265] : memref<4xf32, #tpu.memory_space<smem>>
    %2275 = vector.broadcast %2274 : f32 to vector<2x64xf32>
    %2276 = arith.mulf %2273, %2275 : vector<2x64xf32>
    %c3_266 = arith.constant 3 : index
    %2277 = memref.load %arg11[%c3_266] : memref<4xf32, #tpu.memory_space<smem>>
    %2278 = vector.broadcast %2277 : f32 to vector<2x64xf32>
    %2279 = arith.addf %2276, %2278 : vector<2x64xf32>
    %2280 = vector.shape_cast %2255 : vector<2x64xf32> to vector<1x2x64xf32>
    %2281 = vector.shape_cast %2263 : vector<2x64xf32> to vector<1x2x64xf32>
    %2282 = vector.shape_cast %2271 : vector<2x64xf32> to vector<1x2x64xf32>
    %2283 = vector.shape_cast %2279 : vector<2x64xf32> to vector<1x2x64xf32>
    %2284 = tpu.concatenate %2280, %2281, %2282, %2283 in 0 : vector<1x2x64xf32>, vector<1x2x64xf32>, vector<1x2x64xf32>, vector<1x2x64xf32> -> vector<4x2x64xf32>
    %2285 = arith.negf %2284 : vector<4x2x64xf32>
    %2286 = math.exp %2285 : vector<4x2x64xf32>
    %cst_267 = arith.constant 1.000000e+00 : f32
    %2287 = vector.broadcast %cst_267 : f32 to vector<4x2x64xf32>
    %2288 = arith.addf %2287, %2286 : vector<4x2x64xf32>
    %2289 = arith.divf %2287, %2288 : vector<4x2x64xf32>
    %2290 = arith.mulf %31, %2289 : vector<4x2x64xf32>
    %2291 = arith.addf %1885, %2290 : vector<4x2x64xf32>
    %2292 = tpu.concatenate %2088, %2291 in 2 : vector<4x2x64xf32>, vector<4x2x64xf32> -> vector<4x2x128xf32>
    %c0_268 = arith.constant 0 : index
    %c0_269 = arith.constant 0 : index
    %c0_270 = arith.constant 0 : index
    %2293 = vector.load %arg12[%c0_268, %c0_269, %c0_270] : memref<4x2x128xf32, #tpu.memory_space<vmem>>, vector<4x2x128xf32>
    tpu.vector_store %arg12[%c0_268, %c0_269, %c0_270], %2292 {strides = array<i32>} : memref<4x2x128xf32, #tpu.memory_space<vmem>>, vector<4x2x128xf32>,
    return
  }
}

</mosaic_0001>

<bundles_post_ra>
// kernel: split_block5_forward.1
= control target key start
LH: loop header
LB: loop body
LE: loop exit
PB: predicated region body
PF: predicated region fallthrough
CT: control target
= control target key end

     0   :  { %17 = vsyncpa [#allocation3], 0  ;;  %s5853_s0 = inlined_call_operand.vmem [shape: f32[4,2,64], index: 0, kind: input, shape index: {}]   ;;  %s5854_s1 = inlined_call_operand.vmem [shape: f32[4,2,64], index: 1, kind: input, shape index: {}]   ;;  %s5855_s2 = inlined_call_operand.vmem [shape: f32[4,2,64], index: 2, kind: input, shape index: {}]   ;;  %s5856_s3 = inlined_call_operand.vmem [shape: f32[4,2,64], index: 3, kind: input, shape index: {}]   ;;  %s5857_s4 = inlined_call_operand.vmem [shape: f32[144], index: 4, kind: input, shape index: {}]   ;;  %s5858_s5 = inlined_call_operand.vmem [shape: f32[4], index: 5, kind: input, shape index: {}]   ;;  %s5859_s6 = inlined_call_operand.vmem [shape: f32[144], index: 6, kind: input, shape index: {}]   ;;  %s5860_s7 = inlined_call_operand.vmem [shape: f32[4], index: 7, kind: input, shape index: {}]   ;;  %s5861_s8 = inlined_call_operand.vmem [shape: f32[16], index: 8, kind: input, shape index: {}]   ;;  %s5862_s9 = inlined_call_operand.vmem [shape: f32[4], index: 9, kind: input, shape index: {}]   ;;  %s5863_s10 = inlined_call_operand.vmem [shape: f32[4], index: 10, kind: input, shape index: {}]   ;;  %s5864_s11 = inlined_call_operand.vmem [shape: f32[4], index: 11, kind: input, shape index: {}]   ;;  %s5865_s12 = inlined_call_operand.vmem [shape: f32[4,2,128], index: 12, kind: output, shape index: {}]  }
   0x1   :  { %18 = vsyncpa [#allocation5], 0 }
   0x2   :  { %19 = vsyncpa [#allocation8], 0 }
   0x3   :  { %20 = vsyncpa [#allocation11], 0  ;;  %s46_s23 = sshll.u32 %s5858_s5, 4  ;;  %s47_s23 = int_to_ptr.vmem [resolvable:$true] %s46_s23 }
   0x4   :  { %21 = vsyncpa [#allocation14], 0  ;;  %s66_s26 = sshll.u32 %s5860_s7, 4  ;;  %s3351_s27 = scalar_lea.vmem %s47_s23, 16  ;;  %s67_s26 = int_to_ptr.vmem [resolvable:$true] %s66_s26 }
   0x5   :  { %p3352_p0 = scmp.ne.s32.totalorder %s47_s23, %s3351_s27  ;;  %p3356_p1 = scmp.lt.s32.totalorder %s47_s23, %s47_s23 }
   0x6   :  { %p3357_p2 = scmp.lt.s32.totalorder %s3351_s27, %s3351_s27 }
   0x8   :  { %p3358_p3 = por %p3357_p2, %p3356_p1 }
   0xa   :  { %p3359_p4 = pnand %p3358_p3, %p3352_p0 }
   0xc   :  { %3362 = shalt.err (!%p3359_p4)
}
   0xd   :  { %s3457_s28 = smov [#allocation4]   ;;  %s3363_s29 = scalar_lea.vmem %s67_s26, 16 }
   0xe   :  { %49 = dma.vmem_to_smem %s47_s23, 16, %s3457_s28, [#allocation5]  }
   0xf   :  { %p3364_p5 = scmp.ne.s32.totalorder %s67_s26, %s3363_s29  ;;  %p3368_p6 = scmp.lt.s32.totalorder %s67_s26, %s67_s26 }
  0x10   :  { %p3369_p7 = scmp.lt.s32.totalorder %s3363_s29, %s3363_s29 }
  0x12   :  { %p3370_p8 = por %p3369_p7, %p3368_p6 }
  0x14   :  { %p3371_p9 = pnand %p3370_p8, %p3364_p5 }
  0x16   :  { %3374 = shalt.err (!%p3371_p9)
}
  0x17   :  { %s3458_s5 = smov [#allocation7]   ;;  %s86_s13 = sshll.u32 %s5862_s9, 4  ;;  %s87_s13 = int_to_ptr.vmem [resolvable:$true] %s86_s13 }
  0x18   :  { %69 = dma.vmem_to_smem %s67_s26, 16, %s3458_s5, [#allocation8]  }
  0x19   :  { %s36_s16 = sshll.u32 %s5857_s4, 4  ;;  %s3375_s17 = scalar_lea.vmem %s87_s13, 16  ;;  %s37_s16 = int_to_ptr.vmem [resolvable:$true] %s36_s16 }
  0x1a   :  { %p3376_p10 = scmp.ne.s32.totalorder %s87_s13, %s3375_s17  ;;  %p3380_p11 = scmp.lt.s32.totalorder %s87_s13, %s87_s13 }
  0x1b   :  { %p3381_p12 = scmp.lt.s32.totalorder %s3375_s17, %s3375_s17 }
  0x1d   :  { %p3382_p13 = por %p3381_p12, %p3380_p11 }
  0x1f   :  { %p3383_p0 = pnand %p3382_p13, %p3376_p10 }
  0x21   :  { %3386 = shalt.err (!%p3383_p0)
}
  0x22   :  { %s3459_s18 = smov [#allocation10]   ;;  %s3387_s19 = scalar_lea.vmem %s37_s16, 32 }
  0x23   :  { %89 = dma.vmem_to_smem %s87_s13, 16, %s3459_s18, [#allocation11]  }
  0x24   :  { %p3388_p1 = scmp.ne.s32.totalorder %s37_s16, %s3387_s19  ;;  %p3392_p2 = scmp.lt.s32.totalorder %s37_s16, %s37_s16 }
  0x25   :  { %p3393_p3 = scmp.lt.s32.totalorder %s3387_s19, %s3387_s19 }
  0x27   :  { %p3394_p4 = por %p3393_p3, %p3392_p2 }
  0x29   :  { %p3395_p5 = pnand %p3394_p4, %p3388_p1 }
  0x2b   :  { %3398 = shalt.err (!%p3395_p5)
}
  0x2c   :  { %s3460_s9 = smov [#allocation2]   ;;  %s56_s21 = sshll.u32 %s5859_s6, 4  ;;  %s57_s21 = int_to_ptr.vmem [resolvable:$true] %s56_s21 }
  0x2d   :  { %39 = dma.vmem_to_smem %s37_s16, 32, %s3460_s9, [#allocation3]  }
  0x2e   :  { %s76_s24 = sshll.u32 %s5861_s8, 4  ;;  %s3399_s25 = scalar_lea.vmem %s57_s21, 32  ;;  %s77_s24 = int_to_ptr.vmem [resolvable:$true] %s76_s24 }
  0x2f   :  { %p3400_p6 = scmp.ne.s32.totalorder %s57_s21, %s3399_s25  ;;  %p3404_p7 = scmp.lt.s32.totalorder %s57_s21, %s57_s21 }
  0x30   :  { %p3405_p8 = scmp.lt.s32.totalorder %s3399_s25, %s3399_s25 }
  0x32   :  { %p3406_p9 = por %p3405_p8, %p3404_p7 }
  0x34   :  { %p3407_p10 = pnand %p3406_p9, %p3400_p6 }
  0x36   :  { %3410 = shalt.err (!%p3407_p10)
}
  0x37   :  { %s3461_s26 = smov [#allocation6]   ;;  %s3411_s27 = scalar_lea.vmem %s77_s24, 16 }
  0x38   :  { %59 = dma.vmem_to_smem %s57_s21, 32, %s3461_s26, [#allocation5]  }
  0x39   :  { %p3412_p11 = scmp.ne.s32.totalorder %s77_s24, %s3411_s27  ;;  %p3416_p12 = scmp.lt.s32.totalorder %s77_s24, %s77_s24 }
  0x3a   :  { %p3417_p13 = scmp.lt.s32.totalorder %s3411_s27, %s3411_s27 }
  0x3c   :  { %p3418_p0 = por %p3417_p13, %p3416_p12 }
  0x3e   :  { %p3419_p1 = pnand %p3418_p0, %p3412_p11 }
  0x40   :  { %3422 = shalt.err (!%p3419_p1)
}
  0x41   :  { %s3462_s6 = smov [#allocation9]   ;;  %s96_s29 = sshll.u32 %s5863_s10, 4  ;;  %s97_s29 = int_to_ptr.vmem [resolvable:$true] %s96_s29 }
  0x42   :  { %79 = dma.vmem_to_smem %s77_s24, 16, %s3462_s6, [#allocation8]  }
  0x43   :  { %s106_s30 = sshll.u32 %s5864_s11, 4  ;;  %s3423_s13 = scalar_lea.vmem %s97_s29, 16  ;;  %s107_s30 = int_to_ptr.vmem [resolvable:$true] %s106_s30 }
  0x44   :  { %p3424_p2 = scmp.ne.s32.totalorder %s97_s29, %s3423_s13  ;;  %p3428_p3 = scmp.lt.s32.totalorder %s97_s29, %s97_s29 }
  0x45   :  { %p3429_p4 = scmp.lt.s32.totalorder %s3423_s13, %s3423_s13 }
  0x47   :  { %p3430_p5 = por %p3429_p4, %p3428_p3 }
  0x49   :  { %p3431_p6 = pnand %p3430_p5, %p3424_p2 }
  0x4b   :  { %3434 = shalt.err (!%p3431_p6)
}
  0x4c   :  { %s3463_s14 = smov [#allocation12]   ;;  %s3435_s15 = scalar_lea.vmem %s107_s30, 16 }
  0x4d   :  { %99 = dma.vmem_to_smem %s97_s29, 16, %s3463_s14, [#allocation11]  }
  0x4e   :  { %p3436_p7 = scmp.ne.s32.totalorder %s107_s30, %s3435_s15  ;;  %p3440_p8 = scmp.lt.s32.totalorder %s107_s30, %s107_s30 }
  0x4f   :  { %p3441_p9 = scmp.lt.s32.totalorder %s3435_s15, %s3435_s15 }
  0x51   :  { %p3442_p10 = por %p3441_p9, %p3440_p8 }
  0x53   :  { %p3443_p11 = pnand %p3442_p10, %p3436_p7 }
  0x55   :  { %3446 = shalt.err (!%p3443_p11)
}
  0x56   :  { %s3464_s10 = smov [#allocation13]  }
  0x57   :  { %109 = dma.vmem_to_smem %s107_s30, 16, %s3464_s10, [#allocation14]  }
  0x58   :  { %3447 = dma.done.wait [#allocation3], 32  }
  0x59   :  { %3448 = vsyncadd [#allocation3], 4294967264 }
  0x5a   :  { %3449 = dma.done.wait [#allocation5], 48  }
  0x5b   :  { %3450 = vsyncadd [#allocation5], 4294967248 }
  0x5c   :  { %3451 = dma.done.wait [#allocation8], 32  }
  0x5d   :  { %3452 = vsyncadd [#allocation8], 4294967264 }
  0x5e   :  { %3453 = dma.done.wait [#allocation11], 32  }
  0x5f   :  { %3454 = vsyncadd [#allocation11], 4294967264 }
  0x60   :  { %3455 = dma.done.wait [#allocation14], 16  }
  0x61   :  { %3456 = vsyncadd [#allocation14], 4294967280 }
  0x62   :  { %134 = sfence }
  0x63   :  { %v155_v0 = vld [vmem:[%s5853_s0 + $0x4] sm:$0x3]  ;;  %v153_v1 = vld [vmem:[%s5853_s0] sm:$0x3]  ;;  %v135_v2 = vlaneseq  ;;  %s3465_s19 = smov 9   ;;  %v3466_v7 = vmov 0.0  }
  0x64   :  { %177 = vrot.lane.b32.xlu1 %v155_v0, %s3465_s19  ;;  %173 = vrot.lane.b32.xlu0 %v153_v1, %s3465_s19  ;;  %v156_v3 = vld [vmem:[%s5853_s0 + $0x6] sm:$0x3]  ;;  %v154_v4 = vld [vmem:[%s5853_s0 + $0x2] sm:$0x3]  ;;  %s3467_s22 = smov 2   ;;  %s3468_s23 = smov 8  }
  0x65   :  { %v136_v5 = vand.u32 127, %v135_v2  ;;  %s3469_s24 = smov 10   ;;  %s3470_s0 = smov 16   ;;  %vm185_vm2 = vcmask 72704   ;;  %vm190_vm3 = vcmask 596992   ;;  %vm1336_vm4 = vcmask 517120  }
  0x66   :  { %s3471_s25 = smov 18   ;;  %s2954_s26 = sld [smem:[#allocation2 + $0x10]]  ;;  %vm2933_vm5 = vcmask 523264  }
  0x67   :  { %v141_v6 = vand.u32 7, %v136_v5  ;;  %s2956_s27 = sld [smem:[#allocation2 + $0x18]]  ;;  %s3472_s7 = smov 127  }
  0x68   :  { %179 = vrot.lane.b32.xlu1 %v156_v3, %s3465_s19  ;;  %175 = vrot.lane.b32.xlu0 %v154_v4, %s3465_s19  ;;  %s2955_s6 = sld [smem:[#allocation2 + $0x14]]  ;;  %s3473_s17 = smov 119  }
  0x69   :  { %vm151_vm0 = vcmp.le.s32.totalorder %v141_v6, 6  ;;  %vm149_vm1 = vcmp.ge.s32.totalorder %v141_v6, 1  ;;  %s3590_s8 = sld [smem:[#allocation2 + $0x1c]] }
  0x6a   :  { %v152_v8 = vsel %vm151_vm0, 1.0, %v3466_v7  ;;  %v3586_v9 = vsel %vm149_vm1, 1.0, %v3466_v7  ;;  %s2966_s28 = sld [smem:[#allocation2 + $0x40]] }
  0x6b   :  { %s3601_s29 = sld [smem:[#allocation2 + $0x44]] }
  0x6c   :  { %200 = vrot.lane.b32.xlu0 %v152_v8, %s3467_s22  ;;  %208 = vrot.lane.b32.xlu1 %v3586_v9, %s3468_s23  ;;  %v253_v12 = vstv %s2954_s26  ;;  %s2968_s5 = sld [smem:[#allocation2 + $0x48]] }
  0x6d   :  { %v269_v17 = vstv %s2956_s27  ;;  %s2969_s30 = sld [smem:[#allocation2 + $0x4c]] }
  0x6e   :  { %v261_v21 = vstv %s2955_s6  ;;  %s2978_s13 = sld [smem:[#allocation2 + $0x70]] }
  0x6f   :  { %v277_v27 = vstv %s3590_s8  ;;  %s3615_s14 = sld [smem:[#allocation2 + $0x74]] }
  0x70   :  { %215 = vrot.lane.b32.xlu0 %v152_v8, %s3469_s24  ;;  %222 = vrot.lane.b32.xlu1 %v3586_v9, %s3470_s0  ;;  %v349_v29 = vstv %s2966_s28  ;;  %s3620_s15 = sld [smem:[#allocation2 + $0x78]]  ;;  %s3474_s0 = smov 111  }
  0x71   :  { %s3622_s10 = sld [smem:[#allocation2 + $0x7c]]  ;;  %v357_v32 = vstv %s3601_s29 }
  0x72   :  { %s3625_s11 = sld [smem:[#allocation2 + $0x11]]  ;;  %v365_v33 = vstv %s2968_s5 }
  0x73   :  { %s3628_s16 = sld [smem:[#allocation2 + $0x15]]  ;;  %v373_v36 = vstv %s2969_s30 }
  0x74   :  { %229 = vrot.lane.b32.xlu0 %v152_v8, %s3471_s25  ;;  %s3632_s18 = sld [smem:[#allocation2 + $0x19]]  ;;  %v445_v37 = vstv %s2978_s13 }
  0x75   :  { %s3634_s9 = sld [smem:[#allocation2]]  ;;  %v453_v40 = vstv %s3615_s14 }
  0x76   :  { %s3638_s4 = sld [smem:[#allocation2 + $0x4]]  ;;  %v461_v41 = vstv %s3620_s15 }
  0x77   :  { %s3640_s20 = sld [smem:[#allocation2 + $0x8]]  ;;  %v469_v47 = vstv %s3622_s10 }
  0x78   :  { %s3644_s21 = sld [smem:[#allocation2 + $0xc]]  ;;  %v528_v48 = vstv %s3625_s11 }
  0x79   :  { %s3646_s22 = sld [smem:[#allocation2 + $0x1]]  ;;  %v536_v54 = vstv %s3628_s16 }
  0x7a   :  { %s3650_s23 = sld [smem:[#allocation2 + $0x5]]  ;;  %v544_v61 = vstv %s3632_s18 }
  0x7b   :  { %s3654_s24 = sld [smem:[#allocation2 + $0x9]]  ;;  %v237_v45 = vstv %s3634_s9 }
  0x7c   :  { %s3658_s25 = sld [smem:[#allocation2 + $0xd]]  ;;  %v241_v46 = vstv %s3638_s4 }
  0x7d   :  { %s3660_s26 = sld [smem:[#allocation2 + $0x1d]]  ;;  %v245_v51 = vstv %s3640_s20  ;;  %s3475_s20 = smov 126  }
  0x7e   :  { %s3668_s27 = sld [smem:[#allocation2 + $0x41]]  ;;  %v249_v52 = vstv %s3644_s21 }
  0x7f   :  { %s3695_s6 = sld [smem:[#allocation2 + $0x45]]  ;;  %v512_v59 = vstv %s3646_s22 }
  0x80   :  { %v516_v60 = vstv %s3650_s23  ;;  %s3700_s8 = sld [smem:[#allocation2 + $0x49]] }
  0x81   :  { %v520_v1 = vstv %s3654_s24  ;;  %s3714_s28 = sld [smem:[#allocation2 + $0x4d]] }
  0x82   :  { %v524_v2 = vstv %s3658_s25  ;;  %s3716_s29 = sld [smem:[#allocation2 + $0x20]] }
  0x83   :  { %v552_v8 = vstv %s3660_s26  ;;  %s3724_s5 = sld [smem:[#allocation2 + $0x24]] }
  0x84   :  { %s3726_s30 = sld [smem:[#allocation2 + $0x28]] }
  0x85   :  { %s3730_s13 = sld [smem:[#allocation2 + $0x2c]] }
  0x86   :  { %s3738_s14 = sld [smem:[#allocation2 + $0x2]] }
  0x87   :  { %s3742_s15 = sld [smem:[#allocation2 + $0x6]] }
  0x88   :  { %s3744_s10 = sld [smem:[#allocation2 + $0xa]] }
  0x89   :  { %s3752_s11 = sld [smem:[#allocation2 + $0xe]] }
  0x8a   :  { %s3756_s16 = sld [smem:[#allocation2 + $0x30]] }
  0x8b   :  { %s3764_s18 = sld [smem:[#allocation2 + $0x34]] }
  0x8c   :  { %s3775_s9 = sld [smem:[#allocation2 + $0x38]] }
  0x8d   :  { %s3778_s4 = sld [smem:[#allocation2 + $0x3c]] }
  0x8e   :  { %s3782_s21 = sld [smem:[#allocation2 + $0x50]] }
  0x8f   :  { %s3794_s22 = sld [smem:[#allocation2 + $0x3]] }
  0x90   :  { %s3800_s23 = sld [smem:[#allocation2 + $0x7]] }
  0x91   :  { %s3806_s24 = sld [smem:[#allocation2 + $0xb]] }
  0x92   :  { %s3810_s25 = sld [smem:[#allocation2 + $0xf]] }
  0x93   :  { %s3824_s26 = sld [smem:[#allocation2 + $0x54]] }
  0xd6   :  { %v178_v10 = vpop.permute.xlu1 %177  ;;  %v174_v11 = vpop.permute.xlu0 %173 }
  0xd7   :  { %v188_v13 = vsel %vm185_vm2, 0.0, %v178_v10  ;;  %v186_v14 = vsel %vm185_vm2, 0.0, %v174_v11  ;;  %v624_v10 = vstv %s3668_s27  ;;  %s3830_s27 = sld [smem:[#allocation2 + $0x58]] }
  0xd8   :  { %v3595_v15 = vsel %vm190_vm3, %v188_v13, 0.0  ;;  %v3598_v16 = vsel %vm190_vm3, %v186_v14, 0.0 }
  0xd9   :  { %v254_v18 = vmul.f32 %v253_v12, %v3598_v16  ;;  %v270_v24 = vmul.f32 %v269_v17, %v3595_v15  ;;  %v350_v31 = vmul.f32 %v349_v29, %v3598_v16  ;;  %v366_v35 = vmul.f32 %v365_v33, %v3595_v15 }
  0xda   :  { %v180_v19 = vpop.permute.xlu1 %179  ;;  %v176_v20 = vpop.permute.xlu0 %175  ;;  %v446_v39 = vmul.f32 %v445_v37, %v3598_v16  ;;  %v3664_v42 = vmul.f32 %v3598_v16, %v3586_v9  ;;  %v462_v44 = vmul.f32 %v461_v41, %v3595_v15  ;;  %v3680_v50 = vmul.f32 %v3595_v15, %v3586_v9 }
  0xdb   :  { %v189_v22 = vsel %vm185_vm2, 0.0, %v180_v19  ;;  %v187_v23 = vsel %vm185_vm2, 0.0, %v176_v20  ;;  %256 = vrot.lane.b32.xlu1 %v254_v18, %s3472_s7  ;;  %v529_v58 = vmul.f32 %v528_v48, %v3598_v16  ;;  %v545_v7 = vmul.f32 %v544_v61, %v3595_v15 }
  0xdc   :  { %v3608_v25 = vsel %vm190_vm3, %v189_v22, 0.0  ;;  %v3611_v26 = vsel %vm190_vm3, %v187_v23, 0.0  ;;  %v238_v55 = vmul.f32 %v237_v45, %v3664_v42  ;;  %v246_v63 = vmul.f32 %v245_v51, %v3680_v50 }
  0xdd   :  { %v262_v28 = vmul.f32 %v261_v21, %v3611_v26  ;;  %v278_v30 = vmul.f32 %v277_v27, %v3608_v25  ;;  %v358_v34 = vmul.f32 %v357_v32, %v3611_v26  ;;  %v374_v38 = vmul.f32 %v373_v36, %v3608_v25 }
  0xde   :  { %v454_v43 = vmul.f32 %v453_v40, %v3611_v26  ;;  %v3676_v49 = vmul.f32 %v3611_v26, %v3586_v9  ;;  %v3688_v53 = vmul.f32 %v3608_v25, %v3586_v9  ;;  %v470_v57 = vmul.f32 %v469_v47, %v3608_v25  ;;  %v3732_v20 = vpop.permute.xlu0 %200  ;;  %v3766_v32 = vpop.permute.xlu1 %208 }
  0xdf   :  { %264 = vrot.lane.b32.xlu0 %v262_v28, %s3472_s7  ;;  %272 = vrot.lane.b32.xlu1 %v270_v24, %s3472_s7  ;;  %v513_v4 = vmul.f32 %v512_v59, %v3664_v42  ;;  %v537_v6 = vmul.f32 %v536_v54, %v3611_v26  ;;  %v521_v13 = vmul.f32 %v520_v1, %v3680_v50  ;;  %v632_v21 = vstv %s3695_s6  ;;  %s3476_s6 = smov 120  }
  0xe0   :  { %v242_v56 = vmul.f32 %v241_v46, %v3676_v49  ;;  %v250_v0 = vmul.f32 %v249_v52, %v3688_v53  ;;  %v517_v5 = vmul.f32 %v516_v60, %v3676_v49  ;;  %v525_v14 = vmul.f32 %v524_v2, %v3688_v53 }
  0xe1   :  { %v553_v18 = vmul.f32 %v552_v8, %v3608_v25  ;;  %v625_v19 = vmul.f32 %v624_v10, %v3598_v16  ;;  %v640_v22 = vstv %s3700_s8  ;;  %v633_v24 = vmul.f32 %v632_v21, %v3611_v26  ;;  %s3847_s8 = sld [smem:[#allocation2 + $0x5c]] }
  0xe2   :  { %v243_v62 = vadd.f32 %v242_v56, %v238_v55  ;;  %v518_v12 = vadd.f32 %v517_v5, %v513_v4  ;;  %v641_v27 = vmul.f32 %v640_v22, %v3595_v15  ;;  %v3750_v28 = vmul.f32 %v3732_v20, %v3598_v16  ;;  %v3826_v61 = vpop.permute.xlu0 %215 }
  0xe3   :  { %280 = vrot.lane.b32.xlu0 %v278_v30, %s3472_s7  ;;  %352 = vrot.lane.b32.xlu1 %v350_v31, %s3473_s17  ;;  %v648_v29 = vstv %s3714_s28  ;;  %v285_v30 = vstv %s3716_s29  ;;  %v3762_v31 = vmul.f32 %v3732_v20, %v3611_v26  ;;  %v3773_v36 = vmul.f32 %v3732_v20, %v3595_v15  ;;  %5875 = vst [vmem:[#allocation21_spill] sm:$0xff] %v3826_v61  ;;  %s3851_s28 = sld [smem:[#allocation2 + $0x60]] }
  0xe4   :  { %v247_v3 = vadd.f32 %v246_v63, %v243_v62  ;;  %v522_v17 = vadd.f32 %v521_v13, %v518_v12  ;;  %v649_v33 = vmul.f32 %v648_v29, %v3608_v25  ;;  %v301_v37 = vstv %s3726_s30  ;;  %s3870_s29 = sld [smem:[#allocation2 + $0x64]]  ;;  %s3477_s30 = smov 118  }
  0xe5   :  { %v3791_v40 = vmul.f32 %v3766_v32, %v3598_v16  ;;  %v787_v41 = vstv %s3738_s14  ;;  %v795_v45 = vstv %s3744_s10  ;;  %v799_v46 = vstv %s3752_s11  ;;  %s2982_s14 = sld [smem:[#allocation2 + $0x80]]  ;;  %s3478_s11 = smov 112  }
  0xe6   :  { %v3718_v11 = vadd.f32 %v250_v0, %v247_v3  ;;  %v3736_v23 = vadd.f32 %v525_v14, %v522_v17  ;;  %v309_v47 = vstv %s3730_s13  ;;  %v317_v48 = vstv %s3756_s16  ;;  %s2977_s13 = sld [smem:[#allocation2 + $0x6c]] }
  0xe7   :  { %360 = vrot.lane.b32.xlu0 %v358_v34, %s3473_s17  ;;  %368 = vrot.lane.b32.xlu1 %v366_v35, %s3473_s17  ;;  %v286_v34 = vmul.f32 %v285_v30, %v3750_v28  ;;  %v293_v35 = vstv %s3724_s5  ;;  %v788_v51 = vmul.f32 %v787_v41, %v3664_v42  ;;  %v796_v55 = vmul.f32 %v795_v45, %v3680_v50  ;;  %s2976_s5 = sld [smem:[#allocation2 + $0x68]] }
  0xe8   :  { %5874 = vst [vmem:[#allocation20_spill] sm:$0xff] %v3736_v23  ;;  %v800_v56 = vmul.f32 %v799_v46, %v3688_v53  ;;  %v3818_v59 = vmul.f32 %v3766_v32, %v3611_v26  ;;  %v3822_v60 = vmul.f32 %v3766_v32, %v3595_v15  ;;  %v325_v62 = vstv %s3764_s18  ;;  %s2984_s10 = sld [smem:[#allocation2 + $0x88]] }
  0xe9   :  { %v333_v63 = vstv %s3775_s9  ;;  %v3836_v1 = vmul.f32 %v3766_v32, %v3608_v25  ;;  %v341_v2 = vstv %s3778_s4  ;;  %v381_v8 = vstv %s3782_s21  ;;  %s2985_s16 = sld [smem:[#allocation2 + $0x8c]]  ;;  %s3479_s21 = smov 110  }
  0xea   :  { %v326_v4 = vmul.f32 %v325_v62, %v3818_v59  ;;  %v334_v5 = vmul.f32 %v333_v63, %v3822_v60  ;;  %v1066_v10 = vstv %s3800_s23  ;;  %v1070_v12 = vstv %s3806_s24  ;;  %s2994_s18 = sld [smem:[#allocation2 + $0x21]] }
  0xeb   :  { %376 = vrot.lane.b32.xlu0 %v374_v38, %s3473_s17  ;;  %448 = vrot.lane.b32.xlu1 %v446_v39, %s3474_s0  ;;  %v294_v38 = vmul.f32 %v293_v35, %v3762_v31  ;;  %v3787_v39 = vmul.f32 %v3732_v20, %v3608_v25  ;;  %v1074_v13 = vstv %s3810_s25  ;;  %v1067_v17 = vmul.f32 %v1066_v10, %v3676_v49  ;;  %s2995_s9 = sld [smem:[#allocation2 + $0x25]] }
  0xec   :  { %v3867_v21 = vmul.f32 %v3826_v61, %v3595_v15  ;;  %v389_v29 = vstv %s3824_s26  ;;  %v397_v30 = vstv %s3830_s27  ;;  %v413_v41 = vstv %s3851_s28  ;;  %s2996_s4 = sld [smem:[#allocation2 + $0x29]] }
  0xed   :  { %s2998_s23 = sld [smem:[#allocation2 + $0x31]] }
  0xee   :  { %s2999_s24 = sld [smem:[#allocation2 + $0x35]] }
  0xef   :  { %456 = vrot.lane.b32.xlu0 %v454_v43, %s3474_s0  ;;  %464 = vrot.lane.b32.xlu1 %v462_v44, %s3474_s0  ;;  %v302_v43 = vmul.f32 %v301_v37, %v3773_v36  ;;  %v791_v44 = vstv %s3742_s15  ;;  %s2983_s15 = sld [smem:[#allocation2 + $0x84]] }
  0xf0   :  { %v792_v52 = vmul.f32 %v791_v44, %v3676_v49  ;;  %v3874_v49 = vpop.permute.xlu1 %222  ;;  %s3000_s25 = sld [smem:[#allocation2 + $0x39]] }
  0xf1   :  { %5877 = vst [vmem:[#allocation23_spill] sm:$0xff] %v3874_v49  ;;  %v3888_v35 = vmul.f32 %v3874_v49, %v3598_v16  ;;  %v3900_v45 = vmul.f32 %v3874_v49, %v3611_v26  ;;  %v3904_v46 = vmul.f32 %v3874_v49, %v3595_v15  ;;  %s3001_s26 = sld [smem:[#allocation2 + $0x3d]] }
  0xf2   :  { %v793_v54 = vadd.f32 %v792_v52, %v788_v51  ;;  %v429_v51 = vstv %s2976_s5  ;;  %s3006_s27 = sld [smem:[#allocation2 + $0x51]] }
  0xf3   :  { %472 = vrot.lane.b32.xlu0 %v470_v57, %s3474_s0  ;;  %531 = vrot.lane.b32.xlu1 %v529_v58, %s3472_s7  ;;  %v310_v57 = vmul.f32 %v309_v47, %v3787_v39  ;;  %v318_v58 = vmul.f32 %v317_v48, %v3791_v40  ;;  %v414_v44 = vmul.f32 %v413_v41, %v3888_v35  ;;  %v3906_v47 = vpop.permute.xlu0 %229  ;;  %v421_v48 = vstv %s3870_s29  ;;  %s3008_s28 = sld [smem:[#allocation2 + $0x59]] }
  0xf4   :  { %v797_v0 = vadd.f32 %v796_v55, %v793_v54  ;;  %5879 = vst [vmem:[#allocation25_spill] sm:$0xff] %v3906_v47  ;;  %v422_v52 = vmul.f32 %v421_v48, %v3900_v45  ;;  %v430_v54 = vmul.f32 %v429_v51, %v3904_v46  ;;  %v3915_v55 = vmul.f32 %v3874_v49, %v3608_v25  ;;  %s3009_s29 = sld [smem:[#allocation2 + $0x5d]] }
  0xf5   :  { %v3939_v10 = vmul.f32 %v3906_v47, %v3608_v25  ;;  %s3010_s5 = sld [smem:[#allocation2 + $0x61]] }
  0xf6   :  { %v3839_v3 = vadd.f32 %v800_v56, %v797_v0  ;;  %v3919_v56 = vmul.f32 %v3906_v47, %v3598_v16  ;;  %v3927_v0 = vmul.f32 %v3906_v47, %v3611_v26 }
  0xf7   :  { %539 = vrot.lane.b32.xlu0 %v537_v6, %s3472_s7  ;;  %547 = vrot.lane.b32.xlu1 %v545_v7, %s3472_s7  ;;  %v3845_v6 = vmul.f32 %v3826_v61, %v3598_v16  ;;  %v1062_v7 = vstv %s3794_s22  ;;  %s2997_s22 = sld [smem:[#allocation2 + $0x2d]] }
  0xf8   :  { %5876 = vst [vmem:[#allocation22_spill] sm:$0xff] %v3839_v3  ;;  %v1063_v14 = vmul.f32 %v1062_v7, %v3664_v42  ;;  %v1075_v42 = vmul.f32 %v1074_v13, %v3688_v53  ;;  %v398_v53 = vmul.f32 %v397_v30, %v3867_v21  ;;  %v560_v13 = vstv %s2994_s18  ;;  %s3016_s18 = sld [smem:[#allocation2 + $0x79]] }
  0xf9   :  { %v382_v22 = vmul.f32 %v381_v8, %v3845_v6 }
  0xfb   :  { %555 = vrot.lane.b32.xlu0 %v553_v18, %s3472_s7  ;;  %627 = vrot.lane.b32.xlu1 %v625_v19, %s3473_s17  ;;  %v342_v18 = vmul.f32 %v341_v2, %v3836_v1  ;;  %v3863_v19 = vmul.f32 %v3826_v61, %v3611_v26  ;;  %v3931_v2 = vmul.f32 %v3906_v47, %v3595_v15 }
  0xff   :  { %635 = vrot.lane.b32.xlu0 %v633_v24, %s3473_s17  ;;  %643 = vrot.lane.b32.xlu1 %v641_v27, %s3473_s17  ;;  %v1068_v24 = vadd.f32 %v1067_v17, %v1063_v14  ;;  %v1071_v27 = vmul.f32 %v1070_v12, %v3680_v50  ;;  %v390_v50 = vmul.f32 %v389_v29, %v3863_v19  ;;  %v501_v12 = vstv %s2985_s16  ;;  %s3015_s16 = sld [smem:[#allocation2 + $0x75]] }
 0x100   :  { %v502_v14 = vmul.f32 %v501_v12, %v3939_v10  ;;  %v561_v17 = vmul.f32 %v560_v13, %v3750_v28  ;;  %v592_v29 = vstv %s2998_s23  ;;  %s3020_s23 = sld [smem:[#allocation2 + $0x89]] }
 0x103   :  { %651 = vrot.lane.b32.xlu0 %v649_v33, %s3473_s17  ;;  %288 = vrot.lane.b32.xlu1 %v286_v34, %s3475_s20  ;;  %v1072_v33 = vadd.f32 %v1071_v27, %v1068_v24  ;;  %v3882_v34 = vmul.f32 %v3826_v61, %v3608_v25 }
 0x105   :  { %v3890_v37 = vadd.f32 %v1075_v42, %v1072_v33  ;;  %v584_v42 = vstv %s2997_s22  ;;  %v593_v33 = vmul.f32 %v592_v29, %v3791_v40  ;;  %s3019_s22 = sld [smem:[#allocation2 + $0x85]] }
 0x106   :  { %v585_v30 = vmul.f32 %v584_v42, %v3787_v39 }
 0x107   :  { %296 = vrot.lane.b32.xlu0 %v294_v38, %s3475_s20  ;;  %304 = vrot.lane.b32.xlu1 %v302_v43, %s3475_s20  ;;  %5878 = vst [vmem:[#allocation24_spill] sm:$0xff] %v3890_v37  ;;  %v405_v38 = vstv %s3847_s8  ;;  %s3007_s8 = sld [smem:[#allocation2 + $0x55]] }
 0x108   :  { %v406_v43 = vmul.f32 %v405_v38, %v3882_v34 }
 0x10b   :  { %312 = vrot.lane.b32.xlu0 %v310_v57, %s3475_s20  ;;  %320 = vrot.lane.b32.xlu1 %v318_v58, %s3476_s6  ;;  %v437_v57 = vstv %s2977_s13  ;;  %v477_v58 = vstv %s2982_s14  ;;  %s3011_s13 = sld [smem:[#allocation2 + $0x65]] }
 0x10c   :  { %v438_v62 = vmul.f32 %v437_v57, %v3915_v55  ;;  %v478_v63 = vmul.f32 %v477_v58, %v3919_v56  ;;  %s3012_s14 = sld [smem:[#allocation2 + $0x69]] }
 0x10f   :  { %328 = vrot.lane.b32.xlu0 %v326_v4, %s3476_s6  ;;  %336 = vrot.lane.b32.xlu1 %v334_v5, %s3476_s6  ;;  %v485_v4 = vstv %s2983_s15  ;;  %v493_v5 = vstv %s2984_s10  ;;  %s3013_s15 = sld [smem:[#allocation2 + $0x6d]] }
 0x110   :  { %v486_v7 = vmul.f32 %v485_v4, %v3927_v0  ;;  %v494_v8 = vmul.f32 %v493_v5, %v3931_v2  ;;  %s3014_s10 = sld [smem:[#allocation2 + $0x71]] }
 0x113   :  { %344 = vrot.lane.b32.xlu0 %v342_v18, %s3476_s6  ;;  %384 = vrot.lane.b32.xlu1 %v382_v22, %s3477_s30  ;;  %v568_v18 = vstv %s2995_s9  ;;  %v576_v22 = vstv %s2996_s4  ;;  %s3017_s9 = sld [smem:[#allocation2 + $0x7d]] }
 0x114   :  { %v569_v24 = vmul.f32 %v568_v18, %v3762_v31  ;;  %v577_v27 = vmul.f32 %v576_v22, %v3773_v36  ;;  %s3018_s4 = sld [smem:[#allocation2 + $0x81]] }
 0x117   :  { %392 = vrot.lane.b32.xlu0 %v390_v50, %s3477_s30  ;;  %400 = vrot.lane.b32.xlu1 %v398_v53, %s3477_s30  ;;  %v600_v50 = vstv %s2999_s24  ;;  %v608_v53 = vstv %s3000_s25  ;;  %s3021_s24 = sld [smem:[#allocation2 + $0x8d]] }
 0x118   :  { %v601_v38 = vmul.f32 %v600_v50, %v3818_v59  ;;  %v609_v41 = vmul.f32 %v608_v53, %v3822_v60  ;;  %s3027_s25 = sld [smem:[#allocation2 + $0x12]] }
 0x11a   :  { %v752_v50 = vstv %s3018_s4  ;;  %s3041_s4 = sld [smem:[#allocation2 + $0x4a]] }
 0x11b   :  { %408 = vrot.lane.b32.xlu0 %v406_v43, %s3477_s30  ;;  %416 = vrot.lane.b32.xlu1 %v414_v44, %s3478_s11  ;;  %v616_v43 = vstv %s3001_s26  ;;  %v656_v44 = vstv %s3006_s27  ;;  %s3028_s26 = sld [smem:[#allocation2 + $0x16]] }
 0x11c   :  { %v617_v48 = vmul.f32 %v616_v43, %v3836_v1  ;;  %v657_v51 = vmul.f32 %v656_v44, %v3845_v6  ;;  %v753_v43 = vmul.f32 %v752_v50, %v3919_v56  ;;  %v760_v44 = vstv %s3019_s22  ;;  %s3029_s27 = sld [smem:[#allocation2 + $0x1a]] }
 0x11d   :  { %s3042_s22 = sld [smem:[#allocation2 + $0x4e]] }
 0x11f   :  { %424 = vrot.lane.b32.xlu0 %v422_v52, %s3478_s11  ;;  %432 = vrot.lane.b32.xlu1 %v430_v54, %s3478_s11  ;;  %v664_v52 = vstv %s3007_s8  ;;  %v672_v54 = vstv %s3008_s28  ;;  %s3030_s8 = sld [smem:[#allocation2 + $0x1e]] }
 0x120   :  { %v665_v57 = vmul.f32 %v664_v52, %v3863_v19  ;;  %v673_v58 = vmul.f32 %v672_v54, %v3867_v21  ;;  %v761_v54 = vmul.f32 %v760_v44, %v3927_v0  ;;  %s3031_s28 = sld [smem:[#allocation2 + $0x22]] }
 0x123   :  { %440 = vrot.lane.b32.xlu0 %v438_v62, %s3478_s11  ;;  %480 = vrot.lane.b32.xlu1 %v478_v63, %s3479_s21  ;;  %v680_v62 = vstv %s3009_s29  ;;  %v688_v63 = vstv %s3010_s5  ;;  %s3032_s29 = sld [smem:[#allocation2 + $0x26]] }
 0x124   :  { %v681_v4 = vmul.f32 %v680_v62, %v3882_v34  ;;  %v689_v5 = vmul.f32 %v688_v63, %v3888_v35  ;;  %v803_v62 = vstv %s3027_s25  ;;  %s3033_s5 = sld [smem:[#allocation2 + $0x2a]] }
 0x125   :  { %s3045_s25 = sld [smem:[#allocation2 + $0x5a]] }
 0x127   :  { %488 = vrot.lane.b32.xlu0 %v486_v7, %s3479_s21  ;;  %496 = vrot.lane.b32.xlu1 %v494_v8, %s3479_s21  ;;  %v696_v7 = vstv %s3011_s13  ;;  %v704_v8 = vstv %s3012_s14  ;;  %s3034_s13 = sld [smem:[#allocation2 + $0x2e]] }
 0x128   :  { %v697_v12 = vmul.f32 %v696_v7, %v3900_v45  ;;  %v705_v13 = vmul.f32 %v704_v8, %v3904_v46  ;;  %v804_v7 = vmul.f32 %v803_v62, %v3598_v16  ;;  %v811_v8 = vstv %s3028_s26  ;;  %s3035_s14 = sld [smem:[#allocation2 + $0x32]] }
 0x129   :  { %v843_v50 = vstv %s3032_s29  ;;  %s3046_s26 = sld [smem:[#allocation2 + $0x5e]] }
 0x12a   :  { %s3050_s29 = sld [smem:[#allocation2 + $0x6e]] }
 0x12b   :  { %504 = vrot.lane.b32.xlu0 %v502_v14, %s3479_s21  ;;  %563 = vrot.lane.b32.xlu1 %v561_v17, %s3475_s20  ;;  %v712_v14 = vstv %s3013_s15  ;;  %v720_v17 = vstv %s3014_s10  ;;  %s3036_s15 = sld [smem:[#allocation2 + $0x36]] }
 0x12c   :  { %v713_v18 = vmul.f32 %v712_v14, %v3915_v55  ;;  %v721_v22 = vmul.f32 %v720_v17, %v3598_v16  ;;  %v812_v17 = vmul.f32 %v811_v8, %v3611_v26  ;;  %s3037_s10 = sld [smem:[#allocation2 + $0x3a]] }
 0x12f   :  { %571 = vrot.lane.b32.xlu0 %v569_v24, %s3475_s20  ;;  %579 = vrot.lane.b32.xlu1 %v577_v27, %s3475_s20  ;;  %v728_v24 = vstv %s3015_s16  ;;  %v736_v27 = vstv %s3016_s18  ;;  %s3038_s16 = sld [smem:[#allocation2 + $0x3e]] }
 0x130   :  { %v729_v29 = vmul.f32 %v728_v24, %v3611_v26  ;;  %v835_v24 = vstv %s3031_s28  ;;  %s3039_s18 = sld [smem:[#allocation2 + $0x42]] }
 0x131   :  { %s3049_s28 = sld [smem:[#allocation2 + $0x6a]] }
 0x133   :  { %587 = vrot.lane.b32.xlu0 %v585_v30, %s3475_s20  ;;  %595 = vrot.lane.b32.xlu1 %v593_v33, %s3476_s6  ;;  %v737_v30 = vmul.f32 %v736_v27, %v3595_v15  ;;  %v744_v33 = vstv %s3017_s9  ;;  %s3040_s9 = sld [smem:[#allocation2 + $0x46]] }
 0x137   :  { %603 = vrot.lane.b32.xlu0 %v601_v38, %s3476_s6  ;;  %611 = vrot.lane.b32.xlu1 %v609_v41, %s3476_s6  ;;  %v745_v41 = vmul.f32 %v744_v33, %v3608_v25  ;;  %v836_v33 = vmul.f32 %v835_v24, %v3750_v28 }
 0x13b   :  { %619 = vrot.lane.b32.xlu0 %v617_v48, %s3476_s6  ;;  %659 = vrot.lane.b32.xlu1 %v657_v51, %s3477_s30  ;;  %v768_v48 = vstv %s3020_s23  ;;  %s3043_s23 = sld [smem:[#allocation2 + $0x52]] }
 0x13f   :  { %667 = vrot.lane.b32.xlu0 %v665_v57, %s3477_s30  ;;  %675 = vrot.lane.b32.xlu1 %v673_v58, %s3477_s30  ;;  %v769_v57 = vmul.f32 %v768_v48, %v3931_v2  ;;  %v776_v58 = vstv %s3021_s24  ;;  %v844_v48 = vmul.f32 %v843_v50, %v3762_v31  ;;  %v899_v50 = vstv %s3039_s18  ;;  %s3044_s24 = sld [smem:[#allocation2 + $0x56]] }
 0x140   :  { %s3057_s18 = sld [smem:[#allocation2 + $0x8a]] }
 0x143   :  { %683 = vrot.lane.b32.xlu0 %v681_v4, %s3477_s30  ;;  %691 = vrot.lane.b32.xlu1 %v689_v5, %s3478_s11  ;;  %v777_v5 = vmul.f32 %v776_v58, %v3939_v10  ;;  %v867_v58 = vstv %s3035_s14  ;;  %s3053_s14 = sld [smem:[#allocation2 + $0x7a]] }
 0x144   :  { %v868_v8 = vmul.f32 %v867_v58, %v3791_v40  ;;  %v907_v58 = vstv %s3040_s9  ;;  %s4122_s9 = sld [smem:[#allocation2 + $0x8e]] }
 0x147   :  { %699 = vrot.lane.b32.xlu0 %v697_v12, %s3478_s11  ;;  %707 = vrot.lane.b32.xlu1 %v705_v13, %s3478_s11  ;;  %v819_v12 = vstv %s3029_s27  ;;  %s3047_s27 = sld [smem:[#allocation2 + $0x62]] }
 0x14b   :  { %715 = vrot.lane.b32.xlu0 %v713_v18, %s3478_s11  ;;  %723 = vrot.lane.b32.xlu1 %v721_v22, %s3474_s0  ;;  %v820_v18 = vmul.f32 %v819_v12, %v3595_v15  ;;  %v827_v22 = vstv %s3030_s8  ;;  %v875_v12 = vstv %s3036_s15  ;;  %s3048_s8 = sld [smem:[#allocation2 + $0x66]] }
 0x14c   :  { %v876_v24 = vmul.f32 %v875_v12, %v3818_v59  ;;  %s4099_s15 = sld [smem:[#allocation2 + $0x7e]] }
 0x14d   :  { %v3979_v42 = vpop.permute.xlu1 %256 }
 0x14f   :  { %731 = vrot.lane.b32.xlu0 %v729_v29, %s3474_s0  ;;  %739 = vrot.lane.b32.xlu1 %v737_v30, %s3474_s0  ;;  %v828_v30 = vmul.f32 %v827_v22, %v3608_v25 }
 0x151   :  { %v3985_v53 = vpop.permute.xlu0 %264  ;;  %v3987_v38 = vpop.permute.xlu1 %272 }
 0x153   :  { %747 = vrot.lane.b32.xlu0 %v745_v41, %s3474_s0  ;;  %755 = vrot.lane.b32.xlu1 %v753_v43, %s3479_s21  ;;  %v851_v41 = vstv %s3033_s5  ;;  %s3051_s5 = sld [smem:[#allocation2 + $0x72]] }
 0x155   :  { %v3993_v51 = vpop.permute.xlu0 %280  ;;  %v3995_v52 = vpop.permute.xlu1 %352 }
 0x157   :  { %763 = vrot.lane.b32.xlu0 %v761_v54, %s3479_s21  ;;  %771 = vrot.lane.b32.xlu1 %v769_v57, %s3479_s21  ;;  %v852_v54 = vmul.f32 %v851_v41, %v3773_v36  ;;  %v859_v57 = vstv %s3034_s13  ;;  %s4087_s13 = sld [smem:[#allocation2 + $0x76]] }
 0x159   :  { %v4001_v63 = vpop.permute.xlu0 %360  ;;  %v4003_v4 = vpop.permute.xlu1 %368 }
 0x15b   :  { %779 = vrot.lane.b32.xlu0 %v777_v5, %s3479_s21  ;;  %806 = vrot.lane.b32.xlu1 %v804_v7, %s3472_s7  ;;  %v860_v7 = vmul.f32 %v859_v57, %v3787_v39  ;;  %v900_v57 = vmul.f32 %v899_v50, %v3598_v16 }
 0x15d   :  { %v4009_v13 = vpop.permute.xlu0 %376  ;;  %v4011_v14 = vpop.permute.xlu1 %448 }
 0x15f   :  { %814 = vrot.lane.b32.xlu0 %v812_v17, %s3472_s7  ;;  %822 = vrot.lane.b32.xlu1 %v820_v18, %s3472_s7  ;;  %v883_v17 = vstv %s3037_s10  ;;  %s3055_s10 = sld [smem:[#allocation2 + $0x82]] }
 0x161   :  { %v4017_v27 = vpop.permute.xlu0 %456  ;;  %v4019_v29 = vpop.permute.xlu1 %464 }
 0x163   :  { %830 = vrot.lane.b32.xlu0 %v828_v30, %s3472_s7  ;;  %838 = vrot.lane.b32.xlu1 %v836_v33, %s3475_s20  ;;  %v884_v30 = vmul.f32 %v883_v17, %v3822_v60  ;;  %v891_v33 = vstv %s3038_s16  ;;  %v908_v17 = vmul.f32 %v907_v58, %v3611_v26  ;;  %v939_v58 = vstv %s3044_s24  ;;  %s4110_s16 = sld [smem:[#allocation2 + $0x86]] }
 0x164   :  { %s3067_s24 = sld [smem:[#allocation2 + $0x1f]] }
 0x165   :  { %v4025_v43 = vpop.permute.xlu0 %472  ;;  %v4027_v44 = vpop.permute.xlu1 %531 }
 0x166   :  { %5880 = vst [vmem:[#allocation26_spill] sm:$0xff] %v4027_v44  ;;  %v1043_v44 = vstv %s3057_s18  ;;  %s3074_s18 = sld [smem:[#allocation2 + $0x3b]] }
 0x167   :  { %846 = vrot.lane.b32.xlu0 %v844_v48, %s3475_s20  ;;  %854 = vrot.lane.b32.xlu1 %v852_v54, %s3475_s20  ;;  %v892_v54 = vmul.f32 %v891_v33, %v3836_v1  ;;  %v931_v33 = vstv %s3043_s23  ;;  %s3066_s23 = sld [smem:[#allocation2 + $0x1b]] }
 0x168   :  { %v932_v47 = vmul.f32 %v931_v33, %v3845_v6 }
 0x169   :  { %v4033_v62 = vpop.permute.xlu0 %539  ;;  %v4035_v5 = vpop.permute.xlu1 %547 }
 0x16a   :  { %5881 = vst [vmem:[#allocation27_spill] sm:$0xff] %v4033_v62  ;;  %5882 = vst [vmem:[#allocation28_spill] sm:$0xff] %v4035_v5  ;;  %v987_v5 = vstv %s3050_s29  ;;  %s3071_s29 = sld [smem:[#allocation2 + $0x2f]] }
 0x16b   :  { %862 = vrot.lane.b32.xlu0 %v860_v7, %s3475_s20  ;;  %870 = vrot.lane.b32.xlu1 %v868_v8, %s3476_s6  ;;  %v915_v7 = vstv %s3041_s4  ;;  %s3064_s4 = sld [smem:[#allocation2 + $0x13]] }
 0x16d   :  { %v4041_v18 = vpop.permute.xlu0 %555  ;;  %v4043_v22 = vpop.permute.xlu1 %627  ;;  %v1094_v49 = vstv %s3066_s23  ;;  %s3076_s23 = sld [smem:[#allocation2 + $0x43]] }
 0x16e   :  { %5883 = vst [vmem:[#allocation29_spill] sm:$0xff] %v4041_v18  ;;  %5884 = vst [vmem:[#allocation30_spill] sm:$0xff] %v4043_v22 }
 0x16f   :  { %878 = vrot.lane.b32.xlu0 %v876_v24, %s3476_s6  ;;  %886 = vrot.lane.b32.xlu1 %v884_v30, %s3476_s6  ;;  %v916_v24 = vmul.f32 %v915_v7, %v3595_v15  ;;  %v923_v30 = vstv %s3042_s22  ;;  %s3065_s22 = sld [smem:[#allocation2 + $0x17]] }
 0x171   :  { %v4049_v41 = vpop.permute.xlu0 %635  ;;  %v4051_v48 = vpop.permute.xlu1 %643 }
 0x172   :  { %5885 = vst [vmem:[#allocation31_spill] sm:$0xff] %v4049_v41  ;;  %5886 = vst [vmem:[#allocation32_spill] sm:$0xff] %v4051_v48  ;;  %v963_v41 = vstv %s3047_s27  ;;  %s3070_s27 = sld [smem:[#allocation2 + $0x2b]] }
 0x173   :  { %894 = vrot.lane.b32.xlu0 %v892_v54, %s3476_s6  ;;  %902 = vrot.lane.b32.xlu1 %v900_v57, %s3473_s17  ;;  %v924_v57 = vmul.f32 %v923_v30, %v3608_v25  ;;  %v955_v30 = vstv %s3046_s26  ;;  %v964_v37 = vmul.f32 %v963_v41, %v3888_v35  ;;  %s3069_s26 = sld [smem:[#allocation2 + $0x27]] }
 0x175   :  { %v4057_v8 = vpop.permute.xlu0 %651  ;;  %v4059_v12 = vpop.permute.xlu1 %288  ;;  %v1086_v23 = vstv %s3065_s22  ;;  %s4208_s22 = sld [smem:[#allocation2 + $0x3f]] }
 0x176   :  { %5887 = vst [vmem:[#allocation33_spill] sm:$0xff] %v4057_v8  ;;  %v947_v8 = vstv %s3045_s25  ;;  %s3068_s25 = sld [smem:[#allocation2 + $0x23]] }
 0x177   :  { %910 = vrot.lane.b32.xlu0 %v908_v17, %s3473_s17  ;;  %918 = vrot.lane.b32.xlu1 %v916_v24, %s3473_s17  ;;  %v940_v24 = vmul.f32 %v939_v58, %v3863_v19  ;;  %v948_v48 = vmul.f32 %v947_v8, %v3867_v21  ;;  %v971_v58 = vstv %s3048_s8  ;;  %v979_v8 = vstv %s3049_s28  ;;  %s4254_s8 = sld [smem:[#allocation2 + $0x5f]] }
 0x178   :  { %v980_v41 = vmul.f32 %v979_v8, %v3904_v46  ;;  %v1003_v8 = vstv %s4087_s13  ;;  %s3084_s28 = sld [smem:[#allocation2 + $0x63]] }
 0x179   :  { %v4065_v50 = vpop.permute.xlu0 %296  ;;  %v4067_v54 = vpop.permute.xlu1 %304  ;;  %v1004_v62 = vmul.f32 %v1003_v8, %v3611_v26  ;;  %s4278_s13 = sld [smem:[#allocation2 + $0x6f]] }
 0x17b   :  { %926 = vrot.lane.b32.xlu0 %v924_v57, %s3473_s17  ;;  %934 = vrot.lane.b32.xlu1 %v932_v47, %s3477_s30  ;;  %v956_v47 = vmul.f32 %v955_v30, %v3882_v34  ;;  %v972_v30 = vmul.f32 %v971_v58, %v3900_v45 }
 0x17c   :  { %v1110_v61 = vstv %s3068_s25  ;;  %s3080_s25 = sld [smem:[#allocation2 + $0x53]] }
 0x17d   :  { %v4073_v7 = vpop.permute.xlu0 %312  ;;  %v4075_v17 = vpop.permute.xlu1 %320 }
 0x17f   :  { %942 = vrot.lane.b32.xlu0 %v940_v24, %s3477_s30  ;;  %950 = vrot.lane.b32.xlu1 %v948_v48, %s3477_s30  ;;  %v259_v48 = vadd.f32 %v3979_v42, %v3718_v11  ;;  %v988_v42 = vmul.f32 %v987_v5, %v3915_v55 }
 0x181   :  { %v4081_v33 = vpop.permute.xlu0 %328  ;;  %v4083_v57 = vpop.permute.xlu1 %336  ;;  %v267_v18 = vadd.f32 %v3985_v53, %v259_v48  ;;  %v1011_v48 = vstv %s3053_s14  ;;  %s3088_s14 = sld [smem:[#allocation2 + $0x73]] }
 0x182   :  { %v1012_v5 = vmul.f32 %v1011_v48, %v3595_v15 }
 0x183   :  { %958 = vrot.lane.b32.xlu0 %v956_v47, %s3477_s30  ;;  %966 = vrot.lane.b32.xlu1 %v964_v37, %s3478_s11  ;;  %v995_v47 = vstv %s3051_s5  ;;  %v275_v53 = vadd.f32 %v3987_v38, %v267_v18  ;;  %v1019_v18 = vstv %s4099_s15  ;;  %s3072_s5 = sld [smem:[#allocation2 + $0x33]] }
 0x184   :  { %v996_v58 = vmul.f32 %v995_v47, %v3598_v16  ;;  %v1027_v47 = vstv %s3055_s10  ;;  %v1020_v8 = vmul.f32 %v1019_v18, %v3608_v25  ;;  %s4290_s15 = sld [smem:[#allocation2 + $0x77]] }
 0x185   :  { %v4093_v24 = vpop.permute.xlu0 %344  ;;  %v4095_v22 = vpop.permute.xlu1 %384  ;;  %v283_v38 = vadd.f32 %v3993_v51, %v275_v53  ;;  %v1028_v48 = vmul.f32 %v1027_v47, %v3919_v56  ;;  %v1035_v53 = vstv %s4110_s16  ;;  %v1051_v47 = vstv %s4122_s9  ;;  %s3073_s16 = sld [smem:[#allocation2 + $0x37]] }
 0x186   :  { %s3090_s10 = sld [smem:[#allocation2 + $0x7b]] }
 0x187   :  { %974 = vrot.lane.b32.xlu0 %v972_v30, %s3478_s11  ;;  %982 = vrot.lane.b32.xlu1 %v980_v41, %s3478_s11  ;;  %s3093_s9 = sld [smem:[#allocation2 + $0x87]] }
 0x189   :  { %v4104_v11 = vpop.permute.xlu0 %392  ;;  %v4106_v37 = vpop.permute.xlu1 %400 }
 0x18b   :  { %990 = vrot.lane.b32.xlu0 %v988_v42, %s3478_s11  ;;  %998 = vrot.lane.b32.xlu1 %v996_v58, %s3474_s0  ;;  %v291_v42 = vadd.f32 %v4059_v12, %v283_v38  ;;  %v1044_v38 = vmul.f32 %v1043_v44, %v3931_v2 }
 0x18d   :  { %v4116_v30 = vpop.permute.xlu0 %408  ;;  %v4118_v41 = vpop.permute.xlu1 %416  ;;  %v299_v51 = vadd.f32 %v4065_v50, %v291_v42  ;;  %v1078_v50 = vstv %s3064_s4  ;;  %s3094_s4 = sld [smem:[#allocation2 + $0x8b]] }
 0x18f   :  { %1006 = vrot.lane.b32.xlu0 %v1004_v62, %s3474_s0  ;;  %1014 = vrot.lane.b32.xlu1 %v1012_v5, %s3474_s0  ;;  %v1036_v5 = vmul.f32 %v1035_v53, %v3927_v0  ;;  %v307_v18 = vadd.f32 %v4067_v54, %v299_v51  ;;  %v1079_v53 = vmul.f32 %v1078_v50, %v3598_v16  ;;  %v1102_v50 = vstv %s3067_s24  ;;  %s3078_s24 = sld [smem:[#allocation2 + $0x4b]] }
 0x191   :  { %v4129_v58 = vpop.permute.xlu0 %424  ;;  %v4131_v3 = vpop.permute.xlu1 %432  ;;  %v315_v44 = vadd.f32 %v4073_v7, %v307_v18 }
 0x193   :  { %1022 = vrot.lane.b32.xlu0 %v1020_v8, %s3474_s0  ;;  %1030 = vrot.lane.b32.xlu1 %v1028_v48, %s3479_s21  ;;  %v1052_v48 = vmul.f32 %v1051_v47, %v3939_v10  ;;  %v323_v47 = vadd.f32 %v4075_v17, %v315_v44 }
 0x195   :  { %v4139_v62 = vpop.permute.xlu0 %440  ;;  %v4141_v12 = vpop.permute.xlu1 %480 }
 0x197   :  { %1038 = vrot.lane.b32.xlu0 %v1036_v5, %s3479_s21  ;;  %1046 = vrot.lane.b32.xlu1 %v1044_v38, %s3479_s21  ;;  %v1087_v5 = vmul.f32 %v1086_v23, %v3611_v26  ;;  %v1095_v38 = vmul.f32 %v1094_v49, %v3595_v15  ;;  %v331_v23 = vadd.f32 %v4081_v33, %v323_v47  ;;  %v157_v49 = vld [vmem:[%s5854_s1] sm:$0x3]  ;;  %v159_v33 = vld [vmem:[%s5854_s1 + $0x4] sm:$0x3] }
 0x199   :  { %v4149_v42 = vpop.permute.xlu0 %488  ;;  %v4151_v8 = vpop.permute.xlu1 %496 }
 0x19b   :  { %1054 = vrot.lane.b32.xlu0 %v1052_v48, %s3479_s21  ;;  %1081 = vrot.lane.b32.xlu1 %v1079_v53, %s3472_s7  ;;  %v1103_v48 = vmul.f32 %v1102_v50, %v3608_v25  ;;  %v1111_v53 = vmul.f32 %v1110_v61, %v3750_v28  ;;  %v339_v28 = vadd.f32 %v4083_v57, %v331_v23  ;;  %v158_v61 = vld [vmem:[%s5854_s1 + $0x2] sm:$0x3]  ;;  %v1126_v57 = vstv %s3070_s27  ;;  %s3082_s27 = sld [smem:[#allocation2 + $0x5b]] }
 0x19c   :  { %v1134_v23 = vstv %s3071_s29  ;;  %s4266_s29 = sld [smem:[#allocation2 + $0x67]] }
 0x19d   :  { %v4158_v54 = vpop.permute.xlu0 %504  ;;  %v4160_v51 = vpop.permute.xlu1 %563 }
 0x19e   :  { %5888 = vst [vmem:[#allocation34_spill] sm:$0xff] %v4160_v51  ;;  %v1118_v51 = vstv %s3069_s26  ;;  %s4242_s26 = sld [smem:[#allocation2 + $0x57]] }
 0x19f   :  { %1089 = vrot.lane.b32.xlu0 %v1087_v5, %s3472_s7  ;;  %1097 = vrot.lane.b32.xlu1 %v1095_v38, %s3472_s7  ;;  %v1119_v5 = vmul.f32 %v1118_v51, %v3762_v31  ;;  %v347_v31 = vadd.f32 %v4093_v24, %v339_v28  ;;  %v160_v51 = vld [vmem:[%s5854_s1 + $0x6] sm:$0x3]  ;;  %s4219_s1 = sld [smem:[#allocation2 + $0x47]] }
 0x1a1   :  { %v4167_v7 = vpop.permute.xlu0 %571  ;;  %v4169_v18 = vpop.permute.xlu1 %579  ;;  %v355_v24 = vadd.f32 %v3995_v52, %v347_v31  ;;  %v1158_v31 = vstv %s3074_s18  ;;  %s3092_s18 = sld [smem:[#allocation2 + $0x83]] }
 0x1a3   :  { %1105 = vrot.lane.b32.xlu0 %v1103_v48, %s3472_s7  ;;  %1113 = vrot.lane.b32.xlu1 %v1111_v53, %s3475_s20  ;;  %v1127_v53 = vmul.f32 %v1126_v57, %v3773_v36  ;;  %v363_v52 = vadd.f32 %v4001_v63, %v355_v24  ;;  %v1174_v24 = vstv %s3076_s23  ;;  %s508_s23 = sld [smem:[#allocation4]] }
 0x1a5   :  { %v4179_v17 = vpop.permute.xlu0 %587  ;;  %v4181_v44 = vpop.permute.xlu1 %595  ;;  %v371_v63 = vadd.f32 %v4003_v4, %v363_v52 }
 0x1a7   :  { %1121 = vrot.lane.b32.xlu0 %v1119_v5, %s3475_s20  ;;  %1405 = vrot.lane.b32.xlu1 %v157_v49, %s3465_s19  ;;  %v1142_v49 = vstv %s3072_s5  ;;  %v379_v4 = vadd.f32 %v4009_v13, %v371_v63  ;;  %s3086_s5 = sld [smem:[#allocation2 + $0x6b]] }
 0x1a8   :  { %v1143_v36 = vmul.f32 %v1142_v49, %v3791_v40  ;;  %v1159_v40 = vmul.f32 %v1158_v31, %v3822_v60  ;;  %v1175_v60 = vmul.f32 %v1174_v24, %v3598_v16 }
 0x1a9   :  { %v4193_v38 = vpop.permute.xlu0 %603  ;;  %v4195_v47 = vpop.permute.xlu1 %611  ;;  %v387_v13 = vadd.f32 %v4095_v22, %v379_v4  ;;  %v1222_v4 = vstv %s3082_s27  ;;  %s4418_s27 = sld [smem:[#allocation6 + $0x21]] }
 0x1ab   :  { %1407 = vrot.lane.b32.xlu0 %v158_v61, %s3465_s19  ;;  %1409 = vrot.lane.b32.xlu1 %v159_v33, %s3465_s19  ;;  %v1135_v61 = vmul.f32 %v1134_v23, %v3787_v39  ;;  %v1150_v33 = vstv %s3073_s16  ;;  %v395_v22 = vadd.f32 %v4104_v11, %v387_v13  ;;  %v1238_v13 = vstv %s3084_s28  ;;  %s3091_s16 = sld [smem:[#allocation2 + $0x7f]] }
 0x1ac   :  { %v1151_v39 = vmul.f32 %v1150_v33, %v3818_v59  ;;  %s4426_s28 = sld [smem:[#allocation6 + $0x1b]] }
 0x1ad   :  { %v4203_v50 = vpop.permute.xlu0 %619  ;;  %v4205_v48 = vpop.permute.xlu1 %659  ;;  %v403_v11 = vadd.f32 %v4106_v37, %v395_v22 }
 0x1af   :  { %1411 = vrot.lane.b32.xlu0 %v160_v51, %s3465_s19  ;;  %1129 = vrot.lane.b32.xlu1 %v1127_v53, %s3475_s20  ;;  %s4230_s19 = sld [smem:[#allocation2 + $0x4f]]  ;;  %v1166_v53 = vstv %s4208_s22  ;;  %v411_v37 = vadd.f32 %v4116_v30, %v403_v11  ;;  %v1262_v30 = vstv %s4278_s13 }
 0x1b0   :  { %v1167_v59 = vmul.f32 %v1166_v53, %v3836_v1  ;;  %s3095_s22 = sld [smem:[#allocation2 + $0x8f]] }
 0x1b1   :  { %v4213_v5 = vpop.permute.xlu0 %667  ;;  %v4215_v28 = vpop.permute.xlu1 %675  ;;  %s4435_s13 = sld [smem:[#allocation6 + $0x19]] }
 0x1b2   :  { %5889 = vst [vmem:[#allocation35_spill] sm:$0xff] %v4213_v5  ;;  %5890 = vst [vmem:[#allocation36_spill] sm:$0xff] %v4215_v28 }
 0x1b3   :  { %1137 = vrot.lane.b32.xlu0 %v1135_v61, %s3475_s20  ;;  %1145 = vrot.lane.b32.xlu1 %v1143_v36, %s3476_s6  ;;  %v1182_v61 = vstv %s4219_s1  ;;  %v1190_v36 = vstv %s3078_s24  ;;  %s3100_s1 = sld [smem:[#allocation6 + $0x10]] }
 0x1b4   :  { %v1183_v1 = vmul.f32 %v1182_v61, %v3611_v26  ;;  %v1191_v31 = vmul.f32 %v1190_v36, %v3595_v15  ;;  %s3136_s24 = sld [smem:[#allocation6 + $0x11]] }
 0x1b5   :  { %v4224_v57 = vpop.permute.xlu0 %683  ;;  %v4226_v51 = vpop.permute.xlu1 %691 }
 0x1b6   :  { %5891 = vst [vmem:[#allocation37_spill] sm:$0xff] %v4224_v57  ;;  %5892 = vst [vmem:[#allocation38_spill] sm:$0xff] %v4226_v51 }
 0x1b7   :  { %1153 = vrot.lane.b32.xlu0 %v1151_v39, %s3476_s6  ;;  %1161 = vrot.lane.b32.xlu1 %v1159_v40, %s3476_s6  ;;  %v1198_v39 = vstv %s4230_s19  ;;  %v1206_v40 = vstv %s3080_s25  ;;  %s3101_s19 = sld [smem:[#allocation6 + $0x14]] }
 0x1b8   :  { %v1199_v24 = vmul.f32 %v1198_v39, %v3608_v25  ;;  %s4412_s25 = sld [smem:[#allocation6 + $0x1c]] }
 0x1b9   :  { %v4236_v23 = vpop.permute.xlu0 %699  ;;  %v4238_v49 = vpop.permute.xlu1 %707 }
 0x1ba   :  { %5893 = vst [vmem:[#allocation39_spill] sm:$0xff] %v4236_v23  ;;  %5894 = vst [vmem:[#allocation40_spill] sm:$0xff] %v4238_v49 }
 0x1bb   :  { %1169 = vrot.lane.b32.xlu0 %v1167_v59, %s3476_s6  ;;  %1177 = vrot.lane.b32.xlu1 %v1175_v60, %s3473_s17  ;;  %v1207_v59 = vmul.f32 %v1206_v40, %v3845_v6  ;;  %v1214_v60 = vstv %s4242_s26  ;;  %v1223_v6 = vmul.f32 %v1222_v4, %v3867_v21  ;;  %v1239_v21 = vmul.f32 %v1238_v13, %v3888_v35  ;;  %s4414_s26 = sld [smem:[#allocation6 + $0x15]] }
 0x1bc   :  { %v419_v4 = vadd.f32 %v4118_v41, %v411_v37  ;;  %v1278_v13 = vstv %s4290_s15  ;;  %v1286_v41 = vstv %s3090_s10  ;;  %s4440_s15 = sld [smem:[#allocation6 + $0x16]] }
 0x1bd   :  { %v4248_v52 = vpop.permute.xlu0 %715  ;;  %v4250_v33 = vpop.permute.xlu1 %723  ;;  %v1279_v37 = vmul.f32 %v1278_v13, %v3611_v26  ;;  %s4446_s10 = sld [smem:[#allocation6 + $0x29]] }
 0x1be   :  { %5895 = vst [vmem:[#allocation41_spill] sm:$0xff] %v4248_v52  ;;  %5896 = vst [vmem:[#allocation42_spill] sm:$0xff] %v4250_v33 }
 0x1bf   :  { %1185 = vrot.lane.b32.xlu0 %v1183_v1, %s3473_s17  ;;  %1193 = vrot.lane.b32.xlu1 %v1191_v31, %s3473_s17  ;;  %v1215_v1 = vmul.f32 %v1214_v60, %v3863_v19  ;;  %v1230_v31 = vstv %s4254_s8  ;;  %s4421_s8 = sld [smem:[#allocation6 + $0x12]] }
 0x1c0   :  { %v1231_v19 = vmul.f32 %v1230_v31, %v3882_v34  ;;  %v1263_v31 = vmul.f32 %v1262_v30, %v3915_v55  ;;  %v1287_v55 = vmul.f32 %v1286_v41, %v3595_v15  ;;  %v1310_v15 = vstv %s3093_s9  ;;  %s4463_s9 = sld [smem:[#allocation6 + $0x8]] }
 0x1c1   :  { %v4260_v63 = vpop.permute.xlu0 %731  ;;  %v4262_v53 = vpop.permute.xlu1 %739  ;;  %v1318_v30 = vstv %s3094_s4  ;;  %s4467_s4 = sld [smem:[#allocation6 + $0xc]] }
 0x1c2   :  { %5897 = vst [vmem:[#allocation43_spill] sm:$0xff] %v4260_v63  ;;  %5898 = vst [vmem:[#allocation44_spill] sm:$0xff] %v4262_v53 }
 0x1c3   :  { %1201 = vrot.lane.b32.xlu0 %v1199_v24, %s3473_s17  ;;  %1209 = vrot.lane.b32.xlu1 %v1207_v59, %s3477_s30  ;;  %v1246_v24 = vstv %s4266_s29  ;;  %v1254_v59 = vstv %s3086_s5  ;;  %s4429_s29 = sld [smem:[#allocation6 + $0x18]] }
 0x1c4   :  { %v1247_v34 = vmul.f32 %v1246_v24, %v3900_v45  ;;  %v1255_v35 = vmul.f32 %v1254_v59, %v3904_v46  ;;  %v427_v46 = vadd.f32 %v4129_v58, %v419_v4  ;;  %v1294_v24 = vstv %s3091_s16  ;;  %s4431_s5 = sld [smem:[#allocation6 + $0x25]] }
 0x1c5   :  { %v4272_v61 = vpop.permute.xlu0 %747  ;;  %v4274_v36 = vpop.permute.xlu1 %755  ;;  %v1302_v59 = vstv %s3092_s18  ;;  %s4451_s16 = sld [smem:[#allocation6]]  ;;  %v1789_v28 = vstv %s4446_s10 }
 0x1c6   :  { %5899 = vst [vmem:[#allocation45_spill] sm:$0xff] %v4272_v61  ;;  %5900 = vst [vmem:[#allocation46_spill] sm:$0xff] %v4274_v36  ;;  %v1303_v4 = vmul.f32 %v1302_v59, %v3919_v56  ;;  %s4456_s18 = sld [smem:[#allocation6 + $0x4]]  ;;  %v1458_v33 = vstv %s4463_s9 }
 0x1c7   :  { %1217 = vrot.lane.b32.xlu0 %v1215_v1, %s3477_s30  ;;  %1225 = vrot.lane.b32.xlu1 %v1223_v6, %s3477_s30  ;;  %v1270_v1 = vstv %s3088_s14  ;;  %s4437_s14 = sld [smem:[#allocation6 + $0x1f]]  ;;  %v1462_v49 = vstv %s4467_s4 }
 0x1c8   :  { %v1271_v45 = vmul.f32 %v1270_v1, %v3598_v16  ;;  %v435_v16 = vadd.f32 %v4131_v3, %v427_v46  ;;  %v1326_v46 = vstv %s3095_s22  ;;  %s4472_s22 = sld [smem:[#allocation6 + $0x1]] }
 0x1c9   :  { %v4284_v39 = vpop.permute.xlu0 %763  ;;  %v4286_v40 = vpop.permute.xlu1 %771  ;;  %v1327_v13 = vmul.f32 %v1326_v46, %v3939_v10  ;;  %s4584_s10 = sld [smem:[#allocation6 + $0x27]] }
 0x1ca   :  { %5901 = vst [vmem:[#allocation47_spill] sm:$0xff] %v4284_v39  ;;  %5902 = vst [vmem:[#allocation48_spill] sm:$0xff] %v4286_v40  ;;  %v443_v26 = vadd.f32 %v4139_v62, %v435_v16  ;;  %v1741_v39 = vstv %s3136_s24  ;;  %s4485_s24 = sld [smem:[#allocation6 + $0xd]] }
 0x1cb   :  { %1233 = vrot.lane.b32.xlu0 %v1231_v19, %s3477_s30  ;;  %1241 = vrot.lane.b32.xlu1 %v1239_v21, %s3478_s11  ;;  %s4603_s9 = sld [smem:[#allocation6 + $0x31]] }
 0x1cc   :  { %s4607_s4 = sld [smem:[#allocation6 + $0x17]] }
 0x1cd   :  { %v4296_v22 = vpop.permute.xlu0 %779  ;;  %v4298_v60 = vpop.permute.xlu1 %806 }
 0x1ce   :  { %5903 = vst [vmem:[#allocation49_spill] sm:$0xff] %v4296_v22 }
 0x1cf   :  { %1249 = vrot.lane.b32.xlu0 %v1247_v34, %s3478_s11  ;;  %1257 = vrot.lane.b32.xlu1 %v1255_v35, %s3478_s11  ;;  %v1295_v35 = vmul.f32 %v1294_v24, %v3608_v25  ;;  %v451_v25 = vadd.f32 %v4011_v14, %v443_v26 }
 0x1d0   :  { %v1737_v51 = vstv %s4485_s24  ;;  %s3176_s24 = sld [smem:[#allocation6 + $0x1e]] }
 0x1d1   :  { %v4306_v6 = vpop.permute.xlu0 %814  ;;  %v4308_v11 = vpop.permute.xlu1 %822  ;;  %v459_v41 = vadd.f32 %v4017_v27, %v451_v25 }
 0x1d3   :  { %1265 = vrot.lane.b32.xlu0 %v1263_v31, %s3478_s11  ;;  %1273 = vrot.lane.b32.xlu1 %v1271_v45, %s3474_s0  ;;  %v1311_v31 = vmul.f32 %v1310_v15, %v3927_v0  ;;  %v1319_v45 = vmul.f32 %v1318_v30, %v3931_v2  ;;  %v467_v14 = vadd.f32 %v4019_v29, %v459_v41 }
 0x1d5   :  { %v4316_v19 = vpop.permute.xlu0 %830  ;;  %v4318_v21 = vpop.permute.xlu1 %838  ;;  %v475_v16 = vadd.f32 %v4025_v43, %v467_v14 }
 0x1d7   :  { %1281 = vrot.lane.b32.xlu0 %v1279_v37, %s3474_s0  ;;  %1289 = vrot.lane.b32.xlu1 %v1287_v55, %s3474_s0  ;;  %v483_v10 = vadd.f32 %v4141_v12, %v475_v16  ;;  %v509_v12 = vstv %s508_s23  ;;  %s4475_s23 = sld [smem:[#allocation6 + $0x5]] }
 0x1d9   :  { %v4325_v58 = vpop.permute.xlu0 %846  ;;  %v4327_v34 = vpop.permute.xlu1 %854 }
 0x1db   :  { %1297 = vrot.lane.b32.xlu0 %v1295_v35, %s3474_s0  ;;  %1305 = vrot.lane.b32.xlu1 %v1303_v4, %s3479_s21  ;;  %v491_v4 = vadd.f32 %v4149_v42, %v483_v10 }
 0x1dd   :  { %v4334_v3 = vpop.permute.xlu0 %862  ;;  %v4336_v1 = vpop.permute.xlu1 %870  ;;  %v499_v15 = vadd.f32 %v4151_v8, %v491_v4 }
 0x1df   :  { %1313 = vrot.lane.b32.xlu0 %v1311_v31, %s3479_s21  ;;  %1321 = vrot.lane.b32.xlu1 %v1319_v45, %s3479_s21  ;;  %v507_v31 = vadd.f32 %v4158_v54, %v499_v15 }
 0x1e1   :  { %v4343_v56 = vpop.permute.xlu0 %878  ;;  %v4345_v62 = vpop.permute.xlu1 %886  ;;  %v4384_v46 = vadd.f32 %v509_v12, %v507_v31 }
 0x1e3   :  { %1329 = vrot.lane.b32.xlu0 %v1327_v13, %s3479_s21  ;;  %5913 = vst [vmem:[#allocation59_spill] sm:$0xff] %v4384_v46  ;;  %v1337_v8 = vsel %vm1336_vm4, %v4384_v46, 0.0 }
 0x1e5   :  { %v4350_v0 = vpop.permute.xlu0 %894  ;;  %v4352_v2 = vpop.permute.xlu1 %902 }
 0x1e9   :  { %v4355_v37 = vpop.permute.xlu0 %910  ;;  %v4357_v55 = vpop.permute.xlu1 %918 }
 0x1ed   :  { %v4360_v24 = vpop.permute.xlu0 %926  ;;  %v4362_v59 = vpop.permute.xlu1 %934 }
 0x1ee   :  { %5904 = vst [vmem:[#allocation50_spill] sm:$0xff] %v4362_v59 }
 0x1f1   :  { %v4365_v27 = vpop.permute.xlu0 %942  ;;  %v4367_v35 = vpop.permute.xlu1 %950 }
 0x1f2   :  { %5905 = vst [vmem:[#allocation51_spill] sm:$0xff] %v4365_v27  ;;  %5906 = vst [vmem:[#allocation52_spill] sm:$0xff] %v4367_v35 }
 0x1f5   :  { %v4370_v29 = vpop.permute.xlu0 %958  ;;  %v4372_v26 = vpop.permute.xlu1 %966 }
 0x1f6   :  { %5907 = vst [vmem:[#allocation53_spill] sm:$0xff] %v4370_v29  ;;  %5908 = vst [vmem:[#allocation54_spill] sm:$0xff] %v4372_v26  ;;  %v1725_v26 = vstv %s4472_s22  ;;  %s3104_s22 = sld [smem:[#allocation6 + $0x20]] }
 0x1f9   :  { %v4375_v43 = vpop.permute.xlu0 %974  ;;  %v4377_v30 = vpop.permute.xlu1 %982 }
 0x1fa   :  { %5909 = vst [vmem:[#allocation55_spill] sm:$0xff] %v4375_v43  ;;  %5910 = vst [vmem:[#allocation56_spill] sm:$0xff] %v4377_v30  ;;  %v1729_v30 = vstv %s4475_s23  ;;  %s3216_s23 = sld [smem:[#allocation6 + $0x2b]] }
 0x1fd   :  { %v4380_v45 = vpop.permute.xlu0 %990  ;;  %v4382_v25 = vpop.permute.xlu1 %998 }
 0x1fe   :  { %5911 = vst [vmem:[#allocation57_spill] sm:$0xff] %v4380_v45  ;;  %5912 = vst [vmem:[#allocation58_spill] sm:$0xff] %v4382_v25  ;;  %v2016_v25 = vstv %s4421_s8  ;;  %s4511_s8 = sld [smem:[#allocation6 + $0xa]]  ;;  %v1450_v45 = vstv %s4451_s16 }
 0x1ff   :  { %s4563_s16 = sld [smem:[#allocation6 + $0xf]] }
 0x201   :  { %v4386_v42 = vpop.permute.xlu0 %1006  ;;  %v4388_v13 = vpop.permute.xlu1 %1014 }
 0x202   :  { %5914 = vst [vmem:[#allocation60_spill] sm:$0xff] %v4386_v42  ;;  %5915 = vst [vmem:[#allocation61_spill] sm:$0xff] %v4388_v13  ;;  %v1490_v13 = vstv %s4412_s25  ;;  %s4493_s25 = sld [smem:[#allocation6 + $0x13]] }
 0x203   :  { %1338 = vadd.xlane.f32.xlu1 %v1337_v8 }
 0x205   :  { %v4392_v41 = vpop.permute.xlu0 %1022  ;;  %v4394_v14 = vpop.permute.xlu1 %1030 }
 0x206   :  { %5916 = vst [vmem:[#allocation62_spill] sm:$0xff] %v4392_v41  ;;  %5917 = vst [vmem:[#allocation63_spill] sm:$0xff] %v4394_v14 }
 0x209   :  { %v4396_v54 = vpop.permute.xlu0 %1038  ;;  %v4398_v16 = vpop.permute.xlu1 %1046 }
 0x20a   :  { %5918 = vst [vmem:[#allocation64_spill] sm:$0xff] %v4396_v54  ;;  %5919 = vst [vmem:[#allocation65_spill] sm:$0xff] %v4398_v16  ;;  %v1466_v16 = vstv %s3100_s1  ;;  %s4479_s1 = sld [smem:[#allocation6 + $0x9]] }
 0x20d   :  { %v4400_v10 = vpop.permute.xlu0 %1054  ;;  %v4402_v4 = vpop.permute.xlu1 %1081 }
 0x20e   :  { %5920 = vst [vmem:[#allocation66_spill] sm:$0xff] %v4400_v10 }
 0x210   :  { %v1733_v23 = vstv %s4479_s1  ;;  %s3145_s1 = sld [smem:[#allocation6 + $0x35]] }
 0x211   :  { %v4404_v15 = vpop.permute.xlu0 %1089  ;;  %v4406_v31 = vpop.permute.xlu1 %1097 }
 0x215   :  { %v4408_v12 = vpop.permute.xlu0 %1105  ;;  %v4410_v8 = vpop.permute.xlu1 %1113 }
 0x219   :  { %v4416_v46 = vpop.permute.xlu0 %1121  ;;  %v1406_v10 = vpop.permute.xlu1 %1405 }
 0x21a   :  { %5921 = vst [vmem:[#allocation67_spill] sm:$0xff] %v4416_v46  ;;  %v1417_v22 = vsel %vm185_vm2, 0.0, %v1406_v10  ;;  %v1474_v10 = vstv %s3101_s19  ;;  %s4490_s19 = sld [smem:[#allocation6 + $0x6]] }
 0x21b   :  { %v4424_v54 = vsel %vm190_vm3, %v1417_v22, 0.0 }
 0x21c   :  { %v1467_v40 = vmul.f32 %v1466_v16, %v4424_v54  ;;  %v1742_v22 = vmul.f32 %v1741_v39, %v4424_v54  ;;  %v4461_v42 = vmul.f32 %v4424_v54, %v3732_v20 }
 0x21d   :  { %v1408_v14 = vpop.permute.xlu0 %1407  ;;  %v1410_v39 = vpop.permute.xlu1 %1409 }
 0x21e   :  { %v1418_v41 = vsel %vm185_vm2, 0.0, %v1408_v14  ;;  %1469 = vrot.lane.b32.xlu0 %v1467_v40, %s3472_s7 }
 0x21f   :  { %v4443_v16 = vsel %vm190_vm3, %v1418_v41, 0.0 }
 0x220   :  { %v1475_v14 = vmul.f32 %v1474_v10, %v4443_v16  ;;  %v1419_v10 = vsel %vm185_vm2, 0.0, %v1410_v39  ;;  %v4515_v63 = vmul.f32 %v4443_v16, %v3586_v9 }
 0x221   :  { %v1412_v36 = vpop.permute.xlu0 %1411  ;;  %v4482_v39 = vsel %vm190_vm3, %v1419_v10, 0.0  ;;  %v1781_v10 = vstv %s4431_s5  ;;  %s4541_s5 = sld [smem:[#allocation6 + $0x3]] }
 0x222   :  { %v1420_v40 = vsel %vm185_vm2, 0.0, %v1412_v36  ;;  %1744 = vrot.lane.b32.xlu0 %v1742_v22, %s3472_s7  ;;  %v1749_v36 = vstv %s4414_s26  ;;  %v1773_v22 = vstv %s4418_s27  ;;  %s4500_s26 = sld [smem:[#allocation6 + $0x23]]  ;;  %v4535_v52 = vmul.f32 %v4482_v39, %v3586_v9 }
 0x223   :  { %v4454_v61 = vsel %vm190_vm3, %v1420_v40, 0.0  ;;  %v1750_v40 = vmul.f32 %v1749_v36, %v4443_v16  ;;  %v1774_v53 = vmul.f32 %v1773_v22, %v4461_v42  ;;  %v2017_v36 = vmul.f32 %v2016_v25, %v4424_v54  ;;  %s4504_s27 = sld [smem:[#allocation6 + $0x2]] }
 0x224   :  { %v1491_v41 = vmul.f32 %v1490_v13, %v4454_v61  ;;  %v2307_v13 = vstv %s4426_s28  ;;  %v4498_v22 = vmul.f32 %v4443_v16, %v3732_v20  ;;  %v1454_v25 = vstv %s4456_s18  ;;  %s4520_s28 = sld [smem:[#allocation6 + $0xe]] }
 0x225   :  { %v1455_v43 = vmul.f32 %v1454_v25, %v4515_v63  ;;  %v4554_v35 = vmul.f32 %v4482_v39, %v3732_v20  ;;  %v1734_v27 = vmul.f32 %v1733_v23, %v4535_v52  ;;  %s4567_s18 = sld [smem:[#allocation6 + $0x2d]] }
 0x226   :  { %1477 = vrot.lane.b32.xlu0 %v1475_v14, %s3472_s7  ;;  %1493 = vrot.lane.b32.xlu1 %v1491_v41, %s3472_s7  ;;  %v2308_v14 = vmul.f32 %v2307_v13, %v4482_v39  ;;  %v1482_v41 = vstv %s4429_s29  ;;  %s4523_s29 = sld [smem:[#allocation6 + $0x1d]] }
 0x227   :  { %v1483_v13 = vmul.f32 %v1482_v41, %v4482_v39  ;;  %v4527_v41 = vmul.f32 %v4454_v61, %v3586_v9  ;;  %v1790_v59 = vmul.f32 %v1789_v28, %v4554_v35 }
 0x22a   :  { %1752 = vrot.lane.b32.xlu0 %v1750_v40, %s3472_s7  ;;  %1776 = vrot.lane.b32.xlu1 %v1774_v53, %s3475_s20  ;;  %v1757_v53 = vstv %s4435_s13  ;;  %v2315_v40 = vstv %s4437_s14  ;;  %s4549_s13 = sld [smem:[#allocation6 + $0x7]] }
 0x22b   :  { %v1758_v25 = vmul.f32 %v1757_v53, %v4482_v39  ;;  %s4558_s14 = sld [smem:[#allocation6 + $0xb]]  ;;  %v2024_v53 = vstv %s4440_s15 }
 0x22c   :  { %v2025_v46 = vmul.f32 %v2024_v53, %v4443_v16  ;;  %s4578_s15 = sld [smem:[#allocation6 + $0x1a]] }
 0x22e   :  { %2019 = vrot.lane.b32.xlu0 %v2017_v36, %s3472_s7  ;;  %2310 = vrot.lane.b32.xlu1 %v2308_v14, %s3472_s7  ;;  %v1782_v14 = vmul.f32 %v1781_v10, %v4498_v22  ;;  %v4531_v36 = vmul.f32 %v4424_v54, %v3586_v9  ;;  %v2316_v10 = vmul.f32 %v2315_v40, %v4454_v61  ;;  %v2004_v9 = vstv %s4490_s19  ;;  %s3105_s19 = sld [smem:[#allocation6 + $0x24]] }
 0x22f   :  { %v2005_v23 = vmul.f32 %v2004_v9, %v4515_v63 }
 0x230   :  { %v1451_v29 = vmul.f32 %v1450_v45, %v4531_v36  ;;  %v1463_v45 = vmul.f32 %v1462_v49, %v4527_v41  ;;  %v1726_v57 = vmul.f32 %v1725_v26, %v4531_v36  ;;  %v2008_v26 = vstv %s4511_s8  ;;  %s3106_s8 = sld [smem:[#allocation6 + $0x28]] }
 0x231   :  { %v2009_v9 = vmul.f32 %v2008_v26, %v4535_v52  ;;  %v4601_v26 = vmul.f32 %v4454_v61, %v3732_v20 }
 0x232   :  { %1485 = vrot.lane.b32.xlu0 %v1483_v13, %s3472_s7  ;;  %1784 = vrot.lane.b32.xlu1 %v1782_v14, %s3475_s20  ;;  %v1459_v13 = vmul.f32 %v1458_v33, %v4535_v52  ;;  %v1730_v14 = vmul.f32 %v1729_v30, %v4515_v63  ;;  %v1456_v40 = vadd.f32 %v1455_v43, %v1451_v29  ;;  %v2000_v33 = vstv %s4504_s27  ;;  %s3146_s27 = sld [smem:[#allocation6 + $0x39]] }
 0x233   :  { %v1738_v29 = vmul.f32 %v1737_v51, %v4527_v41  ;;  %v2012_v30 = vstv %s4520_s28  ;;  %v2323_v51 = vstv %s4500_s26  ;;  %s3177_s26 = sld [smem:[#allocation6 + $0x22]] }
 0x234   :  { %v1460_v49 = vadd.f32 %v1459_v13, %v1456_v40  ;;  %v1731_v43 = vadd.f32 %v1730_v14, %v1726_v57  ;;  %v2291_v13 = vstv %s4493_s25  ;;  %v2001_v57 = vmul.f32 %v2000_v33, %v4531_v36  ;;  %s3217_s25 = sld [smem:[#allocation6 + $0x2f]] }
 0x235   :  { %v2275_v14 = vstv %s4541_s5  ;;  %v1765_v40 = vstv %s4523_s29  ;;  %v2324_v33 = vmul.f32 %v2323_v51, %v4461_v42  ;;  %s3218_s28 = sld [smem:[#allocation6 + $0x33]] }
 0x236   :  { %1760 = vrot.lane.b32.xlu0 %v1758_v25, %s3472_s7  ;;  %2318 = vrot.lane.b32.xlu1 %v2316_v10, %s3472_s7  ;;  %v4580_v25 = vadd.f32 %v1463_v45, %v1460_v49  ;;  %v1735_v10 = vadd.f32 %v1734_v27, %v1731_v43  ;;  %v2279_v45 = vstv %s4549_s13  ;;  %v2013_v27 = vmul.f32 %v2012_v30, %v4527_v41  ;;  %s3178_s29 = sld [smem:[#allocation6 + $0x26]] }
 0x237   :  { %v2006_v53 = vadd.f32 %v2005_v23, %v2001_v57  ;;  %v2283_v49 = vstv %s4558_s14  ;;  %v2292_v43 = vmul.f32 %v2291_v13, %v4424_v54  ;;  %v2276_v23 = vmul.f32 %v2275_v14, %v4531_v36  ;;  %s3147_s5 = sld [smem:[#allocation6 + $0x3d]] }
 0x238   :  { %5922 = vst [vmem:[#allocation68_spill] sm:$0xff] %v4580_v25  ;;  %v4590_v28 = vadd.f32 %v1738_v29, %v1735_v10  ;;  %v2280_v30 = vmul.f32 %v2279_v45, %v4515_v63  ;;  %v1766_v20 = vmul.f32 %v1765_v40, %v4454_v61  ;;  %v2284_v10 = vmul.f32 %v2283_v49, %v4535_v52  ;;  %v4625_v52 = vpop.permute.xlu0 %1137  ;;  %s3219_s13 = sld [smem:[#allocation6 + $0x37]] }
 0x239   :  { %v2010_v29 = vadd.f32 %v2009_v9, %v2006_v53  ;;  %v2032_v36 = vstv %s4578_s15  ;;  %v2331_v63 = vstv %s4584_s10  ;;  %5924 = vst [vmem:[#allocation70_spill] sm:$0xff] %v4625_v52  ;;  %v2299_v53 = vstv %s4607_s4  ;;  %s3148_s14 = sld [smem:[#allocation6 + $0x41]] }
 0x23a   :  { %2027 = vrot.lane.b32.xlu0 %v2025_v46, %s3472_s7  ;;  %1792 = vrot.lane.b32.xlu1 %v1790_v59, %s3475_s20  ;;  %v2287_v59 = vstv %s4563_s16  ;;  %v1797_v46 = vstv %s4567_s18  ;;  %v2281_v51 = vadd.f32 %v2280_v30, %v2276_v23  ;;  %v2033_v40 = vmul.f32 %v2032_v36, %v4482_v39  ;;  %s3179_s16 = sld [smem:[#allocation6 + $0x2a]] }
 0x23b   :  { %v4615_v13 = vadd.f32 %v2013_v27, %v2010_v29  ;;  %v2288_v57 = vmul.f32 %v2287_v59, %v4527_v41  ;;  %v1798_v9 = vmul.f32 %v1797_v46, %v4601_v26  ;;  %v2332_v41 = vmul.f32 %v2331_v63, %v4498_v22  ;;  %s3108_s18 = sld [smem:[#allocation6 + $0x30]] }
 0x23c   :  { %v2285_v14 = vadd.f32 %v2284_v10, %v2281_v51  ;;  %v4631_v27 = vmul.f32 %v4424_v54, %v3766_v32  ;;  %v1805_v49 = vstv %s4603_s9  ;;  %v1498_v46 = vstv %s3104_s22  ;;  %v4641_v23 = vpop.permute.xlu0 %1153  ;;  %s3220_s15 = sld [smem:[#allocation6 + $0x3b]] }
 0x23d   :  { %5923 = vst [vmem:[#allocation69_spill] sm:$0xff] %v4615_v13  ;;  %v2339_v29 = vstv %s3216_s23  ;;  %5926 = vst [vmem:[#allocation72_spill] sm:$0xff] %v4641_v23  ;;  %v1499_v30 = vmul.f32 %v1498_v46, %v4461_v42  ;;  %v4649_v10 = vmul.f32 %v4443_v16, %v3766_v32  ;;  %v2040_v51 = vstv %s3176_s24  ;;  %s3180_s10 = sld [smem:[#allocation6 + $0x2e]] }
 0x23e   :  { %2294 = vrot.lane.b32.xlu0 %v2292_v43, %s3472_s7  ;;  %2326 = vrot.lane.b32.xlu1 %v2324_v33, %s3475_s20  ;;  %v4623_v45 = vadd.f32 %v2288_v57, %v2285_v14  ;;  %v4637_v43 = vpop.permute.xlu1 %1129  ;;  %v2300_v33 = vmul.f32 %v2299_v53, %v4443_v16  ;;  %v1806_v59 = vmul.f32 %v1805_v49, %v4631_v27  ;;  %v1813_v57 = vstv %s3145_s1  ;;  %s3149_s9 = sld [smem:[#allocation6 + $0x45]] }
 0x23f   :  { %5925 = vst [vmem:[#allocation71_spill] sm:$0xff] %v4637_v43  ;;  %v2041_v63 = vmul.f32 %v2040_v51, %v4454_v61  ;;  %v1814_v14 = vmul.f32 %v1813_v57, %v4649_v10  ;;  %v2048_v46 = vstv %s3177_s26  ;;  %v1514_v57 = vstv %s3106_s8  ;;  %s3109_s4 = sld [smem:[#allocation6 + $0x34]] }
 0x240   :  { %v4655_v36 = vpop.permute.xlu0 %1169  ;;  %v1837_v13 = vstv %s3148_s14  ;;  %s3221_s22 = sld [smem:[#allocation6 + $0x3f]] }
 0x241   :  { %5928 = vst [vmem:[#allocation74_spill] sm:$0xff] %v4655_v36  ;;  %s3181_s23 = sld [smem:[#allocation6 + $0x32]]  ;;  %v5960_v36 = vld [vmem:[#allocation20_spill] sm:$0xff] }
 0x242   :  { %1768 = vrot.lane.b32.xlu0 %v1766_v20, %s3472_s7  ;;  %1800 = vrot.lane.b32.xlu1 %v1798_v9, %s3475_s20  ;;  %v2340_v20 = vmul.f32 %v2339_v29, %v4554_v35  ;;  %v4651_v9 = vpop.permute.xlu1 %1145  ;;  %v1821_v29 = vstv %s3146_s27  ;;  %s3150_s1 = sld [smem:[#allocation6 + $0x49]] }
 0x243   :  { %5927 = vst [vmem:[#allocation73_spill] sm:$0xff] %v4651_v9  ;;  %s3110_s24 = sld [smem:[#allocation6 + $0x38]] }
 0x244   :  { %s3151_s26 = sld [smem:[#allocation6 + $0x4d]] }
 0x245   :  { %s3223_s27 = sld [smem:[#allocation6 + $0x47]] }
 0x246   :  { %2035 = vrot.lane.b32.xlu0 %v2033_v40, %s3472_s7  ;;  %2334 = vrot.lane.b32.xlu1 %v2332_v41, %s3475_s20  ;;  %v1506_v40 = vstv %s3105_s19  ;;  %v2347_v41 = vstv %s3217_s25  ;;  %v4661_v53 = vpop.permute.xlu1 %1161  ;;  %s3222_s19 = sld [smem:[#allocation6 + $0x43]] }
 0x247   :  { %5929 = vst [vmem:[#allocation75_spill] sm:$0xff] %v4661_v53  ;;  %v1507_v49 = vmul.f32 %v1506_v40, %v4498_v22  ;;  %s3182_s25 = sld [smem:[#allocation6 + $0x36]]  ;;  %v5961_v53 = vld [vmem:[#allocation26_spill] sm:$0xff] }
 0x248   :  { %s3183_s8 = sld [smem:[#allocation6 + $0x3a]] }
 0x249   :  { %s3113_s14 = sld [smem:[#allocation6 + $0x44]] }
 0x24a   :  { %2302 = vrot.lane.b32.xlu0 %v2300_v33, %s3472_s7  ;;  %1808 = vrot.lane.b32.xlu1 %v1806_v59, %s3476_s6  ;;  %v2348_v33 = vmul.f32 %v2347_v41, %v4601_v26  ;;  %v4667_v59 = vmul.f32 %v4482_v39, %v3766_v32  ;;  %v1515_v41 = vmul.f32 %v1514_v57, %v4554_v35 }
 0x24c   :  { %v1822_v51 = vmul.f32 %v1821_v29, %v4667_v59 }
 0x24e   :  { %1501 = vrot.lane.b32.xlu0 %v1499_v30, %s3475_s20  ;;  %2342 = vrot.lane.b32.xlu1 %v2340_v20, %s3475_s20  ;;  %v4669_v30 = vpop.permute.xlu0 %1185  ;;  %v2049_v20 = vmul.f32 %v2048_v46, %v4461_v42  ;;  %v4685_v42 = vmul.f32 %v4454_v61, %v3766_v32  ;;  %v1829_v46 = vstv %s3147_s5  ;;  %s3224_s5 = sld [smem:[#allocation6 + $0x4b]] }
 0x24f   :  { %5930 = vst [vmem:[#allocation76_spill] sm:$0xff] %v4669_v30 }
 0x252   :  { %2043 = vrot.lane.b32.xlu0 %v2041_v63, %s3472_s7  ;;  %1816 = vrot.lane.b32.xlu1 %v1814_v14, %s3476_s6  ;;  %s3107_s7 = sld [smem:[#allocation6 + $0x2c]]  ;;  %v2355_v63 = vstv %s3218_s28  ;;  %v4675_v14 = vpop.permute.xlu1 %1177  ;;  %v4679_v40 = vpop.permute.xlu0 %1201 }
 0x253   :  { %5931 = vst [vmem:[#allocation77_spill] sm:$0xff] %v4675_v14  ;;  %5932 = vst [vmem:[#allocation78_spill] sm:$0xff] %v4679_v40  ;;  %v2064_v40 = vstv %s3179_s16  ;;  %s3152_s28 = sld [smem:[#allocation6 + $0x51]] }
 0x254   :  { %s3225_s16 = sld [smem:[#allocation6 + $0x4f]] }
 0x256   :  { %1509 = vrot.lane.b32.xlu0 %v1507_v49, %s3475_s20  ;;  %2350 = vrot.lane.b32.xlu1 %v2348_v33, %s3475_s20  ;;  %v2356_v49 = vmul.f32 %v2355_v63, %v4631_v27  ;;  %v2056_v33 = vstv %s3178_s29  ;;  %v4689_v29 = vpop.permute.xlu1 %1193  ;;  %v2363_v63 = vstv %s3219_s13  ;;  %v4693_v32 = vpop.permute.xlu0 %1217  ;;  %s3112_s29 = sld [smem:[#allocation6 + $0x40]] }
 0x257   :  { %5933 = vst [vmem:[#allocation79_spill] sm:$0xff] %v4689_v29  ;;  %5934 = vst [vmem:[#allocation80_spill] sm:$0xff] %v4693_v32  ;;  %v1845_v32 = vstv %s3149_s9  ;;  %s3153_s13 = sld [smem:[#allocation6 + $0x55]] }
 0x258   :  { %v1522_v57 = vstv %s3107_s7  ;;  %s3184_s7 = sld [smem:[#allocation6 + $0x3e]] }
 0x259   :  { %s3226_s9 = sld [smem:[#allocation6 + $0x53]] }
 0x25a   :  { %2051 = vrot.lane.b32.xlu0 %v2049_v20, %s3475_s20  ;;  %1824 = vrot.lane.b32.xlu1 %v1822_v51, %s3476_s6  ;;  %v2057_v20 = vmul.f32 %v2056_v33, %v4498_v22  ;;  %v1830_v51 = vmul.f32 %v1829_v46, %v4685_v42  ;;  %v4699_v22 = vpop.permute.xlu1 %1209  ;;  %v4703_v33 = vpop.permute.xlu0 %1233  ;;  %v2065_v46 = vmul.f32 %v2064_v40, %v4554_v35 }
 0x25b   :  { %5935 = vst [vmem:[#allocation81_spill] sm:$0xff] %v4699_v22  ;;  %5936 = vst [vmem:[#allocation82_spill] sm:$0xff] %v4703_v33  ;;  %v2072_v33 = vstv %s3180_s10  ;;  %v1846_v40 = vmul.f32 %v1845_v32, %v4443_v16  ;;  %s3114_s10 = sld [smem:[#allocation6 + $0x48]] }
 0x25e   :  { %1517 = vrot.lane.b32.xlu0 %v1515_v41, %s3475_s20  ;;  %2358 = vrot.lane.b32.xlu1 %v2356_v49, %s3476_s6  ;;  %v1523_v41 = vmul.f32 %v1522_v57, %v4601_v26  ;;  %v2364_v49 = vmul.f32 %v2363_v63, %v4649_v10  ;;  %v2371_v57 = vstv %s3220_s15  ;;  %v4709_v63 = vpop.permute.xlu1 %1225  ;;  %v4713_v35 = vpop.permute.xlu0 %1249  ;;  %s3154_s15 = sld [smem:[#allocation6 + $0x59]] }
 0x25f   :  { %5937 = vst [vmem:[#allocation83_spill] sm:$0xff] %v4709_v63  ;;  %5938 = vst [vmem:[#allocation84_spill] sm:$0xff] %v4713_v35  ;;  %v2387_v35 = vstv %s3222_s19  ;;  %s3116_s19 = sld [smem:[#allocation6 + $0x50]] }
 0x262   :  { %2059 = vrot.lane.b32.xlu0 %v2057_v20, %s3475_s20  ;;  %1832 = vrot.lane.b32.xlu1 %v1830_v51, %s3476_s6  ;;  %v1838_v20 = vmul.f32 %v1837_v13, %v4424_v54  ;;  %v1530_v51 = vstv %s3108_s18  ;;  %v2073_v13 = vmul.f32 %v2072_v33, %v4601_v26  ;;  %v2080_v26 = vstv %s3181_s23  ;;  %s3185_s18 = sld [smem:[#allocation6 + $0x42]] }
 0x263   :  { %v1853_v33 = vstv %s3150_s1  ;;  %s3227_s23 = sld [smem:[#allocation6 + $0x57]] }
 0x264   :  { %s3187_s1 = sld [smem:[#allocation6 + $0x4a]] }
 0x266   :  { %1525 = vrot.lane.b32.xlu0 %v1523_v41, %s3475_s20  ;;  %2366 = vrot.lane.b32.xlu1 %v2364_v49, %s3476_s6  ;;  %v1531_v41 = vmul.f32 %v1530_v51, %v4631_v27  ;;  %v2372_v49 = vmul.f32 %v2371_v57, %v4667_v59  ;;  %v4719_v51 = vpop.permute.xlu1 %1241  ;;  %v4723_v57 = vpop.permute.xlu0 %1265 }
 0x267   :  { %5939 = vst [vmem:[#allocation85_spill] sm:$0xff] %v4719_v51  ;;  %5940 = vst [vmem:[#allocation86_spill] sm:$0xff] %v4723_v57  ;;  %v1546_v57 = vstv %s3110_s24  ;;  %v2419_v51 = vstv %s3226_s9  ;;  %s3156_s24 = sld [smem:[#allocation6 + $0x61]] }
 0x268   :  { %s4960_s9 = sld [smem:[#allocation6 + $0x6b]] }
 0x26a   :  { %2067 = vrot.lane.b32.xlu0 %v2065_v46, %s3475_s20  ;;  %1840 = vrot.lane.b32.xlu1 %v1838_v20, %s3473_s17  ;;  %v1538_v46 = vstv %s3109_s4  ;;  %v2379_v20 = vstv %s3221_s22  ;;  %v4729_v32 = vpop.permute.xlu1 %1257  ;;  %s3186_s4 = sld [smem:[#allocation6 + $0x46]] }
 0x26b   :  { %5941 = vst [vmem:[#allocation87_spill] sm:$0xff] %v4729_v32  ;;  %v1861_v32 = vstv %s3151_s26  ;;  %s3155_s22 = sld [smem:[#allocation6 + $0x5d]] }
 0x26c   :  { %s4835_s26 = sld [smem:[#allocation6 + $0x4e]] }
 0x26e   :  { %1533 = vrot.lane.b32.xlu0 %v1531_v41, %s3476_s6  ;;  %2374 = vrot.lane.b32.xlu1 %v2372_v49, %s3476_s6  ;;  %v1539_v41 = vmul.f32 %v1538_v46, %v4649_v10  ;;  %v2380_v49 = vmul.f32 %v2379_v20, %v4685_v42  ;;  %v4733_v46 = vpop.permute.xlu0 %1281  ;;  %v1547_v20 = vmul.f32 %v1546_v57, %v4667_v59 }
 0x26f   :  { %5942 = vst [vmem:[#allocation88_spill] sm:$0xff] %v4733_v46  ;;  %v5946_v46 = vld [vmem:[#allocation21_spill] sm:$0xff] }
 0x272   :  { %2075 = vrot.lane.b32.xlu0 %v2073_v13, %s3475_s20  ;;  %1848 = vrot.lane.b32.xlu1 %v1846_v40, %s3473_s17  ;;  %v2081_v13 = vmul.f32 %v2080_v26, %v4631_v27  ;;  %v1854_v40 = vmul.f32 %v1853_v33, %v4482_v39  ;;  %s3111_s20 = sld [smem:[#allocation6 + $0x3c]]  ;;  %v4739_v27 = vpop.permute.xlu1 %1273  ;;  %v4743_v26 = vpop.permute.xlu0 %1297  ;;  %v2136_v23 = vstv %s4835_s26 }
 0x273   :  { %5943 = vst [vmem:[#allocation89_spill] sm:$0xff] %v4739_v27  ;;  %5944 = vst [vmem:[#allocation90_spill] sm:$0xff] %v4743_v26  ;;  %v4755_v26 = vmul.f32 %v4424_v54, %v5946_v46  ;;  %s5036_s26 = sld [smem:[#allocation6 + $0x66]] }
 0x275   :  { %v2420_v22 = vmul.f32 %v2419_v51, %v4755_v26 }
 0x276   :  { %1541 = vrot.lane.b32.xlu0 %v1539_v41, %s3476_s6  ;;  %2382 = vrot.lane.b32.xlu1 %v2380_v49, %s3476_s6  ;;  %v2388_v41 = vmul.f32 %v2387_v35, %v4424_v54  ;;  %v2088_v49 = vstv %s3182_s25  ;;  %v4749_v35 = vpop.permute.xlu1 %1289  ;;  %s3228_s25 = sld [smem:[#allocation6 + $0x5b]] }
 0x277   :  { %v2089_v33 = vmul.f32 %v2088_v49, %v4649_v10  ;;  %5945 = vst [vmem:[#allocation91_spill] sm:$0xff] %v4749_v35  ;;  %v2096_v10 = vstv %s3183_s8  ;;  %v4757_v49 = vpop.permute.xlu0 %1313  ;;  %s4849_s8 = sld [smem:[#allocation6 + $0x5f]] }
 0x278   :  { %v1554_v57 = vstv %s3111_s20  ;;  %5947 = vst [vmem:[#allocation21_spill] sm:$0xff] %v4757_v49  ;;  %v2411_v49 = vstv %s3225_s16  ;;  %s4837_s20 = sld [smem:[#allocation6 + $0x65]] }
 0x279   :  { %s4924_s16 = sld [smem:[#allocation6 + $0x67]] }
 0x27a   :  { %2083 = vrot.lane.b32.xlu0 %v2081_v13, %s3476_s6  ;;  %1856 = vrot.lane.b32.xlu1 %v1854_v40, %s3473_s17  ;;  %v1862_v13 = vmul.f32 %v1861_v32, %v4454_v61  ;;  %v2395_v40 = vstv %s3223_s27  ;;  %v1869_v32 = vstv %s3152_s28  ;;  %v4763_v35 = vpop.permute.xlu1 %1305  ;;  %s4847_s27 = sld [smem:[#allocation6 + $0x54]] }
 0x27b   :  { %5948 = vst [vmem:[#allocation92_spill] sm:$0xff] %v4763_v35  ;;  %v4767_v27 = vpop.permute.xlu0 %1329  ;;  %s4863_s28 = sld [smem:[#allocation6 + $0x52]] }
 0x27c   :  { %5949 = vst [vmem:[#allocation93_spill] sm:$0xff] %v4767_v27  ;;  %v1570_v27 = vstv %s3113_s14  ;;  %v2435_v25 = vstv %s3228_s25  ;;  %s4919_s14 = sld [smem:[#allocation6 + $0x5c]] }
 0x27d   :  { %s5024_s25 = sld [smem:[#allocation6 + $0x73]] }
 0x27e   :  { %1549 = vrot.lane.b32.xlu0 %v1547_v20, %s3476_s6  ;;  %2390 = vrot.lane.b32.xlu1 %v2388_v41, %s3473_s17  ;;  %v1555_v20 = vmul.f32 %v1554_v57, %v4685_v42  ;;  %v2396_v41 = vmul.f32 %v2395_v40, %v4443_v16  ;;  %v1562_v57 = vstv %s3112_s29  ;;  %v2403_v40 = vstv %s3224_s5  ;;  %s4871_s29 = sld [smem:[#allocation6 + $0x69]] }
 0x27f   :  { %v1909_v9 = vstv %s4837_s20  ;;  %s4883_s5 = sld [smem:[#allocation6 + $0x58]] }
 0x280   :  { %s5052_s20 = sld [smem:[#allocation6 + $0x6c]] }
 0x282   :  { %2091 = vrot.lane.b32.xlu0 %v2089_v33, %s3476_s6  ;;  %1864 = vrot.lane.b32.xlu1 %v1862_v13, %s3473_s17  ;;  %v2097_v33 = vmul.f32 %v2096_v10, %v4667_v59  ;;  %v1870_v13 = vmul.f32 %v1869_v32, %v4755_v26  ;;  %v4773_v59 = vmul.f32 %v4443_v16, %v5946_v46  ;;  %v2104_v10 = vstv %s3184_s7  ;;  %s4887_s7 = sld [smem:[#allocation6 + $0x63]] }
 0x283   :  { %v1877_v32 = vstv %s3153_s13  ;;  %s4907_s13 = sld [smem:[#allocation6 + $0x6d]] }
 0x285   :  { %v1610_v5 = vstv %s4883_s5  ;;  %s5100_s5 = sld [smem:[#allocation6 + $0x7b]] }
 0x286   :  { %1557 = vrot.lane.b32.xlu0 %v1555_v20, %s3476_s6  ;;  %2398 = vrot.lane.b32.xlu1 %v2396_v41, %s3473_s17  ;;  %v1563_v20 = vmul.f32 %v1562_v57, %v4424_v54  ;;  %v2404_v41 = vmul.f32 %v2403_v40, %v4482_v39  ;;  %v2105_v57 = vmul.f32 %v2104_v10, %v4685_v42  ;;  %v2112_v10 = vstv %s3185_s18  ;;  %s4940_s18 = sld [smem:[#allocation6 + $0x5a]] }
 0x287   :  { %v1878_v40 = vmul.f32 %v1877_v32, %v4773_v59  ;;  %v4793_v42 = vmul.f32 %v4482_v39, %v5946_v46  ;;  %v1885_v32 = vstv %s3154_s15  ;;  %s4944_s15 = sld [smem:[#allocation6 + $0x71]] }
 0x289   :  { %v2436_v14 = vmul.f32 %v2435_v25, %v4793_v42  ;;  %v5963_v25 = vld [vmem:[#allocation27_spill] sm:$0xff] }
 0x28a   :  { %2099 = vrot.lane.b32.xlu0 %v2097_v33, %s3476_s6  ;;  %1872 = vrot.lane.b32.xlu1 %v1870_v13, %s3477_s30  ;;  %v4777_v33 = vpop.permute.xlu1 %1321 }
 0x28b   :  { %5950 = vst [vmem:[#allocation94_spill] sm:$0xff] %v4777_v33  ;;  %v2412_v33 = vmul.f32 %v2411_v49, %v4454_v61  ;;  %v1886_v49 = vmul.f32 %v1885_v32, %v4793_v42  ;;  %v2120_v32 = vstv %s3186_s4  ;;  %s4972_s4 = sld [smem:[#allocation6 + $0x5e]] }
 0x28e   :  { %1565 = vrot.lane.b32.xlu0 %v1563_v20, %s3473_s17  ;;  %2406 = vrot.lane.b32.xlu1 %v2404_v41, %s3473_s17  ;;  %v4785_v35 = vpop.xlane.xlu1 %1338  ;;  %v1571_v41 = vmul.f32 %v1570_v27, %v4443_v16  ;;  %v2113_v27 = vmul.f32 %v2112_v10, %v4424_v54  ;;  %v4813_v10 = vmul.f32 %v4454_v61, %v5946_v46  ;;  %v2427_v46 = vstv %s3227_s23  ;;  %s4992_s23 = sld [smem:[#allocation6 + $0x6f]] }
 0x28f   :  { %5952 = vst [vmem:[#allocation96_spill] sm:$0xff] %v4785_v35  ;;  %v1578_v35 = vstv %s3114_s10  ;;  %s4956_s10 = sld [smem:[#allocation6 + $0x60]] }
 0x290   :  { %v4779_v13 = vpop.permute.xlu0 %1469 }
 0x291   :  { %5951 = vst [vmem:[#allocation95_spill] sm:$0xff] %v4779_v13  ;;  %v1901_v13 = vstv %s3156_s24  ;;  %s5008_s24 = sld [smem:[#allocation6 + $0x79]] }
 0x292   :  { %2107 = vrot.lane.b32.xlu0 %v2105_v57, %s3476_s6  ;;  %1880 = vrot.lane.b32.xlu1 %v1878_v40, %s3477_s30  ;;  %s3115_s6 = sld [smem:[#allocation6 + $0x4c]] }
 0x294   :  { %v4787_v20 = vpop.permute.xlu0 %1744 }
 0x296   :  { %1573 = vrot.lane.b32.xlu0 %v1571_v41, %s3473_s17  ;;  %2414 = vrot.lane.b32.xlu1 %v2412_v33, %s3473_s17  ;;  %v1579_v33 = vmul.f32 %v1578_v35, %v4482_v39  ;;  %v2121_v35 = vmul.f32 %v2120_v32, %v4443_v16 }
 0x298   :  { %v4797_v57 = vpop.permute.xlu0 %1477  ;;  %v4799_v40 = vpop.permute.xlu1 %1493  ;;  %v1586_v29 = vstv %s3115_s6  ;;  %s4988_s6 = sld [smem:[#allocation6 + $0x64]] }
 0x299   :  { %5953 = vst [vmem:[#allocation97_spill] sm:$0xff] %v4797_v57  ;;  %5954 = vst [vmem:[#allocation98_spill] sm:$0xff] %v4799_v40  ;;  %v1893_v40 = vstv %s3155_s22  ;;  %v5957_v57 = vld [vmem:[#allocation23_spill] sm:$0xff]  ;;  %s4976_s22 = sld [smem:[#allocation6 + $0x75]] }
 0x29a   :  { %2115 = vrot.lane.b32.xlu0 %v2113_v27, %s3473_s17  ;;  %1888 = vrot.lane.b32.xlu1 %v1886_v49, %s3477_s30  ;;  %v1894_v51 = vmul.f32 %v1893_v40, %v4813_v10  ;;  %v4833_v32 = vmul.f32 %v4424_v54, %v5957_v57  ;;  %v2128_v40 = vstv %s3187_s1  ;;  %s5004_s1 = sld [smem:[#allocation6 + $0x62]] }
 0x29c   :  { %v4805_v63 = vpop.permute.xlu0 %1752  ;;  %v4807_v41 = vpop.permute.xlu1 %1776 }
 0x29e   :  { %1581 = vrot.lane.b32.xlu0 %v1579_v33, %s3473_s17  ;;  %2422 = vrot.lane.b32.xlu1 %v2420_v22, %s3477_s30  ;;  %v1587_v22 = vmul.f32 %v1586_v29, %v4454_v61  ;;  %v2129_v29 = vmul.f32 %v2128_v40, %v4482_v39 }
 0x2a0   :  { %v4817_v27 = vpop.permute.xlu0 %2019  ;;  %v4819_v49 = vpop.permute.xlu1 %2310 }
 0x2a1   :  { %5955 = vst [vmem:[#allocation99_spill] sm:$0xff] %v4817_v27  ;;  %v2428_v27 = vmul.f32 %v2427_v46, %v4773_v59  ;;  %v1902_v46 = vmul.f32 %v1901_v13, %v4833_v32  ;;  %v4861_v13 = vmul.f32 %v4443_v16, %v5957_v57 }
 0x2a2   :  { %2123 = vrot.lane.b32.xlu0 %v2121_v35, %s3473_s17  ;;  %1896 = vrot.lane.b32.xlu1 %v1894_v51, %s3477_s30 }
 0x2a4   :  { %v4825_v30 = vpop.permute.xlu0 %1485  ;;  %v4827_v33 = vpop.permute.xlu1 %1784 }
 0x2a5   :  { %5956 = vst [vmem:[#allocation100_spill] sm:$0xff] %v4825_v30  ;;  %v1594_v30 = vstv %s3116_s19  ;;  %s5020_s19 = sld [smem:[#allocation6 + $0x68]] }
 0x2a6   :  { %1589 = vrot.lane.b32.xlu0 %v1587_v22, %s3473_s17  ;;  %2430 = vrot.lane.b32.xlu1 %v2428_v27, %s3477_s30  ;;  %v1595_v40 = vmul.f32 %v1594_v30, %v4755_v26 }
 0x2a8   :  { %v4841_v35 = vpop.permute.xlu0 %1760  ;;  %v4843_v51 = vpop.permute.xlu1 %2318 }
 0x2aa   :  { %2131 = vrot.lane.b32.xlu0 %v2129_v29, %s3473_s17  ;;  %1904 = vrot.lane.b32.xlu1 %v1902_v46, %s3478_s11  ;;  %v534_v29 = vadd.f32 %v5961_v53, %v5960_v36  ;;  %v5962_v46 = vld [vmem:[#allocation22_spill] sm:$0xff]  ;;  %v2137_v36 = vmul.f32 %v2136_v23, %v4454_v61  ;;  %v1602_v53 = vstv %s4847_s27  ;;  %s5058_s27 = sld [smem:[#allocation6 + $0x77]] }
 0x2ac   :  { %v4853_v27 = vpop.permute.xlu0 %2027  ;;  %v4855_v22 = vpop.permute.xlu1 %1792  ;;  %v542_v30 = vadd.f32 %v5963_v25, %v534_v29  ;;  %v4901_v25 = vmul.f32 %v4482_v39, %v5957_v57 }
 0x2ad   :  { %5958 = vst [vmem:[#allocation23_spill] sm:$0xff] %v4853_v27  ;;  %5959 = vst [vmem:[#allocation101_spill] sm:$0xff] %v4855_v22  ;;  %v809_v27 = vadd.f32 %v4298_v60, %v5962_v46  ;;  %v1910_v60 = vmul.f32 %v1909_v9, %v4861_v13  ;;  %v1603_v9 = vmul.f32 %v1602_v53, %v4773_v59 }
 0x2ae   :  { %1597 = vrot.lane.b32.xlu0 %v1595_v40, %s3477_s30  ;;  %2438 = vrot.lane.b32.xlu1 %v2436_v14, %s3477_s30  ;;  %v2443_v40 = vstv %s4849_s8  ;;  %s5074_s8 = sld [smem:[#allocation6 + $0x6a]] }
 0x2af   :  { %v817_v52 = vadd.f32 %v4306_v6, %v809_v27  ;;  %v5965_v6 = vld [vmem:[#allocation28_spill] sm:$0xff]  ;;  %v2444_v46 = vmul.f32 %v2443_v40, %v4813_v10 }
 0x2b0   :  { %v4877_v43 = vpop.permute.xlu0 %2294  ;;  %v4879_v22 = vpop.permute.xlu1 %2326  ;;  %v550_v14 = vadd.f32 %v5965_v6, %v542_v30  ;;  %v1917_v30 = vstv %s4871_s29  ;;  %s5095_s29 = sld [smem:[#allocation6 + $0x70]] }
 0x2b1   :  { %5964 = vst [vmem:[#allocation20_spill] sm:$0xff] %v4879_v22  ;;  %v825_v27 = vadd.f32 %v4308_v11, %v817_v52  ;;  %v5967_v11 = vld [vmem:[#allocation29_spill] sm:$0xff]  ;;  %v5968_v22 = vld [vmem:[#allocation34_spill] sm:$0xff] }
 0x2b2   :  { %2139 = vrot.lane.b32.xlu0 %v2137_v36, %s3473_s17  ;;  %1912 = vrot.lane.b32.xlu1 %v1910_v60, %s3478_s11  ;;  %s4903_s17 = sld [smem:[#allocation6 + $0x56]]  ;;  %v2144_v36 = vstv %s4863_s28  ;;  %v558_v52 = vadd.f32 %v5967_v11, %v550_v14 }
 0x2b3   :  { %v833_v60 = vadd.f32 %v4316_v19, %v825_v27  ;;  %v2145_v6 = vmul.f32 %v2144_v36, %v4755_v26  ;;  %v1611_v36 = vmul.f32 %v1610_v5, %v4793_v42  ;;  %s5079_s28 = sld [smem:[#allocation6 + $0x81]] }
 0x2b4   :  { %v4893_v29 = vpop.permute.xlu0 %1768  ;;  %v4895_v23 = vpop.permute.xlu1 %1800 }
 0x2b5   :  { %5966 = vst [vmem:[#allocation26_spill] sm:$0xff] %v4895_v23  ;;  %v1918_v23 = vmul.f32 %v1917_v30, %v4901_v25  ;;  %v841_v26 = vadd.f32 %v4318_v21, %v833_v60  ;;  %v4938_v30 = vmul.f32 %v4454_v61, %v5957_v57 }
 0x2b6   :  { %1605 = vrot.lane.b32.xlu0 %v1603_v9, %s3477_s30  ;;  %2446 = vrot.lane.b32.xlu1 %v2444_v46, %s3477_s30  ;;  %v566_v9 = vadd.f32 %v5968_v22, %v558_v52  ;;  %v2451_v46 = vstv %s4887_s7  ;;  %s5118_s7 = sld [smem:[#allocation6 + $0x6e]] }
 0x2b7   :  { %v2452_v22 = vmul.f32 %v2451_v46, %v4833_v32  ;;  %v849_v21 = vadd.f32 %v4325_v58, %v841_v26 }
 0x2b8   :  { %v4913_v53 = vpop.permute.xlu0 %2035  ;;  %v4915_v40 = vpop.permute.xlu1 %2334  ;;  %v574_v19 = vadd.f32 %v4167_v7, %v566_v9  ;;  %v1925_v7 = vstv %s4907_s13  ;;  %v2459_v9 = vstv %s4924_s16  ;;  %s5137_s13 = sld [smem:[#allocation6 + $0x74]] }
 0x2b9   :  { %v1926_v60 = vmul.f32 %v1925_v7, %v4938_v30  ;;  %v857_v58 = vadd.f32 %v4327_v34, %v849_v21  ;;  %v2460_v26 = vmul.f32 %v2459_v9, %v4861_v13  ;;  %s5160_s16 = sld [smem:[#allocation6 + $0x72]] }
 0x2ba   :  { %2147 = vrot.lane.b32.xlu0 %v2145_v6, %s3477_s30  ;;  %1920 = vrot.lane.b32.xlu1 %v1918_v23, %s3478_s11  ;;  %v2152_v23 = vstv %s4903_s17  ;;  %v582_v5 = vadd.f32 %v4169_v18, %v574_v19  ;;  %v1618_v6 = vstv %s4919_s14  ;;  %s5123_s17 = sld [smem:[#allocation6 + $0x85]] }
 0x2bb   :  { %v2153_v57 = vmul.f32 %v2152_v23, %v4773_v59  ;;  %v1619_v19 = vmul.f32 %v1618_v6, %v4813_v10  ;;  %v865_v34 = vadd.f32 %v4334_v3, %v857_v58  ;;  %v2168_v58 = vstv %s4972_s4  ;;  %s5142_s14 = sld [smem:[#allocation6 + $0x7f]] }
 0x2bc   :  { %v4930_v14 = vpop.permute.xlu0 %2302  ;;  %v4932_v27 = vpop.permute.xlu1 %1808  ;;  %v590_v18 = vadd.f32 %v4179_v17, %v582_v5  ;;  %s5219_s4 = sld [smem:[#allocation6 + $0x7c]] }
 0x2bd   :  { %v873_v3 = vadd.f32 %v4336_v1, %v865_v34  ;;  %v1634_v34 = vstv %s4988_s6  ;;  %s5242_s6 = sld [smem:[#allocation6 + $0x7a]] }
 0x2be   :  { %1613 = vrot.lane.b32.xlu0 %v1611_v36, %s3477_s30  ;;  %2454 = vrot.lane.b32.xlu1 %v2452_v22, %s3478_s11  ;;  %v2160_v36 = vstv %s4940_s18  ;;  %v1933_v22 = vstv %s4944_s15  ;;  %v598_v17 = vadd.f32 %v4181_v44, %v590_v18  ;;  %s5165_s18 = sld [smem:[#allocation6 + $0x89]] }
 0x2bf   :  { %v2161_v5 = vmul.f32 %v2160_v36, %v4793_v42  ;;  %v1934_v21 = vmul.f32 %v1933_v22, %v4424_v54  ;;  %v881_v1 = vadd.f32 %v4343_v56, %v873_v3  ;;  %v2169_v22 = vmul.f32 %v2168_v58, %v4813_v10  ;;  %s5180_s15 = sld [smem:[#allocation6 + $0x78]] }
 0x2c0   :  { %v4950_v11 = vpop.permute.xlu0 %1501  ;;  %v4952_v52 = vpop.permute.xlu1 %2342  ;;  %v606_v44 = vadd.f32 %v4193_v38, %v598_v17  ;;  %v1949_v3 = vstv %s5008_s24  ;;  %s5280_s24 = sld [smem:[#allocation6 + $0x7e]] }
 0x2c1   :  { %v889_v56 = vadd.f32 %v4345_v62, %v881_v1  ;;  %v1747_v1 = vadd.f32 %v4787_v20, %v4590_v28 }
 0x2c2   :  { %2155 = vrot.lane.b32.xlu0 %v2153_v57, %s3477_s30  ;;  %1928 = vrot.lane.b32.xlu1 %v1926_v60, %s3478_s11  ;;  %v1626_v57 = vstv %s4956_s10  ;;  %v2467_v60 = vstv %s4960_s9  ;;  %v614_v38 = vadd.f32 %v4195_v47, %v606_v44  ;;  %s5185_s10 = sld [smem:[#allocation6 + $0x83]] }
 0x2c3   :  { %v1627_v9 = vmul.f32 %v1626_v57, %v4833_v32  ;;  %v2468_v18 = vmul.f32 %v2467_v60, %v4901_v25  ;;  %v1635_v57 = vmul.f32 %v1634_v34, %v4861_v13  ;;  %v2176_v44 = vstv %s5004_s1  ;;  %s5207_s9 = sld [smem:[#allocation6 + $0x8d]] }
 0x2c4   :  { %v4966_v46 = vpop.permute.xlu0 %2043  ;;  %v4968_v59 = vpop.permute.xlu1 %1816  ;;  %v622_v47 = vadd.f32 %v4203_v50, %v614_v38  ;;  %v5969_v50 = vld [vmem:[#allocation30_spill] sm:$0xff]  ;;  %v1950_v38 = vmul.f32 %v1949_v3, %v4482_v39  ;;  %v2184_v3 = vstv %s5036_s26  ;;  %s5264_s1 = sld [smem:[#allocation6 + $0x80]] }
 0x2c5   :  { %s5322_s26 = sld [smem:[#allocation6 + $0x88]] }
 0x2c6   :  { %1621 = vrot.lane.b32.xlu0 %v1619_v19, %s3477_s30  ;;  %2462 = vrot.lane.b32.xlu1 %v2460_v26, %s3478_s11  ;;  %v1941_v19 = vstv %s4976_s22  ;;  %v630_v62 = vadd.f32 %v5969_v50, %v622_v47  ;;  %s5225_s22 = sld [smem:[#allocation6 + $0x87]] }
 0x2c7   :  { %v1942_v17 = vmul.f32 %v1941_v19, %v4443_v16  ;;  %v2177_v19 = vmul.f32 %v2176_v44, %v4833_v32  ;;  %v5971_v32 = vld [vmem:[#allocation31_spill] sm:$0xff] }
 0x2c8   :  { %v4982_v23 = vpop.permute.xlu0 %1509  ;;  %v4984_v7 = vpop.permute.xlu1 %2350 }
 0x2ca   :  { %2163 = vrot.lane.b32.xlu0 %v2161_v5, %s3477_s30  ;;  %1936 = vrot.lane.b32.xlu1 %v1934_v21, %s3474_s0  ;;  %v2475_v5 = vstv %s4992_s23  ;;  %s5248_s23 = sld [smem:[#allocation6 + $0x8b]] }
 0x2cb   :  { %v2476_v60 = vmul.f32 %v2475_v5, %v4938_v30  ;;  %v638_v5 = vadd.f32 %v5971_v32, %v630_v62  ;;  %v2297_v62 = vadd.f32 %v4877_v43, %v4623_v45 }
 0x2cc   :  { %v4998_v6 = vpop.permute.xlu0 %2051  ;;  %v5000_v42 = vpop.permute.xlu1 %1824 }
 0x2ce   :  { %1629 = vrot.lane.b32.xlu0 %v1627_v9, %s3478_s11  ;;  %2470 = vrot.lane.b32.xlu1 %v2468_v18, %s3478_s11  ;;  %v897_v9 = vadd.f32 %v4350_v0, %v889_v56  ;;  %v5970_v0 = vld [vmem:[#allocation24_spill] sm:$0xff]  ;;  %v1755_v56 = vadd.f32 %v4805_v63, %v1747_v1  ;;  %v2185_v1 = vmul.f32 %v2184_v3, %v4861_v13 }
 0x2cf   :  { %v1084_v34 = vadd.f32 %v4402_v4, %v5970_v0  ;;  %v2491_v0 = vstv %s5058_s27  ;;  %s5364_s27 = sld [smem:[#allocation6 + $0x8a]] }
 0x2d0   :  { %v5014_v26 = vpop.permute.xlu0 %1517  ;;  %v5016_v36 = vpop.permute.xlu1 %2358  ;;  %v905_v47 = vadd.f32 %v4352_v2, %v897_v9  ;;  %v1763_v44 = vadd.f32 %v4841_v35, %v1755_v56  ;;  %v5972_v2 = vld [vmem:[#allocation32_spill] sm:$0xff] }
 0x2d1   :  { %v1092_v28 = vadd.f32 %v4404_v15, %v1084_v34  ;;  %v646_v15 = vadd.f32 %v5972_v2, %v638_v5  ;;  %v2492_v5 = vmul.f32 %v2491_v0, %v4443_v16 }
 0x2d2   :  { %2171 = vrot.lane.b32.xlu0 %v2169_v22, %s3477_s30  ;;  %1944 = vrot.lane.b32.xlu1 %v1942_v17, %s3474_s0  ;;  %s5040_s30 = sld [smem:[#allocation6 + $0x7d]]  ;;  %v1642_v22 = vstv %s5020_s19  ;;  %v2483_v17 = vstv %s5024_s25  ;;  %v913_v63 = vadd.f32 %v4355_v37, %v905_v47  ;;  %v1771_v9 = vadd.f32 %v4893_v29, %v1763_v44  ;;  %v5974_v47 = vld [vmem:[#allocation25_spill] sm:$0xff] }
 0x2d3   :  { %v2484_v4 = vmul.f32 %v2483_v17, %v4424_v54  ;;  %v1100_v35 = vadd.f32 %v4406_v31, %v1092_v28  ;;  %v2305_v17 = vadd.f32 %v4930_v14, %v2297_v62  ;;  %v1650_v37 = vstv %s5052_s20  ;;  %v5973_v31 = vld [vmem:[#allocation33_spill] sm:$0xff]  ;;  %s5294_s19 = sld [smem:[#allocation6 + $0x84]] }
 0x2d4   :  { %v5030_v21 = vpop.permute.xlu0 %2059  ;;  %v5032_v10 = vpop.permute.xlu1 %1832  ;;  %v654_v45 = vadd.f32 %v5973_v31, %v646_v15  ;;  %v921_v43 = vadd.f32 %v4357_v55, %v913_v63  ;;  %v1779_v13 = vadd.f32 %v4807_v41, %v1771_v9  ;;  %v1651_v32 = vmul.f32 %v1650_v37, %v4938_v30  ;;  %v5977_v62 = vld [vmem:[#allocation101_spill] sm:$0xff]  ;;  %v5979_v31 = vld [vmem:[#allocation20_spill] sm:$0xff]  ;;  %s5308_s25 = sld [smem:[#allocation6 + $0x82]] }
 0x2d5   :  { %v1108_v29 = vadd.f32 %v4408_v12, %v1100_v35  ;;  %v5116_v56 = vmul.f32 %v4424_v54, %v5974_v47  ;;  %v2313_v55 = vadd.f32 %v4819_v49, %v2305_v17  ;;  %v2192_v41 = vstv %s5074_s8  ;;  %v5978_v35 = vld [vmem:[#allocation67_spill] sm:$0xff]  ;;  %s5354_s20 = sld [smem:[#allocation4 + $0x1]] }
 0x2d6   :  { %1637 = vrot.lane.b32.xlu0 %v1635_v57, %s3478_s11  ;;  %2478 = vrot.lane.b32.xlu1 %v2476_v60, %s3478_s11  ;;  %v1643_v60 = vmul.f32 %v1642_v22, %v4901_v25  ;;  %v1965_v12 = vstv %s5079_s28  ;;  %v662_v28 = vadd.f32 %v4205_v48, %v654_v45  ;;  %v1658_v63 = vstv %s5095_s29  ;;  %s5376_s8 = sld [smem:[#allocation6 + $0x8e]] }
 0x2d7   :  { %v1116_v44 = vadd.f32 %v4410_v8, %v1108_v29  ;;  %v1966_v2 = vmul.f32 %v1965_v12, %v5116_v56  ;;  %v2321_v15 = vadd.f32 %v4843_v51, %v2313_v55  ;;  %v2499_v48 = vstv %s5100_s5  ;;  %v5980_v29 = vld [vmem:[#allocation71_spill] sm:$0xff]  ;;  %s5378_s28 = sld [smem:[#allocation4 + $0x2]] }
 0x2d8   :  { %v5046_v18 = vpop.permute.xlu0 %1525  ;;  %v5048_v58 = vpop.permute.xlu1 %2366  ;;  %v1957_v50 = vstv %s5040_s30  ;;  %v1659_v17 = vmul.f32 %v1658_v63, %v4424_v54  ;;  %v2500_v37 = vmul.f32 %v2499_v48, %v4482_v39  ;;  %v5158_v0 = vmul.f32 %v4443_v16, %v5974_v47  ;;  %s5348_s30 = sld [smem:[#allocation6 + $0x8c]] }
 0x2d9   :  { %v1958_v22 = vmul.f32 %v1957_v50, %v4454_v61  ;;  %v2193_v50 = vmul.f32 %v2192_v41, %v4901_v25  ;;  %v2329_v45 = vadd.f32 %v5979_v31, %v2321_v15  ;;  %v5982_v41 = vld [vmem:[#allocation51_spill] sm:$0xff]  ;;  %s5392_s29 = sld [smem:[#allocation6 + $0x8f]] }
 0x2da   :  { %2179 = vrot.lane.b32.xlu0 %v2177_v19, %s3478_s11  ;;  %1952 = vrot.lane.b32.xlu1 %v1950_v38, %s3474_s0  ;;  %s3168_s5 = sld [smem:[#allocation7 + $0x1]] }
 0x2db   :  { %v2337_v48 = vadd.f32 %v4915_v40, %v2329_v45  ;;  %v5199_v45 = vmul.f32 %v4482_v39, %v5974_v47 }
 0x2dc   :  { %v5068_v20 = vpop.permute.xlu0 %2067  ;;  %v5070_v57 = vpop.permute.xlu1 %1840 }
 0x2de   :  { %1645 = vrot.lane.b32.xlu0 %v1643_v60, %s3478_s11  ;;  %2486 = vrot.lane.b32.xlu1 %v2484_v4, %s3474_s0  ;;  %v929_v60 = vadd.f32 %v4360_v24, %v921_v43  ;;  %v1787_v4 = vadd.f32 %v4827_v33, %v1779_v13  ;;  %v5975_v24 = vld [vmem:[#allocation35_spill] sm:$0xff]  ;;  %v5976_v33 = vld [vmem:[#allocation50_spill] sm:$0xff]  ;;  %v2200_v43 = vstv %s5118_s7  ;;  %v1973_v13 = vstv %s5123_s17  ;;  %s1721_s7 = sld [smem:[#allocation7]] }
 0x2df   :  { %v670_v8 = vadd.f32 %v5975_v24, %v662_v28  ;;  %v5983_v28 = vld [vmem:[#allocation26_spill] sm:$0xff]  ;;  %v2201_v15 = vmul.f32 %v2200_v43, %v4938_v30  ;;  %v1974_v63 = vmul.f32 %v1973_v13, %v5158_v0  ;;  %v1666_v24 = vstv %s5137_s13  ;;  %s3205_s17 = sld [smem:[#allocation7 + $0x2]] }
 0x2e0   :  { %v5089_v19 = vpop.permute.xlu0 %1533  ;;  %v5091_v38 = vpop.permute.xlu1 %2374  ;;  %v937_v25 = vadd.f32 %v5976_v33, %v929_v60  ;;  %v1795_v9 = vadd.f32 %v5977_v62, %v1787_v4  ;;  %v5984_v4 = vld [vmem:[#allocation70_spill] sm:$0xff]  ;;  %v5985_v33 = vld [vmem:[#allocation37_spill] sm:$0xff]  ;;  %v5986_v62 = vld [vmem:[#allocation52_spill] sm:$0xff]  ;;  %v2345_v43 = vadd.f32 %v4952_v52, %v2337_v48  ;;  %v1674_v48 = vstv %s5180_s15  ;;  %s3242_s13 = sld [smem:[#allocation7 + $0x3]] }
 0x2e1   :  { %s5494_s15 = sld [smem:[#allocation9 + $0xd]] }
 0x2e2   :  { %2187 = vrot.lane.b32.xlu0 %v2185_v1, %s3478_s11  ;;  %1960 = vrot.lane.b32.xlu1 %v1958_v22, %s3474_s0  ;;  %v1124_v1 = vadd.f32 %v5978_v35, %v1116_v44  ;;  %v945_v12 = vadd.f32 %v5982_v41, %v937_v25  ;;  %v1803_v60 = vadd.f32 %v5983_v28, %v1795_v9  ;;  %v5987_v35 = vld [vmem:[#allocation73_spill] sm:$0xff]  ;;  %v5990_v28 = vld [vmem:[#allocation72_spill] sm:$0xff] }
 0x2e4   :  { %v5108_v34 = vpop.permute.xlu0 %2075  ;;  %v5110_v14 = vpop.permute.xlu1 %1848  ;;  %v953_v30 = vadd.f32 %v5986_v62, %v945_v12  ;;  %v1811_v9 = vadd.f32 %v4932_v27, %v1803_v60  ;;  %v2208_v27 = vstv %s5160_s16  ;;  %v5993_v62 = vld [vmem:[#allocation75_spill] sm:$0xff]  ;;  %s5490_s16 = sld [smem:[#allocation9 + $0x5]] }
 0x2e6   :  { %1653 = vrot.lane.b32.xlu0 %v1651_v32, %s3478_s11  ;;  %2494 = vrot.lane.b32.xlu1 %v2492_v5, %s3474_s0  ;;  %v1132_v32 = vadd.f32 %v5980_v29, %v1124_v1  ;;  %v5981_v5 = vld [vmem:[#allocation36_spill] sm:$0xff]  ;;  %v1819_v13 = vadd.f32 %v4968_v59, %v1811_v9  ;;  %v1981_v29 = vstv %s5165_s18  ;;  %s5492_s18 = sld [smem:[#allocation9 + $0x9]] }
 0x2e7   :  { %v678_v55 = vadd.f32 %v5981_v5, %v670_v8  ;;  %v2507_v8 = vstv %s5142_s14  ;;  %s5486_s14 = sld [smem:[#allocation9 + $0x1]] }
 0x2e8   :  { %v5131_v3 = vpop.permute.xlu0 %1541  ;;  %v5133_v49 = vpop.permute.xlu1 %2382  ;;  %v1140_v44 = vadd.f32 %v5984_v4, %v1132_v32  ;;  %v2508_v31 = vmul.f32 %v2507_v8, %v4454_v61  ;;  %v5988_v32 = vld [vmem:[#allocation38_spill] sm:$0xff]  ;;  %v1827_v12 = vadd.f32 %v5000_v42, %v1819_v13  ;;  %v2209_v4 = vmul.f32 %v2208_v27, %v4424_v54  ;;  %v5991_v42 = vld [vmem:[#allocation39_spill] sm:$0xff]  ;;  %v5994_v13 = vld [vmem:[#allocation40_spill] sm:$0xff] }
 0x2e9   :  { %v686_v25 = vadd.f32 %v5985_v33, %v678_v55  ;;  %v5989_v55 = vld [vmem:[#allocation53_spill] sm:$0xff]  ;;  %v5992_v8 = vld [vmem:[#allocation54_spill] sm:$0xff] }
 0x2ea   :  { %2195 = vrot.lane.b32.xlu0 %v2193_v50, %s3478_s11  ;;  %1968 = vrot.lane.b32.xlu1 %v1966_v2, %s3479_s21  ;;  %v1148_v1 = vadd.f32 %v5987_v35, %v1140_v44  ;;  %v961_v41 = vadd.f32 %v5989_v55, %v953_v30  ;;  %v1982_v44 = vmul.f32 %v1981_v29, %v5199_v45 }
 0x2eb   :  { %v694_v5 = vadd.f32 %v5988_v32, %v686_v25  ;;  %v1675_v35 = vmul.f32 %v1674_v48, %v4482_v39 }
 0x2ec   :  { %v5150_v22 = vpop.permute.xlu0 %2083  ;;  %v5152_v51 = vpop.permute.xlu1 %1856  ;;  %v1156_v52 = vadd.f32 %v5990_v28, %v1148_v1  ;;  %v969_v33 = vadd.f32 %v5992_v8, %v961_v41 }
 0x2ed   :  { %v702_v54 = vadd.f32 %v5991_v42, %v694_v5  ;;  %v5996_v5 = vld [vmem:[#allocation74_spill] sm:$0xff]  ;;  %v5999_v42 = vld [vmem:[#allocation77_spill] sm:$0xff] }
 0x2ee   :  { %1661 = vrot.lane.b32.xlu0 %v1659_v17, %s3474_s0  ;;  %2502 = vrot.lane.b32.xlu1 %v2500_v37, %s3474_s0  ;;  %v1667_v37 = vmul.f32 %v1666_v24, %v4443_v16  ;;  %v2515_v24 = vstv %s5185_s10  ;;  %s5496_s10 = sld [smem:[#allocation9]] }
 0x2ef   :  { %v2516_v1 = vmul.f32 %v2515_v24, %v5116_v56  ;;  %v710_v27 = vadd.f32 %v5994_v13, %v702_v54  ;;  %v6004_v13 = vld [vmem:[#allocation57_spill] sm:$0xff] }
 0x2f0   :  { %v5174_v50 = vpop.permute.xlu0 %1549  ;;  %v5176_v2 = vpop.permute.xlu1 %2390 }
 0x2f2   :  { %2203 = vrot.lane.b32.xlu0 %v2201_v15, %s3478_s11  ;;  %1976 = vrot.lane.b32.xlu1 %v1974_v63, %s3479_s21  ;;  %s5201_s11 = sld [smem:[#allocation6 + $0x76]]  ;;  %v2353_v15 = vadd.f32 %v4984_v7, %v2345_v43  ;;  %v1835_v63 = vadd.f32 %v5032_v10, %v1827_v12  ;;  %v1164_v10 = vadd.f32 %v5993_v62, %v1156_v52  ;;  %v1989_v43 = vstv %s5207_s9  ;;  %v6001_v62 = vld [vmem:[#allocation95_spill] sm:$0xff] }
 0x2f3   :  { %s5500_s9 = sld [smem:[#allocation9 + $0x2]] }
 0x2f4   :  { %v5193_v17 = vpop.permute.xlu0 %2091  ;;  %v1865_v40 = vpop.permute.xlu1 %1864  ;;  %v2361_v25 = vadd.f32 %v5016_v36, %v2353_v15  ;;  %v1843_v7 = vadd.f32 %v5070_v57, %v1835_v63  ;;  %v2523_v15 = vstv %s5225_s22  ;;  %v5998_v63 = vld [vmem:[#allocation56_spill] sm:$0xff]  ;;  %s5505_s22 = sld [smem:[#allocation9 + $0x6]] }
 0x2f6   :  { %1669 = vrot.lane.b32.xlu0 %v1667_v37, %s3474_s0  ;;  %2510 = vrot.lane.b32.xlu1 %v2508_v31, %s3474_s0  ;;  %v5240_v37 = vmul.f32 %v4454_v61, %v5974_v47  ;;  %v2369_v31 = vadd.f32 %v5048_v58, %v2361_v25  ;;  %v1851_v36 = vadd.f32 %v5110_v14, %v1843_v7  ;;  %v5995_v47 = vld [vmem:[#allocation55_spill] sm:$0xff]  ;;  %v2224_v25 = vstv %s5242_s6  ;;  %v6000_v7 = vld [vmem:[#allocation68_spill] sm:$0xff]  ;;  %s5507_s6 = sld [smem:[#allocation9 + $0x3]] }
 0x2f7   :  { %v977_v29 = vadd.f32 %v5995_v47, %v969_v33  ;;  %v1172_v14 = vadd.f32 %v5996_v5, %v1164_v10  ;;  %v2524_v33 = vmul.f32 %v2523_v15, %v5158_v0  ;;  %v1472_v10 = vadd.f32 %v6001_v62, %v6000_v7  ;;  %v6005_v47 = vld [vmem:[#allocation76_spill] sm:$0xff] }
 0x2f8   :  { %v5215_v60 = vpop.permute.xlu0 %1557  ;;  %v2399_v59 = vpop.permute.xlu1 %2398  ;;  %v2216_v57 = vstv %s5201_s11  ;;  %v2377_v32 = vadd.f32 %v5091_v38, %v2369_v31  ;;  %v1859_v58 = vadd.f32 %v5152_v51, %v1851_v36  ;;  %v1990_v28 = vmul.f32 %v1989_v43, %v5240_v37  ;;  %v5997_v38 = vld [vmem:[#allocation41_spill] sm:$0xff]  ;;  %s5498_s11 = sld [smem:[#allocation9 + $0x4]] }
 0x2f9   :  { %v2217_v12 = vmul.f32 %v2216_v57, %v4443_v16  ;;  %v718_v51 = vadd.f32 %v5997_v38, %v710_v27  ;;  %v985_v48 = vadd.f32 %v5998_v63, %v977_v29  ;;  %v2531_v31 = vstv %s5248_s23  ;;  %v6003_v36 = vld [vmem:[#allocation97_spill] sm:$0xff]  ;;  %v6009_v38 = vld [vmem:[#allocation79_spill] sm:$0xff]  ;;  %s5509_s23 = sld [smem:[#allocation9 + $0xc]] }
 0x2fa   :  { %2211 = vrot.lane.b32.xlu0 %v2209_v4, %s3474_s0  ;;  %1984 = vrot.lane.b32.xlu1 %v1982_v44, %s3479_s21  ;;  %v2385_v52 = vadd.f32 %v5133_v49, %v2377_v32  ;;  %v1867_v4 = vadd.f32 %v1865_v40, %v1859_v58  ;;  %v1682_v44 = vstv %s5219_s4  ;;  %v1180_v49 = vadd.f32 %v5999_v42, %v1172_v14  ;;  %v6006_v14 = vld [vmem:[#allocation100_spill] sm:$0xff]  ;;  %s5502_s4 = sld [smem:[#allocation9 + $0x8]] }
 0x2fb   :  { %v1683_v8 = vmul.f32 %v1682_v44, %v4454_v61  ;;  %v1480_v57 = vadd.f32 %v6003_v36, %v1472_v10  ;;  %v993_v27 = vadd.f32 %v6004_v13, %v985_v48  ;;  %v2225_v58 = vmul.f32 %v2224_v25, %v4482_v39  ;;  %v6008_v44 = vld [vmem:[#allocation58_spill] sm:$0xff]  ;;  %v6013_v25 = vld [vmem:[#allocation23_spill] sm:$0xff]  ;;  %v6014_v10 = vld [vmem:[#allocation44_spill] sm:$0xff] }
 0x2fc   :  { %v5234_v30 = vpop.permute.xlu0 %2099  ;;  %v1873_v9 = vpop.permute.xlu1 %1872  ;;  %v2393_v16 = vadd.f32 %v5176_v2, %v2385_v52  ;;  %v6002_v2 = vld [vmem:[#allocation42_spill] sm:$0xff]  ;;  %v1188_v29 = vadd.f32 %v6005_v47, %v1180_v49  ;;  %v2532_v5 = vmul.f32 %v2531_v31, %v5199_v45  ;;  %v1690_v52 = vstv %s5264_s1  ;;  %v6015_v31 = vld [vmem:[#allocation60_spill] sm:$0xff]  ;;  %s5512_s1 = sld [smem:[#allocation9 + $0x7]] }
 0x2fd   :  { %v1875_v24 = vadd.f32 %v1873_v9, %v1867_v4  ;;  %v726_v9 = vadd.f32 %v6002_v2, %v718_v51  ;;  %v1001_v15 = vadd.f32 %v6008_v44, %v993_v27  ;;  %v1691_v48 = vmul.f32 %v1690_v52, %v5116_v56  ;;  %v6012_v49 = vld [vmem:[#allocation98_spill] sm:$0xff] }
 0x2fe   :  { %1677 = vrot.lane.b32.xlu0 %v1675_v35, %s3474_s0  ;;  %2518 = vrot.lane.b32.xlu1 %v2516_v1, %s3479_s21  ;;  %v2401_v35 = vadd.f32 %v2399_v59, %v2393_v16  ;;  %v1196_v51 = vadd.f32 %v6009_v38, %v1188_v29  ;;  %v6010_v16 = vld [vmem:[#allocation69_spill] sm:$0xff]  ;;  %v1698_v29 = vstv %s5294_s19  ;;  %v6020_v38 = vld [vmem:[#allocation46_spill] sm:$0xff]  ;;  %s5518_s19 = sld [smem:[#allocation9 + $0xe]] }
 0x2ff   :  { %v1009_v2 = vadd.f32 %v6015_v31, %v1001_v15 }
 0x300   :  { %v5257_v55 = vpop.permute.xlu0 %1565  ;;  %v2407_v41 = vpop.permute.xlu1 %2406 }
 0x301   :  { %v2409_v43 = vadd.f32 %v2407_v41, %v2401_v35  ;;  %v6007_v41 = vld [vmem:[#allocation43_spill] sm:$0xff] }
 0x302   :  { %2219 = vrot.lane.b32.xlu0 %v2217_v12, %s3474_s0  ;;  %1992 = vrot.lane.b32.xlu1 %v1990_v28, %s3479_s21  ;;  %v1488_v12 = vadd.f32 %v6006_v14, %v1480_v57  ;;  %v734_v4 = vadd.f32 %v6007_v41, %v726_v9  ;;  %v6016_v9 = vld [vmem:[#allocation78_spill] sm:$0xff]  ;;  %v6018_v14 = vld [vmem:[#allocation61_spill] sm:$0xff] }
 0x303   :  { %v1204_v36 = vadd.f32 %v6016_v9, %v1196_v51 }
 0x304   :  { %v5272_v54 = vpop.permute.xlu0 %2107  ;;  %v1881_v40 = vpop.permute.xlu1 %1880  ;;  %v742_v35 = vadd.f32 %v6014_v10, %v734_v4 }
 0x305   :  { %v1883_v1 = vadd.f32 %v1881_v40, %v1875_v24  ;;  %v6011_v24 = vld [vmem:[#allocation99_spill] sm:$0xff]  ;;  %v1496_v40 = vadd.f32 %v6012_v49, %v1488_v12  ;;  %v1017_v12 = vadd.f32 %v6018_v14, %v1009_v2 }
 0x306   :  { %1685 = vrot.lane.b32.xlu0 %v1683_v8, %s3474_s0  ;;  %2526 = vrot.lane.b32.xlu1 %v2524_v33, %s3479_s21  ;;  %v2022_v42 = vadd.f32 %v6011_v24, %v6010_v16  ;;  %v2232_v33 = vstv %s5280_s24  ;;  %v6022_v16 = vld [vmem:[#allocation80_spill] sm:$0xff]  ;;  %s5515_s24 = sld [smem:[#allocation9 + $0xa]] }
 0x307   :  { %v1504_v62 = vadd.f32 %v4950_v11, %v1496_v40 }
 0x308   :  { %v5288_v32 = vpop.permute.xlu0 %1573  ;;  %v2415_v59 = vpop.permute.xlu1 %2414  ;;  %v2030_v7 = vadd.f32 %v6013_v25, %v2022_v42  ;;  %v6023_v25 = vld [vmem:[#allocation47_spill] sm:$0xff] }
 0x309   :  { %v2417_v28 = vadd.f32 %v2415_v59, %v2409_v43  ;;  %v1512_v27 = vadd.f32 %v4982_v23, %v1504_v62 }
 0x30a   :  { %2227 = vrot.lane.b32.xlu0 %v2225_v58, %s3474_s0  ;;  %2534 = vrot.lane.b32.xlu1 %v2532_v5, %s3479_s21  ;;  %v2038_v13 = vadd.f32 %v4913_v53, %v2030_v7  ;;  %v6017_v58 = vld [vmem:[#allocation45_spill] sm:$0xff] }
 0x30b   :  { %v1520_v59 = vadd.f32 %v5014_v26, %v1512_v27  ;;  %v750_v5 = vadd.f32 %v6017_v58, %v742_v35  ;;  %v6027_v27 = vld [vmem:[#allocation64_spill] sm:$0xff] }
 0x30c   :  { %v5301_v39 = vpop.permute.xlu0 %2115  ;;  %v1889_v63 = vpop.permute.xlu1 %1888  ;;  %v2046_v11 = vadd.f32 %v4966_v46, %v2038_v13  ;;  %v2240_v46 = vstv %s5308_s25  ;;  %s5524_s25 = sld [smem:[#allocation9 + $0xb]] }
 0x30d   :  { %v1891_v8 = vadd.f32 %v1889_v63, %v1883_v1  ;;  %v2233_v1 = vmul.f32 %v2232_v33, %v4454_v61  ;;  %v6019_v61 = vld [vmem:[#allocation81_spill] sm:$0xff]  ;;  %v1528_v4 = vadd.f32 %v5046_v18, %v1520_v59  ;;  %v758_v51 = vadd.f32 %v6020_v38, %v750_v5  ;;  %v6021_v63 = vld [vmem:[#allocation62_spill] sm:$0xff] }
 0x30e   :  { %1693 = vrot.lane.b32.xlu0 %v1691_v48, %s3479_s21  ;;  %v1212_v52 = vadd.f32 %v6019_v61, %v1204_v36  ;;  %v2054_v41 = vadd.f32 %v4998_v6, %v2046_v11  ;;  %v1025_v48 = vadd.f32 %v6021_v63, %v1017_v12  ;;  %v2241_v18 = vmul.f32 %v2240_v46, %v5116_v56  ;;  %v6024_v56 = vld [vmem:[#allocation63_spill] sm:$0xff]  ;;  %v6029_v61 = vld [vmem:[#allocation49_spill] sm:$0xff] }
 0x30f   :  { %v1536_v15 = vadd.f32 %v5089_v19, %v1528_v4  ;;  %v1706_v33 = vstv %s5322_s26  ;;  %v766_v7 = vadd.f32 %v6023_v25, %v758_v51  ;;  %v6032_v51 = vld [vmem:[#allocation66_spill] sm:$0xff]  ;;  %s5530_s26 = sld [smem:[#allocation9 + $0xf]] }
 0x310   :  { %v5316_v57 = vpop.permute.xlu0 %1581  ;;  %v2423_v43 = vpop.permute.xlu1 %2422  ;;  %v2062_v26 = vadd.f32 %v5030_v21, %v2054_v41  ;;  %v1220_v24 = vadd.f32 %v6022_v16, %v1212_v52  ;;  %v1033_v62 = vadd.f32 %v6024_v56, %v1025_v48  ;;  %v1707_v31 = vmul.f32 %v1706_v33, %v5199_v45  ;;  %v6030_v52 = vld [vmem:[#allocation65_spill] sm:$0xff]  ;;  %v6033_v48 = vld [vmem:[#allocation84_spill] sm:$0xff]  ;;  %v6034_v33 = vld [vmem:[#allocation87_spill] sm:$0xff] }
 0x311   :  { %v2425_v47 = vadd.f32 %v2423_v43, %v2417_v28  ;;  %v1699_v28 = vmul.f32 %v1698_v29, %v5158_v0  ;;  %v1544_v40 = vadd.f32 %v5131_v3, %v1536_v15  ;;  %v6028_v29 = vld [vmem:[#allocation82_spill] sm:$0xff] }
 0x312   :  { %2235 = vrot.lane.b32.xlu0 %v2233_v1, %s3474_s0  ;;  %s5336_s0 = sld [smem:[#allocation6 + $0x86]]  ;;  %v2070_v49 = vadd.f32 %v5068_v20, %v2062_v26  ;;  %v6025_v20 = vld [vmem:[#allocation83_spill] sm:$0xff]  ;;  %v6026_v1 = vld [vmem:[#allocation48_spill] sm:$0xff] }
 0x313   :  { %v1552_v19 = vadd.f32 %v5174_v50, %v1544_v40  ;;  %v1228_v10 = vadd.f32 %v6025_v20, %v1220_v24  ;;  %v774_v13 = vadd.f32 %v6026_v1, %v766_v7  ;;  %v2264_v40 = vstv %s5376_s8  ;;  %s5741_s8 = sld [smem:[#allocation12 + $0x1]] }
 0x314   :  { %v5330_v53 = vpop.permute.xlu0 %2123  ;;  %v1897_v23 = vpop.permute.xlu1 %1896  ;;  %v2078_v21 = vadd.f32 %v5108_v34, %v2070_v49  ;;  %v2265_v7 = vmul.f32 %v2264_v40, %v5240_v37  ;;  %v2539_v20 = vstv %s5392_s29  ;;  %s5745_s29 = sld [smem:[#allocation12]] }
 0x315   :  { %v1899_v44 = vadd.f32 %v1897_v23, %v1891_v8  ;;  %v1560_v9 = vadd.f32 %v5215_v60, %v1552_v19 }
 0x316   :  { %1701 = vrot.lane.b32.xlu0 %v1699_v28, %s3479_s21  ;;  %v2086_v2 = vadd.f32 %v5150_v22, %v2078_v21  ;;  %v1236_v22 = vadd.f32 %v6028_v29, %v1228_v10 }
 0x317   :  { %v1568_v43 = vadd.f32 %v5257_v55, %v1560_v9  ;;  %v2540_v9 = vmul.f32 %v2539_v20, %v5240_v37 }
 0x318   :  { %v1590_v6 = vpop.permute.xlu0 %1589  ;;  %v2431_v42 = vpop.permute.xlu1 %2430  ;;  %v2248_v50 = vstv %s5336_s0  ;;  %v2094_v36 = vadd.f32 %v5193_v17, %v2086_v2  ;;  %v1714_v17 = vstv %s5348_s30  ;;  %s5533_s0 = sld [smem:[#allocation10 + $0x1]] }
 0x319   :  { %v2433_v8 = vadd.f32 %v2431_v42, %v2425_v47  ;;  %v1041_v47 = vadd.f32 %v6027_v27, %v1033_v62  ;;  %v2249_v59 = vmul.f32 %v2248_v50, %v5158_v0  ;;  %v1576_v5 = vadd.f32 %v5288_v32, %v1568_v43  ;;  %s5551_s30 = sld [smem:[#allocation10]] }
 0x31a   :  { %2243 = vrot.lane.b32.xlu0 %v2241_v18, %s3479_s21  ;;  %v2102_v58 = vadd.f32 %v5234_v30, %v2094_v36  ;;  %v782_v0 = vadd.f32 %v6029_v61, %v774_v13  ;;  %v6031_v30 = vld [vmem:[#allocation85_spill] sm:$0xff]  ;;  %v1715_v4 = vmul.f32 %v1714_v17, %v5240_v37  ;;  %v6038_v17 = vld [vmem:[#allocation91_spill] sm:$0xff] }
 0x31b   :  { %v1584_v12 = vadd.f32 %v5316_v57, %v1576_v5  ;;  %v1049_v23 = vadd.f32 %v6030_v52, %v1041_v47  ;;  %v1244_v28 = vadd.f32 %v6031_v30, %v1236_v22  ;;  %v6036_v13 = vld [vmem:[#allocation89_spill] sm:$0xff]  ;;  %v6039_v52 = vld [vmem:[#allocation90_spill] sm:$0xff] }
 0x31c   :  { %v2132_v3 = vpop.permute.xlu0 %2131  ;;  %v1905_v35 = vpop.permute.xlu1 %1904  ;;  %v2110_v55 = vadd.f32 %v5272_v54, %v2102_v58  ;;  %v2256_v54 = vstv %s5364_s27  ;;  %s5588_s27 = sld [smem:[#allocation10 + $0x3]] }
 0x31d   :  { %v5361_v34 = vadd.f32 %v1905_v35, %v1899_v44  ;;  %v784_v44 = vstv %s5354_s20  ;;  %v1592_v26 = vadd.f32 %v1590_v6, %v1584_v12  ;;  %v1057_v63 = vadd.f32 %v6032_v51, %v1049_v23  ;;  %s5564_s20 = sld [smem:[#allocation10 + $0x2]] }
 0x31e   :  { %1709 = vrot.lane.b32.xlu0 %v1707_v31, %s3479_s21  ;;  %v2118_v46 = vadd.f32 %v5301_v39, %v2110_v55  ;;  %v5396_v38 = vadd.f32 %v784_v44, %v782_v0  ;;  %v1252_v16 = vadd.f32 %v6033_v48, %v1244_v28  ;;  %v2257_v39 = vmul.f32 %v2256_v54, %v5199_v45  ;;  %v6040_v44 = vld [vmem:[#allocation92_spill] sm:$0xff] }
 0x320   :  { %v1598_v11 = vpop.permute.xlu0 %1597  ;;  %v2439_v60 = vpop.permute.xlu1 %2438  ;;  %v2126_v57 = vadd.f32 %v5330_v53, %v2118_v46  ;;  %v1260_v21 = vadd.f32 %v6034_v33, %v1252_v16  ;;  %v1340_v56 = vsel %vm1336_vm4, %v5396_v38, 0.0  ;;  %v1354_v10 = vmul.f32 %v5396_v38, %v5396_v38  ;;  %v6044_v33 = vld [vmem:[#allocation59_spill] sm:$0xff] }
 0x321   :  { %v2441_v14 = vadd.f32 %v2439_v60, %v2433_v8  ;;  %v1600_v15 = vadd.f32 %v1598_v11, %v1592_v26  ;;  %v1059_v8 = vstv %s5378_s28  ;;  %v6037_v60 = vld [vmem:[#allocation88_spill] sm:$0xff]  ;;  %s5743_s28 = sld [smem:[#allocation13 + $0x1]] }
 0x322   :  { %2251 = vrot.lane.b32.xlu0 %v2249_v59, %s3479_s21  ;;  %v2134_v6 = vadd.f32 %v2132_v3, %v2126_v57  ;;  %v5410_v62 = vadd.f32 %v1059_v8, %v1057_v63  ;;  %v6035_v3 = vld [vmem:[#allocation86_spill] sm:$0xff]  ;;  %v1360_v43 = vsel %vm1336_vm4, %v1354_v10, 0.0 }
 0x323   :  { %v1268_v35 = vadd.f32 %v6035_v3, %v1260_v21  ;;  %v1353_v21 = vmul.f32 %v6044_v33, %v6044_v33 }
 0x324   :  { %v2140_v32 = vpop.permute.xlu0 %2139  ;;  %v5386_v41 = vpop.permute.xlu1 %1912  ;;  %v1355_v1 = vmul.f32 %v5410_v62, %v5410_v62 }
 0x325   :  { %v2142_v53 = vadd.f32 %v2140_v32, %v2134_v6  ;;  %v1276_v27 = vadd.f32 %v6036_v13, %v1268_v35  ;;  %v1357_v10 = vsel %vm1336_vm4, %v1353_v21, 0.0 }
 0x326   :  { %1717 = vrot.lane.b32.xlu0 %v1715_v4, %s3479_s21  ;;  %v1363_v11 = vsel %vm1336_vm4, %v1355_v1, 0.0 }
 0x327   :  { %v1284_v37 = vadd.f32 %v6037_v60, %v1276_v27  ;;  %v1915_v27 = vadd.f32 %v5386_v41, %v5361_v34  ;;  %v1997_v41 = vstv %s3168_s5  ;;  %s5749_s5 = sld [smem:[#allocation12 + $0x2]] }
 0x328   :  { %v1606_v24 = vpop.permute.xlu0 %1605  ;;  %v2447_v42 = vpop.permute.xlu1 %2446 }
 0x329   :  { %v1608_v18 = vadd.f32 %v1606_v24, %v1600_v15  ;;  %v2449_v49 = vadd.f32 %v2447_v42, %v2441_v14  ;;  %v1292_v55 = vadd.f32 %v6038_v17, %v1284_v37  ;;  %v6041_v15 = vld [vmem:[#allocation21_spill] sm:$0xff]  ;;  %v6042_v24 = vld [vmem:[#allocation94_spill] sm:$0xff] }
 0x32a   :  { %2259 = vrot.lane.b32.xlu0 %v2257_v39, %s3479_s21 }
 0x32b   :  { %v1300_v23 = vadd.f32 %v6039_v52, %v1292_v55 }
 0x32c   :  { %v2148_v19 = vpop.permute.xlu0 %2147  ;;  %v5405_v25 = vpop.permute.xlu1 %1920 }
 0x32d   :  { %v2150_v45 = vadd.f32 %v2148_v19, %v2142_v53  ;;  %v1308_v46 = vadd.f32 %v6040_v44, %v1300_v23  ;;  %v1343_v53 = vsel %vm1336_vm4, %v5410_v62, 0.0 }
 0x32e   :  { %2267 = vrot.lane.b32.xlu0 %v2265_v7, %s3479_s21  ;;  %1341 = vadd.xlane.f32.xlu1 %v1340_v56 }
 0x32f   :  { %v1316_v51 = vadd.f32 %v6041_v15, %v1308_v46 }
 0x330   :  { %v1614_v31 = vpop.permute.xlu0 %1613  ;;  %v2455_v2 = vpop.permute.xlu1 %2454 }
 0x331   :  { %v1616_v50 = vadd.f32 %v1614_v31, %v1608_v18  ;;  %v2457_v36 = vadd.f32 %v2455_v2, %v2449_v49  ;;  %v1324_v42 = vadd.f32 %v6042_v24, %v1316_v51  ;;  %v6043_v18 = vld [vmem:[#allocation93_spill] sm:$0xff] }
 0x332   :  { %2542 = vrot.lane.b32.xlu0 %v2540_v9, %s3479_s21  ;;  %1361 = vadd.xlane.f32.xlu1 %v1360_v43  ;;  %s3096_s21 = sld [smem:[#allocation4 + $0x3]] }
 0x333   :  { %v1332_v49 = vadd.f32 %v6043_v18, %v1324_v42 }
 0x334   :  { %v2156_v47 = vpop.permute.xlu0 %2155  ;;  %v1929_v29 = vpop.permute.xlu1 %1928 }
 0x335   :  { %v2158_v22 = vadd.f32 %v2156_v47, %v2150_v45  ;;  %v1923_v47 = vadd.f32 %v5405_v25, %v1915_v27 }
 0x336   :  { %1364 = vadd.xlane.f32.xlu1 %v1363_v11 }
 0x337   :  { %v1931_v60 = vadd.f32 %v1929_v29, %v1923_v47 }
 0x338   :  { %v1622_v59 = vpop.permute.xlu0 %1621  ;;  %v2463_v58 = vpop.permute.xlu1 %2462  ;;  %v1334_v19 = vstv %s3096_s21  ;;  %s5747_s21 = sld [smem:[#allocation13]] }
 0x339   :  { %v1624_v5 = vadd.f32 %v1622_v59, %v1616_v50  ;;  %v2465_v14 = vadd.f32 %v2463_v58, %v2457_v36  ;;  %v5439_v56 = vadd.f32 %v1334_v19, %v1332_v49 }
 0x33b   :  { %v1346_v31 = vsel %vm1336_vm4, %v5439_v56, 0.0  ;;  %v1356_v2 = vmul.f32 %v5439_v56, %v5439_v56 }
 0x33c   :  { %v2164_v12 = vpop.permute.xlu0 %2163  ;;  %v1937_v61 = vpop.permute.xlu1 %1936 }
 0x33d   :  { %v2166_v0 = vadd.f32 %v2164_v12, %v2158_v22  ;;  %v1366_v43 = vsel %vm1336_vm4, %v1356_v2, 0.0  ;;  %v1939_v37 = vadd.f32 %v1937_v61, %v1931_v60 }
 0x340   :  { %v1630_v30 = vpop.permute.xlu0 %1629  ;;  %v2471_v28 = vpop.permute.xlu1 %2470 }
 0x341   :  { %v5427_v32 = vadd.f32 %v1630_v30, %v1624_v5  ;;  %v2473_v4 = vadd.f32 %v2471_v28, %v2465_v14 }
 0x344   :  { %v2172_v26 = vpop.permute.xlu0 %2171  ;;  %v1945_v54 = vpop.permute.xlu1 %1944 }
 0x345   :  { %v5430_v57 = vadd.f32 %v2172_v26, %v2166_v0  ;;  %v1947_v5 = vadd.f32 %v1945_v54, %v1939_v37 }
 0x348   :  { %v1638_v63 = vpop.permute.xlu0 %1637  ;;  %v2479_v48 = vpop.permute.xlu1 %2478 }
 0x349   :  { %v2481_v16 = vadd.f32 %v2479_v48, %v2473_v4  ;;  %v1640_v15 = vadd.f32 %v1638_v63, %v5427_v32 }
 0x34c   :  { %v2180_v39 = vpop.permute.xlu0 %2179  ;;  %v1953_v6 = vpop.permute.xlu1 %1952 }
 0x34d   :  { %v1955_v14 = vadd.f32 %v1953_v6, %v1947_v5  ;;  %v2182_v24 = vadd.f32 %v2180_v39, %v5430_v57 }
 0x350   :  { %v1646_v40 = vpop.permute.xlu0 %1645  ;;  %v2487_v8 = vpop.permute.xlu1 %2486 }
 0x351   :  { %v2489_v7 = vadd.f32 %v2487_v8, %v2481_v16  ;;  %1344 = vadd.xlane.f32.xlu0 %v1343_v53  ;;  %v1648_v51 = vadd.f32 %v1646_v40, %v1640_v15 }
 0x354   :  { %v2188_v45 = vpop.permute.xlu0 %2187  ;;  %v1961_v20 = vpop.permute.xlu1 %1960 }
 0x355   :  { %1358 = vadd.xlane.f32.xlu0 %v1357_v10  ;;  %v1963_v12 = vadd.f32 %v1961_v20, %v1955_v14  ;;  %v2190_v18 = vadd.f32 %v2188_v45, %v2182_v24 }
 0x358   :  { %v1654_v3 = vpop.permute.xlu0 %1653  ;;  %v2495_v35 = vpop.permute.xlu1 %2494 }
 0x359   :  { %v5446_v9 = vadd.f32 %v2495_v35, %v2489_v7  ;;  %1347 = vadd.xlane.f32.xlu0 %v1346_v31  ;;  %v1656_v16 = vadd.f32 %v1654_v3, %v1648_v51  ;;  %v1722_v3 = vstv %s1721_s7  ;;  %s5751_s7 = sld [smem:[#allocation12 + $0x3]] }
 0x35c   :  { %v2196_v50 = vpop.permute.xlu0 %2195  ;;  %v1969_v36 = vpop.permute.xlu1 %1968 }
 0x35d   :  { %1367 = vadd.xlane.f32.xlu0 %v1366_v43  ;;  %v1971_v0 = vadd.f32 %v1969_v36, %v1963_v12  ;;  %v2198_v8 = vadd.f32 %v2196_v50, %v2190_v18  ;;  %v2547_v12 = vstv %s3242_s13  ;;  %s5755_s13 = sld [smem:[#allocation13 + $0x3]] }
 0x360   :  { %v1662_v1 = vpop.permute.xlu0 %1661  ;;  %v2503_v13 = vpop.permute.xlu1 %2502 }
 0x361   :  { %v1664_v42 = vadd.f32 %v1662_v1, %v1656_v16  ;;  %v2505_v50 = vadd.f32 %v2503_v13, %v5446_v9  ;;  %v2272_v9 = vstv %s3205_s17  ;;  %s5753_s17 = sld [smem:[#allocation13 + $0x2]] }
 0x364   :  { %v2204_v22 = vpop.permute.xlu0 %2203  ;;  %v1977_v11 = vpop.permute.xlu1 %1976 }
 0x365   :  { %v1979_v30 = vadd.f32 %v1977_v11, %v1971_v0  ;;  %v2206_v19 = vadd.f32 %v2204_v22, %v2198_v8 }
 0x368   :  { %v1670_v59 = vpop.permute.xlu0 %1669  ;;  %v2511_v58 = vpop.permute.xlu1 %2510 }
 0x369   :  { %v1672_v49 = vadd.f32 %v1670_v59, %v1664_v42  ;;  %v2513_v27 = vadd.f32 %v2511_v58, %v2505_v50  ;;  %v6045_v42 = vld [vmem:[#allocation96_spill] sm:$0xff] }
 0x36c   :  { %v2212_v17 = vpop.permute.xlu0 %2211  ;;  %v1985_v55 = vpop.permute.xlu1 %1984 }
 0x36d   :  { %v1987_v28 = vadd.f32 %v1985_v55, %v1979_v30  ;;  %v2214_v20 = vadd.f32 %v2212_v17, %v2206_v19 }
 0x370   :  { %v1678_v52 = vpop.permute.xlu0 %1677  ;;  %v2519_v23 = vpop.permute.xlu1 %2518 }
 0x371   :  { %v1680_v53 = vadd.f32 %v1678_v52, %v1672_v49  ;;  %v2521_v60 = vadd.f32 %v2519_v23, %v2513_v27 }
 0x374   :  { %v2220_v34 = vpop.permute.xlu0 %2219  ;;  %v1993_v25 = vpop.permute.xlu1 %1992 }
 0x375   :  { %v1995_v4 = vadd.f32 %v1993_v25, %v1987_v28  ;;  %v2222_v31 = vadd.f32 %v2220_v34, %v2214_v20 }
 0x377   :  { %v5452_v44 = vadd.f32 %v1997_v41, %v1995_v4 }
 0x378   :  { %v1686_v29 = vpop.permute.xlu0 %1685  ;;  %v2527_v45 = vpop.permute.xlu1 %2526 }
 0x379   :  { %v2552_v61 = vsel %vm1336_vm4, %v5452_v44, 0.0  ;;  %v1688_v7 = vadd.f32 %v1686_v29, %v1680_v53  ;;  %v2529_v14 = vadd.f32 %v2527_v45, %v2521_v60  ;;  %v2566_v23 = vmul.f32 %v5452_v44, %v5452_v44 }
 0x37a   :  { %2553 = vadd.xlane.f32.xlu0 %v2552_v61 }
 0x37b   :  { %v2572_v34 = vsel %vm1336_vm4, %v2566_v23, 0.0 }
 0x37c   :  { %v2228_v46 = vpop.permute.xlu0 %2227  ;;  %v2535_v5 = vpop.permute.xlu1 %2534 }
 0x37d   :  { %v2230_v63 = vadd.f32 %v2228_v46, %v2222_v31  ;;  %v2537_v55 = vadd.f32 %v2535_v5, %v2529_v14  ;;  %v2637_v5 = vstv %s5490_s16 }
 0x380   :  { %v1694_v26 = vpop.permute.xlu0 %1693 }
 0x381   :  { %v1696_v10 = vadd.f32 %v1694_v26, %v1688_v7 }
 0x384   :  { %v2236_v54 = vpop.permute.xlu0 %2235 }
 0x385   :  { %v2238_v57 = vadd.f32 %v2236_v54, %v2230_v63 }
 0x388   :  { %v1702_v48 = vpop.permute.xlu0 %1701 }
 0x389   :  { %v1704_v32 = vadd.f32 %v1702_v48, %v1696_v10 }
 0x38c   :  { %v2244_v6 = vpop.permute.xlu0 %2243 }
 0x38d   :  { %v2246_v36 = vadd.f32 %v2244_v6, %v2238_v57  ;;  %v1349_v6 = vmul.f32 0.015625, %v6045_v42  ;;  %v2664_v42 = vstv %s5518_s19 }
 0x38f   :  { %v1373_v19 = vmul.f32 %v1349_v6, %v1349_v6  ;;  %v1381_v27 = vsub.f32 %v6044_v33, %v1349_v6 }
 0x390   :  { %v1710_v21 = vpop.permute.xlu0 %1709 }
 0x391   :  { %v1712_v40 = vadd.f32 %v1710_v21, %v1704_v32 }
 0x394   :  { %v2252_v35 = vpop.permute.xlu0 %2251 }
 0x395   :  { %v2254_v47 = vadd.f32 %v2252_v35, %v2246_v36 }
 0x398   :  { %v1718_v2 = vpop.permute.xlu0 %1717 }
 0x399   :  { %v1720_v39 = vadd.f32 %v1718_v2, %v1712_v40 }
 0x39b   :  { %v5459_v43 = vadd.f32 %v1722_v3, %v1720_v39 }
 0x39c   :  { %v2260_v1 = vpop.permute.xlu0 %2259 }
 0x39d   :  { %v2549_v22 = vsel %vm1336_vm4, %v5459_v43, 0.0  ;;  %v2565_v11 = vmul.f32 %v5459_v43, %v5459_v43  ;;  %v2262_v37 = vadd.f32 %v2260_v1, %v2254_v47 }
 0x39e   :  { %2550 = vadd.xlane.f32.xlu1 %v2549_v22 }
 0x39f   :  { %v2569_v59 = vsel %vm1336_vm4, %v2565_v11, 0.0  ;;  %v2633_v11 = vstv %s5486_s14 }
 0x3a0   :  { %v2268_v13 = vpop.permute.xlu0 %2267  ;;  %2570 = vadd.xlane.f32.xlu0 %v2569_v59  ;;  %v2652_v59 = vstv %s5500_s9  ;;  %s3480_s9 = smov 64  }
 0x3a1   :  { %v2270_v17 = vadd.f32 %v2268_v13, %v2262_v37  ;;  %v2614_v37 = vstv %s5496_s10  ;;  %v2656_v13 = vstv %s5505_s22 }
 0x3a3   :  { %v5466_v58 = vadd.f32 %v2272_v9, %v2270_v17  ;;  %v2618_v9 = vstv %s5498_s11 }
 0x3a4   :  { %v2543_v0 = vpop.permute.xlu0 %2542 }
 0x3a5   :  { %v2545_v52 = vadd.f32 %v2543_v0, %v2537_v55  ;;  %v2555_v30 = vsel %vm1336_vm4, %v5466_v58, 0.0  ;;  %v2567_v25 = vmul.f32 %v5466_v58, %v5466_v58 }
 0x3a6   :  { %2556 = vadd.xlane.f32.xlu1 %v2555_v30 }
 0x3a7   :  { %v5472_v28 = vadd.f32 %v2547_v12, %v2545_v52  ;;  %v2575_v29 = vsel %vm1336_vm4, %v2567_v25, 0.0  ;;  %v2671_v12 = vstv %s5507_s6  ;;  %v2641_v52 = vstv %s5492_s18 }
 0x3a9   :  { %v2558_v41 = vsel %vm1336_vm4, %v5472_v28, 0.0  ;;  %v2568_v4 = vmul.f32 %v5472_v28, %v5472_v28 }
 0x3aa   :  { %2573 = vadd.xlane.f32.xlu1 %v2572_v34  ;;  %2559 = vadd.xlane.f32.xlu0 %v2558_v41  ;;  %v2622_v41 = vstv %s5502_s4 }
 0x3ab   :  { %v2578_v61 = vsel %vm1336_vm4, %v2568_v4, 0.0  ;;  %v2675_v4 = vstv %s5512_s1 }
 0x3ae   :  { %2576 = vadd.xlane.f32.xlu1 %v2575_v29  ;;  %2579 = vadd.xlane.f32.xlu0 %v2578_v61 }
 0x3b7   :  { %v1342_v46 = vpop.xlane.xlu1 %1341 }
 0x3b8   :  { %v1350_v54 = vmul.f32 0.015625, %v1342_v46 }
 0x3ba   :  { %v1374_v51 = vmul.f32 %v1350_v54, %v1350_v54  ;;  %v1382_v50 = vsub.f32 %v5396_v38, %v1350_v54 }
 0x3bb   :  { %v1362_v26 = vpop.xlane.xlu1 %1361 }
 0x3bc   :  { %v1370_v15 = vmul.f32 0.015625, %v1362_v26  ;;  %v2660_v26 = vstv %s5515_s24 }
 0x3be   :  { %v1378_v48 = vsub.f32 %v1370_v15, %v1374_v51  ;;  %v2645_v15 = vstv %s5494_s15  ;;  %v2626_v51 = vstv %s5509_s23 }
 0x3bf   :  { %v1365_v16 = vpop.xlane.xlu1 %1364 }
 0x3c0   :  { %v1386_v49 = vadd.f32 1e-05, %v1378_v48  ;;  %v1371_v8 = vmul.f32 0.015625, %v1365_v16 }
 0x3c2   :  { %3299 = vrsqrt.f32 %v1386_v49 }
 0x3cf   :  { %v3300_v45 = vpop.eup %3299 }
 0x3d0   :  { %v1394_v36 = vmul.f32 %v3300_v45, %v1382_v50  ;;  %v2668_v45 = vstv %s5564_s20 }
 0x3d2   :  { %v5520_v60 = vmax.f32 %v1394_v36, 0.0 }
 0x3d4   :  { %v2804_v30 = vmul.f32 %v2637_v5, %v5520_v60  ;;  %v2795_v23 = vmul.f32 %v2618_v9, %v5520_v60  ;;  %v2813_v25 = vmul.f32 %v2656_v13, %v5520_v60  ;;  %v2822_v6 = vmul.f32 %v2675_v4, %v5520_v60 }
 0x3da   :  { %v1345_v24 = vpop.xlane.xlu0 %1344 }
 0x3db   :  { %v1351_v18 = vmul.f32 0.015625, %v1345_v24 }
 0x3dd   :  { %v1375_v53 = vmul.f32 %v1351_v18, %v1351_v18  ;;  %v1383_v38 = vsub.f32 %v5410_v62, %v1351_v18 }
 0x3de   :  { %v1359_v21 = vpop.xlane.xlu0 %1358 }
 0x3df   :  { %v1379_v7 = vsub.f32 %v1371_v8, %v1375_v53  ;;  %v1369_v20 = vmul.f32 0.015625, %v1359_v21  ;;  %v2679_v8 = vstv %s5524_s25  ;;  %v2683_v53 = vstv %s5530_s26 }
 0x3e1   :  { %v1387_v10 = vadd.f32 1e-05, %v1379_v7  ;;  %v1377_v35 = vsub.f32 %v1369_v20, %v1373_v19 }
 0x3e2   :  { %v1348_v31 = vpop.xlane.xlu0 %1347 }
 0x3e3   :  { %v1385_v32 = vadd.f32 1e-05, %v1377_v35  ;;  %v5484_v63 = vmul.f32 0.015625, %v1348_v31  ;;  %3301 = vrsqrt.f32 %v1387_v10 }
 0x3e5   :  { %3303 = vrsqrt.f32 %v1385_v32  ;;  %v1376_v3 = vmul.f32 %v5484_v63, %v5484_v63  ;;  %v1384_v34 = vsub.f32 %v5439_v56, %v5484_v63  ;;  %v2649_v32 = vstv %s5533_s0 }
 0x3e6   :  { %v1368_v40 = vpop.xlane.xlu0 %1367  ;;  %v2630_v63 = vstv %s5551_s30 }
 0x3e7   :  { %v1372_v2 = vmul.f32 0.015625, %v1368_v40 }
 0x3e9   :  { %v1380_v57 = vsub.f32 %v1372_v2, %v1376_v3 }
 0x3eb   :  { %v1388_v39 = vadd.f32 1e-05, %v1380_v57 }
 0x3ed   :  { %3305 = vrsqrt.f32 %v1388_v39 }
 0x3f0   :  { %v3302_v1 = vpop.eup %3301 }
 0x3f1   :  { %v1395_v33 = vmul.f32 %v3302_v1, %v1383_v38 }
 0x3f2   :  { %v3304_v47 = vpop.eup %3303 }
 0x3f3   :  { %v1393_v22 = vmul.f32 %v3304_v47, %v1381_v27  ;;  %v5545_v0 = vmax.f32 %v1395_v33, 0.0 }
 0x3f5   :  { %v5526_v62 = vmax.f32 %v1393_v22, 0.0  ;;  %v2806_v16 = vmul.f32 %v2641_v52, %v5545_v0  ;;  %v2797_v24 = vmul.f32 %v2622_v41, %v5545_v0  ;;  %v2815_v49 = vmul.f32 %v2660_v26, %v5545_v0 }
 0x3f6   :  { %v2824_v40 = vmul.f32 %v2679_v8, %v5545_v0 }
 0x3f7   :  { %v2802_v14 = vmul.f32 %v2633_v11, %v5526_v62  ;;  %v2793_v17 = vmul.f32 %v2614_v37, %v5526_v62  ;;  %v2811_v55 = vmul.f32 %v2652_v59, %v5526_v62  ;;  %v2820_v54 = vmul.f32 %v2671_v12, %v5526_v62 }
 0x3f9   :  { %v2805_v61 = vadd.f32 %v2804_v30, %v2802_v14  ;;  %v2796_v46 = vadd.f32 %v2795_v23, %v2793_v17  ;;  %v2814_v48 = vadd.f32 %v2813_v25, %v2811_v55  ;;  %v2823_v7 = vadd.f32 %v2822_v6, %v2820_v54 }
 0x3fa   :  { %v3306_v29 = vpop.eup %3305  ;;  %v2687_v14 = vstv %s5588_s27 }
 0x3fb   :  { %v1396_v56 = vmul.f32 %v3306_v29, %v1384_v34  ;;  %v2807_v21 = vadd.f32 %v2806_v16, %v2805_v61  ;;  %v2798_v19 = vadd.f32 %v2797_v24, %v2796_v46  ;;  %v2816_v35 = vadd.f32 %v2815_v49, %v2814_v48 }
 0x3fc   :  { %v2825_v50 = vadd.f32 %v2824_v40, %v2823_v7 }
 0x3fd   :  { %v5581_v18 = vmax.f32 %v1396_v56, 0.0 }
 0x3ff   :  { %v2808_v20 = vmul.f32 %v2645_v15, %v5581_v18  ;;  %v2799_v10 = vmul.f32 %v2626_v51, %v5581_v18  ;;  %v2817_v31 = vmul.f32 %v2664_v42, %v5581_v18  ;;  %v2826_v3 = vmul.f32 %v2683_v53, %v5581_v18 }
 0x401   :  { %v2809_v2 = vadd.f32 %v2808_v20, %v2807_v21  ;;  %v2800_v57 = vadd.f32 %v2799_v10, %v2798_v19  ;;  %v2818_v39 = vadd.f32 %v2817_v31, %v2816_v35  ;;  %v2827_v27 = vadd.f32 %v2826_v3, %v2825_v50 }
 0x403   :  { %v5610_v36 = vadd.f32 %v2809_v2, %v2649_v32  ;;  %v5614_v1 = vadd.f32 %v2800_v57, %v2630_v63  ;;  %v5624_v33 = vadd.f32 %v2818_v39, %v2668_v45  ;;  %v5632_v30 = vadd.f32 %v2827_v27, %v2687_v14  ;;  %v2554_v56 = vpop.xlane.xlu0 %2553 }
 0x404   :  { %v2562_v7 = vmul.f32 0.015625, %v2554_v56 }
 0x405   :  { %v2832_v47 = vsel %vm1336_vm4, %v5610_v36, 0.0  ;;  %v2829_v38 = vsel %vm1336_vm4, %v5614_v1, 0.0  ;;  %v2845_v22 = vmul.f32 %v5614_v1, %v5614_v1  ;;  %v2835_v55 = vsel %vm1336_vm4, %v5624_v33, 0.0 }
 0x406   :  { %2833 = vadd.xlane.f32.xlu0 %v2832_v47  ;;  %2830 = vadd.xlane.f32.xlu1 %v2829_v38  ;;  %v2846_v23 = vmul.f32 %v5610_v36, %v5610_v36  ;;  %v2838_v34 = vsel %vm1336_vm4, %v5632_v30, 0.0  ;;  %v2848_v29 = vmul.f32 %v5632_v30, %v5632_v30  ;;  %v2847_v61 = vmul.f32 %v5624_v33, %v5624_v33 }
 0x407   :  { %v2849_v17 = vsel %vm1336_vm4, %v2845_v22, 0.0  ;;  %v2586_v40 = vmul.f32 %v2562_v7, %v2562_v7 }
 0x408   :  { %v2852_v25 = vsel %vm1336_vm4, %v2846_v23, 0.0  ;;  %v2858_v46 = vsel %vm1336_vm4, %v2848_v29, 0.0  ;;  %v2855_v54 = vsel %vm1336_vm4, %v2847_v61, 0.0 }
 0x40a   :  { %2850 = vadd.xlane.f32.xlu0 %v2849_v17  ;;  %2836 = vadd.xlane.f32.xlu1 %v2835_v55 }
 0x40e   :  { %2839 = vadd.xlane.f32.xlu0 %v2838_v34  ;;  %2853 = vadd.xlane.f32.xlu1 %v2852_v25 }
 0x412   :  { %2859 = vadd.xlane.f32.xlu0 %v2858_v46  ;;  %2856 = vadd.xlane.f32.xlu1 %v2855_v54  ;;  %v2594_v54 = vsub.f32 %v5452_v44, %v2562_v7 }
 0x427   :  { %v2551_v48 = vpop.xlane.xlu1 %2550 }
 0x428   :  { %v2561_v16 = vmul.f32 0.015625, %v2551_v48 }
 0x429   :  { %v2571_v24 = vpop.xlane.xlu0 %2570 }
 0x42a   :  { %v2585_v6 = vmul.f32 %v2561_v16, %v2561_v16  ;;  %v2581_v49 = vmul.f32 0.015625, %v2571_v24  ;;  %v2593_v61 = vsub.f32 %v5459_v43, %v2561_v16 }
 0x42c   :  { %v2589_v21 = vsub.f32 %v2581_v49, %v2585_v6 }
 0x42e   :  { %v2597_v20 = vadd.f32 1e-05, %v2589_v21 }
 0x42f   :  { %v2557_v19 = vpop.xlane.xlu1 %2556 }
 0x430   :  { %v2563_v10 = vmul.f32 0.015625, %v2557_v19  ;;  %3307 = vrsqrt.f32 %v2597_v20 }
 0x432   :  { %v2587_v39 = vmul.f32 %v2563_v10, %v2563_v10  ;;  %v2595_v19 = vsub.f32 %v5466_v58, %v2563_v10 }
 0x433   :  { %v2560_v35 = vpop.xlane.xlu0 %2559  ;;  %v2574_v31 = vpop.xlane.xlu1 %2573 }
 0x434   :  { %v2564_v3 = vmul.f32 0.015625, %v2560_v35  ;;  %v2582_v2 = vmul.f32 0.015625, %v2574_v31 }
 0x436   :  { %v2590_v57 = vsub.f32 %v2582_v2, %v2586_v40  ;;  %v2588_v47 = vmul.f32 %v2564_v3, %v2564_v3  ;;  %v2596_v6 = vsub.f32 %v5472_v28, %v2564_v3 }
 0x437   :  { %v2580_v50 = vpop.xlane.xlu0 %2579  ;;  %v2577_v27 = vpop.xlane.xlu1 %2576 }
 0x438   :  { %v2598_v38 = vadd.f32 1e-05, %v2590_v57  ;;  %v2584_v22 = vmul.f32 0.015625, %v2580_v50  ;;  %v2583_v17 = vmul.f32 0.015625, %v2577_v27 }
 0x43a   :  { %3309 = vrsqrt.f32 %v2598_v38  ;;  %v2592_v55 = vsub.f32 %v2584_v22, %v2588_v47  ;;  %v2591_v23 = vsub.f32 %v2583_v17, %v2587_v39 }
 0x43c   :  { %v2600_v34 = vadd.f32 1e-05, %v2592_v55  ;;  %v2599_v25 = vadd.f32 1e-05, %v2591_v23 }
 0x43d   :  { %v3308_v29 = vpop.eup %3307 }
 0x43e   :  { %3311 = vrsqrt.f32 %v2600_v34  ;;  %v2605_v46 = vmul.f32 %v3308_v29, %v2593_v61 }
 0x43f   :  { %3313 = vrsqrt.f32 %v2599_v25 }
 0x440   :  { %v5647_v24 = vmax.f32 %v2605_v46, 0.0 }
 0x442   :  { %v2634_v58 = vmul.f32 %v2633_v11, %v5647_v24  ;;  %v2615_v35 = vmul.f32 %v2614_v37, %v5647_v24  ;;  %v2672_v11 = vmul.f32 %v2671_v12, %v5647_v24 }
 0x447   :  { %v3310_v56 = vpop.eup %3309 }
 0x448   :  { %v2606_v48 = vmul.f32 %v3310_v56, %v2594_v54 }
 0x44a   :  { %v5650_v49 = vmax.f32 %v2606_v48, 0.0 }
 0x44b   :  { %v3312_v21 = vpop.eup %3311 }
 0x44c   :  { %v3314_v43 = vpop.eup %3313  ;;  %v2608_v16 = vmul.f32 %v3312_v21, %v2596_v6  ;;  %v2638_v44 = vmul.f32 %v2637_v5, %v5650_v49  ;;  %v2619_v7 = vmul.f32 %v2618_v9, %v5650_v49  ;;  %v2657_v28 = vmul.f32 %v2656_v13, %v5650_v49 }
 0x44d   :  { %v2607_v20 = vmul.f32 %v3314_v43, %v2595_v19  ;;  %v2653_v5 = vmul.f32 %v2652_v59, %v5647_v24  ;;  %v2676_v9 = vmul.f32 %v2675_v4, %v5650_v49 }
 0x44e   :  { %v5665_v10 = vmax.f32 %v2608_v16, 0.0  ;;  %v2639_v13 = vadd.f32 %v2638_v44, %v2634_v58  ;;  %v2620_v40 = vadd.f32 %v2619_v7, %v2615_v35 }
 0x44f   :  { %v5676_v31 = vmax.f32 %v2607_v20, 0.0  ;;  %v2658_v3 = vadd.f32 %v2657_v28, %v2653_v5  ;;  %v2677_v39 = vadd.f32 %v2676_v9, %v2672_v11 }
 0x450   :  { %v2646_v57 = vmul.f32 %v2645_v15, %v5665_v10  ;;  %v2627_v12 = vmul.f32 %v2626_v51, %v5665_v10 }
 0x451   :  { %v2642_v2 = vmul.f32 %v2641_v52, %v5676_v31  ;;  %v2623_v37 = vmul.f32 %v2622_v41, %v5676_v31  ;;  %v2661_v59 = vmul.f32 %v2660_v26, %v5676_v31  ;;  %v2680_v4 = vmul.f32 %v2679_v8, %v5676_v31 }
 0x452   :  { %v2665_v41 = vmul.f32 %v2664_v42, %v5665_v10  ;;  %v2684_v8 = vmul.f32 %v2683_v53, %v5665_v10 }
 0x453   :  { %v2643_v52 = vadd.f32 %v2642_v2, %v2639_v13  ;;  %v2624_v50 = vadd.f32 %v2623_v37, %v2620_v40  ;;  %v2662_v27 = vadd.f32 %v2661_v59, %v2658_v3  ;;  %v2681_v47 = vadd.f32 %v2680_v4, %v2677_v39 }
 0x454   :  { %v2738_v39 = vstv %s5745_s29 }
 0x455   :  { %v2647_v26 = vadd.f32 %v2646_v57, %v2643_v52  ;;  %v2628_v38 = vadd.f32 %v2627_v12, %v2624_v50  ;;  %v2666_v22 = vadd.f32 %v2665_v41, %v2662_v27  ;;  %v2685_v17 = vadd.f32 %v2684_v8, %v2681_v47 }
 0x456   :  { %v2744_v12 = vstv %s5741_s8  ;;  %v2750_v52 = vstv %s5749_s5  ;;  %v2756_v50 = vstv %s5751_s7  ;;  %v2747_v47 = vstv %s5743_s28 }
 0x457   :  { %v5707_v15 = vadd.f32 %v2649_v32, %v2647_v26  ;;  %v5711_v51 = vadd.f32 %v2630_v63, %v2628_v38  ;;  %v5721_v34 = vadd.f32 %v2668_v45, %v2666_v22  ;;  %v5728_v63 = vadd.f32 %v2687_v14, %v2685_v17 }
 0x458   :  { %v2753_v26 = vstv %s5753_s17  ;;  %v2759_v38 = vstv %s5755_s13 }
 0x459   :  { %v2692_v55 = vsel %vm1336_vm4, %v5707_v15, 0.0  ;;  %v2689_v42 = vsel %vm1336_vm4, %v5711_v51, 0.0  ;;  %v2705_v23 = vmul.f32 %v5711_v51, %v5711_v51  ;;  %v2695_v32 = vsel %vm1336_vm4, %v5721_v34, 0.0 }
 0x45a   :  { %2693 = vadd.xlane.f32.xlu0 %v2692_v55  ;;  %2690 = vadd.xlane.f32.xlu1 %v2689_v42  ;;  %v2706_v25 = vmul.f32 %v5707_v15, %v5707_v15  ;;  %v2698_v29 = vsel %vm1336_vm4, %v5728_v63, 0.0  ;;  %v2708_v61 = vmul.f32 %v5728_v63, %v5728_v63  ;;  %v2707_v46 = vmul.f32 %v5721_v34, %v5721_v34 }
 0x45b   :  { %v2709_v53 = vsel %vm1336_vm4, %v2705_v23, 0.0 }
 0x45c   :  { %v2712_v45 = vsel %vm1336_vm4, %v2706_v25, 0.0  ;;  %v2718_v14 = vsel %vm1336_vm4, %v2708_v61, 0.0  ;;  %v2715_v54 = vsel %vm1336_vm4, %v2707_v46, 0.0 }
 0x45e   :  { %2710 = vadd.xlane.f32.xlu0 %v2709_v53  ;;  %2696 = vadd.xlane.f32.xlu1 %v2695_v32 }
 0x462   :  { %2699 = vadd.xlane.f32.xlu0 %v2698_v29  ;;  %2713 = vadd.xlane.f32.xlu1 %v2712_v45 }
 0x466   :  { %2719 = vadd.xlane.f32.xlu0 %v2718_v14  ;;  %2716 = vadd.xlane.f32.xlu1 %v2715_v54 }
 0x48f   :  { %v2834_v56 = vpop.xlane.xlu0 %2833  ;;  %v2831_v48 = vpop.xlane.xlu1 %2830 }
 0x490   :  { %v2841_v19 = vadd.f32 %v2834_v56, %v2831_v48 }
 0x493   :  { %v2851_v6 = vpop.xlane.xlu0 %2850  ;;  %v2837_v21 = vpop.xlane.xlu1 %2836 }
 0x494   :  { %v2842_v43 = vadd.f32 %v2841_v19, %v2837_v21  ;;  %v166_v19 = vld [vmem:[%s5856_s3 + $0x2] sm:$0x3] }
 0x497   :  { %v2840_v16 = vpop.xlane.xlu0 %2839  ;;  %v2854_v44 = vpop.xlane.xlu1 %2853 }
 0x498   :  { %v2843_v7 = vadd.f32 %v2842_v43, %v2840_v16  ;;  %v2861_v28 = vadd.f32 %v2854_v44, %v2851_v6  ;;  %v165_v43 = vld [vmem:[%s5856_s3] sm:$0x3] }
 0x49a   :  { %v2844_v58 = vmul.f32 0.00390625, %v2843_v7 }
 0x49b   :  { %v2857_v20 = vpop.xlane.xlu1 %2856  ;;  %v2860_v5 = vpop.xlane.xlu0 %2859 }
 0x49c   :  { %v2862_v35 = vadd.f32 %v2861_v28, %v2857_v20  ;;  %v2865_v13 = vmul.f32 %v2844_v58, %v2844_v58  ;;  %v2867_v2 = vsub.f32 %v5614_v1, %v2844_v58  ;;  %v2868_v37 = vsub.f32 %v5610_v36, %v2844_v58  ;;  %v167_v28 = vld [vmem:[%s5856_s3 + $0x4] sm:$0x3] }
 0x49d   :  { %v2869_v59 = vsub.f32 %v5624_v33, %v2844_v58  ;;  %v2870_v4 = vsub.f32 %v5632_v30, %v2844_v58  ;;  %v2741_v33 = vstv %s5747_s21 }
 0x49e   :  { %v2863_v9 = vadd.f32 %v2862_v35, %v2860_v5 }
 0x4a0   :  { %v2864_v40 = vmul.f32 0.00390625, %v2863_v9 }
 0x4a2   :  { %v2866_v3 = vsub.f32 %v2864_v40, %v2865_v13  ;;  %v168_v40 = vld [vmem:[%s5856_s3 + $0x6] sm:$0x3] }
 0x4a4   :  { %v2871_v11 = vadd.f32 1e-05, %v2866_v3 }
 0x4a6   :  { %3315 = vrsqrt.f32 %v2871_v11 }
 0x4b3   :  { %v3316_v57 = vpop.eup %3315 }
 0x4b4   :  { %v2874_v1 = vmul.f32 %v3316_v57, %v2868_v37  ;;  %v2873_v27 = vmul.f32 %v3316_v57, %v2867_v2  ;;  %v2875_v36 = vmul.f32 %v3316_v57, %v2869_v59  ;;  %v2876_v41 = vmul.f32 %v3316_v57, %v2870_v4 }
 0x4b6   :  { %v2879_v30 = vmul.f32 %v2874_v1, %v2744_v12  ;;  %v2877_v22 = vmul.f32 %v2873_v27, %v2738_v39  ;;  %v2881_v8 = vmul.f32 %v2875_v36, %v2750_v52  ;;  %v2883_v17 = vmul.f32 %v2876_v41, %v2756_v50 }
 0x4b8   :  { %v2880_v55 = vadd.f32 %v2879_v30, %v2747_v47  ;;  %v2878_v42 = vadd.f32 %v2877_v22, %v2741_v33  ;;  %v2882_v23 = vadd.f32 %v2881_v8, %v2753_v26  ;;  %v2884_v53 = vadd.f32 %v2883_v17, %v2759_v38 }
 0x4ba   :  { %v3272_v32 = vmul.f32 -1.442695, %v2880_v55  ;;  %v3271_v25 = vmul.f32 -1.442695, %v2878_v42  ;;  %v3273_v29 = vmul.f32 -1.442695, %v2882_v23 }
 0x4bb   :  { %v3274_v45 = vmul.f32 -1.442695, %v2884_v53 }
 0x4bc   :  { %3317 = vpow2.f32 %v3272_v32 }
 0x4bd   :  { %3319 = vpow2.f32 %v3271_v25 }
 0x4be   :  { %3321 = vpow2.f32 %v3273_v29 }
 0x4bf   :  { %3323 = vpow2.f32 %v3274_v45 }
 0x4c9   :  { %v3318_v61 = vpop.eup %3317 }
 0x4ca   :  { %v3320_v46 = vpop.eup %3319  ;;  %v2898_v14 = vadd.f32 1.0, %v3318_v61 }
 0x4cb   :  { %v3322_v54 = vpop.eup %3321  ;;  %v2897_v56 = vadd.f32 1.0, %v3320_v46 }
 0x4cc   :  { %v3324_v48 = vpop.eup %3323  ;;  %3325 = vrcp.f32 %v2898_v14  ;;  %v2899_v6 = vadd.f32 1.0, %v3322_v54 }
 0x4cd   :  { %3327 = vrcp.f32 %v2897_v56  ;;  %v2900_v21 = vadd.f32 1.0, %v3324_v48 }
 0x4ce   :  { %3329 = vrcp.f32 %v2899_v6 }
 0x4cf   :  { %3331 = vrcp.f32 %v2900_v21 }
 0x4d9   :  { %v3326_v16 = vpop.eup %3325 }
 0x4da   :  { %v3328_v44 = vpop.eup %3327  ;;  %v2910_v7 = vmul.f32 %v3326_v16, %v166_v19 }
 0x4db   :  { %v3330_v20 = vpop.eup %3329  ;;  %v2909_v58 = vmul.f32 %v3328_v44, %v165_v43 }
 0x4dc   :  { %v2914_v35 = vadd.f32 %v2910_v7, %v5650_v49  ;;  %v2911_v9 = vmul.f32 %v3330_v20, %v167_v28  ;;  %v3332_v13 = vpop.eup %3331 }
 0x4dd   :  { %v2913_v5 = vadd.f32 %v2909_v58, %v5647_v24  ;;  %v2912_v11 = vmul.f32 %v3332_v13, %v168_v40  ;;  %v161_v58 = vld [vmem:[%s5855_s2] sm:$0x3]  ;;  %v163_v13 = vld [vmem:[%s5855_s2 + $0x4] sm:$0x3] }
 0x4de   :  { %2923 = vrot.lane.b32.xlu0 %v2914_v35, %s3480_s9  ;;  %v2915_v3 = vadd.f32 %v2911_v9, %v5676_v31 }
 0x4df   :  { %2921 = vrot.lane.b32.xlu1 %v2913_v5, %s3480_s9  ;;  %v2916_v59 = vadd.f32 %v2912_v11, %v5665_v10 }
 0x4e3   :  { %v2691_v2 = vpop.xlane.xlu1 %2690  ;;  %2925 = vrot.lane.b32.xlu1 %v2915_v3, %s3480_s9  ;;  %v2694_v37 = vpop.xlane.xlu0 %2693 }
 0x4e4   :  { %v2701_v27 = vadd.f32 %v2694_v37, %v2691_v2 }
 0x4e7   :  { %v2697_v49 = vpop.xlane.xlu1 %2696  ;;  %2927 = vrot.lane.b32.xlu1 %v2916_v59, %s3480_s9  ;;  %v2711_v24 = vpop.xlane.xlu0 %2710 }
 0x4e8   :  { %v2702_v41 = vadd.f32 %v2701_v27, %v2697_v49 }
 0x4eb   :  { %v2714_v4 = vpop.xlane.xlu1 %2713  ;;  %v2700_v57 = vpop.xlane.xlu0 %2699 }
 0x4ec   :  { %v2721_v36 = vadd.f32 %v2714_v4, %v2711_v24  ;;  %v2703_v22 = vadd.f32 %v2702_v41, %v2700_v57  ;;  %v164_v24 = vld [vmem:[%s5855_s2 + $0x6] sm:$0x3] }
 0x4ee   :  { %v2704_v17 = vmul.f32 0.00390625, %v2703_v22 }
 0x4ef   :  { %v2717_v1 = vpop.xlane.xlu1 %2716  ;;  %v2720_v31 = vpop.xlane.xlu0 %2719 }
 0x4f0   :  { %v2722_v30 = vadd.f32 %v2721_v36, %v2717_v1  ;;  %v2725_v10 = vmul.f32 %v2704_v17, %v2704_v17  ;;  %v2728_v32 = vsub.f32 %v5707_v15, %v2704_v17  ;;  %v2727_v25 = vsub.f32 %v5711_v51, %v2704_v17 }
 0x4f1   :  { %v2729_v61 = vsub.f32 %v5721_v34, %v2704_v17  ;;  %v2730_v56 = vsub.f32 %v5728_v63, %v2704_v17 }
 0x4f2   :  { %v2723_v8 = vadd.f32 %v2722_v30, %v2720_v31 }
 0x4f4   :  { %v2724_v55 = vmul.f32 0.00390625, %v2723_v8 }
 0x4f6   :  { %v2726_v42 = vsub.f32 %v2724_v55, %v2725_v10 }
 0x4f8   :  { %v2731_v23 = vadd.f32 1e-05, %v2726_v42 }
 0x4fa   :  { %3333 = vrsqrt.f32 %v2731_v23 }
 0x507   :  { %v3334_v53 = vpop.eup %3333 }
 0x508   :  { %v2734_v29 = vmul.f32 %v3334_v53, %v2728_v32  ;;  %v2733_v45 = vmul.f32 %v3334_v53, %v2727_v25  ;;  %v2735_v54 = vmul.f32 %v3334_v53, %v2729_v61  ;;  %v2736_v21 = vmul.f32 %v3334_v53, %v2730_v56 }
 0x50a   :  { %v2745_v46 = vmul.f32 %v2744_v12, %v2734_v29  ;;  %v2739_v14 = vmul.f32 %v2738_v39, %v2733_v45  ;;  %v2751_v15 = vmul.f32 %v2750_v52, %v2735_v54  ;;  %v2757_v34 = vmul.f32 %v2756_v50, %v2736_v21 }
 0x50c   :  { %v2748_v48 = vadd.f32 %v2747_v47, %v2745_v46  ;;  %v2742_v6 = vadd.f32 %v2741_v33, %v2739_v14  ;;  %v2754_v43 = vadd.f32 %v2753_v26, %v2751_v15  ;;  %v2760_v39 = vadd.f32 %v2759_v38, %v2757_v34  ;;  %v162_v38 = vld [vmem:[%s5855_s2 + $0x2] sm:$0x3] }
 0x50e   :  { %v3268_v51 = vmul.f32 -1.442695, %v2748_v48  ;;  %v3267_v19 = vmul.f32 -1.442695, %v2742_v6  ;;  %v3269_v12 = vmul.f32 -1.442695, %v2754_v43 }
 0x50f   :  { %v3270_v63 = vmul.f32 -1.442695, %v2760_v39 }
 0x510   :  { %3335 = vpow2.f32 %v3268_v51 }
 0x511   :  { %3337 = vpow2.f32 %v3267_v19 }
 0x512   :  { %3339 = vpow2.f32 %v3269_v12 }
 0x513   :  { %3341 = vpow2.f32 %v3270_v63 }
 0x51d   :  { %v3336_v47 = vpop.eup %3335 }
 0x51e   :  { %v3338_v16 = vpop.eup %3337  ;;  %v2774_v33 = vadd.f32 1.0, %v3336_v47 }
 0x51f   :  { %v2773_v44 = vadd.f32 1.0, %v3338_v16  ;;  %v3340_v52 = vpop.eup %3339 }
 0x520   :  { %3343 = vrcp.f32 %v2774_v33  ;;  %v2775_v7 = vadd.f32 1.0, %v3340_v52  ;;  %v3342_v28 = vpop.eup %3341 }
 0x521   :  { %3345 = vrcp.f32 %v2773_v44  ;;  %v2776_v26 = vadd.f32 1.0, %v3342_v28 }
 0x522   :  { %3347 = vrcp.f32 %v2775_v7 }
 0x523   :  { %3349 = vrcp.f32 %v2776_v26 }
 0x52d   :  { %v3344_v50 = vpop.eup %3343 }
 0x52e   :  { %v3346_v20 = vpop.eup %3345  ;;  %v2786_v35 = vmul.f32 %v3344_v50, %v162_v38 }
 0x52f   :  { %v2785_v5 = vmul.f32 %v3346_v20, %v161_v58  ;;  %v3348_v9 = vpop.eup %3347 }
 0x530   :  { %v2790_v40 = vadd.f32 %v2786_v35, %v5520_v60  ;;  %v2787_v2 = vmul.f32 %v3348_v9, %v163_v13  ;;  %v3350_v37 = vpop.eup %3349 }
 0x531   :  { %v2789_v11 = vadd.f32 %v2785_v5, %v5526_v62  ;;  %v2788_v62 = vmul.f32 %v3350_v37, %v164_v24 }
 0x532   :  { %v2791_v60 = vadd.f32 %v2787_v2, %v5545_v0 }
 0x533   :  { %v2792_v27 = vadd.f32 %v2788_v62, %v5581_v18 }
 0x550   :  { %v2924_v3 = vpop.permute.xlu0 %2923 }
 0x551   :  { %v2935_v59 = vsel %vm2933_vm5, %v2790_v40, %v2924_v3  ;;  %v2922_v49 = vpop.permute.xlu1 %2921 }
 0x552   :  { %2939 = vst [vmem:[%s5865_s12 + $0x2] sm:$0x3] %v2935_v59  ;;  %v2934_v4 = vsel %vm2933_vm5, %v2789_v11, %v2922_v49 }
 0x553   :  { %2938 = vst [vmem:[%s5865_s12] sm:$0x3] %v2934_v4 }
 0x555   :  { %v2926_v57 = vpop.permute.xlu1 %2925 }
 0x556   :  { %v2936_v1 = vsel %vm2933_vm5, %v2791_v60, %v2926_v57 }
 0x557   :  { %2940 = vst [vmem:[%s5865_s12 + $0x4] sm:$0x3] %v2936_v1 }
 0x559   :  { %v2928_v36 = vpop.permute.xlu1 %2927 }
 0x55a   :  { %v2937_v41 = vsel %vm2933_vm5, %v2792_v27, %v2928_v36 }
 0x55b   :  { %2941 = vst [vmem:[%s5865_s12 + $0x6] sm:$0x3] %v2937_v41 }
 0x55c   :  { %2946 = vsyncpa [#allocation3], 1 }
 0x55d   :  { %2947 = vsyncpa [#allocation5], 1 }
 0x55e   :  { %2948 = vsyncpa [#allocation8], 1 }
 0x55f   :  { %2949 = vsyncpa [#allocation11], 1 }
 0x560   :  { %2950 = vsyncpa [#allocation14], 1 }

</bundles_post_ra>
